<compile_context>
chip_gen: v7x
topology: tpu7x:2x2x1
jax: 0.10.0
libtpu: 0.0.40
codegen_flags: <defaults>
</compile_context>

<pallas_src>
import functools

import jax
import jax.numpy as jnp
from jax.experimental import pallas as pl
from jax.experimental.pallas import tpu as pltpu

# ----- model hyper-parameters (globals in the original code) -----
HIDDEN_SIZE = 32
OUTPUT_SIZE = 4
EMBEDDING_DIM = 201
EMBEDDING_DIM_PAD = 256          # zero-padded, lane aligned
NUM_LAYERS = 5
BATCH_TILE = 8                   # sublane-aligned batch tile


# ---------------------------------------------------------------------------
# Fused kernel: embedding gather + 5 LSTM layers (wavefront) + final FC.
# ---------------------------------------------------------------------------
def _fused_stacked_lstm_kernel(ids_ref,       # SMEM (B_pad, T) int32   (scalar prefetch)
                               emb_ref,       # (V_pad, E_pad)  f32
                               wih0_ref,      # (E_pad, 4H)     f32     layer-0 input weights
                               wfused_ref,    # (L-1, H, 8H)    bf16    [W_hh(l) | W_ih(l+1)]
                               whh_last_ref,  # (H, 4H)         bf16    last layer W_hh
                               b_ref,         # (L, 1, 4H)      f32     b_ih + b_hh
                               fcw_ref,       # (2H, O)         f32
                               fcb_ref,       # (1, O)          f32
                               out_ref,       # (B_tile, O)     f32
                               x_scr,         # VMEM (T*B_tile, E_pad)  f32
                               pre_scr,       # VMEM (T*B_tile, 4H)     f32
                               *, seq_len, batch_tile, hidden, num_layers):
    T, B, H, L = seq_len, batch_tile, hidden, num_layers
    G = 4 * H
    gtile = pl.program_id(0)

    # ---- 1. In-kernel embedding gather, time-major, into VMEM scratch ----
    for t in range(T):
        for b in range(B):
            tok = ids_ref[gtile * B + b, t]
            x_scr[pl.ds(t * B + b, 1), :] = emb_ref[pl.ds(tok, 1), :]

    # ---- 2. Hoisted layer-0 input projection for the whole sequence ----
    pre_scr[...] = jnp.dot(x_scr[...], wih0_ref[...],
                           preferred_element_type=jnp.float32)

    # ---- gate activation: one EUP pass over the full (B, 4H) gate vreg ----
    lane = jax.lax.broadcasted_iota(jnp.int32, (B, G), 1)
    g_mask = (lane >= 2 * H) & (lane < 3 * H)          # tanh lanes (g-gate)

    def gate_act(z):
        z = jnp.where(g_mask, 2.0 * z, z)              # pre-scale g lanes
        s = jax.nn.sigmoid(z)                          # single EUP pass
        return jnp.where(g_mask, 2.0 * s - 1.0, s)     # tanh(x) = 2*sigmoid(2x)-1

    # per-layer recurrent state (values, fully unrolled)
    h = [jnp.zeros((B, H), jnp.float32) for _ in range(L)]
    c = [jnp.zeros((B, H), jnp.float32) for _ in range(L)]
    rec = [jnp.zeros((B, G), jnp.float32) for _ in range(L)]   # h_l(t-1) @ W_hh(l)
    inp = [[None] * T for _ in range(L)]                       # input projection (l>=1)

    def cell(l, t):
        x_contrib = pre_scr[pl.ds(t * B, B), :] if l == 0 else inp[l][t]
        gates = x_contrib + rec[l] + b_ref[l]                  # (B, 4H), PyTorch i|f|g|o
        a = gate_act(gates)
        i_g = a[:, 0 * H:1 * H]
        f_g = a[:, 1 * H:2 * H]
        g_g = a[:, 2 * H:3 * H]
        o_g = a[:, 3 * H:4 * H]
        c[l] = f_g * c[l] + i_g * g_g
        h_new = o_g * jnp.tanh(c[l])
        h[l] = h_new
        h_b = h_new.astype(jnp.bfloat16)                       # bf16 dot operand only
        if l < L - 1:
            # one 256-wide push: recurrent gates for (l, t+1) + input proj for (l+1, t)
            fused = jnp.dot(h_b, wfused_ref[l], preferred_element_type=jnp.float32)
            rec[l] = fused[:, :G]
            inp[l + 1][t] = fused[:, G:]
        elif t < T - 1:
            rec[l] = jnp.dot(h_b, whh_last_ref[...],
                             preferred_element_type=jnp.float32)

    # ---- 3. (layer, time) wavefront: step s handles t = s - l for every ready l ----
    for s in range(L + T - 1):
        for l in range(L):
            t = s - l
            if 0 <= t < T:
                cell(l, t)

    # ---- 4. repeat_vector = cat(hidden[-2], hidden[-1]); dropout = identity; FC ----
    repeat = jnp.concatenate([h[L - 2], h[L - 1]], axis=1)     # (B, 2H)
    out_ref[...] = (jnp.dot(repeat, fcw_ref[...],
                            preferred_element_type=jnp.float32) + fcb_ref[...])


def _fused_forward(ids_pad, emb, wih0, wfused, whh_last, bias, fcw, fcb,
                   *, seq_len, batch_tile):
    batch_pad = ids_pad.shape[0]
    O = fcw.shape[1]
    n_tiles = batch_pad // batch_tile

    kern = functools.partial(_fused_stacked_lstm_kernel,
                             seq_len=seq_len, batch_tile=batch_tile,
                             hidden=HIDDEN_SIZE, num_layers=NUM_LAYERS)

    grid_spec = pltpu.PrefetchScalarGridSpec(
        num_scalar_prefetch=1,                       # token ids -> SMEM
        grid=(n_tiles,),
        in_specs=[
            pl.BlockSpec(emb.shape, lambda g, ids: (0, 0)),
            pl.BlockSpec(wih0.shape, lambda g, ids: (0, 0)),
            pl.BlockSpec(wfused.shape, lambda g, ids: (0, 0, 0)),
            pl.BlockSpec(whh_last.shape, lambda g, ids: (0, 0)),
            pl.BlockSpec(bias.shape, lambda g, ids: (0, 0, 0)),
            pl.BlockSpec(fcw.shape, lambda g, ids: (0, 0)),
            pl.BlockSpec(fcb.shape, lambda g, ids: (0, 0)),
        ],
        out_specs=pl.BlockSpec((batch_tile, O), lambda g, ids: (g, 0)),
        scratch_shapes=[
            pltpu.VMEM((seq_len * batch_tile, EMBEDDING_DIM_PAD), jnp.float32),
            pltpu.VMEM((seq_len * batch_tile, 4 * HIDDEN_SIZE), jnp.float32),
        ],
    )
    return pl.pallas_call(
        kern,
        out_shape=jax.ShapeDtypeStruct((batch_pad, O), jnp.float32),
        grid_spec=grid_spec,
        compiler_params=pltpu.CompilerParams(
            dimension_semantics=("parallel",)),       # batch tiles shard across TCs
    )(ids_pad, emb, wih0, wfused, whh_last, bias, fcw, fcb)


# ---------------------------------------------------------------------------
# Full model forward (only a tiny int pad remains outside the kernel).
# ---------------------------------------------------------------------------
def stacked_lstm_forward(token_ids, params):
    B, T = token_ids.shape
    b_pad = ((B + BATCH_TILE - 1) // BATCH_TILE) * BATCH_TILE
    ids = token_ids.astype(jnp.int32)
    if b_pad != B:
        ids = jnp.pad(ids, ((0, b_pad - B), (0, 0)))   # padded rows use token 0
    out_pad = _fused_forward(ids, params["embedding"], params["w_ih0_t"],
                             params["w_fused"], params["w_hh_last"],
                             params["bias"], params["fc_w_t"], params["fc_b"],
                             seq_len=T, batch_tile=BATCH_TILE)
    return out_pad[:B]


def init_params(key, vocab_size):
    H, E, E_pad = HIDDEN_SIZE, EMBEDDING_DIM, EMBEDDING_DIM_PAD
    ks = jax.random.split(key, 4 * NUM_LAYERS + 3)
    it = iter(ks)

    # Frozen "GloVe" embedding table (synthetic); rows/cols zero-padded for alignment.
    emb = jax.random.normal(next(it), (vocab_size, E), dtype=jnp.float32) * 0.1
    v_pad = ((vocab_size + 7) // 8) * 8
    emb_pad = jnp.pad(emb, ((0, v_pad - vocab_size), (0, E_pad - E)))

    bound = 1.0 / (H ** 0.5)
    w_ih_t, w_hh_t, bias_all = [], [], []
    for l in range(NUM_LAYERS):
        d_in = E if l == 0 else H
        w_ih = jax.random.uniform(next(it), (4 * H, d_in),
                                  minval=-bound, maxval=bound, dtype=jnp.float32)
        w_hh = jax.random.uniform(next(it), (4 * H, H),
                                  minval=-bound, maxval=bound, dtype=jnp.float32)
        b_ih = jax.random.uniform(next(it), (4 * H,),
                                  minval=-bound, maxval=bound, dtype=jnp.float32)
        b_hh = jax.random.uniform(next(it), (4 * H,),
                                  minval=-bound, maxval=bound, dtype=jnp.float32)
        w_ih_t.append(w_ih.T)                         # (d_in, 4H), PyTorch i|f|g|o order
        w_hh_t.append(w_hh.T)                         # (H, 4H)
        bias_all.append((b_ih + b_hh)[None, :])       # (1, 4H)

    wih0 = jnp.pad(w_ih_t[0], ((0, E_pad - E), (0, 0)))                # (E_pad, 4H) f32
    wfused = jnp.stack([jnp.concatenate([w_hh_t[l], w_ih_t[l + 1]], axis=1)
                        for l in range(NUM_LAYERS - 1)]).astype(jnp.bfloat16)  # (L-1,H,8H)
    whh_last = w_hh_t[-1].astype(jnp.bfloat16)                          # (H, 4H)

    fc_bound = 1.0 / ((2 * H) ** 0.5)
    fc_w = jax.random.uniform(next(it), (OUTPUT_SIZE, 2 * H),
                              minval=-fc_bound, maxval=fc_bound, dtype=jnp.float32)
    fc_b = jax.random.uniform(next(it), (OUTPUT_SIZE,),
                              minval=-fc_bound, maxval=fc_bound, dtype=jnp.float32)

    return {
        "embedding": emb_pad,          # (V_pad, 256) f32
        "w_ih0_t": wih0,               # (256, 4H)    f32
        "w_fused": wfused,             # (L-1, H, 8H) bf16
        "w_hh_last": whh_last,         # (H, 4H)      bf16
        "bias": jnp.stack(bias_all),   # (L, 1, 4H)   f32
        "fc_w_t": fc_w.T,              # (2H, O)      f32
        "fc_b": fc_b[None, :],         # (1, O)       f32
    }


if __name__ == "__main__":
    key = jax.random.PRNGKey(0)
    k_param, k_data = jax.random.split(key)

    VOCAB = 50
    B, T = 2, 8

    params = init_params(k_param, VOCAB)
    token_ids = jax.random.randint(k_data, (B, T), 0, VOCAB, dtype=jnp.int32)

    out = jax.jit(stacked_lstm_forward)(token_ids, params)
    out = jax.block_until_ready(out)

    assert out.shape == (B, OUTPUT_SIZE), out.shape
    assert bool(jnp.all(jnp.isfinite(out)))
    print("KERNEL_OK")
</pallas_src>

<mosaic_0001>
module attributes {stable_mosaic.version = 11 : i64} {
  func.func @_fused_stacked_lstm_kernel(%arg0: i32, %arg1: memref<8x8xi32, #tpu.memory_space<smem>>, %arg2: memref<56x256xf32, #tpu.memory_space<vmem>>, %arg3: memref<256x128xf32, #tpu.memory_space<vmem>>, %arg4: memref<4x32x256xbf16, #tpu.memory_space<vmem>>, %arg5: memref<32x128xbf16, #tpu.memory_space<vmem>>, %arg6: memref<5x1x128xf32, #tpu.memory_space<vmem>>, %arg7: memref<64x4xf32, #tpu.memory_space<vmem>>, %arg8: memref<1x4xf32, #tpu.memory_space<vmem>>, %arg9: memref<8x4xf32, #tpu.memory_space<vmem>>, %arg10: memref<64x256xf32, #tpu.memory_space<vmem>>, %arg11: memref<64x128xf32, #tpu.memory_space<vmem>>) attributes {dimension_semantics = [#tpu.dimension_semantics<parallel>], iteration_bounds = array<i64: 1>, scalar_prefetch = 1 : i64, scratch_operands = 2 : i64, tpu.core_type = #tpu.core_type<tc>, window_params = [{pipeline_mode = #tpu.pipeline_mode<synchronous>, transform_indices = @transform_0, window_bounds = array<i64: 56, 256>}, {pipeline_mode = #tpu.pipeline_mode<synchronous>, transform_indices = @transform_1, window_bounds = array<i64: 256, 128>}, {pipeline_mode = #tpu.pipeline_mode<synchronous>, transform_indices = @transform_2, window_bounds = array<i64: 4, 32, 256>}, {pipeline_mode = #tpu.pipeline_mode<synchronous>, transform_indices = @transform_3, window_bounds = array<i64: 32, 128>}, {pipeline_mode = #tpu.pipeline_mode<synchronous>, transform_indices = @transform_4, window_bounds = array<i64: 5, 1, 128>}, {pipeline_mode = #tpu.pipeline_mode<synchronous>, transform_indices = @transform_5, window_bounds = array<i64: 64, 4>}, {pipeline_mode = #tpu.pipeline_mode<synchronous>, transform_indices = @transform_6, window_bounds = array<i64: 1, 4>}, {transform_indices = @transform_7, window_bounds = array<i64: 8, 4>}]} {
    %c8_i32 = arith.constant 8 : i32
    %0 = arith.muli %arg0, %c8_i32 : i32
    %c0_i32 = arith.constant 0 : i32
    %1 = arith.addi %0, %c0_i32 : i32
    %2 = arith.index_cast %1 : i32 to index
    %c0 = arith.constant 0 : index
    %3 = memref.load %arg1[%2, %c0] : memref<8x8xi32, #tpu.memory_space<smem>>
    %4 = arith.index_cast %3 : i32 to index
    %c0_0 = arith.constant 0 : index
    %5 = vector.load %arg2[%4, %c0_0] : memref<56x256xf32, #tpu.memory_space<vmem>>, vector<1x256xf32>
    %c0_1 = arith.constant 0 : index
    %c0_2 = arith.constant 0 : index
    %6 = vector.load %arg10[%c0_1, %c0_2] : memref<64x256xf32, #tpu.memory_space<vmem>>, vector<1x256xf32>
    tpu.vector_store %arg10[%c0_1, %c0_2], %5 {strides = array<i32>} : memref<64x256xf32, #tpu.memory_space<vmem>>, vector<1x256xf32>,
    %c8_i32_3 = arith.constant 8 : i32
    %7 = arith.muli %arg0, %c8_i32_3 : i32
    %c1_i32 = arith.constant 1 : i32
    %8 = arith.addi %7, %c1_i32 : i32
    %9 = arith.index_cast %8 : i32 to index
    %c0_4 = arith.constant 0 : index
    %10 = memref.load %arg1[%9, %c0_4] : memref<8x8xi32, #tpu.memory_space<smem>>
    %11 = arith.index_cast %10 : i32 to index
    %c0_5 = arith.constant 0 : index
    %12 = vector.load %arg2[%11, %c0_5] : memref<56x256xf32, #tpu.memory_space<vmem>>, vector<1x256xf32>
    %c1 = arith.constant 1 : index
    %c0_6 = arith.constant 0 : index
    %13 = vector.load %arg10[%c1, %c0_6] : memref<64x256xf32, #tpu.memory_space<vmem>>, vector<1x256xf32>
    tpu.vector_store %arg10[%c1, %c0_6], %12 {strides = array<i32>} : memref<64x256xf32, #tpu.memory_space<vmem>>, vector<1x256xf32>,
    %c8_i32_7 = arith.constant 8 : i32
    %14 = arith.muli %arg0, %c8_i32_7 : i32
    %c2_i32 = arith.constant 2 : i32
    %15 = arith.addi %14, %c2_i32 : i32
    %16 = arith.index_cast %15 : i32 to index
    %c0_8 = arith.constant 0 : index
    %17 = memref.load %arg1[%16, %c0_8] : memref<8x8xi32, #tpu.memory_space<smem>>
    %18 = arith.index_cast %17 : i32 to index
    %c0_9 = arith.constant 0 : index
    %19 = vector.load %arg2[%18, %c0_9] : memref<56x256xf32, #tpu.memory_space<vmem>>, vector<1x256xf32>
    %c2 = arith.constant 2 : index
    %c0_10 = arith.constant 0 : index
    %20 = vector.load %arg10[%c2, %c0_10] : memref<64x256xf32, #tpu.memory_space<vmem>>, vector<1x256xf32>
    tpu.vector_store %arg10[%c2, %c0_10], %19 {strides = array<i32>} : memref<64x256xf32, #tpu.memory_space<vmem>>, vector<1x256xf32>,
    %c8_i32_11 = arith.constant 8 : i32
    %21 = arith.muli %arg0, %c8_i32_11 : i32
    %c3_i32 = arith.constant 3 : i32
    %22 = arith.addi %21, %c3_i32 : i32
    %23 = arith.index_cast %22 : i32 to index
    %c0_12 = arith.constant 0 : index
    %24 = memref.load %arg1[%23, %c0_12] : memref<8x8xi32, #tpu.memory_space<smem>>
    %25 = arith.index_cast %24 : i32 to index
    %c0_13 = arith.constant 0 : index
    %26 = vector.load %arg2[%25, %c0_13] : memref<56x256xf32, #tpu.memory_space<vmem>>, vector<1x256xf32>
    %c3 = arith.constant 3 : index
    %c0_14 = arith.constant 0 : index
    %27 = vector.load %arg10[%c3, %c0_14] : memref<64x256xf32, #tpu.memory_space<vmem>>, vector<1x256xf32>
    tpu.vector_store %arg10[%c3, %c0_14], %26 {strides = array<i32>} : memref<64x256xf32, #tpu.memory_space<vmem>>, vector<1x256xf32>,
    %c8_i32_15 = arith.constant 8 : i32
    %28 = arith.muli %arg0, %c8_i32_15 : i32
    %c4_i32 = arith.constant 4 : i32
    %29 = arith.addi %28, %c4_i32 : i32
    %30 = arith.index_cast %29 : i32 to index
    %c0_16 = arith.constant 0 : index
    %31 = memref.load %arg1[%30, %c0_16] : memref<8x8xi32, #tpu.memory_space<smem>>
    %32 = arith.index_cast %31 : i32 to index
    %c0_17 = arith.constant 0 : index
    %33 = vector.load %arg2[%32, %c0_17] : memref<56x256xf32, #tpu.memory_space<vmem>>, vector<1x256xf32>
    %c4 = arith.constant 4 : index
    %c0_18 = arith.constant 0 : index
    %34 = vector.load %arg10[%c4, %c0_18] : memref<64x256xf32, #tpu.memory_space<vmem>>, vector<1x256xf32>
    tpu.vector_store %arg10[%c4, %c0_18], %33 {strides = array<i32>} : memref<64x256xf32, #tpu.memory_space<vmem>>, vector<1x256xf32>,
    %c8_i32_19 = arith.constant 8 : i32
    %35 = arith.muli %arg0, %c8_i32_19 : i32
    %c5_i32 = arith.constant 5 : i32
    %36 = arith.addi %35, %c5_i32 : i32
    %37 = arith.index_cast %36 : i32 to index
    %c0_20 = arith.constant 0 : index
    %38 = memref.load %arg1[%37, %c0_20] : memref<8x8xi32, #tpu.memory_space<smem>>
    %39 = arith.index_cast %38 : i32 to index
    %c0_21 = arith.constant 0 : index
    %40 = vector.load %arg2[%39, %c0_21] : memref<56x256xf32, #tpu.memory_space<vmem>>, vector<1x256xf32>
    %c5 = arith.constant 5 : index
    %c0_22 = arith.constant 0 : index
    %41 = vector.load %arg10[%c5, %c0_22] : memref<64x256xf32, #tpu.memory_space<vmem>>, vector<1x256xf32>
    tpu.vector_store %arg10[%c5, %c0_22], %40 {strides = array<i32>} : memref<64x256xf32, #tpu.memory_space<vmem>>, vector<1x256xf32>,
    %c8_i32_23 = arith.constant 8 : i32
    %42 = arith.muli %arg0, %c8_i32_23 : i32
    %c6_i32 = arith.constant 6 : i32
    %43 = arith.addi %42, %c6_i32 : i32
    %44 = arith.index_cast %43 : i32 to index
    %c0_24 = arith.constant 0 : index
    %45 = memref.load %arg1[%44, %c0_24] : memref<8x8xi32, #tpu.memory_space<smem>>
    %46 = arith.index_cast %45 : i32 to index
    %c0_25 = arith.constant 0 : index
    %47 = vector.load %arg2[%46, %c0_25] : memref<56x256xf32, #tpu.memory_space<vmem>>, vector<1x256xf32>
    %c6 = arith.constant 6 : index
    %c0_26 = arith.constant 0 : index
    %48 = vector.load %arg10[%c6, %c0_26] : memref<64x256xf32, #tpu.memory_space<vmem>>, vector<1x256xf32>
    tpu.vector_store %arg10[%c6, %c0_26], %47 {strides = array<i32>} : memref<64x256xf32, #tpu.memory_space<vmem>>, vector<1x256xf32>,
    %c8_i32_27 = arith.constant 8 : i32
    %49 = arith.muli %arg0, %c8_i32_27 : i32
    %c7_i32 = arith.constant 7 : i32
    %50 = arith.addi %49, %c7_i32 : i32
    %51 = arith.index_cast %50 : i32 to index
    %c0_28 = arith.constant 0 : index
    %52 = memref.load %arg1[%51, %c0_28] : memref<8x8xi32, #tpu.memory_space<smem>>
    %53 = arith.index_cast %52 : i32 to index
    %c0_29 = arith.constant 0 : index
    %54 = vector.load %arg2[%53, %c0_29] : memref<56x256xf32, #tpu.memory_space<vmem>>, vector<1x256xf32>
    %c7 = arith.constant 7 : index
    %c0_30 = arith.constant 0 : index
    %55 = vector.load %arg10[%c7, %c0_30] : memref<64x256xf32, #tpu.memory_space<vmem>>, vector<1x256xf32>
    tpu.vector_store %arg10[%c7, %c0_30], %54 {strides = array<i32>} : memref<64x256xf32, #tpu.memory_space<vmem>>, vector<1x256xf32>,
    %c8_i32_31 = arith.constant 8 : i32
    %56 = arith.muli %arg0, %c8_i32_31 : i32
    %c0_i32_32 = arith.constant 0 : i32
    %57 = arith.addi %56, %c0_i32_32 : i32
    %58 = arith.index_cast %57 : i32 to index
    %c1_33 = arith.constant 1 : index
    %59 = memref.load %arg1[%58, %c1_33] : memref<8x8xi32, #tpu.memory_space<smem>>
    %60 = arith.index_cast %59 : i32 to index
    %c0_34 = arith.constant 0 : index
    %61 = vector.load %arg2[%60, %c0_34] : memref<56x256xf32, #tpu.memory_space<vmem>>, vector<1x256xf32>
    %c8 = arith.constant 8 : index
    %c0_35 = arith.constant 0 : index
    %62 = vector.load %arg10[%c8, %c0_35] : memref<64x256xf32, #tpu.memory_space<vmem>>, vector<1x256xf32>
    tpu.vector_store %arg10[%c8, %c0_35], %61 {strides = array<i32>} : memref<64x256xf32, #tpu.memory_space<vmem>>, vector<1x256xf32>,
    %c8_i32_36 = arith.constant 8 : i32
    %63 = arith.muli %arg0, %c8_i32_36 : i32
    %c1_i32_37 = arith.constant 1 : i32
    %64 = arith.addi %63, %c1_i32_37 : i32
    %65 = arith.index_cast %64 : i32 to index
    %c1_38 = arith.constant 1 : index
    %66 = memref.load %arg1[%65, %c1_38] : memref<8x8xi32, #tpu.memory_space<smem>>
    %67 = arith.index_cast %66 : i32 to index
    %c0_39 = arith.constant 0 : index
    %68 = vector.load %arg2[%67, %c0_39] : memref<56x256xf32, #tpu.memory_space<vmem>>, vector<1x256xf32>
    %c9 = arith.constant 9 : index
    %c0_40 = arith.constant 0 : index
    %69 = vector.load %arg10[%c9, %c0_40] : memref<64x256xf32, #tpu.memory_space<vmem>>, vector<1x256xf32>
    tpu.vector_store %arg10[%c9, %c0_40], %68 {strides = array<i32>} : memref<64x256xf32, #tpu.memory_space<vmem>>, vector<1x256xf32>,
    %c8_i32_41 = arith.constant 8 : i32
    %70 = arith.muli %arg0, %c8_i32_41 : i32
    %c2_i32_42 = arith.constant 2 : i32
    %71 = arith.addi %70, %c2_i32_42 : i32
    %72 = arith.index_cast %71 : i32 to index
    %c1_43 = arith.constant 1 : index
    %73 = memref.load %arg1[%72, %c1_43] : memref<8x8xi32, #tpu.memory_space<smem>>
    %74 = arith.index_cast %73 : i32 to index
    %c0_44 = arith.constant 0 : index
    %75 = vector.load %arg2[%74, %c0_44] : memref<56x256xf32, #tpu.memory_space<vmem>>, vector<1x256xf32>
    %c10 = arith.constant 10 : index
    %c0_45 = arith.constant 0 : index
    %76 = vector.load %arg10[%c10, %c0_45] : memref<64x256xf32, #tpu.memory_space<vmem>>, vector<1x256xf32>
    tpu.vector_store %arg10[%c10, %c0_45], %75 {strides = array<i32>} : memref<64x256xf32, #tpu.memory_space<vmem>>, vector<1x256xf32>,
    %c8_i32_46 = arith.constant 8 : i32
    %77 = arith.muli %arg0, %c8_i32_46 : i32
    %c3_i32_47 = arith.constant 3 : i32
    %78 = arith.addi %77, %c3_i32_47 : i32
    %79 = arith.index_cast %78 : i32 to index
    %c1_48 = arith.constant 1 : index
    %80 = memref.load %arg1[%79, %c1_48] : memref<8x8xi32, #tpu.memory_space<smem>>
    %81 = arith.index_cast %80 : i32 to index
    %c0_49 = arith.constant 0 : index
    %82 = vector.load %arg2[%81, %c0_49] : memref<56x256xf32, #tpu.memory_space<vmem>>, vector<1x256xf32>
    %c11 = arith.constant 11 : index
    %c0_50 = arith.constant 0 : index
    %83 = vector.load %arg10[%c11, %c0_50] : memref<64x256xf32, #tpu.memory_space<vmem>>, vector<1x256xf32>
    tpu.vector_store %arg10[%c11, %c0_50], %82 {strides = array<i32>} : memref<64x256xf32, #tpu.memory_space<vmem>>, vector<1x256xf32>,
    %c8_i32_51 = arith.constant 8 : i32
    %84 = arith.muli %arg0, %c8_i32_51 : i32
    %c4_i32_52 = arith.constant 4 : i32
    %85 = arith.addi %84, %c4_i32_52 : i32
    %86 = arith.index_cast %85 : i32 to index
    %c1_53 = arith.constant 1 : index
    %87 = memref.load %arg1[%86, %c1_53] : memref<8x8xi32, #tpu.memory_space<smem>>
    %88 = arith.index_cast %87 : i32 to index
    %c0_54 = arith.constant 0 : index
    %89 = vector.load %arg2[%88, %c0_54] : memref<56x256xf32, #tpu.memory_space<vmem>>, vector<1x256xf32>
    %c12 = arith.constant 12 : index
    %c0_55 = arith.constant 0 : index
    %90 = vector.load %arg10[%c12, %c0_55] : memref<64x256xf32, #tpu.memory_space<vmem>>, vector<1x256xf32>
    tpu.vector_store %arg10[%c12, %c0_55], %89 {strides = array<i32>} : memref<64x256xf32, #tpu.memory_space<vmem>>, vector<1x256xf32>,
    %c8_i32_56 = arith.constant 8 : i32
    %91 = arith.muli %arg0, %c8_i32_56 : i32
    %c5_i32_57 = arith.constant 5 : i32
    %92 = arith.addi %91, %c5_i32_57 : i32
    %93 = arith.index_cast %92 : i32 to index
    %c1_58 = arith.constant 1 : index
    %94 = memref.load %arg1[%93, %c1_58] : memref<8x8xi32, #tpu.memory_space<smem>>
    %95 = arith.index_cast %94 : i32 to index
    %c0_59 = arith.constant 0 : index
    %96 = vector.load %arg2[%95, %c0_59] : memref<56x256xf32, #tpu.memory_space<vmem>>, vector<1x256xf32>
    %c13 = arith.constant 13 : index
    %c0_60 = arith.constant 0 : index
    %97 = vector.load %arg10[%c13, %c0_60] : memref<64x256xf32, #tpu.memory_space<vmem>>, vector<1x256xf32>
    tpu.vector_store %arg10[%c13, %c0_60], %96 {strides = array<i32>} : memref<64x256xf32, #tpu.memory_space<vmem>>, vector<1x256xf32>,
    %c8_i32_61 = arith.constant 8 : i32
    %98 = arith.muli %arg0, %c8_i32_61 : i32
    %c6_i32_62 = arith.constant 6 : i32
    %99 = arith.addi %98, %c6_i32_62 : i32
    %100 = arith.index_cast %99 : i32 to index
    %c1_63 = arith.constant 1 : index
    %101 = memref.load %arg1[%100, %c1_63] : memref<8x8xi32, #tpu.memory_space<smem>>
    %102 = arith.index_cast %101 : i32 to index
    %c0_64 = arith.constant 0 : index
    %103 = vector.load %arg2[%102, %c0_64] : memref<56x256xf32, #tpu.memory_space<vmem>>, vector<1x256xf32>
    %c14 = arith.constant 14 : index
    %c0_65 = arith.constant 0 : index
    %104 = vector.load %arg10[%c14, %c0_65] : memref<64x256xf32, #tpu.memory_space<vmem>>, vector<1x256xf32>
    tpu.vector_store %arg10[%c14, %c0_65], %103 {strides = array<i32>} : memref<64x256xf32, #tpu.memory_space<vmem>>, vector<1x256xf32>,
    %c8_i32_66 = arith.constant 8 : i32
    %105 = arith.muli %arg0, %c8_i32_66 : i32
    %c7_i32_67 = arith.constant 7 : i32
    %106 = arith.addi %105, %c7_i32_67 : i32
    %107 = arith.index_cast %106 : i32 to index
    %c1_68 = arith.constant 1 : index
    %108 = memref.load %arg1[%107, %c1_68] : memref<8x8xi32, #tpu.memory_space<smem>>
    %109 = arith.index_cast %108 : i32 to index
    %c0_69 = arith.constant 0 : index
    %110 = vector.load %arg2[%109, %c0_69] : memref<56x256xf32, #tpu.memory_space<vmem>>, vector<1x256xf32>
    %c15 = arith.constant 15 : index
    %c0_70 = arith.constant 0 : index
    %111 = vector.load %arg10[%c15, %c0_70] : memref<64x256xf32, #tpu.memory_space<vmem>>, vector<1x256xf32>
    tpu.vector_store %arg10[%c15, %c0_70], %110 {strides = array<i32>} : memref<64x256xf32, #tpu.memory_space<vmem>>, vector<1x256xf32>,
    %c8_i32_71 = arith.constant 8 : i32
    %112 = arith.muli %arg0, %c8_i32_71 : i32
    %c0_i32_72 = arith.constant 0 : i32
    %113 = arith.addi %112, %c0_i32_72 : i32
    %114 = arith.index_cast %113 : i32 to index
    %c2_73 = arith.constant 2 : index
    %115 = memref.load %arg1[%114, %c2_73] : memref<8x8xi32, #tpu.memory_space<smem>>
    %116 = arith.index_cast %115 : i32 to index
    %c0_74 = arith.constant 0 : index
    %117 = vector.load %arg2[%116, %c0_74] : memref<56x256xf32, #tpu.memory_space<vmem>>, vector<1x256xf32>
    %c16 = arith.constant 16 : index
    %c0_75 = arith.constant 0 : index
    %118 = vector.load %arg10[%c16, %c0_75] : memref<64x256xf32, #tpu.memory_space<vmem>>, vector<1x256xf32>
    tpu.vector_store %arg10[%c16, %c0_75], %117 {strides = array<i32>} : memref<64x256xf32, #tpu.memory_space<vmem>>, vector<1x256xf32>,
    %c8_i32_76 = arith.constant 8 : i32
    %119 = arith.muli %arg0, %c8_i32_76 : i32
    %c1_i32_77 = arith.constant 1 : i32
    %120 = arith.addi %119, %c1_i32_77 : i32
    %121 = arith.index_cast %120 : i32 to index
    %c2_78 = arith.constant 2 : index
    %122 = memref.load %arg1[%121, %c2_78] : memref<8x8xi32, #tpu.memory_space<smem>>
    %123 = arith.index_cast %122 : i32 to index
    %c0_79 = arith.constant 0 : index
    %124 = vector.load %arg2[%123, %c0_79] : memref<56x256xf32, #tpu.memory_space<vmem>>, vector<1x256xf32>
    %c17 = arith.constant 17 : index
    %c0_80 = arith.constant 0 : index
    %125 = vector.load %arg10[%c17, %c0_80] : memref<64x256xf32, #tpu.memory_space<vmem>>, vector<1x256xf32>
    tpu.vector_store %arg10[%c17, %c0_80], %124 {strides = array<i32>} : memref<64x256xf32, #tpu.memory_space<vmem>>, vector<1x256xf32>,
    %c8_i32_81 = arith.constant 8 : i32
    %126 = arith.muli %arg0, %c8_i32_81 : i32
    %c2_i32_82 = arith.constant 2 : i32
    %127 = arith.addi %126, %c2_i32_82 : i32
    %128 = arith.index_cast %127 : i32 to index
    %c2_83 = arith.constant 2 : index
    %129 = memref.load %arg1[%128, %c2_83] : memref<8x8xi32, #tpu.memory_space<smem>>
    %130 = arith.index_cast %129 : i32 to index
    %c0_84 = arith.constant 0 : index
    %131 = vector.load %arg2[%130, %c0_84] : memref<56x256xf32, #tpu.memory_space<vmem>>, vector<1x256xf32>
    %c18 = arith.constant 18 : index
    %c0_85 = arith.constant 0 : index
    %132 = vector.load %arg10[%c18, %c0_85] : memref<64x256xf32, #tpu.memory_space<vmem>>, vector<1x256xf32>
    tpu.vector_store %arg10[%c18, %c0_85], %131 {strides = array<i32>} : memref<64x256xf32, #tpu.memory_space<vmem>>, vector<1x256xf32>,
    %c8_i32_86 = arith.constant 8 : i32
    %133 = arith.muli %arg0, %c8_i32_86 : i32
    %c3_i32_87 = arith.constant 3 : i32
    %134 = arith.addi %133, %c3_i32_87 : i32
    %135 = arith.index_cast %134 : i32 to index
    %c2_88 = arith.constant 2 : index
    %136 = memref.load %arg1[%135, %c2_88] : memref<8x8xi32, #tpu.memory_space<smem>>
    %137 = arith.index_cast %136 : i32 to index
    %c0_89 = arith.constant 0 : index
    %138 = vector.load %arg2[%137, %c0_89] : memref<56x256xf32, #tpu.memory_space<vmem>>, vector<1x256xf32>
    %c19 = arith.constant 19 : index
    %c0_90 = arith.constant 0 : index
    %139 = vector.load %arg10[%c19, %c0_90] : memref<64x256xf32, #tpu.memory_space<vmem>>, vector<1x256xf32>
    tpu.vector_store %arg10[%c19, %c0_90], %138 {strides = array<i32>} : memref<64x256xf32, #tpu.memory_space<vmem>>, vector<1x256xf32>,
    %c8_i32_91 = arith.constant 8 : i32
    %140 = arith.muli %arg0, %c8_i32_91 : i32
    %c4_i32_92 = arith.constant 4 : i32
    %141 = arith.addi %140, %c4_i32_92 : i32
    %142 = arith.index_cast %141 : i32 to index
    %c2_93 = arith.constant 2 : index
    %143 = memref.load %arg1[%142, %c2_93] : memref<8x8xi32, #tpu.memory_space<smem>>
    %144 = arith.index_cast %143 : i32 to index
    %c0_94 = arith.constant 0 : index
    %145 = vector.load %arg2[%144, %c0_94] : memref<56x256xf32, #tpu.memory_space<vmem>>, vector<1x256xf32>
    %c20 = arith.constant 20 : index
    %c0_95 = arith.constant 0 : index
    %146 = vector.load %arg10[%c20, %c0_95] : memref<64x256xf32, #tpu.memory_space<vmem>>, vector<1x256xf32>
    tpu.vector_store %arg10[%c20, %c0_95], %145 {strides = array<i32>} : memref<64x256xf32, #tpu.memory_space<vmem>>, vector<1x256xf32>,
    %c8_i32_96 = arith.constant 8 : i32
    %147 = arith.muli %arg0, %c8_i32_96 : i32
    %c5_i32_97 = arith.constant 5 : i32
    %148 = arith.addi %147, %c5_i32_97 : i32
    %149 = arith.index_cast %148 : i32 to index
    %c2_98 = arith.constant 2 : index
    %150 = memref.load %arg1[%149, %c2_98] : memref<8x8xi32, #tpu.memory_space<smem>>
    %151 = arith.index_cast %150 : i32 to index
    %c0_99 = arith.constant 0 : index
    %152 = vector.load %arg2[%151, %c0_99] : memref<56x256xf32, #tpu.memory_space<vmem>>, vector<1x256xf32>
    %c21 = arith.constant 21 : index
    %c0_100 = arith.constant 0 : index
    %153 = vector.load %arg10[%c21, %c0_100] : memref<64x256xf32, #tpu.memory_space<vmem>>, vector<1x256xf32>
    tpu.vector_store %arg10[%c21, %c0_100], %152 {strides = array<i32>} : memref<64x256xf32, #tpu.memory_space<vmem>>, vector<1x256xf32>,
    %c8_i32_101 = arith.constant 8 : i32
    %154 = arith.muli %arg0, %c8_i32_101 : i32
    %c6_i32_102 = arith.constant 6 : i32
    %155 = arith.addi %154, %c6_i32_102 : i32
    %156 = arith.index_cast %155 : i32 to index
    %c2_103 = arith.constant 2 : index
    %157 = memref.load %arg1[%156, %c2_103] : memref<8x8xi32, #tpu.memory_space<smem>>
    %158 = arith.index_cast %157 : i32 to index
    %c0_104 = arith.constant 0 : index
    %159 = vector.load %arg2[%158, %c0_104] : memref<56x256xf32, #tpu.memory_space<vmem>>, vector<1x256xf32>
    %c22 = arith.constant 22 : index
    %c0_105 = arith.constant 0 : index
    %160 = vector.load %arg10[%c22, %c0_105] : memref<64x256xf32, #tpu.memory_space<vmem>>, vector<1x256xf32>
    tpu.vector_store %arg10[%c22, %c0_105], %159 {strides = array<i32>} : memref<64x256xf32, #tpu.memory_space<vmem>>, vector<1x256xf32>,
    %c8_i32_106 = arith.constant 8 : i32
    %161 = arith.muli %arg0, %c8_i32_106 : i32
    %c7_i32_107 = arith.constant 7 : i32
    %162 = arith.addi %161, %c7_i32_107 : i32
    %163 = arith.index_cast %162 : i32 to index
    %c2_108 = arith.constant 2 : index
    %164 = memref.load %arg1[%163, %c2_108] : memref<8x8xi32, #tpu.memory_space<smem>>
    %165 = arith.index_cast %164 : i32 to index
    %c0_109 = arith.constant 0 : index
    %166 = vector.load %arg2[%165, %c0_109] : memref<56x256xf32, #tpu.memory_space<vmem>>, vector<1x256xf32>
    %c23 = arith.constant 23 : index
    %c0_110 = arith.constant 0 : index
    %167 = vector.load %arg10[%c23, %c0_110] : memref<64x256xf32, #tpu.memory_space<vmem>>, vector<1x256xf32>
    tpu.vector_store %arg10[%c23, %c0_110], %166 {strides = array<i32>} : memref<64x256xf32, #tpu.memory_space<vmem>>, vector<1x256xf32>,
    %c8_i32_111 = arith.constant 8 : i32
    %168 = arith.muli %arg0, %c8_i32_111 : i32
    %c0_i32_112 = arith.constant 0 : i32
    %169 = arith.addi %168, %c0_i32_112 : i32
    %170 = arith.index_cast %169 : i32 to index
    %c3_113 = arith.constant 3 : index
    %171 = memref.load %arg1[%170, %c3_113] : memref<8x8xi32, #tpu.memory_space<smem>>
    %172 = arith.index_cast %171 : i32 to index
    %c0_114 = arith.constant 0 : index
    %173 = vector.load %arg2[%172, %c0_114] : memref<56x256xf32, #tpu.memory_space<vmem>>, vector<1x256xf32>
    %c24 = arith.constant 24 : index
    %c0_115 = arith.constant 0 : index
    %174 = vector.load %arg10[%c24, %c0_115] : memref<64x256xf32, #tpu.memory_space<vmem>>, vector<1x256xf32>
    tpu.vector_store %arg10[%c24, %c0_115], %173 {strides = array<i32>} : memref<64x256xf32, #tpu.memory_space<vmem>>, vector<1x256xf32>,
    %c8_i32_116 = arith.constant 8 : i32
    %175 = arith.muli %arg0, %c8_i32_116 : i32
    %c1_i32_117 = arith.constant 1 : i32
    %176 = arith.addi %175, %c1_i32_117 : i32
    %177 = arith.index_cast %176 : i32 to index
    %c3_118 = arith.constant 3 : index
    %178 = memref.load %arg1[%177, %c3_118] : memref<8x8xi32, #tpu.memory_space<smem>>
    %179 = arith.index_cast %178 : i32 to index
    %c0_119 = arith.constant 0 : index
    %180 = vector.load %arg2[%179, %c0_119] : memref<56x256xf32, #tpu.memory_space<vmem>>, vector<1x256xf32>
    %c25 = arith.constant 25 : index
    %c0_120 = arith.constant 0 : index
    %181 = vector.load %arg10[%c25, %c0_120] : memref<64x256xf32, #tpu.memory_space<vmem>>, vector<1x256xf32>
    tpu.vector_store %arg10[%c25, %c0_120], %180 {strides = array<i32>} : memref<64x256xf32, #tpu.memory_space<vmem>>, vector<1x256xf32>,
    %c8_i32_121 = arith.constant 8 : i32
    %182 = arith.muli %arg0, %c8_i32_121 : i32
    %c2_i32_122 = arith.constant 2 : i32
    %183 = arith.addi %182, %c2_i32_122 : i32
    %184 = arith.index_cast %183 : i32 to index
    %c3_123 = arith.constant 3 : index
    %185 = memref.load %arg1[%184, %c3_123] : memref<8x8xi32, #tpu.memory_space<smem>>
    %186 = arith.index_cast %185 : i32 to index
    %c0_124 = arith.constant 0 : index
    %187 = vector.load %arg2[%186, %c0_124] : memref<56x256xf32, #tpu.memory_space<vmem>>, vector<1x256xf32>
    %c26 = arith.constant 26 : index
    %c0_125 = arith.constant 0 : index
    %188 = vector.load %arg10[%c26, %c0_125] : memref<64x256xf32, #tpu.memory_space<vmem>>, vector<1x256xf32>
    tpu.vector_store %arg10[%c26, %c0_125], %187 {strides = array<i32>} : memref<64x256xf32, #tpu.memory_space<vmem>>, vector<1x256xf32>,
    %c8_i32_126 = arith.constant 8 : i32
    %189 = arith.muli %arg0, %c8_i32_126 : i32
    %c3_i32_127 = arith.constant 3 : i32
    %190 = arith.addi %189, %c3_i32_127 : i32
    %191 = arith.index_cast %190 : i32 to index
    %c3_128 = arith.constant 3 : index
    %192 = memref.load %arg1[%191, %c3_128] : memref<8x8xi32, #tpu.memory_space<smem>>
    %193 = arith.index_cast %192 : i32 to index
    %c0_129 = arith.constant 0 : index
    %194 = vector.load %arg2[%193, %c0_129] : memref<56x256xf32, #tpu.memory_space<vmem>>, vector<1x256xf32>
    %c27 = arith.constant 27 : index
    %c0_130 = arith.constant 0 : index
    %195 = vector.load %arg10[%c27, %c0_130] : memref<64x256xf32, #tpu.memory_space<vmem>>, vector<1x256xf32>
    tpu.vector_store %arg10[%c27, %c0_130], %194 {strides = array<i32>} : memref<64x256xf32, #tpu.memory_space<vmem>>, vector<1x256xf32>,
    %c8_i32_131 = arith.constant 8 : i32
    %196 = arith.muli %arg0, %c8_i32_131 : i32
    %c4_i32_132 = arith.constant 4 : i32
    %197 = arith.addi %196, %c4_i32_132 : i32
    %198 = arith.index_cast %197 : i32 to index
    %c3_133 = arith.constant 3 : index
    %199 = memref.load %arg1[%198, %c3_133] : memref<8x8xi32, #tpu.memory_space<smem>>
    %200 = arith.index_cast %199 : i32 to index
    %c0_134 = arith.constant 0 : index
    %201 = vector.load %arg2[%200, %c0_134] : memref<56x256xf32, #tpu.memory_space<vmem>>, vector<1x256xf32>
    %c28 = arith.constant 28 : index
    %c0_135 = arith.constant 0 : index
    %202 = vector.load %arg10[%c28, %c0_135] : memref<64x256xf32, #tpu.memory_space<vmem>>, vector<1x256xf32>
    tpu.vector_store %arg10[%c28, %c0_135], %201 {strides = array<i32>} : memref<64x256xf32, #tpu.memory_space<vmem>>, vector<1x256xf32>,
    %c8_i32_136 = arith.constant 8 : i32
    %203 = arith.muli %arg0, %c8_i32_136 : i32
    %c5_i32_137 = arith.constant 5 : i32
    %204 = arith.addi %203, %c5_i32_137 : i32
    %205 = arith.index_cast %204 : i32 to index
    %c3_138 = arith.constant 3 : index
    %206 = memref.load %arg1[%205, %c3_138] : memref<8x8xi32, #tpu.memory_space<smem>>
    %207 = arith.index_cast %206 : i32 to index
    %c0_139 = arith.constant 0 : index
    %208 = vector.load %arg2[%207, %c0_139] : memref<56x256xf32, #tpu.memory_space<vmem>>, vector<1x256xf32>
    %c29 = arith.constant 29 : index
    %c0_140 = arith.constant 0 : index
    %209 = vector.load %arg10[%c29, %c0_140] : memref<64x256xf32, #tpu.memory_space<vmem>>, vector<1x256xf32>
    tpu.vector_store %arg10[%c29, %c0_140], %208 {strides = array<i32>} : memref<64x256xf32, #tpu.memory_space<vmem>>, vector<1x256xf32>,
    %c8_i32_141 = arith.constant 8 : i32
    %210 = arith.muli %arg0, %c8_i32_141 : i32
    %c6_i32_142 = arith.constant 6 : i32
    %211 = arith.addi %210, %c6_i32_142 : i32
    %212 = arith.index_cast %211 : i32 to index
    %c3_143 = arith.constant 3 : index
    %213 = memref.load %arg1[%212, %c3_143] : memref<8x8xi32, #tpu.memory_space<smem>>
    %214 = arith.index_cast %213 : i32 to index
    %c0_144 = arith.constant 0 : index
    %215 = vector.load %arg2[%214, %c0_144] : memref<56x256xf32, #tpu.memory_space<vmem>>, vector<1x256xf32>
    %c30 = arith.constant 30 : index
    %c0_145 = arith.constant 0 : index
    %216 = vector.load %arg10[%c30, %c0_145] : memref<64x256xf32, #tpu.memory_space<vmem>>, vector<1x256xf32>
    tpu.vector_store %arg10[%c30, %c0_145], %215 {strides = array<i32>} : memref<64x256xf32, #tpu.memory_space<vmem>>, vector<1x256xf32>,
    %c8_i32_146 = arith.constant 8 : i32
    %217 = arith.muli %arg0, %c8_i32_146 : i32
    %c7_i32_147 = arith.constant 7 : i32
    %218 = arith.addi %217, %c7_i32_147 : i32
    %219 = arith.index_cast %218 : i32 to index
    %c3_148 = arith.constant 3 : index
    %220 = memref.load %arg1[%219, %c3_148] : memref<8x8xi32, #tpu.memory_space<smem>>
    %221 = arith.index_cast %220 : i32 to index
    %c0_149 = arith.constant 0 : index
    %222 = vector.load %arg2[%221, %c0_149] : memref<56x256xf32, #tpu.memory_space<vmem>>, vector<1x256xf32>
    %c31 = arith.constant 31 : index
    %c0_150 = arith.constant 0 : index
    %223 = vector.load %arg10[%c31, %c0_150] : memref<64x256xf32, #tpu.memory_space<vmem>>, vector<1x256xf32>
    tpu.vector_store %arg10[%c31, %c0_150], %222 {strides = array<i32>} : memref<64x256xf32, #tpu.memory_space<vmem>>, vector<1x256xf32>,
    %c8_i32_151 = arith.constant 8 : i32
    %224 = arith.muli %arg0, %c8_i32_151 : i32
    %c0_i32_152 = arith.constant 0 : i32
    %225 = arith.addi %224, %c0_i32_152 : i32
    %226 = arith.index_cast %225 : i32 to index
    %c4_153 = arith.constant 4 : index
    %227 = memref.load %arg1[%226, %c4_153] : memref<8x8xi32, #tpu.memory_space<smem>>
    %228 = arith.index_cast %227 : i32 to index
    %c0_154 = arith.constant 0 : index
    %229 = vector.load %arg2[%228, %c0_154] : memref<56x256xf32, #tpu.memory_space<vmem>>, vector<1x256xf32>
    %c32 = arith.constant 32 : index
    %c0_155 = arith.constant 0 : index
    %230 = vector.load %arg10[%c32, %c0_155] : memref<64x256xf32, #tpu.memory_space<vmem>>, vector<1x256xf32>
    tpu.vector_store %arg10[%c32, %c0_155], %229 {strides = array<i32>} : memref<64x256xf32, #tpu.memory_space<vmem>>, vector<1x256xf32>,
    %c8_i32_156 = arith.constant 8 : i32
    %231 = arith.muli %arg0, %c8_i32_156 : i32
    %c1_i32_157 = arith.constant 1 : i32
    %232 = arith.addi %231, %c1_i32_157 : i32
    %233 = arith.index_cast %232 : i32 to index
    %c4_158 = arith.constant 4 : index
    %234 = memref.load %arg1[%233, %c4_158] : memref<8x8xi32, #tpu.memory_space<smem>>
    %235 = arith.index_cast %234 : i32 to index
    %c0_159 = arith.constant 0 : index
    %236 = vector.load %arg2[%235, %c0_159] : memref<56x256xf32, #tpu.memory_space<vmem>>, vector<1x256xf32>
    %c33 = arith.constant 33 : index
    %c0_160 = arith.constant 0 : index
    %237 = vector.load %arg10[%c33, %c0_160] : memref<64x256xf32, #tpu.memory_space<vmem>>, vector<1x256xf32>
    tpu.vector_store %arg10[%c33, %c0_160], %236 {strides = array<i32>} : memref<64x256xf32, #tpu.memory_space<vmem>>, vector<1x256xf32>,
    %c8_i32_161 = arith.constant 8 : i32
    %238 = arith.muli %arg0, %c8_i32_161 : i32
    %c2_i32_162 = arith.constant 2 : i32
    %239 = arith.addi %238, %c2_i32_162 : i32
    %240 = arith.index_cast %239 : i32 to index
    %c4_163 = arith.constant 4 : index
    %241 = memref.load %arg1[%240, %c4_163] : memref<8x8xi32, #tpu.memory_space<smem>>
    %242 = arith.index_cast %241 : i32 to index
    %c0_164 = arith.constant 0 : index
    %243 = vector.load %arg2[%242, %c0_164] : memref<56x256xf32, #tpu.memory_space<vmem>>, vector<1x256xf32>
    %c34 = arith.constant 34 : index
    %c0_165 = arith.constant 0 : index
    %244 = vector.load %arg10[%c34, %c0_165] : memref<64x256xf32, #tpu.memory_space<vmem>>, vector<1x256xf32>
    tpu.vector_store %arg10[%c34, %c0_165], %243 {strides = array<i32>} : memref<64x256xf32, #tpu.memory_space<vmem>>, vector<1x256xf32>,
    %c8_i32_166 = arith.constant 8 : i32
    %245 = arith.muli %arg0, %c8_i32_166 : i32
    %c3_i32_167 = arith.constant 3 : i32
    %246 = arith.addi %245, %c3_i32_167 : i32
    %247 = arith.index_cast %246 : i32 to index
    %c4_168 = arith.constant 4 : index
    %248 = memref.load %arg1[%247, %c4_168] : memref<8x8xi32, #tpu.memory_space<smem>>
    %249 = arith.index_cast %248 : i32 to index
    %c0_169 = arith.constant 0 : index
    %250 = vector.load %arg2[%249, %c0_169] : memref<56x256xf32, #tpu.memory_space<vmem>>, vector<1x256xf32>
    %c35 = arith.constant 35 : index
    %c0_170 = arith.constant 0 : index
    %251 = vector.load %arg10[%c35, %c0_170] : memref<64x256xf32, #tpu.memory_space<vmem>>, vector<1x256xf32>
    tpu.vector_store %arg10[%c35, %c0_170], %250 {strides = array<i32>} : memref<64x256xf32, #tpu.memory_space<vmem>>, vector<1x256xf32>,
    %c8_i32_171 = arith.constant 8 : i32
    %252 = arith.muli %arg0, %c8_i32_171 : i32
    %c4_i32_172 = arith.constant 4 : i32
    %253 = arith.addi %252, %c4_i32_172 : i32
    %254 = arith.index_cast %253 : i32 to index
    %c4_173 = arith.constant 4 : index
    %255 = memref.load %arg1[%254, %c4_173] : memref<8x8xi32, #tpu.memory_space<smem>>
    %256 = arith.index_cast %255 : i32 to index
    %c0_174 = arith.constant 0 : index
    %257 = vector.load %arg2[%256, %c0_174] : memref<56x256xf32, #tpu.memory_space<vmem>>, vector<1x256xf32>
    %c36 = arith.constant 36 : index
    %c0_175 = arith.constant 0 : index
    %258 = vector.load %arg10[%c36, %c0_175] : memref<64x256xf32, #tpu.memory_space<vmem>>, vector<1x256xf32>
    tpu.vector_store %arg10[%c36, %c0_175], %257 {strides = array<i32>} : memref<64x256xf32, #tpu.memory_space<vmem>>, vector<1x256xf32>,
    %c8_i32_176 = arith.constant 8 : i32
    %259 = arith.muli %arg0, %c8_i32_176 : i32
    %c5_i32_177 = arith.constant 5 : i32
    %260 = arith.addi %259, %c5_i32_177 : i32
    %261 = arith.index_cast %260 : i32 to index
    %c4_178 = arith.constant 4 : index
    %262 = memref.load %arg1[%261, %c4_178] : memref<8x8xi32, #tpu.memory_space<smem>>
    %263 = arith.index_cast %262 : i32 to index
    %c0_179 = arith.constant 0 : index
    %264 = vector.load %arg2[%263, %c0_179] : memref<56x256xf32, #tpu.memory_space<vmem>>, vector<1x256xf32>
    %c37 = arith.constant 37 : index
    %c0_180 = arith.constant 0 : index
    %265 = vector.load %arg10[%c37, %c0_180] : memref<64x256xf32, #tpu.memory_space<vmem>>, vector<1x256xf32>
    tpu.vector_store %arg10[%c37, %c0_180], %264 {strides = array<i32>} : memref<64x256xf32, #tpu.memory_space<vmem>>, vector<1x256xf32>,
    %c8_i32_181 = arith.constant 8 : i32
    %266 = arith.muli %arg0, %c8_i32_181 : i32
    %c6_i32_182 = arith.constant 6 : i32
    %267 = arith.addi %266, %c6_i32_182 : i32
    %268 = arith.index_cast %267 : i32 to index
    %c4_183 = arith.constant 4 : index
    %269 = memref.load %arg1[%268, %c4_183] : memref<8x8xi32, #tpu.memory_space<smem>>
    %270 = arith.index_cast %269 : i32 to index
    %c0_184 = arith.constant 0 : index
    %271 = vector.load %arg2[%270, %c0_184] : memref<56x256xf32, #tpu.memory_space<vmem>>, vector<1x256xf32>
    %c38 = arith.constant 38 : index
    %c0_185 = arith.constant 0 : index
    %272 = vector.load %arg10[%c38, %c0_185] : memref<64x256xf32, #tpu.memory_space<vmem>>, vector<1x256xf32>
    tpu.vector_store %arg10[%c38, %c0_185], %271 {strides = array<i32>} : memref<64x256xf32, #tpu.memory_space<vmem>>, vector<1x256xf32>,
    %c8_i32_186 = arith.constant 8 : i32
    %273 = arith.muli %arg0, %c8_i32_186 : i32
    %c7_i32_187 = arith.constant 7 : i32
    %274 = arith.addi %273, %c7_i32_187 : i32
    %275 = arith.index_cast %274 : i32 to index
    %c4_188 = arith.constant 4 : index
    %276 = memref.load %arg1[%275, %c4_188] : memref<8x8xi32, #tpu.memory_space<smem>>
    %277 = arith.index_cast %276 : i32 to index
    %c0_189 = arith.constant 0 : index
    %278 = vector.load %arg2[%277, %c0_189] : memref<56x256xf32, #tpu.memory_space<vmem>>, vector<1x256xf32>
    %c39 = arith.constant 39 : index
    %c0_190 = arith.constant 0 : index
    %279 = vector.load %arg10[%c39, %c0_190] : memref<64x256xf32, #tpu.memory_space<vmem>>, vector<1x256xf32>
    tpu.vector_store %arg10[%c39, %c0_190], %278 {strides = array<i32>} : memref<64x256xf32, #tpu.memory_space<vmem>>, vector<1x256xf32>,
    %c8_i32_191 = arith.constant 8 : i32
    %280 = arith.muli %arg0, %c8_i32_191 : i32
    %c0_i32_192 = arith.constant 0 : i32
    %281 = arith.addi %280, %c0_i32_192 : i32
    %282 = arith.index_cast %281 : i32 to index
    %c5_193 = arith.constant 5 : index
    %283 = memref.load %arg1[%282, %c5_193] : memref<8x8xi32, #tpu.memory_space<smem>>
    %284 = arith.index_cast %283 : i32 to index
    %c0_194 = arith.constant 0 : index
    %285 = vector.load %arg2[%284, %c0_194] : memref<56x256xf32, #tpu.memory_space<vmem>>, vector<1x256xf32>
    %c40 = arith.constant 40 : index
    %c0_195 = arith.constant 0 : index
    %286 = vector.load %arg10[%c40, %c0_195] : memref<64x256xf32, #tpu.memory_space<vmem>>, vector<1x256xf32>
    tpu.vector_store %arg10[%c40, %c0_195], %285 {strides = array<i32>} : memref<64x256xf32, #tpu.memory_space<vmem>>, vector<1x256xf32>,
    %c8_i32_196 = arith.constant 8 : i32
    %287 = arith.muli %arg0, %c8_i32_196 : i32
    %c1_i32_197 = arith.constant 1 : i32
    %288 = arith.addi %287, %c1_i32_197 : i32
    %289 = arith.index_cast %288 : i32 to index
    %c5_198 = arith.constant 5 : index
    %290 = memref.load %arg1[%289, %c5_198] : memref<8x8xi32, #tpu.memory_space<smem>>
    %291 = arith.index_cast %290 : i32 to index
    %c0_199 = arith.constant 0 : index
    %292 = vector.load %arg2[%291, %c0_199] : memref<56x256xf32, #tpu.memory_space<vmem>>, vector<1x256xf32>
    %c41 = arith.constant 41 : index
    %c0_200 = arith.constant 0 : index
    %293 = vector.load %arg10[%c41, %c0_200] : memref<64x256xf32, #tpu.memory_space<vmem>>, vector<1x256xf32>
    tpu.vector_store %arg10[%c41, %c0_200], %292 {strides = array<i32>} : memref<64x256xf32, #tpu.memory_space<vmem>>, vector<1x256xf32>,
    %c8_i32_201 = arith.constant 8 : i32
    %294 = arith.muli %arg0, %c8_i32_201 : i32
    %c2_i32_202 = arith.constant 2 : i32
    %295 = arith.addi %294, %c2_i32_202 : i32
    %296 = arith.index_cast %295 : i32 to index
    %c5_203 = arith.constant 5 : index
    %297 = memref.load %arg1[%296, %c5_203] : memref<8x8xi32, #tpu.memory_space<smem>>
    %298 = arith.index_cast %297 : i32 to index
    %c0_204 = arith.constant 0 : index
    %299 = vector.load %arg2[%298, %c0_204] : memref<56x256xf32, #tpu.memory_space<vmem>>, vector<1x256xf32>
    %c42 = arith.constant 42 : index
    %c0_205 = arith.constant 0 : index
    %300 = vector.load %arg10[%c42, %c0_205] : memref<64x256xf32, #tpu.memory_space<vmem>>, vector<1x256xf32>
    tpu.vector_store %arg10[%c42, %c0_205], %299 {strides = array<i32>} : memref<64x256xf32, #tpu.memory_space<vmem>>, vector<1x256xf32>,
    %c8_i32_206 = arith.constant 8 : i32
    %301 = arith.muli %arg0, %c8_i32_206 : i32
    %c3_i32_207 = arith.constant 3 : i32
    %302 = arith.addi %301, %c3_i32_207 : i32
    %303 = arith.index_cast %302 : i32 to index
    %c5_208 = arith.constant 5 : index
    %304 = memref.load %arg1[%303, %c5_208] : memref<8x8xi32, #tpu.memory_space<smem>>
    %305 = arith.index_cast %304 : i32 to index
    %c0_209 = arith.constant 0 : index
    %306 = vector.load %arg2[%305, %c0_209] : memref<56x256xf32, #tpu.memory_space<vmem>>, vector<1x256xf32>
    %c43 = arith.constant 43 : index
    %c0_210 = arith.constant 0 : index
    %307 = vector.load %arg10[%c43, %c0_210] : memref<64x256xf32, #tpu.memory_space<vmem>>, vector<1x256xf32>
    tpu.vector_store %arg10[%c43, %c0_210], %306 {strides = array<i32>} : memref<64x256xf32, #tpu.memory_space<vmem>>, vector<1x256xf32>,
    %c8_i32_211 = arith.constant 8 : i32
    %308 = arith.muli %arg0, %c8_i32_211 : i32
    %c4_i32_212 = arith.constant 4 : i32
    %309 = arith.addi %308, %c4_i32_212 : i32
    %310 = arith.index_cast %309 : i32 to index
    %c5_213 = arith.constant 5 : index
    %311 = memref.load %arg1[%310, %c5_213] : memref<8x8xi32, #tpu.memory_space<smem>>
    %312 = arith.index_cast %311 : i32 to index
    %c0_214 = arith.constant 0 : index
    %313 = vector.load %arg2[%312, %c0_214] : memref<56x256xf32, #tpu.memory_space<vmem>>, vector<1x256xf32>
    %c44 = arith.constant 44 : index
    %c0_215 = arith.constant 0 : index
    %314 = vector.load %arg10[%c44, %c0_215] : memref<64x256xf32, #tpu.memory_space<vmem>>, vector<1x256xf32>
    tpu.vector_store %arg10[%c44, %c0_215], %313 {strides = array<i32>} : memref<64x256xf32, #tpu.memory_space<vmem>>, vector<1x256xf32>,
    %c8_i32_216 = arith.constant 8 : i32
    %315 = arith.muli %arg0, %c8_i32_216 : i32
    %c5_i32_217 = arith.constant 5 : i32
    %316 = arith.addi %315, %c5_i32_217 : i32
    %317 = arith.index_cast %316 : i32 to index
    %c5_218 = arith.constant 5 : index
    %318 = memref.load %arg1[%317, %c5_218] : memref<8x8xi32, #tpu.memory_space<smem>>
    %319 = arith.index_cast %318 : i32 to index
    %c0_219 = arith.constant 0 : index
    %320 = vector.load %arg2[%319, %c0_219] : memref<56x256xf32, #tpu.memory_space<vmem>>, vector<1x256xf32>
    %c45 = arith.constant 45 : index
    %c0_220 = arith.constant 0 : index
    %321 = vector.load %arg10[%c45, %c0_220] : memref<64x256xf32, #tpu.memory_space<vmem>>, vector<1x256xf32>
    tpu.vector_store %arg10[%c45, %c0_220], %320 {strides = array<i32>} : memref<64x256xf32, #tpu.memory_space<vmem>>, vector<1x256xf32>,
    %c8_i32_221 = arith.constant 8 : i32
    %322 = arith.muli %arg0, %c8_i32_221 : i32
    %c6_i32_222 = arith.constant 6 : i32
    %323 = arith.addi %322, %c6_i32_222 : i32
    %324 = arith.index_cast %323 : i32 to index
    %c5_223 = arith.constant 5 : index
    %325 = memref.load %arg1[%324, %c5_223] : memref<8x8xi32, #tpu.memory_space<smem>>
    %326 = arith.index_cast %325 : i32 to index
    %c0_224 = arith.constant 0 : index
    %327 = vector.load %arg2[%326, %c0_224] : memref<56x256xf32, #tpu.memory_space<vmem>>, vector<1x256xf32>
    %c46 = arith.constant 46 : index
    %c0_225 = arith.constant 0 : index
    %328 = vector.load %arg10[%c46, %c0_225] : memref<64x256xf32, #tpu.memory_space<vmem>>, vector<1x256xf32>
    tpu.vector_store %arg10[%c46, %c0_225], %327 {strides = array<i32>} : memref<64x256xf32, #tpu.memory_space<vmem>>, vector<1x256xf32>,
    %c8_i32_226 = arith.constant 8 : i32
    %329 = arith.muli %arg0, %c8_i32_226 : i32
    %c7_i32_227 = arith.constant 7 : i32
    %330 = arith.addi %329, %c7_i32_227 : i32
    %331 = arith.index_cast %330 : i32 to index
    %c5_228 = arith.constant 5 : index
    %332 = memref.load %arg1[%331, %c5_228] : memref<8x8xi32, #tpu.memory_space<smem>>
    %333 = arith.index_cast %332 : i32 to index
    %c0_229 = arith.constant 0 : index
    %334 = vector.load %arg2[%333, %c0_229] : memref<56x256xf32, #tpu.memory_space<vmem>>, vector<1x256xf32>
    %c47 = arith.constant 47 : index
    %c0_230 = arith.constant 0 : index
    %335 = vector.load %arg10[%c47, %c0_230] : memref<64x256xf32, #tpu.memory_space<vmem>>, vector<1x256xf32>
    tpu.vector_store %arg10[%c47, %c0_230], %334 {strides = array<i32>} : memref<64x256xf32, #tpu.memory_space<vmem>>, vector<1x256xf32>,
    %c8_i32_231 = arith.constant 8 : i32
    %336 = arith.muli %arg0, %c8_i32_231 : i32
    %c0_i32_232 = arith.constant 0 : i32
    %337 = arith.addi %336, %c0_i32_232 : i32
    %338 = arith.index_cast %337 : i32 to index
    %c6_233 = arith.constant 6 : index
    %339 = memref.load %arg1[%338, %c6_233] : memref<8x8xi32, #tpu.memory_space<smem>>
    %340 = arith.index_cast %339 : i32 to index
    %c0_234 = arith.constant 0 : index
    %341 = vector.load %arg2[%340, %c0_234] : memref<56x256xf32, #tpu.memory_space<vmem>>, vector<1x256xf32>
    %c48 = arith.constant 48 : index
    %c0_235 = arith.constant 0 : index
    %342 = vector.load %arg10[%c48, %c0_235] : memref<64x256xf32, #tpu.memory_space<vmem>>, vector<1x256xf32>
    tpu.vector_store %arg10[%c48, %c0_235], %341 {strides = array<i32>} : memref<64x256xf32, #tpu.memory_space<vmem>>, vector<1x256xf32>,
    %c8_i32_236 = arith.constant 8 : i32
    %343 = arith.muli %arg0, %c8_i32_236 : i32
    %c1_i32_237 = arith.constant 1 : i32
    %344 = arith.addi %343, %c1_i32_237 : i32
    %345 = arith.index_cast %344 : i32 to index
    %c6_238 = arith.constant 6 : index
    %346 = memref.load %arg1[%345, %c6_238] : memref<8x8xi32, #tpu.memory_space<smem>>
    %347 = arith.index_cast %346 : i32 to index
    %c0_239 = arith.constant 0 : index
    %348 = vector.load %arg2[%347, %c0_239] : memref<56x256xf32, #tpu.memory_space<vmem>>, vector<1x256xf32>
    %c49 = arith.constant 49 : index
    %c0_240 = arith.constant 0 : index
    %349 = vector.load %arg10[%c49, %c0_240] : memref<64x256xf32, #tpu.memory_space<vmem>>, vector<1x256xf32>
    tpu.vector_store %arg10[%c49, %c0_240], %348 {strides = array<i32>} : memref<64x256xf32, #tpu.memory_space<vmem>>, vector<1x256xf32>,
    %c8_i32_241 = arith.constant 8 : i32
    %350 = arith.muli %arg0, %c8_i32_241 : i32
    %c2_i32_242 = arith.constant 2 : i32
    %351 = arith.addi %350, %c2_i32_242 : i32
    %352 = arith.index_cast %351 : i32 to index
    %c6_243 = arith.constant 6 : index
    %353 = memref.load %arg1[%352, %c6_243] : memref<8x8xi32, #tpu.memory_space<smem>>
    %354 = arith.index_cast %353 : i32 to index
    %c0_244 = arith.constant 0 : index
    %355 = vector.load %arg2[%354, %c0_244] : memref<56x256xf32, #tpu.memory_space<vmem>>, vector<1x256xf32>
    %c50 = arith.constant 50 : index
    %c0_245 = arith.constant 0 : index
    %356 = vector.load %arg10[%c50, %c0_245] : memref<64x256xf32, #tpu.memory_space<vmem>>, vector<1x256xf32>
    tpu.vector_store %arg10[%c50, %c0_245], %355 {strides = array<i32>} : memref<64x256xf32, #tpu.memory_space<vmem>>, vector<1x256xf32>,
    %c8_i32_246 = arith.constant 8 : i32
    %357 = arith.muli %arg0, %c8_i32_246 : i32
    %c3_i32_247 = arith.constant 3 : i32
    %358 = arith.addi %357, %c3_i32_247 : i32
    %359 = arith.index_cast %358 : i32 to index
    %c6_248 = arith.constant 6 : index
    %360 = memref.load %arg1[%359, %c6_248] : memref<8x8xi32, #tpu.memory_space<smem>>
    %361 = arith.index_cast %360 : i32 to index
    %c0_249 = arith.constant 0 : index
    %362 = vector.load %arg2[%361, %c0_249] : memref<56x256xf32, #tpu.memory_space<vmem>>, vector<1x256xf32>
    %c51 = arith.constant 51 : index
    %c0_250 = arith.constant 0 : index
    %363 = vector.load %arg10[%c51, %c0_250] : memref<64x256xf32, #tpu.memory_space<vmem>>, vector<1x256xf32>
    tpu.vector_store %arg10[%c51, %c0_250], %362 {strides = array<i32>} : memref<64x256xf32, #tpu.memory_space<vmem>>, vector<1x256xf32>,
    %c8_i32_251 = arith.constant 8 : i32
    %364 = arith.muli %arg0, %c8_i32_251 : i32
    %c4_i32_252 = arith.constant 4 : i32
    %365 = arith.addi %364, %c4_i32_252 : i32
    %366 = arith.index_cast %365 : i32 to index
    %c6_253 = arith.constant 6 : index
    %367 = memref.load %arg1[%366, %c6_253] : memref<8x8xi32, #tpu.memory_space<smem>>
    %368 = arith.index_cast %367 : i32 to index
    %c0_254 = arith.constant 0 : index
    %369 = vector.load %arg2[%368, %c0_254] : memref<56x256xf32, #tpu.memory_space<vmem>>, vector<1x256xf32>
    %c52 = arith.constant 52 : index
    %c0_255 = arith.constant 0 : index
    %370 = vector.load %arg10[%c52, %c0_255] : memref<64x256xf32, #tpu.memory_space<vmem>>, vector<1x256xf32>
    tpu.vector_store %arg10[%c52, %c0_255], %369 {strides = array<i32>} : memref<64x256xf32, #tpu.memory_space<vmem>>, vector<1x256xf32>,
    %c8_i32_256 = arith.constant 8 : i32
    %371 = arith.muli %arg0, %c8_i32_256 : i32
    %c5_i32_257 = arith.constant 5 : i32
    %372 = arith.addi %371, %c5_i32_257 : i32
    %373 = arith.index_cast %372 : i32 to index
    %c6_258 = arith.constant 6 : index
    %374 = memref.load %arg1[%373, %c6_258] : memref<8x8xi32, #tpu.memory_space<smem>>
    %375 = arith.index_cast %374 : i32 to index
    %c0_259 = arith.constant 0 : index
    %376 = vector.load %arg2[%375, %c0_259] : memref<56x256xf32, #tpu.memory_space<vmem>>, vector<1x256xf32>
    %c53 = arith.constant 53 : index
    %c0_260 = arith.constant 0 : index
    %377 = vector.load %arg10[%c53, %c0_260] : memref<64x256xf32, #tpu.memory_space<vmem>>, vector<1x256xf32>
    tpu.vector_store %arg10[%c53, %c0_260], %376 {strides = array<i32>} : memref<64x256xf32, #tpu.memory_space<vmem>>, vector<1x256xf32>,
    %c8_i32_261 = arith.constant 8 : i32
    %378 = arith.muli %arg0, %c8_i32_261 : i32
    %c6_i32_262 = arith.constant 6 : i32
    %379 = arith.addi %378, %c6_i32_262 : i32
    %380 = arith.index_cast %379 : i32 to index
    %c6_263 = arith.constant 6 : index
    %381 = memref.load %arg1[%380, %c6_263] : memref<8x8xi32, #tpu.memory_space<smem>>
    %382 = arith.index_cast %381 : i32 to index
    %c0_264 = arith.constant 0 : index
    %383 = vector.load %arg2[%382, %c0_264] : memref<56x256xf32, #tpu.memory_space<vmem>>, vector<1x256xf32>
    %c54 = arith.constant 54 : index
    %c0_265 = arith.constant 0 : index
    %384 = vector.load %arg10[%c54, %c0_265] : memref<64x256xf32, #tpu.memory_space<vmem>>, vector<1x256xf32>
    tpu.vector_store %arg10[%c54, %c0_265], %383 {strides = array<i32>} : memref<64x256xf32, #tpu.memory_space<vmem>>, vector<1x256xf32>,
    %c8_i32_266 = arith.constant 8 : i32
    %385 = arith.muli %arg0, %c8_i32_266 : i32
    %c7_i32_267 = arith.constant 7 : i32
    %386 = arith.addi %385, %c7_i32_267 : i32
    %387 = arith.index_cast %386 : i32 to index
    %c6_268 = arith.constant 6 : index
    %388 = memref.load %arg1[%387, %c6_268] : memref<8x8xi32, #tpu.memory_space<smem>>
    %389 = arith.index_cast %388 : i32 to index
    %c0_269 = arith.constant 0 : index
    %390 = vector.load %arg2[%389, %c0_269] : memref<56x256xf32, #tpu.memory_space<vmem>>, vector<1x256xf32>
    %c55 = arith.constant 55 : index
    %c0_270 = arith.constant 0 : index
    %391 = vector.load %arg10[%c55, %c0_270] : memref<64x256xf32, #tpu.memory_space<vmem>>, vector<1x256xf32>
    tpu.vector_store %arg10[%c55, %c0_270], %390 {strides = array<i32>} : memref<64x256xf32, #tpu.memory_space<vmem>>, vector<1x256xf32>,
    %c8_i32_271 = arith.constant 8 : i32
    %392 = arith.muli %arg0, %c8_i32_271 : i32
    %c0_i32_272 = arith.constant 0 : i32
    %393 = arith.addi %392, %c0_i32_272 : i32
    %394 = arith.index_cast %393 : i32 to index
    %c7_273 = arith.constant 7 : index
    %395 = memref.load %arg1[%394, %c7_273] : memref<8x8xi32, #tpu.memory_space<smem>>
    %396 = arith.index_cast %395 : i32 to index
    %c0_274 = arith.constant 0 : index
    %397 = vector.load %arg2[%396, %c0_274] : memref<56x256xf32, #tpu.memory_space<vmem>>, vector<1x256xf32>
    %c56 = arith.constant 56 : index
    %c0_275 = arith.constant 0 : index
    %398 = vector.load %arg10[%c56, %c0_275] : memref<64x256xf32, #tpu.memory_space<vmem>>, vector<1x256xf32>
    tpu.vector_store %arg10[%c56, %c0_275], %397 {strides = array<i32>} : memref<64x256xf32, #tpu.memory_space<vmem>>, vector<1x256xf32>,
    %c8_i32_276 = arith.constant 8 : i32
    %399 = arith.muli %arg0, %c8_i32_276 : i32
    %c1_i32_277 = arith.constant 1 : i32
    %400 = arith.addi %399, %c1_i32_277 : i32
    %401 = arith.index_cast %400 : i32 to index
    %c7_278 = arith.constant 7 : index
    %402 = memref.load %arg1[%401, %c7_278] : memref<8x8xi32, #tpu.memory_space<smem>>
    %403 = arith.index_cast %402 : i32 to index
    %c0_279 = arith.constant 0 : index
    %404 = vector.load %arg2[%403, %c0_279] : memref<56x256xf32, #tpu.memory_space<vmem>>, vector<1x256xf32>
    %c57 = arith.constant 57 : index
    %c0_280 = arith.constant 0 : index
    %405 = vector.load %arg10[%c57, %c0_280] : memref<64x256xf32, #tpu.memory_space<vmem>>, vector<1x256xf32>
    tpu.vector_store %arg10[%c57, %c0_280], %404 {strides = array<i32>} : memref<64x256xf32, #tpu.memory_space<vmem>>, vector<1x256xf32>,
    %c8_i32_281 = arith.constant 8 : i32
    %406 = arith.muli %arg0, %c8_i32_281 : i32
    %c2_i32_282 = arith.constant 2 : i32
    %407 = arith.addi %406, %c2_i32_282 : i32
    %408 = arith.index_cast %407 : i32 to index
    %c7_283 = arith.constant 7 : index
    %409 = memref.load %arg1[%408, %c7_283] : memref<8x8xi32, #tpu.memory_space<smem>>
    %410 = arith.index_cast %409 : i32 to index
    %c0_284 = arith.constant 0 : index
    %411 = vector.load %arg2[%410, %c0_284] : memref<56x256xf32, #tpu.memory_space<vmem>>, vector<1x256xf32>
    %c58 = arith.constant 58 : index
    %c0_285 = arith.constant 0 : index
    %412 = vector.load %arg10[%c58, %c0_285] : memref<64x256xf32, #tpu.memory_space<vmem>>, vector<1x256xf32>
    tpu.vector_store %arg10[%c58, %c0_285], %411 {strides = array<i32>} : memref<64x256xf32, #tpu.memory_space<vmem>>, vector<1x256xf32>,
    %c8_i32_286 = arith.constant 8 : i32
    %413 = arith.muli %arg0, %c8_i32_286 : i32
    %c3_i32_287 = arith.constant 3 : i32
    %414 = arith.addi %413, %c3_i32_287 : i32
    %415 = arith.index_cast %414 : i32 to index
    %c7_288 = arith.constant 7 : index
    %416 = memref.load %arg1[%415, %c7_288] : memref<8x8xi32, #tpu.memory_space<smem>>
    %417 = arith.index_cast %416 : i32 to index
    %c0_289 = arith.constant 0 : index
    %418 = vector.load %arg2[%417, %c0_289] : memref<56x256xf32, #tpu.memory_space<vmem>>, vector<1x256xf32>
    %c59 = arith.constant 59 : index
    %c0_290 = arith.constant 0 : index
    %419 = vector.load %arg10[%c59, %c0_290] : memref<64x256xf32, #tpu.memory_space<vmem>>, vector<1x256xf32>
    tpu.vector_store %arg10[%c59, %c0_290], %418 {strides = array<i32>} : memref<64x256xf32, #tpu.memory_space<vmem>>, vector<1x256xf32>,
    %c8_i32_291 = arith.constant 8 : i32
    %420 = arith.muli %arg0, %c8_i32_291 : i32
    %c4_i32_292 = arith.constant 4 : i32
    %421 = arith.addi %420, %c4_i32_292 : i32
    %422 = arith.index_cast %421 : i32 to index
    %c7_293 = arith.constant 7 : index
    %423 = memref.load %arg1[%422, %c7_293] : memref<8x8xi32, #tpu.memory_space<smem>>
    %424 = arith.index_cast %423 : i32 to index
    %c0_294 = arith.constant 0 : index
    %425 = vector.load %arg2[%424, %c0_294] : memref<56x256xf32, #tpu.memory_space<vmem>>, vector<1x256xf32>
    %c60 = arith.constant 60 : index
    %c0_295 = arith.constant 0 : index
    %426 = vector.load %arg10[%c60, %c0_295] : memref<64x256xf32, #tpu.memory_space<vmem>>, vector<1x256xf32>
    tpu.vector_store %arg10[%c60, %c0_295], %425 {strides = array<i32>} : memref<64x256xf32, #tpu.memory_space<vmem>>, vector<1x256xf32>,
    %c8_i32_296 = arith.constant 8 : i32
    %427 = arith.muli %arg0, %c8_i32_296 : i32
    %c5_i32_297 = arith.constant 5 : i32
    %428 = arith.addi %427, %c5_i32_297 : i32
    %429 = arith.index_cast %428 : i32 to index
    %c7_298 = arith.constant 7 : index
    %430 = memref.load %arg1[%429, %c7_298] : memref<8x8xi32, #tpu.memory_space<smem>>
    %431 = arith.index_cast %430 : i32 to index
    %c0_299 = arith.constant 0 : index
    %432 = vector.load %arg2[%431, %c0_299] : memref<56x256xf32, #tpu.memory_space<vmem>>, vector<1x256xf32>
    %c61 = arith.constant 61 : index
    %c0_300 = arith.constant 0 : index
    %433 = vector.load %arg10[%c61, %c0_300] : memref<64x256xf32, #tpu.memory_space<vmem>>, vector<1x256xf32>
    tpu.vector_store %arg10[%c61, %c0_300], %432 {strides = array<i32>} : memref<64x256xf32, #tpu.memory_space<vmem>>, vector<1x256xf32>,
    %c8_i32_301 = arith.constant 8 : i32
    %434 = arith.muli %arg0, %c8_i32_301 : i32
    %c6_i32_302 = arith.constant 6 : i32
    %435 = arith.addi %434, %c6_i32_302 : i32
    %436 = arith.index_cast %435 : i32 to index
    %c7_303 = arith.constant 7 : index
    %437 = memref.load %arg1[%436, %c7_303] : memref<8x8xi32, #tpu.memory_space<smem>>
    %438 = arith.index_cast %437 : i32 to index
    %c0_304 = arith.constant 0 : index
    %439 = vector.load %arg2[%438, %c0_304] : memref<56x256xf32, #tpu.memory_space<vmem>>, vector<1x256xf32>
    %c62 = arith.constant 62 : index
    %c0_305 = arith.constant 0 : index
    %440 = vector.load %arg10[%c62, %c0_305] : memref<64x256xf32, #tpu.memory_space<vmem>>, vector<1x256xf32>
    tpu.vector_store %arg10[%c62, %c0_305], %439 {strides = array<i32>} : memref<64x256xf32, #tpu.memory_space<vmem>>, vector<1x256xf32>,
    %c8_i32_306 = arith.constant 8 : i32
    %441 = arith.muli %arg0, %c8_i32_306 : i32
    %c7_i32_307 = arith.constant 7 : i32
    %442 = arith.addi %441, %c7_i32_307 : i32
    %443 = arith.index_cast %442 : i32 to index
    %c7_308 = arith.constant 7 : index
    %444 = memref.load %arg1[%443, %c7_308] : memref<8x8xi32, #tpu.memory_space<smem>>
    %445 = arith.index_cast %444 : i32 to index
    %c0_309 = arith.constant 0 : index
    %446 = vector.load %arg2[%445, %c0_309] : memref<56x256xf32, #tpu.memory_space<vmem>>, vector<1x256xf32>
    %c63 = arith.constant 63 : index
    %c0_310 = arith.constant 0 : index
    %447 = vector.load %arg10[%c63, %c0_310] : memref<64x256xf32, #tpu.memory_space<vmem>>, vector<1x256xf32>
    tpu.vector_store %arg10[%c63, %c0_310], %446 {strides = array<i32>} : memref<64x256xf32, #tpu.memory_space<vmem>>, vector<1x256xf32>,
    %c0_311 = arith.constant 0 : index
    %c0_312 = arith.constant 0 : index
    %448 = vector.load %arg10[%c0_311, %c0_312] : memref<64x256xf32, #tpu.memory_space<vmem>>, vector<64x256xf32>
    %c0_313 = arith.constant 0 : index
    %c0_314 = arith.constant 0 : index
    %449 = vector.load %arg3[%c0_313, %c0_314] : memref<256x128xf32, #tpu.memory_space<vmem>>, vector<256x128xf32>
    %cst = arith.constant dense<0.000000e+00> : vector<64x128xf32>
    %450 = tpu.matmul %448, %449, %cst {dimension_numbers = #tpu.dot_dimension_numbers<[1], [0], [0], [1], [0, 0, 1, 1], [], []>} : vector<64x256xf32>, vector<256x128xf32>, vector<64x128xf32> -> vector<64x128xf32>
    %c0_315 = arith.constant 0 : index
    %c0_316 = arith.constant 0 : index
    %451 = vector.load %arg11[%c0_315, %c0_316] : memref<64x128xf32, #tpu.memory_space<vmem>>, vector<64x128xf32>
    tpu.vector_store %arg11[%c0_315, %c0_316], %450 {strides = array<i32>} : memref<64x128xf32, #tpu.memory_space<vmem>>, vector<64x128xf32>,
    %452 = tpu.iota {dimensions = array<i32: 1>} : vector<8x128xi32>
    %c64_i32 = arith.constant 64 : i32
    %453 = vector.broadcast %c64_i32 : i32 to vector<8x128xi32>
    %454 = arith.cmpi sge, %452, %453 : vector<8x128xi32>
    %c96_i32 = arith.constant 96 : i32
    %455 = vector.broadcast %c96_i32 : i32 to vector<8x128xi32>
    %456 = arith.cmpi slt, %452, %455 : vector<8x128xi32>
    %457 = arith.andi %454, %456 : vector<8x128xi1>
    %cst_317 = arith.constant 0.000000e+00 : f32
    %458 = vector.broadcast %cst_317 : f32 to vector<8x32xf32>
    %cst_318 = arith.constant 0.000000e+00 : f32
    %459 = vector.broadcast %cst_318 : f32 to vector<8x32xf32>
    %cst_319 = arith.constant 0.000000e+00 : f32
    %460 = vector.broadcast %cst_319 : f32 to vector<8x32xf32>
    %cst_320 = arith.constant 0.000000e+00 : f32
    %461 = vector.broadcast %cst_320 : f32 to vector<8x32xf32>
    %cst_321 = arith.constant 0.000000e+00 : f32
    %462 = vector.broadcast %cst_321 : f32 to vector<8x32xf32>
    %cst_322 = arith.constant 0.000000e+00 : f32
    %463 = vector.broadcast %cst_322 : f32 to vector<8x128xf32>
    %cst_323 = arith.constant 0.000000e+00 : f32
    %464 = vector.broadcast %cst_323 : f32 to vector<8x128xf32>
    %cst_324 = arith.constant 0.000000e+00 : f32
    %465 = vector.broadcast %cst_324 : f32 to vector<8x128xf32>
    %cst_325 = arith.constant 0.000000e+00 : f32
    %466 = vector.broadcast %cst_325 : f32 to vector<8x128xf32>
    %cst_326 = arith.constant 0.000000e+00 : f32
    %467 = vector.broadcast %cst_326 : f32 to vector<8x128xf32>
    %c0_327 = arith.constant 0 : index
    %c0_328 = arith.constant 0 : index
    %468 = vector.load %arg11[%c0_327, %c0_328] : memref<64x128xf32, #tpu.memory_space<vmem>>, vector<8x128xf32>
    %469 = arith.addf %468, %463 : vector<8x128xf32>
    %c0_329 = arith.constant 0 : index
    %c0_330 = arith.constant 0 : index
    %c0_331 = arith.constant 0 : index
    %470 = vector.load %arg6[%c0_329, %c0_330, %c0_331] : memref<5x1x128xf32, #tpu.memory_space<vmem>>, vector<1x1x128xf32>
    %471 = vector.shape_cast %470 : vector<1x1x128xf32> to vector<1x128xf32>
    %472 = vector.broadcast %471 : vector<1x128xf32> to vector<8x128xf32>
    %473 = arith.addf %469, %472 : vector<8x128xf32>
    %cst_332 = arith.constant 2.000000e+00 : f32
    %474 = vector.broadcast %cst_332 : f32 to vector<8x128xf32>
    %475 = arith.mulf %474, %473 : vector<8x128xf32>
    %476 = arith.select %457, %475, %473 : vector<8x128xi1>, vector<8x128xf32>
    %477 = arith.negf %476 : vector<8x128xf32>
    %478 = math.exp %477 : vector<8x128xf32>
    %cst_333 = arith.constant 1.000000e+00 : f32
    %479 = vector.broadcast %cst_333 : f32 to vector<8x128xf32>
    %480 = arith.addf %479, %478 : vector<8x128xf32>
    %481 = arith.divf %479, %480 : vector<8x128xf32>
    %cst_334 = arith.constant 2.000000e+00 : f32
    %482 = vector.broadcast %cst_334 : f32 to vector<8x128xf32>
    %483 = arith.mulf %482, %481 : vector<8x128xf32>
    %cst_335 = arith.constant 1.000000e+00 : f32
    %484 = vector.broadcast %cst_335 : f32 to vector<8x128xf32>
    %485 = arith.subf %483, %484 : vector<8x128xf32>
    %486 = arith.select %457, %485, %481 : vector<8x128xi1>, vector<8x128xf32>
    %487 = vector.extract_strided_slice %486 {offsets = [0, 0], sizes = [8, 32], strides = [1, 1]} : vector<8x128xf32> to vector<8x32xf32>
    %488 = vector.extract_strided_slice %486 {offsets = [0, 32], sizes = [8, 32], strides = [1, 1]} : vector<8x128xf32> to vector<8x32xf32>
    %489 = vector.extract_strided_slice %486 {offsets = [0, 64], sizes = [8, 32], strides = [1, 1]} : vector<8x128xf32> to vector<8x32xf32>
    %490 = vector.extract_strided_slice %486 {offsets = [0, 96], sizes = [8, 32], strides = [1, 1]} : vector<8x128xf32> to vector<8x32xf32>
    %491 = arith.mulf %488, %458 : vector<8x32xf32>
    %492 = arith.mulf %487, %489 : vector<8x32xf32>
    %493 = arith.addf %491, %492 : vector<8x32xf32>
    %494 = math.tanh %493 : vector<8x32xf32>
    %495 = arith.mulf %490, %494 : vector<8x32xf32>
    %496 = arith.truncf %495 : vector<8x32xf32> to vector<8x32xbf16>
    %c0_336 = arith.constant 0 : index
    %c0_337 = arith.constant 0 : index
    %c0_338 = arith.constant 0 : index
    %497 = vector.load %arg4[%c0_336, %c0_337, %c0_338] : memref<4x32x256xbf16, #tpu.memory_space<vmem>>, vector<1x32x256xbf16>
    %498 = vector.shape_cast %497 : vector<1x32x256xbf16> to vector<32x256xbf16>
    %cst_339 = arith.constant dense<0.000000e+00> : vector<8x256xf32>
    %499 = tpu.matmul %496, %498, %cst_339 {dimension_numbers = #tpu.dot_dimension_numbers<[1], [0], [0], [1], [0, 0, 1, 1], [], []>} : vector<8x32xbf16>, vector<32x256xbf16>, vector<8x256xf32> -> vector<8x256xf32>
    %500 = vector.extract_strided_slice %499 {offsets = [0, 0], sizes = [8, 128], strides = [1, 1]} : vector<8x256xf32> to vector<8x128xf32>
    %501 = vector.extract_strided_slice %499 {offsets = [0, 128], sizes = [8, 128], strides = [1, 1]} : vector<8x256xf32> to vector<8x128xf32>
    %c8_340 = arith.constant 8 : index
    %c0_341 = arith.constant 0 : index
    %502 = vector.load %arg11[%c8_340, %c0_341] : memref<64x128xf32, #tpu.memory_space<vmem>>, vector<8x128xf32>
    %503 = arith.addf %502, %500 : vector<8x128xf32>
    %c0_342 = arith.constant 0 : index
    %c0_343 = arith.constant 0 : index
    %c0_344 = arith.constant 0 : index
    %504 = vector.load %arg6[%c0_342, %c0_343, %c0_344] : memref<5x1x128xf32, #tpu.memory_space<vmem>>, vector<1x1x128xf32>
    %505 = vector.shape_cast %504 : vector<1x1x128xf32> to vector<1x128xf32>
    %506 = vector.broadcast %505 : vector<1x128xf32> to vector<8x128xf32>
    %507 = arith.addf %503, %506 : vector<8x128xf32>
    %cst_345 = arith.constant 2.000000e+00 : f32
    %508 = vector.broadcast %cst_345 : f32 to vector<8x128xf32>
    %509 = arith.mulf %508, %507 : vector<8x128xf32>
    %510 = arith.select %457, %509, %507 : vector<8x128xi1>, vector<8x128xf32>
    %511 = arith.negf %510 : vector<8x128xf32>
    %512 = math.exp %511 : vector<8x128xf32>
    %cst_346 = arith.constant 1.000000e+00 : f32
    %513 = vector.broadcast %cst_346 : f32 to vector<8x128xf32>
    %514 = arith.addf %513, %512 : vector<8x128xf32>
    %515 = arith.divf %513, %514 : vector<8x128xf32>
    %cst_347 = arith.constant 2.000000e+00 : f32
    %516 = vector.broadcast %cst_347 : f32 to vector<8x128xf32>
    %517 = arith.mulf %516, %515 : vector<8x128xf32>
    %cst_348 = arith.constant 1.000000e+00 : f32
    %518 = vector.broadcast %cst_348 : f32 to vector<8x128xf32>
    %519 = arith.subf %517, %518 : vector<8x128xf32>
    %520 = arith.select %457, %519, %515 : vector<8x128xi1>, vector<8x128xf32>
    %521 = vector.extract_strided_slice %520 {offsets = [0, 0], sizes = [8, 32], strides = [1, 1]} : vector<8x128xf32> to vector<8x32xf32>
    %522 = vector.extract_strided_slice %520 {offsets = [0, 32], sizes = [8, 32], strides = [1, 1]} : vector<8x128xf32> to vector<8x32xf32>
    %523 = vector.extract_strided_slice %520 {offsets = [0, 64], sizes = [8, 32], strides = [1, 1]} : vector<8x128xf32> to vector<8x32xf32>
    %524 = vector.extract_strided_slice %520 {offsets = [0, 96], sizes = [8, 32], strides = [1, 1]} : vector<8x128xf32> to vector<8x32xf32>
    %525 = arith.mulf %522, %493 : vector<8x32xf32>
    %526 = arith.mulf %521, %523 : vector<8x32xf32>
    %527 = arith.addf %525, %526 : vector<8x32xf32>
    %528 = math.tanh %527 : vector<8x32xf32>
    %529 = arith.mulf %524, %528 : vector<8x32xf32>
    %530 = arith.truncf %529 : vector<8x32xf32> to vector<8x32xbf16>
    %c0_349 = arith.constant 0 : index
    %c0_350 = arith.constant 0 : index
    %c0_351 = arith.constant 0 : index
    %531 = vector.load %arg4[%c0_349, %c0_350, %c0_351] : memref<4x32x256xbf16, #tpu.memory_space<vmem>>, vector<1x32x256xbf16>
    %532 = vector.shape_cast %531 : vector<1x32x256xbf16> to vector<32x256xbf16>
    %cst_352 = arith.constant dense<0.000000e+00> : vector<8x256xf32>
    %533 = tpu.matmul %530, %532, %cst_352 {dimension_numbers = #tpu.dot_dimension_numbers<[1], [0], [0], [1], [0, 0, 1, 1], [], []>} : vector<8x32xbf16>, vector<32x256xbf16>, vector<8x256xf32> -> vector<8x256xf32>
    %534 = vector.extract_strided_slice %533 {offsets = [0, 0], sizes = [8, 128], strides = [1, 1]} : vector<8x256xf32> to vector<8x128xf32>
    %535 = vector.extract_strided_slice %533 {offsets = [0, 128], sizes = [8, 128], strides = [1, 1]} : vector<8x256xf32> to vector<8x128xf32>
    %536 = arith.addf %501, %464 : vector<8x128xf32>
    %c1_353 = arith.constant 1 : index
    %c0_354 = arith.constant 0 : index
    %c0_355 = arith.constant 0 : index
    %537 = vector.load %arg6[%c1_353, %c0_354, %c0_355] : memref<5x1x128xf32, #tpu.memory_space<vmem>>, vector<1x1x128xf32>
    %538 = vector.shape_cast %537 : vector<1x1x128xf32> to vector<1x128xf32>
    %539 = vector.broadcast %538 : vector<1x128xf32> to vector<8x128xf32>
    %540 = arith.addf %536, %539 : vector<8x128xf32>
    %cst_356 = arith.constant 2.000000e+00 : f32
    %541 = vector.broadcast %cst_356 : f32 to vector<8x128xf32>
    %542 = arith.mulf %541, %540 : vector<8x128xf32>
    %543 = arith.select %457, %542, %540 : vector<8x128xi1>, vector<8x128xf32>
    %544 = arith.negf %543 : vector<8x128xf32>
    %545 = math.exp %544 : vector<8x128xf32>
    %cst_357 = arith.constant 1.000000e+00 : f32
    %546 = vector.broadcast %cst_357 : f32 to vector<8x128xf32>
    %547 = arith.addf %546, %545 : vector<8x128xf32>
    %548 = arith.divf %546, %547 : vector<8x128xf32>
    %cst_358 = arith.constant 2.000000e+00 : f32
    %549 = vector.broadcast %cst_358 : f32 to vector<8x128xf32>
    %550 = arith.mulf %549, %548 : vector<8x128xf32>
    %cst_359 = arith.constant 1.000000e+00 : f32
    %551 = vector.broadcast %cst_359 : f32 to vector<8x128xf32>
    %552 = arith.subf %550, %551 : vector<8x128xf32>
    %553 = arith.select %457, %552, %548 : vector<8x128xi1>, vector<8x128xf32>
    %554 = vector.extract_strided_slice %553 {offsets = [0, 0], sizes = [8, 32], strides = [1, 1]} : vector<8x128xf32> to vector<8x32xf32>
    %555 = vector.extract_strided_slice %553 {offsets = [0, 32], sizes = [8, 32], strides = [1, 1]} : vector<8x128xf32> to vector<8x32xf32>
    %556 = vector.extract_strided_slice %553 {offsets = [0, 64], sizes = [8, 32], strides = [1, 1]} : vector<8x128xf32> to vector<8x32xf32>
    %557 = vector.extract_strided_slice %553 {offsets = [0, 96], sizes = [8, 32], strides = [1, 1]} : vector<8x128xf32> to vector<8x32xf32>
    %558 = arith.mulf %555, %459 : vector<8x32xf32>
    %559 = arith.mulf %554, %556 : vector<8x32xf32>
    %560 = arith.addf %558, %559 : vector<8x32xf32>
    %561 = math.tanh %560 : vector<8x32xf32>
    %562 = arith.mulf %557, %561 : vector<8x32xf32>
    %563 = arith.truncf %562 : vector<8x32xf32> to vector<8x32xbf16>
    %c1_360 = arith.constant 1 : index
    %c0_361 = arith.constant 0 : index
    %c0_362 = arith.constant 0 : index
    %564 = vector.load %arg4[%c1_360, %c0_361, %c0_362] : memref<4x32x256xbf16, #tpu.memory_space<vmem>>, vector<1x32x256xbf16>
    %565 = vector.shape_cast %564 : vector<1x32x256xbf16> to vector<32x256xbf16>
    %cst_363 = arith.constant dense<0.000000e+00> : vector<8x256xf32>
    %566 = tpu.matmul %563, %565, %cst_363 {dimension_numbers = #tpu.dot_dimension_numbers<[1], [0], [0], [1], [0, 0, 1, 1], [], []>} : vector<8x32xbf16>, vector<32x256xbf16>, vector<8x256xf32> -> vector<8x256xf32>
    %567 = vector.extract_strided_slice %566 {offsets = [0, 0], sizes = [8, 128], strides = [1, 1]} : vector<8x256xf32> to vector<8x128xf32>
    %568 = vector.extract_strided_slice %566 {offsets = [0, 128], sizes = [8, 128], strides = [1, 1]} : vector<8x256xf32> to vector<8x128xf32>
    %c16_364 = arith.constant 16 : index
    %c0_365 = arith.constant 0 : index
    %569 = vector.load %arg11[%c16_364, %c0_365] : memref<64x128xf32, #tpu.memory_space<vmem>>, vector<8x128xf32>
    %570 = arith.addf %569, %534 : vector<8x128xf32>
    %c0_366 = arith.constant 0 : index
    %c0_367 = arith.constant 0 : index
    %c0_368 = arith.constant 0 : index
    %571 = vector.load %arg6[%c0_366, %c0_367, %c0_368] : memref<5x1x128xf32, #tpu.memory_space<vmem>>, vector<1x1x128xf32>
    %572 = vector.shape_cast %571 : vector<1x1x128xf32> to vector<1x128xf32>
    %573 = vector.broadcast %572 : vector<1x128xf32> to vector<8x128xf32>
    %574 = arith.addf %570, %573 : vector<8x128xf32>
    %cst_369 = arith.constant 2.000000e+00 : f32
    %575 = vector.broadcast %cst_369 : f32 to vector<8x128xf32>
    %576 = arith.mulf %575, %574 : vector<8x128xf32>
    %577 = arith.select %457, %576, %574 : vector<8x128xi1>, vector<8x128xf32>
    %578 = arith.negf %577 : vector<8x128xf32>
    %579 = math.exp %578 : vector<8x128xf32>
    %cst_370 = arith.constant 1.000000e+00 : f32
    %580 = vector.broadcast %cst_370 : f32 to vector<8x128xf32>
    %581 = arith.addf %580, %579 : vector<8x128xf32>
    %582 = arith.divf %580, %581 : vector<8x128xf32>
    %cst_371 = arith.constant 2.000000e+00 : f32
    %583 = vector.broadcast %cst_371 : f32 to vector<8x128xf32>
    %584 = arith.mulf %583, %582 : vector<8x128xf32>
    %cst_372 = arith.constant 1.000000e+00 : f32
    %585 = vector.broadcast %cst_372 : f32 to vector<8x128xf32>
    %586 = arith.subf %584, %585 : vector<8x128xf32>
    %587 = arith.select %457, %586, %582 : vector<8x128xi1>, vector<8x128xf32>
    %588 = vector.extract_strided_slice %587 {offsets = [0, 0], sizes = [8, 32], strides = [1, 1]} : vector<8x128xf32> to vector<8x32xf32>
    %589 = vector.extract_strided_slice %587 {offsets = [0, 32], sizes = [8, 32], strides = [1, 1]} : vector<8x128xf32> to vector<8x32xf32>
    %590 = vector.extract_strided_slice %587 {offsets = [0, 64], sizes = [8, 32], strides = [1, 1]} : vector<8x128xf32> to vector<8x32xf32>
    %591 = vector.extract_strided_slice %587 {offsets = [0, 96], sizes = [8, 32], strides = [1, 1]} : vector<8x128xf32> to vector<8x32xf32>
    %592 = arith.mulf %589, %527 : vector<8x32xf32>
    %593 = arith.mulf %588, %590 : vector<8x32xf32>
    %594 = arith.addf %592, %593 : vector<8x32xf32>
    %595 = math.tanh %594 : vector<8x32xf32>
    %596 = arith.mulf %591, %595 : vector<8x32xf32>
    %597 = arith.truncf %596 : vector<8x32xf32> to vector<8x32xbf16>
    %c0_373 = arith.constant 0 : index
    %c0_374 = arith.constant 0 : index
    %c0_375 = arith.constant 0 : index
    %598 = vector.load %arg4[%c0_373, %c0_374, %c0_375] : memref<4x32x256xbf16, #tpu.memory_space<vmem>>, vector<1x32x256xbf16>
    %599 = vector.shape_cast %598 : vector<1x32x256xbf16> to vector<32x256xbf16>
    %cst_376 = arith.constant dense<0.000000e+00> : vector<8x256xf32>
    %600 = tpu.matmul %597, %599, %cst_376 {dimension_numbers = #tpu.dot_dimension_numbers<[1], [0], [0], [1], [0, 0, 1, 1], [], []>} : vector<8x32xbf16>, vector<32x256xbf16>, vector<8x256xf32> -> vector<8x256xf32>
    %601 = vector.extract_strided_slice %600 {offsets = [0, 0], sizes = [8, 128], strides = [1, 1]} : vector<8x256xf32> to vector<8x128xf32>
    %602 = vector.extract_strided_slice %600 {offsets = [0, 128], sizes = [8, 128], strides = [1, 1]} : vector<8x256xf32> to vector<8x128xf32>
    %603 = arith.addf %535, %567 : vector<8x128xf32>
    %c1_377 = arith.constant 1 : index
    %c0_378 = arith.constant 0 : index
    %c0_379 = arith.constant 0 : index
    %604 = vector.load %arg6[%c1_377, %c0_378, %c0_379] : memref<5x1x128xf32, #tpu.memory_space<vmem>>, vector<1x1x128xf32>
    %605 = vector.shape_cast %604 : vector<1x1x128xf32> to vector<1x128xf32>
    %606 = vector.broadcast %605 : vector<1x128xf32> to vector<8x128xf32>
    %607 = arith.addf %603, %606 : vector<8x128xf32>
    %cst_380 = arith.constant 2.000000e+00 : f32
    %608 = vector.broadcast %cst_380 : f32 to vector<8x128xf32>
    %609 = arith.mulf %608, %607 : vector<8x128xf32>
    %610 = arith.select %457, %609, %607 : vector<8x128xi1>, vector<8x128xf32>
    %611 = arith.negf %610 : vector<8x128xf32>
    %612 = math.exp %611 : vector<8x128xf32>
    %cst_381 = arith.constant 1.000000e+00 : f32
    %613 = vector.broadcast %cst_381 : f32 to vector<8x128xf32>
    %614 = arith.addf %613, %612 : vector<8x128xf32>
    %615 = arith.divf %613, %614 : vector<8x128xf32>
    %cst_382 = arith.constant 2.000000e+00 : f32
    %616 = vector.broadcast %cst_382 : f32 to vector<8x128xf32>
    %617 = arith.mulf %616, %615 : vector<8x128xf32>
    %cst_383 = arith.constant 1.000000e+00 : f32
    %618 = vector.broadcast %cst_383 : f32 to vector<8x128xf32>
    %619 = arith.subf %617, %618 : vector<8x128xf32>
    %620 = arith.select %457, %619, %615 : vector<8x128xi1>, vector<8x128xf32>
    %621 = vector.extract_strided_slice %620 {offsets = [0, 0], sizes = [8, 32], strides = [1, 1]} : vector<8x128xf32> to vector<8x32xf32>
    %622 = vector.extract_strided_slice %620 {offsets = [0, 32], sizes = [8, 32], strides = [1, 1]} : vector<8x128xf32> to vector<8x32xf32>
    %623 = vector.extract_strided_slice %620 {offsets = [0, 64], sizes = [8, 32], strides = [1, 1]} : vector<8x128xf32> to vector<8x32xf32>
    %624 = vector.extract_strided_slice %620 {offsets = [0, 96], sizes = [8, 32], strides = [1, 1]} : vector<8x128xf32> to vector<8x32xf32>
    %625 = arith.mulf %622, %560 : vector<8x32xf32>
    %626 = arith.mulf %621, %623 : vector<8x32xf32>
    %627 = arith.addf %625, %626 : vector<8x32xf32>
    %628 = math.tanh %627 : vector<8x32xf32>
    %629 = arith.mulf %624, %628 : vector<8x32xf32>
    %630 = arith.truncf %629 : vector<8x32xf32> to vector<8x32xbf16>
    %c1_384 = arith.constant 1 : index
    %c0_385 = arith.constant 0 : index
    %c0_386 = arith.constant 0 : index
    %631 = vector.load %arg4[%c1_384, %c0_385, %c0_386] : memref<4x32x256xbf16, #tpu.memory_space<vmem>>, vector<1x32x256xbf16>
    %632 = vector.shape_cast %631 : vector<1x32x256xbf16> to vector<32x256xbf16>
    %cst_387 = arith.constant dense<0.000000e+00> : vector<8x256xf32>
    %633 = tpu.matmul %630, %632, %cst_387 {dimension_numbers = #tpu.dot_dimension_numbers<[1], [0], [0], [1], [0, 0, 1, 1], [], []>} : vector<8x32xbf16>, vector<32x256xbf16>, vector<8x256xf32> -> vector<8x256xf32>
    %634 = vector.extract_strided_slice %633 {offsets = [0, 0], sizes = [8, 128], strides = [1, 1]} : vector<8x256xf32> to vector<8x128xf32>
    %635 = vector.extract_strided_slice %633 {offsets = [0, 128], sizes = [8, 128], strides = [1, 1]} : vector<8x256xf32> to vector<8x128xf32>
    %636 = arith.addf %568, %465 : vector<8x128xf32>
    %c2_388 = arith.constant 2 : index
    %c0_389 = arith.constant 0 : index
    %c0_390 = arith.constant 0 : index
    %637 = vector.load %arg6[%c2_388, %c0_389, %c0_390] : memref<5x1x128xf32, #tpu.memory_space<vmem>>, vector<1x1x128xf32>
    %638 = vector.shape_cast %637 : vector<1x1x128xf32> to vector<1x128xf32>
    %639 = vector.broadcast %638 : vector<1x128xf32> to vector<8x128xf32>
    %640 = arith.addf %636, %639 : vector<8x128xf32>
    %cst_391 = arith.constant 2.000000e+00 : f32
    %641 = vector.broadcast %cst_391 : f32 to vector<8x128xf32>
    %642 = arith.mulf %641, %640 : vector<8x128xf32>
    %643 = arith.select %457, %642, %640 : vector<8x128xi1>, vector<8x128xf32>
    %644 = arith.negf %643 : vector<8x128xf32>
    %645 = math.exp %644 : vector<8x128xf32>
    %cst_392 = arith.constant 1.000000e+00 : f32
    %646 = vector.broadcast %cst_392 : f32 to vector<8x128xf32>
    %647 = arith.addf %646, %645 : vector<8x128xf32>
    %648 = arith.divf %646, %647 : vector<8x128xf32>
    %cst_393 = arith.constant 2.000000e+00 : f32
    %649 = vector.broadcast %cst_393 : f32 to vector<8x128xf32>
    %650 = arith.mulf %649, %648 : vector<8x128xf32>
    %cst_394 = arith.constant 1.000000e+00 : f32
    %651 = vector.broadcast %cst_394 : f32 to vector<8x128xf32>
    %652 = arith.subf %650, %651 : vector<8x128xf32>
    %653 = arith.select %457, %652, %648 : vector<8x128xi1>, vector<8x128xf32>
    %654 = vector.extract_strided_slice %653 {offsets = [0, 0], sizes = [8, 32], strides = [1, 1]} : vector<8x128xf32> to vector<8x32xf32>
    %655 = vector.extract_strided_slice %653 {offsets = [0, 32], sizes = [8, 32], strides = [1, 1]} : vector<8x128xf32> to vector<8x32xf32>
    %656 = vector.extract_strided_slice %653 {offsets = [0, 64], sizes = [8, 32], strides = [1, 1]} : vector<8x128xf32> to vector<8x32xf32>
    %657 = vector.extract_strided_slice %653 {offsets = [0, 96], sizes = [8, 32], strides = [1, 1]} : vector<8x128xf32> to vector<8x32xf32>
    %658 = arith.mulf %655, %460 : vector<8x32xf32>
    %659 = arith.mulf %654, %656 : vector<8x32xf32>
    %660 = arith.addf %658, %659 : vector<8x32xf32>
    %661 = math.tanh %660 : vector<8x32xf32>
    %662 = arith.mulf %657, %661 : vector<8x32xf32>
    %663 = arith.truncf %662 : vector<8x32xf32> to vector<8x32xbf16>
    %c2_395 = arith.constant 2 : index
    %c0_396 = arith.constant 0 : index
    %c0_397 = arith.constant 0 : index
    %664 = vector.load %arg4[%c2_395, %c0_396, %c0_397] : memref<4x32x256xbf16, #tpu.memory_space<vmem>>, vector<1x32x256xbf16>
    %665 = vector.shape_cast %664 : vector<1x32x256xbf16> to vector<32x256xbf16>
    %cst_398 = arith.constant dense<0.000000e+00> : vector<8x256xf32>
    %666 = tpu.matmul %663, %665, %cst_398 {dimension_numbers = #tpu.dot_dimension_numbers<[1], [0], [0], [1], [0, 0, 1, 1], [], []>} : vector<8x32xbf16>, vector<32x256xbf16>, vector<8x256xf32> -> vector<8x256xf32>
    %667 = vector.extract_strided_slice %666 {offsets = [0, 0], sizes = [8, 128], strides = [1, 1]} : vector<8x256xf32> to vector<8x128xf32>
    %668 = vector.extract_strided_slice %666 {offsets = [0, 128], sizes = [8, 128], strides = [1, 1]} : vector<8x256xf32> to vector<8x128xf32>
    %c24_399 = arith.constant 24 : index
    %c0_400 = arith.constant 0 : index
    %669 = vector.load %arg11[%c24_399, %c0_400] : memref<64x128xf32, #tpu.memory_space<vmem>>, vector<8x128xf32>
    %670 = arith.addf %669, %601 : vector<8x128xf32>
    %c0_401 = arith.constant 0 : index
    %c0_402 = arith.constant 0 : index
    %c0_403 = arith.constant 0 : index
    %671 = vector.load %arg6[%c0_401, %c0_402, %c0_403] : memref<5x1x128xf32, #tpu.memory_space<vmem>>, vector<1x1x128xf32>
    %672 = vector.shape_cast %671 : vector<1x1x128xf32> to vector<1x128xf32>
    %673 = vector.broadcast %672 : vector<1x128xf32> to vector<8x128xf32>
    %674 = arith.addf %670, %673 : vector<8x128xf32>
    %cst_404 = arith.constant 2.000000e+00 : f32
    %675 = vector.broadcast %cst_404 : f32 to vector<8x128xf32>
    %676 = arith.mulf %675, %674 : vector<8x128xf32>
    %677 = arith.select %457, %676, %674 : vector<8x128xi1>, vector<8x128xf32>
    %678 = arith.negf %677 : vector<8x128xf32>
    %679 = math.exp %678 : vector<8x128xf32>
    %cst_405 = arith.constant 1.000000e+00 : f32
    %680 = vector.broadcast %cst_405 : f32 to vector<8x128xf32>
    %681 = arith.addf %680, %679 : vector<8x128xf32>
    %682 = arith.divf %680, %681 : vector<8x128xf32>
    %cst_406 = arith.constant 2.000000e+00 : f32
    %683 = vector.broadcast %cst_406 : f32 to vector<8x128xf32>
    %684 = arith.mulf %683, %682 : vector<8x128xf32>
    %cst_407 = arith.constant 1.000000e+00 : f32
    %685 = vector.broadcast %cst_407 : f32 to vector<8x128xf32>
    %686 = arith.subf %684, %685 : vector<8x128xf32>
    %687 = arith.select %457, %686, %682 : vector<8x128xi1>, vector<8x128xf32>
    %688 = vector.extract_strided_slice %687 {offsets = [0, 0], sizes = [8, 32], strides = [1, 1]} : vector<8x128xf32> to vector<8x32xf32>
    %689 = vector.extract_strided_slice %687 {offsets = [0, 32], sizes = [8, 32], strides = [1, 1]} : vector<8x128xf32> to vector<8x32xf32>
    %690 = vector.extract_strided_slice %687 {offsets = [0, 64], sizes = [8, 32], strides = [1, 1]} : vector<8x128xf32> to vector<8x32xf32>
    %691 = vector.extract_strided_slice %687 {offsets = [0, 96], sizes = [8, 32], strides = [1, 1]} : vector<8x128xf32> to vector<8x32xf32>
    %692 = arith.mulf %689, %594 : vector<8x32xf32>
    %693 = arith.mulf %688, %690 : vector<8x32xf32>
    %694 = arith.addf %692, %693 : vector<8x32xf32>
    %695 = math.tanh %694 : vector<8x32xf32>
    %696 = arith.mulf %691, %695 : vector<8x32xf32>
    %697 = arith.truncf %696 : vector<8x32xf32> to vector<8x32xbf16>
    %c0_408 = arith.constant 0 : index
    %c0_409 = arith.constant 0 : index
    %c0_410 = arith.constant 0 : index
    %698 = vector.load %arg4[%c0_408, %c0_409, %c0_410] : memref<4x32x256xbf16, #tpu.memory_space<vmem>>, vector<1x32x256xbf16>
    %699 = vector.shape_cast %698 : vector<1x32x256xbf16> to vector<32x256xbf16>
    %cst_411 = arith.constant dense<0.000000e+00> : vector<8x256xf32>
    %700 = tpu.matmul %697, %699, %cst_411 {dimension_numbers = #tpu.dot_dimension_numbers<[1], [0], [0], [1], [0, 0, 1, 1], [], []>} : vector<8x32xbf16>, vector<32x256xbf16>, vector<8x256xf32> -> vector<8x256xf32>
    %701 = vector.extract_strided_slice %700 {offsets = [0, 0], sizes = [8, 128], strides = [1, 1]} : vector<8x256xf32> to vector<8x128xf32>
    %702 = vector.extract_strided_slice %700 {offsets = [0, 128], sizes = [8, 128], strides = [1, 1]} : vector<8x256xf32> to vector<8x128xf32>
    %703 = arith.addf %602, %634 : vector<8x128xf32>
    %c1_412 = arith.constant 1 : index
    %c0_413 = arith.constant 0 : index
    %c0_414 = arith.constant 0 : index
    %704 = vector.load %arg6[%c1_412, %c0_413, %c0_414] : memref<5x1x128xf32, #tpu.memory_space<vmem>>, vector<1x1x128xf32>
    %705 = vector.shape_cast %704 : vector<1x1x128xf32> to vector<1x128xf32>
    %706 = vector.broadcast %705 : vector<1x128xf32> to vector<8x128xf32>
    %707 = arith.addf %703, %706 : vector<8x128xf32>
    %cst_415 = arith.constant 2.000000e+00 : f32
    %708 = vector.broadcast %cst_415 : f32 to vector<8x128xf32>
    %709 = arith.mulf %708, %707 : vector<8x128xf32>
    %710 = arith.select %457, %709, %707 : vector<8x128xi1>, vector<8x128xf32>
    %711 = arith.negf %710 : vector<8x128xf32>
    %712 = math.exp %711 : vector<8x128xf32>
    %cst_416 = arith.constant 1.000000e+00 : f32
    %713 = vector.broadcast %cst_416 : f32 to vector<8x128xf32>
    %714 = arith.addf %713, %712 : vector<8x128xf32>
    %715 = arith.divf %713, %714 : vector<8x128xf32>
    %cst_417 = arith.constant 2.000000e+00 : f32
    %716 = vector.broadcast %cst_417 : f32 to vector<8x128xf32>
    %717 = arith.mulf %716, %715 : vector<8x128xf32>
    %cst_418 = arith.constant 1.000000e+00 : f32
    %718 = vector.broadcast %cst_418 : f32 to vector<8x128xf32>
    %719 = arith.subf %717, %718 : vector<8x128xf32>
    %720 = arith.select %457, %719, %715 : vector<8x128xi1>, vector<8x128xf32>
    %721 = vector.extract_strided_slice %720 {offsets = [0, 0], sizes = [8, 32], strides = [1, 1]} : vector<8x128xf32> to vector<8x32xf32>
    %722 = vector.extract_strided_slice %720 {offsets = [0, 32], sizes = [8, 32], strides = [1, 1]} : vector<8x128xf32> to vector<8x32xf32>
    %723 = vector.extract_strided_slice %720 {offsets = [0, 64], sizes = [8, 32], strides = [1, 1]} : vector<8x128xf32> to vector<8x32xf32>
    %724 = vector.extract_strided_slice %720 {offsets = [0, 96], sizes = [8, 32], strides = [1, 1]} : vector<8x128xf32> to vector<8x32xf32>
    %725 = arith.mulf %722, %627 : vector<8x32xf32>
    %726 = arith.mulf %721, %723 : vector<8x32xf32>
    %727 = arith.addf %725, %726 : vector<8x32xf32>
    %728 = math.tanh %727 : vector<8x32xf32>
    %729 = arith.mulf %724, %728 : vector<8x32xf32>
    %730 = arith.truncf %729 : vector<8x32xf32> to vector<8x32xbf16>
    %c1_419 = arith.constant 1 : index
    %c0_420 = arith.constant 0 : index
    %c0_421 = arith.constant 0 : index
    %731 = vector.load %arg4[%c1_419, %c0_420, %c0_421] : memref<4x32x256xbf16, #tpu.memory_space<vmem>>, vector<1x32x256xbf16>
    %732 = vector.shape_cast %731 : vector<1x32x256xbf16> to vector<32x256xbf16>
    %cst_422 = arith.constant dense<0.000000e+00> : vector<8x256xf32>
    %733 = tpu.matmul %730, %732, %cst_422 {dimension_numbers = #tpu.dot_dimension_numbers<[1], [0], [0], [1], [0, 0, 1, 1], [], []>} : vector<8x32xbf16>, vector<32x256xbf16>, vector<8x256xf32> -> vector<8x256xf32>
    %734 = vector.extract_strided_slice %733 {offsets = [0, 0], sizes = [8, 128], strides = [1, 1]} : vector<8x256xf32> to vector<8x128xf32>
    %735 = vector.extract_strided_slice %733 {offsets = [0, 128], sizes = [8, 128], strides = [1, 1]} : vector<8x256xf32> to vector<8x128xf32>
    %736 = arith.addf %635, %667 : vector<8x128xf32>
    %c2_423 = arith.constant 2 : index
    %c0_424 = arith.constant 0 : index
    %c0_425 = arith.constant 0 : index
    %737 = vector.load %arg6[%c2_423, %c0_424, %c0_425] : memref<5x1x128xf32, #tpu.memory_space<vmem>>, vector<1x1x128xf32>
    %738 = vector.shape_cast %737 : vector<1x1x128xf32> to vector<1x128xf32>
    %739 = vector.broadcast %738 : vector<1x128xf32> to vector<8x128xf32>
    %740 = arith.addf %736, %739 : vector<8x128xf32>
    %cst_426 = arith.constant 2.000000e+00 : f32
    %741 = vector.broadcast %cst_426 : f32 to vector<8x128xf32>
    %742 = arith.mulf %741, %740 : vector<8x128xf32>
    %743 = arith.select %457, %742, %740 : vector<8x128xi1>, vector<8x128xf32>
    %744 = arith.negf %743 : vector<8x128xf32>
    %745 = math.exp %744 : vector<8x128xf32>
    %cst_427 = arith.constant 1.000000e+00 : f32
    %746 = vector.broadcast %cst_427 : f32 to vector<8x128xf32>
    %747 = arith.addf %746, %745 : vector<8x128xf32>
    %748 = arith.divf %746, %747 : vector<8x128xf32>
    %cst_428 = arith.constant 2.000000e+00 : f32
    %749 = vector.broadcast %cst_428 : f32 to vector<8x128xf32>
    %750 = arith.mulf %749, %748 : vector<8x128xf32>
    %cst_429 = arith.constant 1.000000e+00 : f32
    %751 = vector.broadcast %cst_429 : f32 to vector<8x128xf32>
    %752 = arith.subf %750, %751 : vector<8x128xf32>
    %753 = arith.select %457, %752, %748 : vector<8x128xi1>, vector<8x128xf32>
    %754 = vector.extract_strided_slice %753 {offsets = [0, 0], sizes = [8, 32], strides = [1, 1]} : vector<8x128xf32> to vector<8x32xf32>
    %755 = vector.extract_strided_slice %753 {offsets = [0, 32], sizes = [8, 32], strides = [1, 1]} : vector<8x128xf32> to vector<8x32xf32>
    %756 = vector.extract_strided_slice %753 {offsets = [0, 64], sizes = [8, 32], strides = [1, 1]} : vector<8x128xf32> to vector<8x32xf32>
    %757 = vector.extract_strided_slice %753 {offsets = [0, 96], sizes = [8, 32], strides = [1, 1]} : vector<8x128xf32> to vector<8x32xf32>
    %758 = arith.mulf %755, %660 : vector<8x32xf32>
    %759 = arith.mulf %754, %756 : vector<8x32xf32>
    %760 = arith.addf %758, %759 : vector<8x32xf32>
    %761 = math.tanh %760 : vector<8x32xf32>
    %762 = arith.mulf %757, %761 : vector<8x32xf32>
    %763 = arith.truncf %762 : vector<8x32xf32> to vector<8x32xbf16>
    %c2_430 = arith.constant 2 : index
    %c0_431 = arith.constant 0 : index
    %c0_432 = arith.constant 0 : index
    %764 = vector.load %arg4[%c2_430, %c0_431, %c0_432] : memref<4x32x256xbf16, #tpu.memory_space<vmem>>, vector<1x32x256xbf16>
    %765 = vector.shape_cast %764 : vector<1x32x256xbf16> to vector<32x256xbf16>
    %cst_433 = arith.constant dense<0.000000e+00> : vector<8x256xf32>
    %766 = tpu.matmul %763, %765, %cst_433 {dimension_numbers = #tpu.dot_dimension_numbers<[1], [0], [0], [1], [0, 0, 1, 1], [], []>} : vector<8x32xbf16>, vector<32x256xbf16>, vector<8x256xf32> -> vector<8x256xf32>
    %767 = vector.extract_strided_slice %766 {offsets = [0, 0], sizes = [8, 128], strides = [1, 1]} : vector<8x256xf32> to vector<8x128xf32>
    %768 = vector.extract_strided_slice %766 {offsets = [0, 128], sizes = [8, 128], strides = [1, 1]} : vector<8x256xf32> to vector<8x128xf32>
    %769 = arith.addf %668, %466 : vector<8x128xf32>
    %c3_434 = arith.constant 3 : index
    %c0_435 = arith.constant 0 : index
    %c0_436 = arith.constant 0 : index
    %770 = vector.load %arg6[%c3_434, %c0_435, %c0_436] : memref<5x1x128xf32, #tpu.memory_space<vmem>>, vector<1x1x128xf32>
    %771 = vector.shape_cast %770 : vector<1x1x128xf32> to vector<1x128xf32>
    %772 = vector.broadcast %771 : vector<1x128xf32> to vector<8x128xf32>
    %773 = arith.addf %769, %772 : vector<8x128xf32>
    %cst_437 = arith.constant 2.000000e+00 : f32
    %774 = vector.broadcast %cst_437 : f32 to vector<8x128xf32>
    %775 = arith.mulf %774, %773 : vector<8x128xf32>
    %776 = arith.select %457, %775, %773 : vector<8x128xi1>, vector<8x128xf32>
    %777 = arith.negf %776 : vector<8x128xf32>
    %778 = math.exp %777 : vector<8x128xf32>
    %cst_438 = arith.constant 1.000000e+00 : f32
    %779 = vector.broadcast %cst_438 : f32 to vector<8x128xf32>
    %780 = arith.addf %779, %778 : vector<8x128xf32>
    %781 = arith.divf %779, %780 : vector<8x128xf32>
    %cst_439 = arith.constant 2.000000e+00 : f32
    %782 = vector.broadcast %cst_439 : f32 to vector<8x128xf32>
    %783 = arith.mulf %782, %781 : vector<8x128xf32>
    %cst_440 = arith.constant 1.000000e+00 : f32
    %784 = vector.broadcast %cst_440 : f32 to vector<8x128xf32>
    %785 = arith.subf %783, %784 : vector<8x128xf32>
    %786 = arith.select %457, %785, %781 : vector<8x128xi1>, vector<8x128xf32>
    %787 = vector.extract_strided_slice %786 {offsets = [0, 0], sizes = [8, 32], strides = [1, 1]} : vector<8x128xf32> to vector<8x32xf32>
    %788 = vector.extract_strided_slice %786 {offsets = [0, 32], sizes = [8, 32], strides = [1, 1]} : vector<8x128xf32> to vector<8x32xf32>
    %789 = vector.extract_strided_slice %786 {offsets = [0, 64], sizes = [8, 32], strides = [1, 1]} : vector<8x128xf32> to vector<8x32xf32>
    %790 = vector.extract_strided_slice %786 {offsets = [0, 96], sizes = [8, 32], strides = [1, 1]} : vector<8x128xf32> to vector<8x32xf32>
    %791 = arith.mulf %788, %461 : vector<8x32xf32>
    %792 = arith.mulf %787, %789 : vector<8x32xf32>
    %793 = arith.addf %791, %792 : vector<8x32xf32>
    %794 = math.tanh %793 : vector<8x32xf32>
    %795 = arith.mulf %790, %794 : vector<8x32xf32>
    %796 = arith.truncf %795 : vector<8x32xf32> to vector<8x32xbf16>
    %c3_441 = arith.constant 3 : index
    %c0_442 = arith.constant 0 : index
    %c0_443 = arith.constant 0 : index
    %797 = vector.load %arg4[%c3_441, %c0_442, %c0_443] : memref<4x32x256xbf16, #tpu.memory_space<vmem>>, vector<1x32x256xbf16>
    %798 = vector.shape_cast %797 : vector<1x32x256xbf16> to vector<32x256xbf16>
    %cst_444 = arith.constant dense<0.000000e+00> : vector<8x256xf32>
    %799 = tpu.matmul %796, %798, %cst_444 {dimension_numbers = #tpu.dot_dimension_numbers<[1], [0], [0], [1], [0, 0, 1, 1], [], []>} : vector<8x32xbf16>, vector<32x256xbf16>, vector<8x256xf32> -> vector<8x256xf32>
    %800 = vector.extract_strided_slice %799 {offsets = [0, 0], sizes = [8, 128], strides = [1, 1]} : vector<8x256xf32> to vector<8x128xf32>
    %801 = vector.extract_strided_slice %799 {offsets = [0, 128], sizes = [8, 128], strides = [1, 1]} : vector<8x256xf32> to vector<8x128xf32>
    %c32_445 = arith.constant 32 : index
    %c0_446 = arith.constant 0 : index
    %802 = vector.load %arg11[%c32_445, %c0_446] : memref<64x128xf32, #tpu.memory_space<vmem>>, vector<8x128xf32>
    %803 = arith.addf %802, %701 : vector<8x128xf32>
    %c0_447 = arith.constant 0 : index
    %c0_448 = arith.constant 0 : index
    %c0_449 = arith.constant 0 : index
    %804 = vector.load %arg6[%c0_447, %c0_448, %c0_449] : memref<5x1x128xf32, #tpu.memory_space<vmem>>, vector<1x1x128xf32>
    %805 = vector.shape_cast %804 : vector<1x1x128xf32> to vector<1x128xf32>
    %806 = vector.broadcast %805 : vector<1x128xf32> to vector<8x128xf32>
    %807 = arith.addf %803, %806 : vector<8x128xf32>
    %cst_450 = arith.constant 2.000000e+00 : f32
    %808 = vector.broadcast %cst_450 : f32 to vector<8x128xf32>
    %809 = arith.mulf %808, %807 : vector<8x128xf32>
    %810 = arith.select %457, %809, %807 : vector<8x128xi1>, vector<8x128xf32>
    %811 = arith.negf %810 : vector<8x128xf32>
    %812 = math.exp %811 : vector<8x128xf32>
    %cst_451 = arith.constant 1.000000e+00 : f32
    %813 = vector.broadcast %cst_451 : f32 to vector<8x128xf32>
    %814 = arith.addf %813, %812 : vector<8x128xf32>
    %815 = arith.divf %813, %814 : vector<8x128xf32>
    %cst_452 = arith.constant 2.000000e+00 : f32
    %816 = vector.broadcast %cst_452 : f32 to vector<8x128xf32>
    %817 = arith.mulf %816, %815 : vector<8x128xf32>
    %cst_453 = arith.constant 1.000000e+00 : f32
    %818 = vector.broadcast %cst_453 : f32 to vector<8x128xf32>
    %819 = arith.subf %817, %818 : vector<8x128xf32>
    %820 = arith.select %457, %819, %815 : vector<8x128xi1>, vector<8x128xf32>
    %821 = vector.extract_strided_slice %820 {offsets = [0, 0], sizes = [8, 32], strides = [1, 1]} : vector<8x128xf32> to vector<8x32xf32>
    %822 = vector.extract_strided_slice %820 {offsets = [0, 32], sizes = [8, 32], strides = [1, 1]} : vector<8x128xf32> to vector<8x32xf32>
    %823 = vector.extract_strided_slice %820 {offsets = [0, 64], sizes = [8, 32], strides = [1, 1]} : vector<8x128xf32> to vector<8x32xf32>
    %824 = vector.extract_strided_slice %820 {offsets = [0, 96], sizes = [8, 32], strides = [1, 1]} : vector<8x128xf32> to vector<8x32xf32>
    %825 = arith.mulf %822, %694 : vector<8x32xf32>
    %826 = arith.mulf %821, %823 : vector<8x32xf32>
    %827 = arith.addf %825, %826 : vector<8x32xf32>
    %828 = math.tanh %827 : vector<8x32xf32>
    %829 = arith.mulf %824, %828 : vector<8x32xf32>
    %830 = arith.truncf %829 : vector<8x32xf32> to vector<8x32xbf16>
    %c0_454 = arith.constant 0 : index
    %c0_455 = arith.constant 0 : index
    %c0_456 = arith.constant 0 : index
    %831 = vector.load %arg4[%c0_454, %c0_455, %c0_456] : memref<4x32x256xbf16, #tpu.memory_space<vmem>>, vector<1x32x256xbf16>
    %832 = vector.shape_cast %831 : vector<1x32x256xbf16> to vector<32x256xbf16>
    %cst_457 = arith.constant dense<0.000000e+00> : vector<8x256xf32>
    %833 = tpu.matmul %830, %832, %cst_457 {dimension_numbers = #tpu.dot_dimension_numbers<[1], [0], [0], [1], [0, 0, 1, 1], [], []>} : vector<8x32xbf16>, vector<32x256xbf16>, vector<8x256xf32> -> vector<8x256xf32>
    %834 = vector.extract_strided_slice %833 {offsets = [0, 0], sizes = [8, 128], strides = [1, 1]} : vector<8x256xf32> to vector<8x128xf32>
    %835 = vector.extract_strided_slice %833 {offsets = [0, 128], sizes = [8, 128], strides = [1, 1]} : vector<8x256xf32> to vector<8x128xf32>
    %836 = arith.addf %702, %734 : vector<8x128xf32>
    %c1_458 = arith.constant 1 : index
    %c0_459 = arith.constant 0 : index
    %c0_460 = arith.constant 0 : index
    %837 = vector.load %arg6[%c1_458, %c0_459, %c0_460] : memref<5x1x128xf32, #tpu.memory_space<vmem>>, vector<1x1x128xf32>
    %838 = vector.shape_cast %837 : vector<1x1x128xf32> to vector<1x128xf32>
    %839 = vector.broadcast %838 : vector<1x128xf32> to vector<8x128xf32>
    %840 = arith.addf %836, %839 : vector<8x128xf32>
    %cst_461 = arith.constant 2.000000e+00 : f32
    %841 = vector.broadcast %cst_461 : f32 to vector<8x128xf32>
    %842 = arith.mulf %841, %840 : vector<8x128xf32>
    %843 = arith.select %457, %842, %840 : vector<8x128xi1>, vector<8x128xf32>
    %844 = arith.negf %843 : vector<8x128xf32>
    %845 = math.exp %844 : vector<8x128xf32>
    %cst_462 = arith.constant 1.000000e+00 : f32
    %846 = vector.broadcast %cst_462 : f32 to vector<8x128xf32>
    %847 = arith.addf %846, %845 : vector<8x128xf32>
    %848 = arith.divf %846, %847 : vector<8x128xf32>
    %cst_463 = arith.constant 2.000000e+00 : f32
    %849 = vector.broadcast %cst_463 : f32 to vector<8x128xf32>
    %850 = arith.mulf %849, %848 : vector<8x128xf32>
    %cst_464 = arith.constant 1.000000e+00 : f32
    %851 = vector.broadcast %cst_464 : f32 to vector<8x128xf32>
    %852 = arith.subf %850, %851 : vector<8x128xf32>
    %853 = arith.select %457, %852, %848 : vector<8x128xi1>, vector<8x128xf32>
    %854 = vector.extract_strided_slice %853 {offsets = [0, 0], sizes = [8, 32], strides = [1, 1]} : vector<8x128xf32> to vector<8x32xf32>
    %855 = vector.extract_strided_slice %853 {offsets = [0, 32], sizes = [8, 32], strides = [1, 1]} : vector<8x128xf32> to vector<8x32xf32>
    %856 = vector.extract_strided_slice %853 {offsets = [0, 64], sizes = [8, 32], strides = [1, 1]} : vector<8x128xf32> to vector<8x32xf32>
    %857 = vector.extract_strided_slice %853 {offsets = [0, 96], sizes = [8, 32], strides = [1, 1]} : vector<8x128xf32> to vector<8x32xf32>
    %858 = arith.mulf %855, %727 : vector<8x32xf32>
    %859 = arith.mulf %854, %856 : vector<8x32xf32>
    %860 = arith.addf %858, %859 : vector<8x32xf32>
    %861 = math.tanh %860 : vector<8x32xf32>
    %862 = arith.mulf %857, %861 : vector<8x32xf32>
    %863 = arith.truncf %862 : vector<8x32xf32> to vector<8x32xbf16>
    %c1_465 = arith.constant 1 : index
    %c0_466 = arith.constant 0 : index
    %c0_467 = arith.constant 0 : index
    %864 = vector.load %arg4[%c1_465, %c0_466, %c0_467] : memref<4x32x256xbf16, #tpu.memory_space<vmem>>, vector<1x32x256xbf16>
    %865 = vector.shape_cast %864 : vector<1x32x256xbf16> to vector<32x256xbf16>
    %cst_468 = arith.constant dense<0.000000e+00> : vector<8x256xf32>
    %866 = tpu.matmul %863, %865, %cst_468 {dimension_numbers = #tpu.dot_dimension_numbers<[1], [0], [0], [1], [0, 0, 1, 1], [], []>} : vector<8x32xbf16>, vector<32x256xbf16>, vector<8x256xf32> -> vector<8x256xf32>
    %867 = vector.extract_strided_slice %866 {offsets = [0, 0], sizes = [8, 128], strides = [1, 1]} : vector<8x256xf32> to vector<8x128xf32>
    %868 = vector.extract_strided_slice %866 {offsets = [0, 128], sizes = [8, 128], strides = [1, 1]} : vector<8x256xf32> to vector<8x128xf32>
    %869 = arith.addf %735, %767 : vector<8x128xf32>
    %c2_469 = arith.constant 2 : index
    %c0_470 = arith.constant 0 : index
    %c0_471 = arith.constant 0 : index
    %870 = vector.load %arg6[%c2_469, %c0_470, %c0_471] : memref<5x1x128xf32, #tpu.memory_space<vmem>>, vector<1x1x128xf32>
    %871 = vector.shape_cast %870 : vector<1x1x128xf32> to vector<1x128xf32>
    %872 = vector.broadcast %871 : vector<1x128xf32> to vector<8x128xf32>
    %873 = arith.addf %869, %872 : vector<8x128xf32>
    %cst_472 = arith.constant 2.000000e+00 : f32
    %874 = vector.broadcast %cst_472 : f32 to vector<8x128xf32>
    %875 = arith.mulf %874, %873 : vector<8x128xf32>
    %876 = arith.select %457, %875, %873 : vector<8x128xi1>, vector<8x128xf32>
    %877 = arith.negf %876 : vector<8x128xf32>
    %878 = math.exp %877 : vector<8x128xf32>
    %cst_473 = arith.constant 1.000000e+00 : f32
    %879 = vector.broadcast %cst_473 : f32 to vector<8x128xf32>
    %880 = arith.addf %879, %878 : vector<8x128xf32>
    %881 = arith.divf %879, %880 : vector<8x128xf32>
    %cst_474 = arith.constant 2.000000e+00 : f32
    %882 = vector.broadcast %cst_474 : f32 to vector<8x128xf32>
    %883 = arith.mulf %882, %881 : vector<8x128xf32>
    %cst_475 = arith.constant 1.000000e+00 : f32
    %884 = vector.broadcast %cst_475 : f32 to vector<8x128xf32>
    %885 = arith.subf %883, %884 : vector<8x128xf32>
    %886 = arith.select %457, %885, %881 : vector<8x128xi1>, vector<8x128xf32>
    %887 = vector.extract_strided_slice %886 {offsets = [0, 0], sizes = [8, 32], strides = [1, 1]} : vector<8x128xf32> to vector<8x32xf32>
    %888 = vector.extract_strided_slice %886 {offsets = [0, 32], sizes = [8, 32], strides = [1, 1]} : vector<8x128xf32> to vector<8x32xf32>
    %889 = vector.extract_strided_slice %886 {offsets = [0, 64], sizes = [8, 32], strides = [1, 1]} : vector<8x128xf32> to vector<8x32xf32>
    %890 = vector.extract_strided_slice %886 {offsets = [0, 96], sizes = [8, 32], strides = [1, 1]} : vector<8x128xf32> to vector<8x32xf32>
    %891 = arith.mulf %888, %760 : vector<8x32xf32>
    %892 = arith.mulf %887, %889 : vector<8x32xf32>
    %893 = arith.addf %891, %892 : vector<8x32xf32>
    %894 = math.tanh %893 : vector<8x32xf32>
    %895 = arith.mulf %890, %894 : vector<8x32xf32>
    %896 = arith.truncf %895 : vector<8x32xf32> to vector<8x32xbf16>
    %c2_476 = arith.constant 2 : index
    %c0_477 = arith.constant 0 : index
    %c0_478 = arith.constant 0 : index
    %897 = vector.load %arg4[%c2_476, %c0_477, %c0_478] : memref<4x32x256xbf16, #tpu.memory_space<vmem>>, vector<1x32x256xbf16>
    %898 = vector.shape_cast %897 : vector<1x32x256xbf16> to vector<32x256xbf16>
    %cst_479 = arith.constant dense<0.000000e+00> : vector<8x256xf32>
    %899 = tpu.matmul %896, %898, %cst_479 {dimension_numbers = #tpu.dot_dimension_numbers<[1], [0], [0], [1], [0, 0, 1, 1], [], []>} : vector<8x32xbf16>, vector<32x256xbf16>, vector<8x256xf32> -> vector<8x256xf32>
    %900 = vector.extract_strided_slice %899 {offsets = [0, 0], sizes = [8, 128], strides = [1, 1]} : vector<8x256xf32> to vector<8x128xf32>
    %901 = vector.extract_strided_slice %899 {offsets = [0, 128], sizes = [8, 128], strides = [1, 1]} : vector<8x256xf32> to vector<8x128xf32>
    %902 = arith.addf %768, %800 : vector<8x128xf32>
    %c3_480 = arith.constant 3 : index
    %c0_481 = arith.constant 0 : index
    %c0_482 = arith.constant 0 : index
    %903 = vector.load %arg6[%c3_480, %c0_481, %c0_482] : memref<5x1x128xf32, #tpu.memory_space<vmem>>, vector<1x1x128xf32>
    %904 = vector.shape_cast %903 : vector<1x1x128xf32> to vector<1x128xf32>
    %905 = vector.broadcast %904 : vector<1x128xf32> to vector<8x128xf32>
    %906 = arith.addf %902, %905 : vector<8x128xf32>
    %cst_483 = arith.constant 2.000000e+00 : f32
    %907 = vector.broadcast %cst_483 : f32 to vector<8x128xf32>
    %908 = arith.mulf %907, %906 : vector<8x128xf32>
    %909 = arith.select %457, %908, %906 : vector<8x128xi1>, vector<8x128xf32>
    %910 = arith.negf %909 : vector<8x128xf32>
    %911 = math.exp %910 : vector<8x128xf32>
    %cst_484 = arith.constant 1.000000e+00 : f32
    %912 = vector.broadcast %cst_484 : f32 to vector<8x128xf32>
    %913 = arith.addf %912, %911 : vector<8x128xf32>
    %914 = arith.divf %912, %913 : vector<8x128xf32>
    %cst_485 = arith.constant 2.000000e+00 : f32
    %915 = vector.broadcast %cst_485 : f32 to vector<8x128xf32>
    %916 = arith.mulf %915, %914 : vector<8x128xf32>
    %cst_486 = arith.constant 1.000000e+00 : f32
    %917 = vector.broadcast %cst_486 : f32 to vector<8x128xf32>
    %918 = arith.subf %916, %917 : vector<8x128xf32>
    %919 = arith.select %457, %918, %914 : vector<8x128xi1>, vector<8x128xf32>
    %920 = vector.extract_strided_slice %919 {offsets = [0, 0], sizes = [8, 32], strides = [1, 1]} : vector<8x128xf32> to vector<8x32xf32>
    %921 = vector.extract_strided_slice %919 {offsets = [0, 32], sizes = [8, 32], strides = [1, 1]} : vector<8x128xf32> to vector<8x32xf32>
    %922 = vector.extract_strided_slice %919 {offsets = [0, 64], sizes = [8, 32], strides = [1, 1]} : vector<8x128xf32> to vector<8x32xf32>
    %923 = vector.extract_strided_slice %919 {offsets = [0, 96], sizes = [8, 32], strides = [1, 1]} : vector<8x128xf32> to vector<8x32xf32>
    %924 = arith.mulf %921, %793 : vector<8x32xf32>
    %925 = arith.mulf %920, %922 : vector<8x32xf32>
    %926 = arith.addf %924, %925 : vector<8x32xf32>
    %927 = math.tanh %926 : vector<8x32xf32>
    %928 = arith.mulf %923, %927 : vector<8x32xf32>
    %929 = arith.truncf %928 : vector<8x32xf32> to vector<8x32xbf16>
    %c3_487 = arith.constant 3 : index
    %c0_488 = arith.constant 0 : index
    %c0_489 = arith.constant 0 : index
    %930 = vector.load %arg4[%c3_487, %c0_488, %c0_489] : memref<4x32x256xbf16, #tpu.memory_space<vmem>>, vector<1x32x256xbf16>
    %931 = vector.shape_cast %930 : vector<1x32x256xbf16> to vector<32x256xbf16>
    %cst_490 = arith.constant dense<0.000000e+00> : vector<8x256xf32>
    %932 = tpu.matmul %929, %931, %cst_490 {dimension_numbers = #tpu.dot_dimension_numbers<[1], [0], [0], [1], [0, 0, 1, 1], [], []>} : vector<8x32xbf16>, vector<32x256xbf16>, vector<8x256xf32> -> vector<8x256xf32>
    %933 = vector.extract_strided_slice %932 {offsets = [0, 0], sizes = [8, 128], strides = [1, 1]} : vector<8x256xf32> to vector<8x128xf32>
    %934 = vector.extract_strided_slice %932 {offsets = [0, 128], sizes = [8, 128], strides = [1, 1]} : vector<8x256xf32> to vector<8x128xf32>
    %935 = arith.addf %801, %467 : vector<8x128xf32>
    %c4_491 = arith.constant 4 : index
    %c0_492 = arith.constant 0 : index
    %c0_493 = arith.constant 0 : index
    %936 = vector.load %arg6[%c4_491, %c0_492, %c0_493] : memref<5x1x128xf32, #tpu.memory_space<vmem>>, vector<1x1x128xf32>
    %937 = vector.shape_cast %936 : vector<1x1x128xf32> to vector<1x128xf32>
    %938 = vector.broadcast %937 : vector<1x128xf32> to vector<8x128xf32>
    %939 = arith.addf %935, %938 : vector<8x128xf32>
    %cst_494 = arith.constant 2.000000e+00 : f32
    %940 = vector.broadcast %cst_494 : f32 to vector<8x128xf32>
    %941 = arith.mulf %940, %939 : vector<8x128xf32>
    %942 = arith.select %457, %941, %939 : vector<8x128xi1>, vector<8x128xf32>
    %943 = arith.negf %942 : vector<8x128xf32>
    %944 = math.exp %943 : vector<8x128xf32>
    %cst_495 = arith.constant 1.000000e+00 : f32
    %945 = vector.broadcast %cst_495 : f32 to vector<8x128xf32>
    %946 = arith.addf %945, %944 : vector<8x128xf32>
    %947 = arith.divf %945, %946 : vector<8x128xf32>
    %cst_496 = arith.constant 2.000000e+00 : f32
    %948 = vector.broadcast %cst_496 : f32 to vector<8x128xf32>
    %949 = arith.mulf %948, %947 : vector<8x128xf32>
    %cst_497 = arith.constant 1.000000e+00 : f32
    %950 = vector.broadcast %cst_497 : f32 to vector<8x128xf32>
    %951 = arith.subf %949, %950 : vector<8x128xf32>
    %952 = arith.select %457, %951, %947 : vector<8x128xi1>, vector<8x128xf32>
    %953 = vector.extract_strided_slice %952 {offsets = [0, 0], sizes = [8, 32], strides = [1, 1]} : vector<8x128xf32> to vector<8x32xf32>
    %954 = vector.extract_strided_slice %952 {offsets = [0, 32], sizes = [8, 32], strides = [1, 1]} : vector<8x128xf32> to vector<8x32xf32>
    %955 = vector.extract_strided_slice %952 {offsets = [0, 64], sizes = [8, 32], strides = [1, 1]} : vector<8x128xf32> to vector<8x32xf32>
    %956 = vector.extract_strided_slice %952 {offsets = [0, 96], sizes = [8, 32], strides = [1, 1]} : vector<8x128xf32> to vector<8x32xf32>
    %957 = arith.mulf %954, %462 : vector<8x32xf32>
    %958 = arith.mulf %953, %955 : vector<8x32xf32>
    %959 = arith.addf %957, %958 : vector<8x32xf32>
    %960 = math.tanh %959 : vector<8x32xf32>
    %961 = arith.mulf %956, %960 : vector<8x32xf32>
    %962 = arith.truncf %961 : vector<8x32xf32> to vector<8x32xbf16>
    %c0_498 = arith.constant 0 : index
    %c0_499 = arith.constant 0 : index
    %963 = vector.load %arg5[%c0_498, %c0_499] : memref<32x128xbf16, #tpu.memory_space<vmem>>, vector<32x128xbf16>
    %cst_500 = arith.constant dense<0.000000e+00> : vector<8x128xf32>
    %964 = tpu.matmul %962, %963, %cst_500 {dimension_numbers = #tpu.dot_dimension_numbers<[1], [0], [0], [1], [0, 0, 1, 1], [], []>} : vector<8x32xbf16>, vector<32x128xbf16>, vector<8x128xf32> -> vector<8x128xf32>
    %c40_501 = arith.constant 40 : index
    %c0_502 = arith.constant 0 : index
    %965 = vector.load %arg11[%c40_501, %c0_502] : memref<64x128xf32, #tpu.memory_space<vmem>>, vector<8x128xf32>
    %966 = arith.addf %965, %834 : vector<8x128xf32>
    %c0_503 = arith.constant 0 : index
    %c0_504 = arith.constant 0 : index
    %c0_505 = arith.constant 0 : index
    %967 = vector.load %arg6[%c0_503, %c0_504, %c0_505] : memref<5x1x128xf32, #tpu.memory_space<vmem>>, vector<1x1x128xf32>
    %968 = vector.shape_cast %967 : vector<1x1x128xf32> to vector<1x128xf32>
    %969 = vector.broadcast %968 : vector<1x128xf32> to vector<8x128xf32>
    %970 = arith.addf %966, %969 : vector<8x128xf32>
    %cst_506 = arith.constant 2.000000e+00 : f32
    %971 = vector.broadcast %cst_506 : f32 to vector<8x128xf32>
    %972 = arith.mulf %971, %970 : vector<8x128xf32>
    %973 = arith.select %457, %972, %970 : vector<8x128xi1>, vector<8x128xf32>
    %974 = arith.negf %973 : vector<8x128xf32>
    %975 = math.exp %974 : vector<8x128xf32>
    %cst_507 = arith.constant 1.000000e+00 : f32
    %976 = vector.broadcast %cst_507 : f32 to vector<8x128xf32>
    %977 = arith.addf %976, %975 : vector<8x128xf32>
    %978 = arith.divf %976, %977 : vector<8x128xf32>
    %cst_508 = arith.constant 2.000000e+00 : f32
    %979 = vector.broadcast %cst_508 : f32 to vector<8x128xf32>
    %980 = arith.mulf %979, %978 : vector<8x128xf32>
    %cst_509 = arith.constant 1.000000e+00 : f32
    %981 = vector.broadcast %cst_509 : f32 to vector<8x128xf32>
    %982 = arith.subf %980, %981 : vector<8x128xf32>
    %983 = arith.select %457, %982, %978 : vector<8x128xi1>, vector<8x128xf32>
    %984 = vector.extract_strided_slice %983 {offsets = [0, 0], sizes = [8, 32], strides = [1, 1]} : vector<8x128xf32> to vector<8x32xf32>
    %985 = vector.extract_strided_slice %983 {offsets = [0, 32], sizes = [8, 32], strides = [1, 1]} : vector<8x128xf32> to vector<8x32xf32>
    %986 = vector.extract_strided_slice %983 {offsets = [0, 64], sizes = [8, 32], strides = [1, 1]} : vector<8x128xf32> to vector<8x32xf32>
    %987 = vector.extract_strided_slice %983 {offsets = [0, 96], sizes = [8, 32], strides = [1, 1]} : vector<8x128xf32> to vector<8x32xf32>
    %988 = arith.mulf %985, %827 : vector<8x32xf32>
    %989 = arith.mulf %984, %986 : vector<8x32xf32>
    %990 = arith.addf %988, %989 : vector<8x32xf32>
    %991 = math.tanh %990 : vector<8x32xf32>
    %992 = arith.mulf %987, %991 : vector<8x32xf32>
    %993 = arith.truncf %992 : vector<8x32xf32> to vector<8x32xbf16>
    %c0_510 = arith.constant 0 : index
    %c0_511 = arith.constant 0 : index
    %c0_512 = arith.constant 0 : index
    %994 = vector.load %arg4[%c0_510, %c0_511, %c0_512] : memref<4x32x256xbf16, #tpu.memory_space<vmem>>, vector<1x32x256xbf16>
    %995 = vector.shape_cast %994 : vector<1x32x256xbf16> to vector<32x256xbf16>
    %cst_513 = arith.constant dense<0.000000e+00> : vector<8x256xf32>
    %996 = tpu.matmul %993, %995, %cst_513 {dimension_numbers = #tpu.dot_dimension_numbers<[1], [0], [0], [1], [0, 0, 1, 1], [], []>} : vector<8x32xbf16>, vector<32x256xbf16>, vector<8x256xf32> -> vector<8x256xf32>
    %997 = vector.extract_strided_slice %996 {offsets = [0, 0], sizes = [8, 128], strides = [1, 1]} : vector<8x256xf32> to vector<8x128xf32>
    %998 = vector.extract_strided_slice %996 {offsets = [0, 128], sizes = [8, 128], strides = [1, 1]} : vector<8x256xf32> to vector<8x128xf32>
    %999 = arith.addf %835, %867 : vector<8x128xf32>
    %c1_514 = arith.constant 1 : index
    %c0_515 = arith.constant 0 : index
    %c0_516 = arith.constant 0 : index
    %1000 = vector.load %arg6[%c1_514, %c0_515, %c0_516] : memref<5x1x128xf32, #tpu.memory_space<vmem>>, vector<1x1x128xf32>
    %1001 = vector.shape_cast %1000 : vector<1x1x128xf32> to vector<1x128xf32>
    %1002 = vector.broadcast %1001 : vector<1x128xf32> to vector<8x128xf32>
    %1003 = arith.addf %999, %1002 : vector<8x128xf32>
    %cst_517 = arith.constant 2.000000e+00 : f32
    %1004 = vector.broadcast %cst_517 : f32 to vector<8x128xf32>
    %1005 = arith.mulf %1004, %1003 : vector<8x128xf32>
    %1006 = arith.select %457, %1005, %1003 : vector<8x128xi1>, vector<8x128xf32>
    %1007 = arith.negf %1006 : vector<8x128xf32>
    %1008 = math.exp %1007 : vector<8x128xf32>
    %cst_518 = arith.constant 1.000000e+00 : f32
    %1009 = vector.broadcast %cst_518 : f32 to vector<8x128xf32>
    %1010 = arith.addf %1009, %1008 : vector<8x128xf32>
    %1011 = arith.divf %1009, %1010 : vector<8x128xf32>
    %cst_519 = arith.constant 2.000000e+00 : f32
    %1012 = vector.broadcast %cst_519 : f32 to vector<8x128xf32>
    %1013 = arith.mulf %1012, %1011 : vector<8x128xf32>
    %cst_520 = arith.constant 1.000000e+00 : f32
    %1014 = vector.broadcast %cst_520 : f32 to vector<8x128xf32>
    %1015 = arith.subf %1013, %1014 : vector<8x128xf32>
    %1016 = arith.select %457, %1015, %1011 : vector<8x128xi1>, vector<8x128xf32>
    %1017 = vector.extract_strided_slice %1016 {offsets = [0, 0], sizes = [8, 32], strides = [1, 1]} : vector<8x128xf32> to vector<8x32xf32>
    %1018 = vector.extract_strided_slice %1016 {offsets = [0, 32], sizes = [8, 32], strides = [1, 1]} : vector<8x128xf32> to vector<8x32xf32>
    %1019 = vector.extract_strided_slice %1016 {offsets = [0, 64], sizes = [8, 32], strides = [1, 1]} : vector<8x128xf32> to vector<8x32xf32>
    %1020 = vector.extract_strided_slice %1016 {offsets = [0, 96], sizes = [8, 32], strides = [1, 1]} : vector<8x128xf32> to vector<8x32xf32>
    %1021 = arith.mulf %1018, %860 : vector<8x32xf32>
    %1022 = arith.mulf %1017, %1019 : vector<8x32xf32>
    %1023 = arith.addf %1021, %1022 : vector<8x32xf32>
    %1024 = math.tanh %1023 : vector<8x32xf32>
    %1025 = arith.mulf %1020, %1024 : vector<8x32xf32>
    %1026 = arith.truncf %1025 : vector<8x32xf32> to vector<8x32xbf16>
    %c1_521 = arith.constant 1 : index
    %c0_522 = arith.constant 0 : index
    %c0_523 = arith.constant 0 : index
    %1027 = vector.load %arg4[%c1_521, %c0_522, %c0_523] : memref<4x32x256xbf16, #tpu.memory_space<vmem>>, vector<1x32x256xbf16>
    %1028 = vector.shape_cast %1027 : vector<1x32x256xbf16> to vector<32x256xbf16>
    %cst_524 = arith.constant dense<0.000000e+00> : vector<8x256xf32>
    %1029 = tpu.matmul %1026, %1028, %cst_524 {dimension_numbers = #tpu.dot_dimension_numbers<[1], [0], [0], [1], [0, 0, 1, 1], [], []>} : vector<8x32xbf16>, vector<32x256xbf16>, vector<8x256xf32> -> vector<8x256xf32>
    %1030 = vector.extract_strided_slice %1029 {offsets = [0, 0], sizes = [8, 128], strides = [1, 1]} : vector<8x256xf32> to vector<8x128xf32>
    %1031 = vector.extract_strided_slice %1029 {offsets = [0, 128], sizes = [8, 128], strides = [1, 1]} : vector<8x256xf32> to vector<8x128xf32>
    %1032 = arith.addf %868, %900 : vector<8x128xf32>
    %c2_525 = arith.constant 2 : index
    %c0_526 = arith.constant 0 : index
    %c0_527 = arith.constant 0 : index
    %1033 = vector.load %arg6[%c2_525, %c0_526, %c0_527] : memref<5x1x128xf32, #tpu.memory_space<vmem>>, vector<1x1x128xf32>
    %1034 = vector.shape_cast %1033 : vector<1x1x128xf32> to vector<1x128xf32>
    %1035 = vector.broadcast %1034 : vector<1x128xf32> to vector<8x128xf32>
    %1036 = arith.addf %1032, %1035 : vector<8x128xf32>
    %cst_528 = arith.constant 2.000000e+00 : f32
    %1037 = vector.broadcast %cst_528 : f32 to vector<8x128xf32>
    %1038 = arith.mulf %1037, %1036 : vector<8x128xf32>
    %1039 = arith.select %457, %1038, %1036 : vector<8x128xi1>, vector<8x128xf32>
    %1040 = arith.negf %1039 : vector<8x128xf32>
    %1041 = math.exp %1040 : vector<8x128xf32>
    %cst_529 = arith.constant 1.000000e+00 : f32
    %1042 = vector.broadcast %cst_529 : f32 to vector<8x128xf32>
    %1043 = arith.addf %1042, %1041 : vector<8x128xf32>
    %1044 = arith.divf %1042, %1043 : vector<8x128xf32>
    %cst_530 = arith.constant 2.000000e+00 : f32
    %1045 = vector.broadcast %cst_530 : f32 to vector<8x128xf32>
    %1046 = arith.mulf %1045, %1044 : vector<8x128xf32>
    %cst_531 = arith.constant 1.000000e+00 : f32
    %1047 = vector.broadcast %cst_531 : f32 to vector<8x128xf32>
    %1048 = arith.subf %1046, %1047 : vector<8x128xf32>
    %1049 = arith.select %457, %1048, %1044 : vector<8x128xi1>, vector<8x128xf32>
    %1050 = vector.extract_strided_slice %1049 {offsets = [0, 0], sizes = [8, 32], strides = [1, 1]} : vector<8x128xf32> to vector<8x32xf32>
    %1051 = vector.extract_strided_slice %1049 {offsets = [0, 32], sizes = [8, 32], strides = [1, 1]} : vector<8x128xf32> to vector<8x32xf32>
    %1052 = vector.extract_strided_slice %1049 {offsets = [0, 64], sizes = [8, 32], strides = [1, 1]} : vector<8x128xf32> to vector<8x32xf32>
    %1053 = vector.extract_strided_slice %1049 {offsets = [0, 96], sizes = [8, 32], strides = [1, 1]} : vector<8x128xf32> to vector<8x32xf32>
    %1054 = arith.mulf %1051, %893 : vector<8x32xf32>
    %1055 = arith.mulf %1050, %1052 : vector<8x32xf32>
    %1056 = arith.addf %1054, %1055 : vector<8x32xf32>
    %1057 = math.tanh %1056 : vector<8x32xf32>
    %1058 = arith.mulf %1053, %1057 : vector<8x32xf32>
    %1059 = arith.truncf %1058 : vector<8x32xf32> to vector<8x32xbf16>
    %c2_532 = arith.constant 2 : index
    %c0_533 = arith.constant 0 : index
    %c0_534 = arith.constant 0 : index
    %1060 = vector.load %arg4[%c2_532, %c0_533, %c0_534] : memref<4x32x256xbf16, #tpu.memory_space<vmem>>, vector<1x32x256xbf16>
    %1061 = vector.shape_cast %1060 : vector<1x32x256xbf16> to vector<32x256xbf16>
    %cst_535 = arith.constant dense<0.000000e+00> : vector<8x256xf32>
    %1062 = tpu.matmul %1059, %1061, %cst_535 {dimension_numbers = #tpu.dot_dimension_numbers<[1], [0], [0], [1], [0, 0, 1, 1], [], []>} : vector<8x32xbf16>, vector<32x256xbf16>, vector<8x256xf32> -> vector<8x256xf32>
    %1063 = vector.extract_strided_slice %1062 {offsets = [0, 0], sizes = [8, 128], strides = [1, 1]} : vector<8x256xf32> to vector<8x128xf32>
    %1064 = vector.extract_strided_slice %1062 {offsets = [0, 128], sizes = [8, 128], strides = [1, 1]} : vector<8x256xf32> to vector<8x128xf32>
    %1065 = arith.addf %901, %933 : vector<8x128xf32>
    %c3_536 = arith.constant 3 : index
    %c0_537 = arith.constant 0 : index
    %c0_538 = arith.constant 0 : index
    %1066 = vector.load %arg6[%c3_536, %c0_537, %c0_538] : memref<5x1x128xf32, #tpu.memory_space<vmem>>, vector<1x1x128xf32>
    %1067 = vector.shape_cast %1066 : vector<1x1x128xf32> to vector<1x128xf32>
    %1068 = vector.broadcast %1067 : vector<1x128xf32> to vector<8x128xf32>
    %1069 = arith.addf %1065, %1068 : vector<8x128xf32>
    %cst_539 = arith.constant 2.000000e+00 : f32
    %1070 = vector.broadcast %cst_539 : f32 to vector<8x128xf32>
    %1071 = arith.mulf %1070, %1069 : vector<8x128xf32>
    %1072 = arith.select %457, %1071, %1069 : vector<8x128xi1>, vector<8x128xf32>
    %1073 = arith.negf %1072 : vector<8x128xf32>
    %1074 = math.exp %1073 : vector<8x128xf32>
    %cst_540 = arith.constant 1.000000e+00 : f32
    %1075 = vector.broadcast %cst_540 : f32 to vector<8x128xf32>
    %1076 = arith.addf %1075, %1074 : vector<8x128xf32>
    %1077 = arith.divf %1075, %1076 : vector<8x128xf32>
    %cst_541 = arith.constant 2.000000e+00 : f32
    %1078 = vector.broadcast %cst_541 : f32 to vector<8x128xf32>
    %1079 = arith.mulf %1078, %1077 : vector<8x128xf32>
    %cst_542 = arith.constant 1.000000e+00 : f32
    %1080 = vector.broadcast %cst_542 : f32 to vector<8x128xf32>
    %1081 = arith.subf %1079, %1080 : vector<8x128xf32>
    %1082 = arith.select %457, %1081, %1077 : vector<8x128xi1>, vector<8x128xf32>
    %1083 = vector.extract_strided_slice %1082 {offsets = [0, 0], sizes = [8, 32], strides = [1, 1]} : vector<8x128xf32> to vector<8x32xf32>
    %1084 = vector.extract_strided_slice %1082 {offsets = [0, 32], sizes = [8, 32], strides = [1, 1]} : vector<8x128xf32> to vector<8x32xf32>
    %1085 = vector.extract_strided_slice %1082 {offsets = [0, 64], sizes = [8, 32], strides = [1, 1]} : vector<8x128xf32> to vector<8x32xf32>
    %1086 = vector.extract_strided_slice %1082 {offsets = [0, 96], sizes = [8, 32], strides = [1, 1]} : vector<8x128xf32> to vector<8x32xf32>
    %1087 = arith.mulf %1084, %926 : vector<8x32xf32>
    %1088 = arith.mulf %1083, %1085 : vector<8x32xf32>
    %1089 = arith.addf %1087, %1088 : vector<8x32xf32>
    %1090 = math.tanh %1089 : vector<8x32xf32>
    %1091 = arith.mulf %1086, %1090 : vector<8x32xf32>
    %1092 = arith.truncf %1091 : vector<8x32xf32> to vector<8x32xbf16>
    %c3_543 = arith.constant 3 : index
    %c0_544 = arith.constant 0 : index
    %c0_545 = arith.constant 0 : index
    %1093 = vector.load %arg4[%c3_543, %c0_544, %c0_545] : memref<4x32x256xbf16, #tpu.memory_space<vmem>>, vector<1x32x256xbf16>
    %1094 = vector.shape_cast %1093 : vector<1x32x256xbf16> to vector<32x256xbf16>
    %cst_546 = arith.constant dense<0.000000e+00> : vector<8x256xf32>
    %1095 = tpu.matmul %1092, %1094, %cst_546 {dimension_numbers = #tpu.dot_dimension_numbers<[1], [0], [0], [1], [0, 0, 1, 1], [], []>} : vector<8x32xbf16>, vector<32x256xbf16>, vector<8x256xf32> -> vector<8x256xf32>
    %1096 = vector.extract_strided_slice %1095 {offsets = [0, 0], sizes = [8, 128], strides = [1, 1]} : vector<8x256xf32> to vector<8x128xf32>
    %1097 = vector.extract_strided_slice %1095 {offsets = [0, 128], sizes = [8, 128], strides = [1, 1]} : vector<8x256xf32> to vector<8x128xf32>
    %1098 = arith.addf %934, %964 : vector<8x128xf32>
    %c4_547 = arith.constant 4 : index
    %c0_548 = arith.constant 0 : index
    %c0_549 = arith.constant 0 : index
    %1099 = vector.load %arg6[%c4_547, %c0_548, %c0_549] : memref<5x1x128xf32, #tpu.memory_space<vmem>>, vector<1x1x128xf32>
    %1100 = vector.shape_cast %1099 : vector<1x1x128xf32> to vector<1x128xf32>
    %1101 = vector.broadcast %1100 : vector<1x128xf32> to vector<8x128xf32>
    %1102 = arith.addf %1098, %1101 : vector<8x128xf32>
    %cst_550 = arith.constant 2.000000e+00 : f32
    %1103 = vector.broadcast %cst_550 : f32 to vector<8x128xf32>
    %1104 = arith.mulf %1103, %1102 : vector<8x128xf32>
    %1105 = arith.select %457, %1104, %1102 : vector<8x128xi1>, vector<8x128xf32>
    %1106 = arith.negf %1105 : vector<8x128xf32>
    %1107 = math.exp %1106 : vector<8x128xf32>
    %cst_551 = arith.constant 1.000000e+00 : f32
    %1108 = vector.broadcast %cst_551 : f32 to vector<8x128xf32>
    %1109 = arith.addf %1108, %1107 : vector<8x128xf32>
    %1110 = arith.divf %1108, %1109 : vector<8x128xf32>
    %cst_552 = arith.constant 2.000000e+00 : f32
    %1111 = vector.broadcast %cst_552 : f32 to vector<8x128xf32>
    %1112 = arith.mulf %1111, %1110 : vector<8x128xf32>
    %cst_553 = arith.constant 1.000000e+00 : f32
    %1113 = vector.broadcast %cst_553 : f32 to vector<8x128xf32>
    %1114 = arith.subf %1112, %1113 : vector<8x128xf32>
    %1115 = arith.select %457, %1114, %1110 : vector<8x128xi1>, vector<8x128xf32>
    %1116 = vector.extract_strided_slice %1115 {offsets = [0, 0], sizes = [8, 32], strides = [1, 1]} : vector<8x128xf32> to vector<8x32xf32>
    %1117 = vector.extract_strided_slice %1115 {offsets = [0, 32], sizes = [8, 32], strides = [1, 1]} : vector<8x128xf32> to vector<8x32xf32>
    %1118 = vector.extract_strided_slice %1115 {offsets = [0, 64], sizes = [8, 32], strides = [1, 1]} : vector<8x128xf32> to vector<8x32xf32>
    %1119 = vector.extract_strided_slice %1115 {offsets = [0, 96], sizes = [8, 32], strides = [1, 1]} : vector<8x128xf32> to vector<8x32xf32>
    %1120 = arith.mulf %1117, %959 : vector<8x32xf32>
    %1121 = arith.mulf %1116, %1118 : vector<8x32xf32>
    %1122 = arith.addf %1120, %1121 : vector<8x32xf32>
    %1123 = math.tanh %1122 : vector<8x32xf32>
    %1124 = arith.mulf %1119, %1123 : vector<8x32xf32>
    %1125 = arith.truncf %1124 : vector<8x32xf32> to vector<8x32xbf16>
    %c0_554 = arith.constant 0 : index
    %c0_555 = arith.constant 0 : index
    %1126 = vector.load %arg5[%c0_554, %c0_555] : memref<32x128xbf16, #tpu.memory_space<vmem>>, vector<32x128xbf16>
    %cst_556 = arith.constant dense<0.000000e+00> : vector<8x128xf32>
    %1127 = tpu.matmul %1125, %1126, %cst_556 {dimension_numbers = #tpu.dot_dimension_numbers<[1], [0], [0], [1], [0, 0, 1, 1], [], []>} : vector<8x32xbf16>, vector<32x128xbf16>, vector<8x128xf32> -> vector<8x128xf32>
    %c48_557 = arith.constant 48 : index
    %c0_558 = arith.constant 0 : index
    %1128 = vector.load %arg11[%c48_557, %c0_558] : memref<64x128xf32, #tpu.memory_space<vmem>>, vector<8x128xf32>
    %1129 = arith.addf %1128, %997 : vector<8x128xf32>
    %c0_559 = arith.constant 0 : index
    %c0_560 = arith.constant 0 : index
    %c0_561 = arith.constant 0 : index
    %1130 = vector.load %arg6[%c0_559, %c0_560, %c0_561] : memref<5x1x128xf32, #tpu.memory_space<vmem>>, vector<1x1x128xf32>
    %1131 = vector.shape_cast %1130 : vector<1x1x128xf32> to vector<1x128xf32>
    %1132 = vector.broadcast %1131 : vector<1x128xf32> to vector<8x128xf32>
    %1133 = arith.addf %1129, %1132 : vector<8x128xf32>
    %cst_562 = arith.constant 2.000000e+00 : f32
    %1134 = vector.broadcast %cst_562 : f32 to vector<8x128xf32>
    %1135 = arith.mulf %1134, %1133 : vector<8x128xf32>
    %1136 = arith.select %457, %1135, %1133 : vector<8x128xi1>, vector<8x128xf32>
    %1137 = arith.negf %1136 : vector<8x128xf32>
    %1138 = math.exp %1137 : vector<8x128xf32>
    %cst_563 = arith.constant 1.000000e+00 : f32
    %1139 = vector.broadcast %cst_563 : f32 to vector<8x128xf32>
    %1140 = arith.addf %1139, %1138 : vector<8x128xf32>
    %1141 = arith.divf %1139, %1140 : vector<8x128xf32>
    %cst_564 = arith.constant 2.000000e+00 : f32
    %1142 = vector.broadcast %cst_564 : f32 to vector<8x128xf32>
    %1143 = arith.mulf %1142, %1141 : vector<8x128xf32>
    %cst_565 = arith.constant 1.000000e+00 : f32
    %1144 = vector.broadcast %cst_565 : f32 to vector<8x128xf32>
    %1145 = arith.subf %1143, %1144 : vector<8x128xf32>
    %1146 = arith.select %457, %1145, %1141 : vector<8x128xi1>, vector<8x128xf32>
    %1147 = vector.extract_strided_slice %1146 {offsets = [0, 0], sizes = [8, 32], strides = [1, 1]} : vector<8x128xf32> to vector<8x32xf32>
    %1148 = vector.extract_strided_slice %1146 {offsets = [0, 32], sizes = [8, 32], strides = [1, 1]} : vector<8x128xf32> to vector<8x32xf32>
    %1149 = vector.extract_strided_slice %1146 {offsets = [0, 64], sizes = [8, 32], strides = [1, 1]} : vector<8x128xf32> to vector<8x32xf32>
    %1150 = vector.extract_strided_slice %1146 {offsets = [0, 96], sizes = [8, 32], strides = [1, 1]} : vector<8x128xf32> to vector<8x32xf32>
    %1151 = arith.mulf %1148, %990 : vector<8x32xf32>
    %1152 = arith.mulf %1147, %1149 : vector<8x32xf32>
    %1153 = arith.addf %1151, %1152 : vector<8x32xf32>
    %1154 = math.tanh %1153 : vector<8x32xf32>
    %1155 = arith.mulf %1150, %1154 : vector<8x32xf32>
    %1156 = arith.truncf %1155 : vector<8x32xf32> to vector<8x32xbf16>
    %c0_566 = arith.constant 0 : index
    %c0_567 = arith.constant 0 : index
    %c0_568 = arith.constant 0 : index
    %1157 = vector.load %arg4[%c0_566, %c0_567, %c0_568] : memref<4x32x256xbf16, #tpu.memory_space<vmem>>, vector<1x32x256xbf16>
    %1158 = vector.shape_cast %1157 : vector<1x32x256xbf16> to vector<32x256xbf16>
    %cst_569 = arith.constant dense<0.000000e+00> : vector<8x256xf32>
    %1159 = tpu.matmul %1156, %1158, %cst_569 {dimension_numbers = #tpu.dot_dimension_numbers<[1], [0], [0], [1], [0, 0, 1, 1], [], []>} : vector<8x32xbf16>, vector<32x256xbf16>, vector<8x256xf32> -> vector<8x256xf32>
    %1160 = vector.extract_strided_slice %1159 {offsets = [0, 0], sizes = [8, 128], strides = [1, 1]} : vector<8x256xf32> to vector<8x128xf32>
    %1161 = vector.extract_strided_slice %1159 {offsets = [0, 128], sizes = [8, 128], strides = [1, 1]} : vector<8x256xf32> to vector<8x128xf32>
    %1162 = arith.addf %998, %1030 : vector<8x128xf32>
    %c1_570 = arith.constant 1 : index
    %c0_571 = arith.constant 0 : index
    %c0_572 = arith.constant 0 : index
    %1163 = vector.load %arg6[%c1_570, %c0_571, %c0_572] : memref<5x1x128xf32, #tpu.memory_space<vmem>>, vector<1x1x128xf32>
    %1164 = vector.shape_cast %1163 : vector<1x1x128xf32> to vector<1x128xf32>
    %1165 = vector.broadcast %1164 : vector<1x128xf32> to vector<8x128xf32>
    %1166 = arith.addf %1162, %1165 : vector<8x128xf32>
    %cst_573 = arith.constant 2.000000e+00 : f32
    %1167 = vector.broadcast %cst_573 : f32 to vector<8x128xf32>
    %1168 = arith.mulf %1167, %1166 : vector<8x128xf32>
    %1169 = arith.select %457, %1168, %1166 : vector<8x128xi1>, vector<8x128xf32>
    %1170 = arith.negf %1169 : vector<8x128xf32>
    %1171 = math.exp %1170 : vector<8x128xf32>
    %cst_574 = arith.constant 1.000000e+00 : f32
    %1172 = vector.broadcast %cst_574 : f32 to vector<8x128xf32>
    %1173 = arith.addf %1172, %1171 : vector<8x128xf32>
    %1174 = arith.divf %1172, %1173 : vector<8x128xf32>
    %cst_575 = arith.constant 2.000000e+00 : f32
    %1175 = vector.broadcast %cst_575 : f32 to vector<8x128xf32>
    %1176 = arith.mulf %1175, %1174 : vector<8x128xf32>
    %cst_576 = arith.constant 1.000000e+00 : f32
    %1177 = vector.broadcast %cst_576 : f32 to vector<8x128xf32>
    %1178 = arith.subf %1176, %1177 : vector<8x128xf32>
    %1179 = arith.select %457, %1178, %1174 : vector<8x128xi1>, vector<8x128xf32>
    %1180 = vector.extract_strided_slice %1179 {offsets = [0, 0], sizes = [8, 32], strides = [1, 1]} : vector<8x128xf32> to vector<8x32xf32>
    %1181 = vector.extract_strided_slice %1179 {offsets = [0, 32], sizes = [8, 32], strides = [1, 1]} : vector<8x128xf32> to vector<8x32xf32>
    %1182 = vector.extract_strided_slice %1179 {offsets = [0, 64], sizes = [8, 32], strides = [1, 1]} : vector<8x128xf32> to vector<8x32xf32>
    %1183 = vector.extract_strided_slice %1179 {offsets = [0, 96], sizes = [8, 32], strides = [1, 1]} : vector<8x128xf32> to vector<8x32xf32>
    %1184 = arith.mulf %1181, %1023 : vector<8x32xf32>
    %1185 = arith.mulf %1180, %1182 : vector<8x32xf32>
    %1186 = arith.addf %1184, %1185 : vector<8x32xf32>
    %1187 = math.tanh %1186 : vector<8x32xf32>
    %1188 = arith.mulf %1183, %1187 : vector<8x32xf32>
    %1189 = arith.truncf %1188 : vector<8x32xf32> to vector<8x32xbf16>
    %c1_577 = arith.constant 1 : index
    %c0_578 = arith.constant 0 : index
    %c0_579 = arith.constant 0 : index
    %1190 = vector.load %arg4[%c1_577, %c0_578, %c0_579] : memref<4x32x256xbf16, #tpu.memory_space<vmem>>, vector<1x32x256xbf16>
    %1191 = vector.shape_cast %1190 : vector<1x32x256xbf16> to vector<32x256xbf16>
    %cst_580 = arith.constant dense<0.000000e+00> : vector<8x256xf32>
    %1192 = tpu.matmul %1189, %1191, %cst_580 {dimension_numbers = #tpu.dot_dimension_numbers<[1], [0], [0], [1], [0, 0, 1, 1], [], []>} : vector<8x32xbf16>, vector<32x256xbf16>, vector<8x256xf32> -> vector<8x256xf32>
    %1193 = vector.extract_strided_slice %1192 {offsets = [0, 0], sizes = [8, 128], strides = [1, 1]} : vector<8x256xf32> to vector<8x128xf32>
    %1194 = vector.extract_strided_slice %1192 {offsets = [0, 128], sizes = [8, 128], strides = [1, 1]} : vector<8x256xf32> to vector<8x128xf32>
    %1195 = arith.addf %1031, %1063 : vector<8x128xf32>
    %c2_581 = arith.constant 2 : index
    %c0_582 = arith.constant 0 : index
    %c0_583 = arith.constant 0 : index
    %1196 = vector.load %arg6[%c2_581, %c0_582, %c0_583] : memref<5x1x128xf32, #tpu.memory_space<vmem>>, vector<1x1x128xf32>
    %1197 = vector.shape_cast %1196 : vector<1x1x128xf32> to vector<1x128xf32>
    %1198 = vector.broadcast %1197 : vector<1x128xf32> to vector<8x128xf32>
    %1199 = arith.addf %1195, %1198 : vector<8x128xf32>
    %cst_584 = arith.constant 2.000000e+00 : f32
    %1200 = vector.broadcast %cst_584 : f32 to vector<8x128xf32>
    %1201 = arith.mulf %1200, %1199 : vector<8x128xf32>
    %1202 = arith.select %457, %1201, %1199 : vector<8x128xi1>, vector<8x128xf32>
    %1203 = arith.negf %1202 : vector<8x128xf32>
    %1204 = math.exp %1203 : vector<8x128xf32>
    %cst_585 = arith.constant 1.000000e+00 : f32
    %1205 = vector.broadcast %cst_585 : f32 to vector<8x128xf32>
    %1206 = arith.addf %1205, %1204 : vector<8x128xf32>
    %1207 = arith.divf %1205, %1206 : vector<8x128xf32>
    %cst_586 = arith.constant 2.000000e+00 : f32
    %1208 = vector.broadcast %cst_586 : f32 to vector<8x128xf32>
    %1209 = arith.mulf %1208, %1207 : vector<8x128xf32>
    %cst_587 = arith.constant 1.000000e+00 : f32
    %1210 = vector.broadcast %cst_587 : f32 to vector<8x128xf32>
    %1211 = arith.subf %1209, %1210 : vector<8x128xf32>
    %1212 = arith.select %457, %1211, %1207 : vector<8x128xi1>, vector<8x128xf32>
    %1213 = vector.extract_strided_slice %1212 {offsets = [0, 0], sizes = [8, 32], strides = [1, 1]} : vector<8x128xf32> to vector<8x32xf32>
    %1214 = vector.extract_strided_slice %1212 {offsets = [0, 32], sizes = [8, 32], strides = [1, 1]} : vector<8x128xf32> to vector<8x32xf32>
    %1215 = vector.extract_strided_slice %1212 {offsets = [0, 64], sizes = [8, 32], strides = [1, 1]} : vector<8x128xf32> to vector<8x32xf32>
    %1216 = vector.extract_strided_slice %1212 {offsets = [0, 96], sizes = [8, 32], strides = [1, 1]} : vector<8x128xf32> to vector<8x32xf32>
    %1217 = arith.mulf %1214, %1056 : vector<8x32xf32>
    %1218 = arith.mulf %1213, %1215 : vector<8x32xf32>
    %1219 = arith.addf %1217, %1218 : vector<8x32xf32>
    %1220 = math.tanh %1219 : vector<8x32xf32>
    %1221 = arith.mulf %1216, %1220 : vector<8x32xf32>
    %1222 = arith.truncf %1221 : vector<8x32xf32> to vector<8x32xbf16>
    %c2_588 = arith.constant 2 : index
    %c0_589 = arith.constant 0 : index
    %c0_590 = arith.constant 0 : index
    %1223 = vector.load %arg4[%c2_588, %c0_589, %c0_590] : memref<4x32x256xbf16, #tpu.memory_space<vmem>>, vector<1x32x256xbf16>
    %1224 = vector.shape_cast %1223 : vector<1x32x256xbf16> to vector<32x256xbf16>
    %cst_591 = arith.constant dense<0.000000e+00> : vector<8x256xf32>
    %1225 = tpu.matmul %1222, %1224, %cst_591 {dimension_numbers = #tpu.dot_dimension_numbers<[1], [0], [0], [1], [0, 0, 1, 1], [], []>} : vector<8x32xbf16>, vector<32x256xbf16>, vector<8x256xf32> -> vector<8x256xf32>
    %1226 = vector.extract_strided_slice %1225 {offsets = [0, 0], sizes = [8, 128], strides = [1, 1]} : vector<8x256xf32> to vector<8x128xf32>
    %1227 = vector.extract_strided_slice %1225 {offsets = [0, 128], sizes = [8, 128], strides = [1, 1]} : vector<8x256xf32> to vector<8x128xf32>
    %1228 = arith.addf %1064, %1096 : vector<8x128xf32>
    %c3_592 = arith.constant 3 : index
    %c0_593 = arith.constant 0 : index
    %c0_594 = arith.constant 0 : index
    %1229 = vector.load %arg6[%c3_592, %c0_593, %c0_594] : memref<5x1x128xf32, #tpu.memory_space<vmem>>, vector<1x1x128xf32>
    %1230 = vector.shape_cast %1229 : vector<1x1x128xf32> to vector<1x128xf32>
    %1231 = vector.broadcast %1230 : vector<1x128xf32> to vector<8x128xf32>
    %1232 = arith.addf %1228, %1231 : vector<8x128xf32>
    %cst_595 = arith.constant 2.000000e+00 : f32
    %1233 = vector.broadcast %cst_595 : f32 to vector<8x128xf32>
    %1234 = arith.mulf %1233, %1232 : vector<8x128xf32>
    %1235 = arith.select %457, %1234, %1232 : vector<8x128xi1>, vector<8x128xf32>
    %1236 = arith.negf %1235 : vector<8x128xf32>
    %1237 = math.exp %1236 : vector<8x128xf32>
    %cst_596 = arith.constant 1.000000e+00 : f32
    %1238 = vector.broadcast %cst_596 : f32 to vector<8x128xf32>
    %1239 = arith.addf %1238, %1237 : vector<8x128xf32>
    %1240 = arith.divf %1238, %1239 : vector<8x128xf32>
    %cst_597 = arith.constant 2.000000e+00 : f32
    %1241 = vector.broadcast %cst_597 : f32 to vector<8x128xf32>
    %1242 = arith.mulf %1241, %1240 : vector<8x128xf32>
    %cst_598 = arith.constant 1.000000e+00 : f32
    %1243 = vector.broadcast %cst_598 : f32 to vector<8x128xf32>
    %1244 = arith.subf %1242, %1243 : vector<8x128xf32>
    %1245 = arith.select %457, %1244, %1240 : vector<8x128xi1>, vector<8x128xf32>
    %1246 = vector.extract_strided_slice %1245 {offsets = [0, 0], sizes = [8, 32], strides = [1, 1]} : vector<8x128xf32> to vector<8x32xf32>
    %1247 = vector.extract_strided_slice %1245 {offsets = [0, 32], sizes = [8, 32], strides = [1, 1]} : vector<8x128xf32> to vector<8x32xf32>
    %1248 = vector.extract_strided_slice %1245 {offsets = [0, 64], sizes = [8, 32], strides = [1, 1]} : vector<8x128xf32> to vector<8x32xf32>
    %1249 = vector.extract_strided_slice %1245 {offsets = [0, 96], sizes = [8, 32], strides = [1, 1]} : vector<8x128xf32> to vector<8x32xf32>
    %1250 = arith.mulf %1247, %1089 : vector<8x32xf32>
    %1251 = arith.mulf %1246, %1248 : vector<8x32xf32>
    %1252 = arith.addf %1250, %1251 : vector<8x32xf32>
    %1253 = math.tanh %1252 : vector<8x32xf32>
    %1254 = arith.mulf %1249, %1253 : vector<8x32xf32>
    %1255 = arith.truncf %1254 : vector<8x32xf32> to vector<8x32xbf16>
    %c3_599 = arith.constant 3 : index
    %c0_600 = arith.constant 0 : index
    %c0_601 = arith.constant 0 : index
    %1256 = vector.load %arg4[%c3_599, %c0_600, %c0_601] : memref<4x32x256xbf16, #tpu.memory_space<vmem>>, vector<1x32x256xbf16>
    %1257 = vector.shape_cast %1256 : vector<1x32x256xbf16> to vector<32x256xbf16>
    %cst_602 = arith.constant dense<0.000000e+00> : vector<8x256xf32>
    %1258 = tpu.matmul %1255, %1257, %cst_602 {dimension_numbers = #tpu.dot_dimension_numbers<[1], [0], [0], [1], [0, 0, 1, 1], [], []>} : vector<8x32xbf16>, vector<32x256xbf16>, vector<8x256xf32> -> vector<8x256xf32>
    %1259 = vector.extract_strided_slice %1258 {offsets = [0, 0], sizes = [8, 128], strides = [1, 1]} : vector<8x256xf32> to vector<8x128xf32>
    %1260 = vector.extract_strided_slice %1258 {offsets = [0, 128], sizes = [8, 128], strides = [1, 1]} : vector<8x256xf32> to vector<8x128xf32>
    %1261 = arith.addf %1097, %1127 : vector<8x128xf32>
    %c4_603 = arith.constant 4 : index
    %c0_604 = arith.constant 0 : index
    %c0_605 = arith.constant 0 : index
    %1262 = vector.load %arg6[%c4_603, %c0_604, %c0_605] : memref<5x1x128xf32, #tpu.memory_space<vmem>>, vector<1x1x128xf32>
    %1263 = vector.shape_cast %1262 : vector<1x1x128xf32> to vector<1x128xf32>
    %1264 = vector.broadcast %1263 : vector<1x128xf32> to vector<8x128xf32>
    %1265 = arith.addf %1261, %1264 : vector<8x128xf32>
    %cst_606 = arith.constant 2.000000e+00 : f32
    %1266 = vector.broadcast %cst_606 : f32 to vector<8x128xf32>
    %1267 = arith.mulf %1266, %1265 : vector<8x128xf32>
    %1268 = arith.select %457, %1267, %1265 : vector<8x128xi1>, vector<8x128xf32>
    %1269 = arith.negf %1268 : vector<8x128xf32>
    %1270 = math.exp %1269 : vector<8x128xf32>
    %cst_607 = arith.constant 1.000000e+00 : f32
    %1271 = vector.broadcast %cst_607 : f32 to vector<8x128xf32>
    %1272 = arith.addf %1271, %1270 : vector<8x128xf32>
    %1273 = arith.divf %1271, %1272 : vector<8x128xf32>
    %cst_608 = arith.constant 2.000000e+00 : f32
    %1274 = vector.broadcast %cst_608 : f32 to vector<8x128xf32>
    %1275 = arith.mulf %1274, %1273 : vector<8x128xf32>
    %cst_609 = arith.constant 1.000000e+00 : f32
    %1276 = vector.broadcast %cst_609 : f32 to vector<8x128xf32>
    %1277 = arith.subf %1275, %1276 : vector<8x128xf32>
    %1278 = arith.select %457, %1277, %1273 : vector<8x128xi1>, vector<8x128xf32>
    %1279 = vector.extract_strided_slice %1278 {offsets = [0, 0], sizes = [8, 32], strides = [1, 1]} : vector<8x128xf32> to vector<8x32xf32>
    %1280 = vector.extract_strided_slice %1278 {offsets = [0, 32], sizes = [8, 32], strides = [1, 1]} : vector<8x128xf32> to vector<8x32xf32>
    %1281 = vector.extract_strided_slice %1278 {offsets = [0, 64], sizes = [8, 32], strides = [1, 1]} : vector<8x128xf32> to vector<8x32xf32>
    %1282 = vector.extract_strided_slice %1278 {offsets = [0, 96], sizes = [8, 32], strides = [1, 1]} : vector<8x128xf32> to vector<8x32xf32>
    %1283 = arith.mulf %1280, %1122 : vector<8x32xf32>
    %1284 = arith.mulf %1279, %1281 : vector<8x32xf32>
    %1285 = arith.addf %1283, %1284 : vector<8x32xf32>
    %1286 = math.tanh %1285 : vector<8x32xf32>
    %1287 = arith.mulf %1282, %1286 : vector<8x32xf32>
    %1288 = arith.truncf %1287 : vector<8x32xf32> to vector<8x32xbf16>
    %c0_610 = arith.constant 0 : index
    %c0_611 = arith.constant 0 : index
    %1289 = vector.load %arg5[%c0_610, %c0_611] : memref<32x128xbf16, #tpu.memory_space<vmem>>, vector<32x128xbf16>
    %cst_612 = arith.constant dense<0.000000e+00> : vector<8x128xf32>
    %1290 = tpu.matmul %1288, %1289, %cst_612 {dimension_numbers = #tpu.dot_dimension_numbers<[1], [0], [0], [1], [0, 0, 1, 1], [], []>} : vector<8x32xbf16>, vector<32x128xbf16>, vector<8x128xf32> -> vector<8x128xf32>
    %c56_613 = arith.constant 56 : index
    %c0_614 = arith.constant 0 : index
    %1291 = vector.load %arg11[%c56_613, %c0_614] : memref<64x128xf32, #tpu.memory_space<vmem>>, vector<8x128xf32>
    %1292 = arith.addf %1291, %1160 : vector<8x128xf32>
    %c0_615 = arith.constant 0 : index
    %c0_616 = arith.constant 0 : index
    %c0_617 = arith.constant 0 : index
    %1293 = vector.load %arg6[%c0_615, %c0_616, %c0_617] : memref<5x1x128xf32, #tpu.memory_space<vmem>>, vector<1x1x128xf32>
    %1294 = vector.shape_cast %1293 : vector<1x1x128xf32> to vector<1x128xf32>
    %1295 = vector.broadcast %1294 : vector<1x128xf32> to vector<8x128xf32>
    %1296 = arith.addf %1292, %1295 : vector<8x128xf32>
    %cst_618 = arith.constant 2.000000e+00 : f32
    %1297 = vector.broadcast %cst_618 : f32 to vector<8x128xf32>
    %1298 = arith.mulf %1297, %1296 : vector<8x128xf32>
    %1299 = arith.select %457, %1298, %1296 : vector<8x128xi1>, vector<8x128xf32>
    %1300 = arith.negf %1299 : vector<8x128xf32>
    %1301 = math.exp %1300 : vector<8x128xf32>
    %cst_619 = arith.constant 1.000000e+00 : f32
    %1302 = vector.broadcast %cst_619 : f32 to vector<8x128xf32>
    %1303 = arith.addf %1302, %1301 : vector<8x128xf32>
    %1304 = arith.divf %1302, %1303 : vector<8x128xf32>
    %cst_620 = arith.constant 2.000000e+00 : f32
    %1305 = vector.broadcast %cst_620 : f32 to vector<8x128xf32>
    %1306 = arith.mulf %1305, %1304 : vector<8x128xf32>
    %cst_621 = arith.constant 1.000000e+00 : f32
    %1307 = vector.broadcast %cst_621 : f32 to vector<8x128xf32>
    %1308 = arith.subf %1306, %1307 : vector<8x128xf32>
    %1309 = arith.select %457, %1308, %1304 : vector<8x128xi1>, vector<8x128xf32>
    %1310 = vector.extract_strided_slice %1309 {offsets = [0, 0], sizes = [8, 32], strides = [1, 1]} : vector<8x128xf32> to vector<8x32xf32>
    %1311 = vector.extract_strided_slice %1309 {offsets = [0, 32], sizes = [8, 32], strides = [1, 1]} : vector<8x128xf32> to vector<8x32xf32>
    %1312 = vector.extract_strided_slice %1309 {offsets = [0, 64], sizes = [8, 32], strides = [1, 1]} : vector<8x128xf32> to vector<8x32xf32>
    %1313 = vector.extract_strided_slice %1309 {offsets = [0, 96], sizes = [8, 32], strides = [1, 1]} : vector<8x128xf32> to vector<8x32xf32>
    %1314 = arith.mulf %1311, %1153 : vector<8x32xf32>
    %1315 = arith.mulf %1310, %1312 : vector<8x32xf32>
    %1316 = arith.addf %1314, %1315 : vector<8x32xf32>
    %1317 = math.tanh %1316 : vector<8x32xf32>
    %1318 = arith.mulf %1313, %1317 : vector<8x32xf32>
    %1319 = arith.truncf %1318 : vector<8x32xf32> to vector<8x32xbf16>
    %c0_622 = arith.constant 0 : index
    %c0_623 = arith.constant 0 : index
    %c0_624 = arith.constant 0 : index
    %1320 = vector.load %arg4[%c0_622, %c0_623, %c0_624] : memref<4x32x256xbf16, #tpu.memory_space<vmem>>, vector<1x32x256xbf16>
    %1321 = vector.shape_cast %1320 : vector<1x32x256xbf16> to vector<32x256xbf16>
    %cst_625 = arith.constant dense<0.000000e+00> : vector<8x256xf32>
    %1322 = tpu.matmul %1319, %1321, %cst_625 {dimension_numbers = #tpu.dot_dimension_numbers<[1], [0], [0], [1], [0, 0, 1, 1], [], []>} : vector<8x32xbf16>, vector<32x256xbf16>, vector<8x256xf32> -> vector<8x256xf32>
    %1323 = vector.extract_strided_slice %1322 {offsets = [0, 128], sizes = [8, 128], strides = [1, 1]} : vector<8x256xf32> to vector<8x128xf32>
    %1324 = arith.addf %1161, %1193 : vector<8x128xf32>
    %c1_626 = arith.constant 1 : index
    %c0_627 = arith.constant 0 : index
    %c0_628 = arith.constant 0 : index
    %1325 = vector.load %arg6[%c1_626, %c0_627, %c0_628] : memref<5x1x128xf32, #tpu.memory_space<vmem>>, vector<1x1x128xf32>
    %1326 = vector.shape_cast %1325 : vector<1x1x128xf32> to vector<1x128xf32>
    %1327 = vector.broadcast %1326 : vector<1x128xf32> to vector<8x128xf32>
    %1328 = arith.addf %1324, %1327 : vector<8x128xf32>
    %cst_629 = arith.constant 2.000000e+00 : f32
    %1329 = vector.broadcast %cst_629 : f32 to vector<8x128xf32>
    %1330 = arith.mulf %1329, %1328 : vector<8x128xf32>
    %1331 = arith.select %457, %1330, %1328 : vector<8x128xi1>, vector<8x128xf32>
    %1332 = arith.negf %1331 : vector<8x128xf32>
    %1333 = math.exp %1332 : vector<8x128xf32>
    %cst_630 = arith.constant 1.000000e+00 : f32
    %1334 = vector.broadcast %cst_630 : f32 to vector<8x128xf32>
    %1335 = arith.addf %1334, %1333 : vector<8x128xf32>
    %1336 = arith.divf %1334, %1335 : vector<8x128xf32>
    %cst_631 = arith.constant 2.000000e+00 : f32
    %1337 = vector.broadcast %cst_631 : f32 to vector<8x128xf32>
    %1338 = arith.mulf %1337, %1336 : vector<8x128xf32>
    %cst_632 = arith.constant 1.000000e+00 : f32
    %1339 = vector.broadcast %cst_632 : f32 to vector<8x128xf32>
    %1340 = arith.subf %1338, %1339 : vector<8x128xf32>
    %1341 = arith.select %457, %1340, %1336 : vector<8x128xi1>, vector<8x128xf32>
    %1342 = vector.extract_strided_slice %1341 {offsets = [0, 0], sizes = [8, 32], strides = [1, 1]} : vector<8x128xf32> to vector<8x32xf32>
    %1343 = vector.extract_strided_slice %1341 {offsets = [0, 32], sizes = [8, 32], strides = [1, 1]} : vector<8x128xf32> to vector<8x32xf32>
    %1344 = vector.extract_strided_slice %1341 {offsets = [0, 64], sizes = [8, 32], strides = [1, 1]} : vector<8x128xf32> to vector<8x32xf32>
    %1345 = vector.extract_strided_slice %1341 {offsets = [0, 96], sizes = [8, 32], strides = [1, 1]} : vector<8x128xf32> to vector<8x32xf32>
    %1346 = arith.mulf %1343, %1186 : vector<8x32xf32>
    %1347 = arith.mulf %1342, %1344 : vector<8x32xf32>
    %1348 = arith.addf %1346, %1347 : vector<8x32xf32>
    %1349 = math.tanh %1348 : vector<8x32xf32>
    %1350 = arith.mulf %1345, %1349 : vector<8x32xf32>
    %1351 = arith.truncf %1350 : vector<8x32xf32> to vector<8x32xbf16>
    %c1_633 = arith.constant 1 : index
    %c0_634 = arith.constant 0 : index
    %c0_635 = arith.constant 0 : index
    %1352 = vector.load %arg4[%c1_633, %c0_634, %c0_635] : memref<4x32x256xbf16, #tpu.memory_space<vmem>>, vector<1x32x256xbf16>
    %1353 = vector.shape_cast %1352 : vector<1x32x256xbf16> to vector<32x256xbf16>
    %cst_636 = arith.constant dense<0.000000e+00> : vector<8x256xf32>
    %1354 = tpu.matmul %1351, %1353, %cst_636 {dimension_numbers = #tpu.dot_dimension_numbers<[1], [0], [0], [1], [0, 0, 1, 1], [], []>} : vector<8x32xbf16>, vector<32x256xbf16>, vector<8x256xf32> -> vector<8x256xf32>
    %1355 = vector.extract_strided_slice %1354 {offsets = [0, 0], sizes = [8, 128], strides = [1, 1]} : vector<8x256xf32> to vector<8x128xf32>
    %1356 = vector.extract_strided_slice %1354 {offsets = [0, 128], sizes = [8, 128], strides = [1, 1]} : vector<8x256xf32> to vector<8x128xf32>
    %1357 = arith.addf %1194, %1226 : vector<8x128xf32>
    %c2_637 = arith.constant 2 : index
    %c0_638 = arith.constant 0 : index
    %c0_639 = arith.constant 0 : index
    %1358 = vector.load %arg6[%c2_637, %c0_638, %c0_639] : memref<5x1x128xf32, #tpu.memory_space<vmem>>, vector<1x1x128xf32>
    %1359 = vector.shape_cast %1358 : vector<1x1x128xf32> to vector<1x128xf32>
    %1360 = vector.broadcast %1359 : vector<1x128xf32> to vector<8x128xf32>
    %1361 = arith.addf %1357, %1360 : vector<8x128xf32>
    %cst_640 = arith.constant 2.000000e+00 : f32
    %1362 = vector.broadcast %cst_640 : f32 to vector<8x128xf32>
    %1363 = arith.mulf %1362, %1361 : vector<8x128xf32>
    %1364 = arith.select %457, %1363, %1361 : vector<8x128xi1>, vector<8x128xf32>
    %1365 = arith.negf %1364 : vector<8x128xf32>
    %1366 = math.exp %1365 : vector<8x128xf32>
    %cst_641 = arith.constant 1.000000e+00 : f32
    %1367 = vector.broadcast %cst_641 : f32 to vector<8x128xf32>
    %1368 = arith.addf %1367, %1366 : vector<8x128xf32>
    %1369 = arith.divf %1367, %1368 : vector<8x128xf32>
    %cst_642 = arith.constant 2.000000e+00 : f32
    %1370 = vector.broadcast %cst_642 : f32 to vector<8x128xf32>
    %1371 = arith.mulf %1370, %1369 : vector<8x128xf32>
    %cst_643 = arith.constant 1.000000e+00 : f32
    %1372 = vector.broadcast %cst_643 : f32 to vector<8x128xf32>
    %1373 = arith.subf %1371, %1372 : vector<8x128xf32>
    %1374 = arith.select %457, %1373, %1369 : vector<8x128xi1>, vector<8x128xf32>
    %1375 = vector.extract_strided_slice %1374 {offsets = [0, 0], sizes = [8, 32], strides = [1, 1]} : vector<8x128xf32> to vector<8x32xf32>
    %1376 = vector.extract_strided_slice %1374 {offsets = [0, 32], sizes = [8, 32], strides = [1, 1]} : vector<8x128xf32> to vector<8x32xf32>
    %1377 = vector.extract_strided_slice %1374 {offsets = [0, 64], sizes = [8, 32], strides = [1, 1]} : vector<8x128xf32> to vector<8x32xf32>
    %1378 = vector.extract_strided_slice %1374 {offsets = [0, 96], sizes = [8, 32], strides = [1, 1]} : vector<8x128xf32> to vector<8x32xf32>
    %1379 = arith.mulf %1376, %1219 : vector<8x32xf32>
    %1380 = arith.mulf %1375, %1377 : vector<8x32xf32>
    %1381 = arith.addf %1379, %1380 : vector<8x32xf32>
    %1382 = math.tanh %1381 : vector<8x32xf32>
    %1383 = arith.mulf %1378, %1382 : vector<8x32xf32>
    %1384 = arith.truncf %1383 : vector<8x32xf32> to vector<8x32xbf16>
    %c2_644 = arith.constant 2 : index
    %c0_645 = arith.constant 0 : index
    %c0_646 = arith.constant 0 : index
    %1385 = vector.load %arg4[%c2_644, %c0_645, %c0_646] : memref<4x32x256xbf16, #tpu.memory_space<vmem>>, vector<1x32x256xbf16>
    %1386 = vector.shape_cast %1385 : vector<1x32x256xbf16> to vector<32x256xbf16>
    %cst_647 = arith.constant dense<0.000000e+00> : vector<8x256xf32>
    %1387 = tpu.matmul %1384, %1386, %cst_647 {dimension_numbers = #tpu.dot_dimension_numbers<[1], [0], [0], [1], [0, 0, 1, 1], [], []>} : vector<8x32xbf16>, vector<32x256xbf16>, vector<8x256xf32> -> vector<8x256xf32>
    %1388 = vector.extract_strided_slice %1387 {offsets = [0, 0], sizes = [8, 128], strides = [1, 1]} : vector<8x256xf32> to vector<8x128xf32>
    %1389 = vector.extract_strided_slice %1387 {offsets = [0, 128], sizes = [8, 128], strides = [1, 1]} : vector<8x256xf32> to vector<8x128xf32>
    %1390 = arith.addf %1227, %1259 : vector<8x128xf32>
    %c3_648 = arith.constant 3 : index
    %c0_649 = arith.constant 0 : index
    %c0_650 = arith.constant 0 : index
    %1391 = vector.load %arg6[%c3_648, %c0_649, %c0_650] : memref<5x1x128xf32, #tpu.memory_space<vmem>>, vector<1x1x128xf32>
    %1392 = vector.shape_cast %1391 : vector<1x1x128xf32> to vector<1x128xf32>
    %1393 = vector.broadcast %1392 : vector<1x128xf32> to vector<8x128xf32>
    %1394 = arith.addf %1390, %1393 : vector<8x128xf32>
    %cst_651 = arith.constant 2.000000e+00 : f32
    %1395 = vector.broadcast %cst_651 : f32 to vector<8x128xf32>
    %1396 = arith.mulf %1395, %1394 : vector<8x128xf32>
    %1397 = arith.select %457, %1396, %1394 : vector<8x128xi1>, vector<8x128xf32>
    %1398 = arith.negf %1397 : vector<8x128xf32>
    %1399 = math.exp %1398 : vector<8x128xf32>
    %cst_652 = arith.constant 1.000000e+00 : f32
    %1400 = vector.broadcast %cst_652 : f32 to vector<8x128xf32>
    %1401 = arith.addf %1400, %1399 : vector<8x128xf32>
    %1402 = arith.divf %1400, %1401 : vector<8x128xf32>
    %cst_653 = arith.constant 2.000000e+00 : f32
    %1403 = vector.broadcast %cst_653 : f32 to vector<8x128xf32>
    %1404 = arith.mulf %1403, %1402 : vector<8x128xf32>
    %cst_654 = arith.constant 1.000000e+00 : f32
    %1405 = vector.broadcast %cst_654 : f32 to vector<8x128xf32>
    %1406 = arith.subf %1404, %1405 : vector<8x128xf32>
    %1407 = arith.select %457, %1406, %1402 : vector<8x128xi1>, vector<8x128xf32>
    %1408 = vector.extract_strided_slice %1407 {offsets = [0, 0], sizes = [8, 32], strides = [1, 1]} : vector<8x128xf32> to vector<8x32xf32>
    %1409 = vector.extract_strided_slice %1407 {offsets = [0, 32], sizes = [8, 32], strides = [1, 1]} : vector<8x128xf32> to vector<8x32xf32>
    %1410 = vector.extract_strided_slice %1407 {offsets = [0, 64], sizes = [8, 32], strides = [1, 1]} : vector<8x128xf32> to vector<8x32xf32>
    %1411 = vector.extract_strided_slice %1407 {offsets = [0, 96], sizes = [8, 32], strides = [1, 1]} : vector<8x128xf32> to vector<8x32xf32>
    %1412 = arith.mulf %1409, %1252 : vector<8x32xf32>
    %1413 = arith.mulf %1408, %1410 : vector<8x32xf32>
    %1414 = arith.addf %1412, %1413 : vector<8x32xf32>
    %1415 = math.tanh %1414 : vector<8x32xf32>
    %1416 = arith.mulf %1411, %1415 : vector<8x32xf32>
    %1417 = arith.truncf %1416 : vector<8x32xf32> to vector<8x32xbf16>
    %c3_655 = arith.constant 3 : index
    %c0_656 = arith.constant 0 : index
    %c0_657 = arith.constant 0 : index
    %1418 = vector.load %arg4[%c3_655, %c0_656, %c0_657] : memref<4x32x256xbf16, #tpu.memory_space<vmem>>, vector<1x32x256xbf16>
    %1419 = vector.shape_cast %1418 : vector<1x32x256xbf16> to vector<32x256xbf16>
    %cst_658 = arith.constant dense<0.000000e+00> : vector<8x256xf32>
    %1420 = tpu.matmul %1417, %1419, %cst_658 {dimension_numbers = #tpu.dot_dimension_numbers<[1], [0], [0], [1], [0, 0, 1, 1], [], []>} : vector<8x32xbf16>, vector<32x256xbf16>, vector<8x256xf32> -> vector<8x256xf32>
    %1421 = vector.extract_strided_slice %1420 {offsets = [0, 0], sizes = [8, 128], strides = [1, 1]} : vector<8x256xf32> to vector<8x128xf32>
    %1422 = vector.extract_strided_slice %1420 {offsets = [0, 128], sizes = [8, 128], strides = [1, 1]} : vector<8x256xf32> to vector<8x128xf32>
    %1423 = arith.addf %1260, %1290 : vector<8x128xf32>
    %c4_659 = arith.constant 4 : index
    %c0_660 = arith.constant 0 : index
    %c0_661 = arith.constant 0 : index
    %1424 = vector.load %arg6[%c4_659, %c0_660, %c0_661] : memref<5x1x128xf32, #tpu.memory_space<vmem>>, vector<1x1x128xf32>
    %1425 = vector.shape_cast %1424 : vector<1x1x128xf32> to vector<1x128xf32>
    %1426 = vector.broadcast %1425 : vector<1x128xf32> to vector<8x128xf32>
    %1427 = arith.addf %1423, %1426 : vector<8x128xf32>
    %cst_662 = arith.constant 2.000000e+00 : f32
    %1428 = vector.broadcast %cst_662 : f32 to vector<8x128xf32>
    %1429 = arith.mulf %1428, %1427 : vector<8x128xf32>
    %1430 = arith.select %457, %1429, %1427 : vector<8x128xi1>, vector<8x128xf32>
    %1431 = arith.negf %1430 : vector<8x128xf32>
    %1432 = math.exp %1431 : vector<8x128xf32>
    %cst_663 = arith.constant 1.000000e+00 : f32
    %1433 = vector.broadcast %cst_663 : f32 to vector<8x128xf32>
    %1434 = arith.addf %1433, %1432 : vector<8x128xf32>
    %1435 = arith.divf %1433, %1434 : vector<8x128xf32>
    %cst_664 = arith.constant 2.000000e+00 : f32
    %1436 = vector.broadcast %cst_664 : f32 to vector<8x128xf32>
    %1437 = arith.mulf %1436, %1435 : vector<8x128xf32>
    %cst_665 = arith.constant 1.000000e+00 : f32
    %1438 = vector.broadcast %cst_665 : f32 to vector<8x128xf32>
    %1439 = arith.subf %1437, %1438 : vector<8x128xf32>
    %1440 = arith.select %457, %1439, %1435 : vector<8x128xi1>, vector<8x128xf32>
    %1441 = vector.extract_strided_slice %1440 {offsets = [0, 0], sizes = [8, 32], strides = [1, 1]} : vector<8x128xf32> to vector<8x32xf32>
    %1442 = vector.extract_strided_slice %1440 {offsets = [0, 32], sizes = [8, 32], strides = [1, 1]} : vector<8x128xf32> to vector<8x32xf32>
    %1443 = vector.extract_strided_slice %1440 {offsets = [0, 64], sizes = [8, 32], strides = [1, 1]} : vector<8x128xf32> to vector<8x32xf32>
    %1444 = vector.extract_strided_slice %1440 {offsets = [0, 96], sizes = [8, 32], strides = [1, 1]} : vector<8x128xf32> to vector<8x32xf32>
    %1445 = arith.mulf %1442, %1285 : vector<8x32xf32>
    %1446 = arith.mulf %1441, %1443 : vector<8x32xf32>
    %1447 = arith.addf %1445, %1446 : vector<8x32xf32>
    %1448 = math.tanh %1447 : vector<8x32xf32>
    %1449 = arith.mulf %1444, %1448 : vector<8x32xf32>
    %1450 = arith.truncf %1449 : vector<8x32xf32> to vector<8x32xbf16>
    %c0_666 = arith.constant 0 : index
    %c0_667 = arith.constant 0 : index
    %1451 = vector.load %arg5[%c0_666, %c0_667] : memref<32x128xbf16, #tpu.memory_space<vmem>>, vector<32x128xbf16>
    %cst_668 = arith.constant dense<0.000000e+00> : vector<8x128xf32>
    %1452 = tpu.matmul %1450, %1451, %cst_668 {dimension_numbers = #tpu.dot_dimension_numbers<[1], [0], [0], [1], [0, 0, 1, 1], [], []>} : vector<8x32xbf16>, vector<32x128xbf16>, vector<8x128xf32> -> vector<8x128xf32>
    %1453 = arith.addf %1323, %1355 : vector<8x128xf32>
    %c1_669 = arith.constant 1 : index
    %c0_670 = arith.constant 0 : index
    %c0_671 = arith.constant 0 : index
    %1454 = vector.load %arg6[%c1_669, %c0_670, %c0_671] : memref<5x1x128xf32, #tpu.memory_space<vmem>>, vector<1x1x128xf32>
    %1455 = vector.shape_cast %1454 : vector<1x1x128xf32> to vector<1x128xf32>
    %1456 = vector.broadcast %1455 : vector<1x128xf32> to vector<8x128xf32>
    %1457 = arith.addf %1453, %1456 : vector<8x128xf32>
    %cst_672 = arith.constant 2.000000e+00 : f32
    %1458 = vector.broadcast %cst_672 : f32 to vector<8x128xf32>
    %1459 = arith.mulf %1458, %1457 : vector<8x128xf32>
    %1460 = arith.select %457, %1459, %1457 : vector<8x128xi1>, vector<8x128xf32>
    %1461 = arith.negf %1460 : vector<8x128xf32>
    %1462 = math.exp %1461 : vector<8x128xf32>
    %cst_673 = arith.constant 1.000000e+00 : f32
    %1463 = vector.broadcast %cst_673 : f32 to vector<8x128xf32>
    %1464 = arith.addf %1463, %1462 : vector<8x128xf32>
    %1465 = arith.divf %1463, %1464 : vector<8x128xf32>
    %cst_674 = arith.constant 2.000000e+00 : f32
    %1466 = vector.broadcast %cst_674 : f32 to vector<8x128xf32>
    %1467 = arith.mulf %1466, %1465 : vector<8x128xf32>
    %cst_675 = arith.constant 1.000000e+00 : f32
    %1468 = vector.broadcast %cst_675 : f32 to vector<8x128xf32>
    %1469 = arith.subf %1467, %1468 : vector<8x128xf32>
    %1470 = arith.select %457, %1469, %1465 : vector<8x128xi1>, vector<8x128xf32>
    %1471 = vector.extract_strided_slice %1470 {offsets = [0, 0], sizes = [8, 32], strides = [1, 1]} : vector<8x128xf32> to vector<8x32xf32>
    %1472 = vector.extract_strided_slice %1470 {offsets = [0, 32], sizes = [8, 32], strides = [1, 1]} : vector<8x128xf32> to vector<8x32xf32>
    %1473 = vector.extract_strided_slice %1470 {offsets = [0, 64], sizes = [8, 32], strides = [1, 1]} : vector<8x128xf32> to vector<8x32xf32>
    %1474 = vector.extract_strided_slice %1470 {offsets = [0, 96], sizes = [8, 32], strides = [1, 1]} : vector<8x128xf32> to vector<8x32xf32>
    %1475 = arith.mulf %1472, %1348 : vector<8x32xf32>
    %1476 = arith.mulf %1471, %1473 : vector<8x32xf32>
    %1477 = arith.addf %1475, %1476 : vector<8x32xf32>
    %1478 = math.tanh %1477 : vector<8x32xf32>
    %1479 = arith.mulf %1474, %1478 : vector<8x32xf32>
    %1480 = arith.truncf %1479 : vector<8x32xf32> to vector<8x32xbf16>
    %c1_676 = arith.constant 1 : index
    %c0_677 = arith.constant 0 : index
    %c0_678 = arith.constant 0 : index
    %1481 = vector.load %arg4[%c1_676, %c0_677, %c0_678] : memref<4x32x256xbf16, #tpu.memory_space<vmem>>, vector<1x32x256xbf16>
    %1482 = vector.shape_cast %1481 : vector<1x32x256xbf16> to vector<32x256xbf16>
    %cst_679 = arith.constant dense<0.000000e+00> : vector<8x256xf32>
    %1483 = tpu.matmul %1480, %1482, %cst_679 {dimension_numbers = #tpu.dot_dimension_numbers<[1], [0], [0], [1], [0, 0, 1, 1], [], []>} : vector<8x32xbf16>, vector<32x256xbf16>, vector<8x256xf32> -> vector<8x256xf32>
    %1484 = vector.extract_strided_slice %1483 {offsets = [0, 128], sizes = [8, 128], strides = [1, 1]} : vector<8x256xf32> to vector<8x128xf32>
    %1485 = arith.addf %1356, %1388 : vector<8x128xf32>
    %c2_680 = arith.constant 2 : index
    %c0_681 = arith.constant 0 : index
    %c0_682 = arith.constant 0 : index
    %1486 = vector.load %arg6[%c2_680, %c0_681, %c0_682] : memref<5x1x128xf32, #tpu.memory_space<vmem>>, vector<1x1x128xf32>
    %1487 = vector.shape_cast %1486 : vector<1x1x128xf32> to vector<1x128xf32>
    %1488 = vector.broadcast %1487 : vector<1x128xf32> to vector<8x128xf32>
    %1489 = arith.addf %1485, %1488 : vector<8x128xf32>
    %cst_683 = arith.constant 2.000000e+00 : f32
    %1490 = vector.broadcast %cst_683 : f32 to vector<8x128xf32>
    %1491 = arith.mulf %1490, %1489 : vector<8x128xf32>
    %1492 = arith.select %457, %1491, %1489 : vector<8x128xi1>, vector<8x128xf32>
    %1493 = arith.negf %1492 : vector<8x128xf32>
    %1494 = math.exp %1493 : vector<8x128xf32>
    %cst_684 = arith.constant 1.000000e+00 : f32
    %1495 = vector.broadcast %cst_684 : f32 to vector<8x128xf32>
    %1496 = arith.addf %1495, %1494 : vector<8x128xf32>
    %1497 = arith.divf %1495, %1496 : vector<8x128xf32>
    %cst_685 = arith.constant 2.000000e+00 : f32
    %1498 = vector.broadcast %cst_685 : f32 to vector<8x128xf32>
    %1499 = arith.mulf %1498, %1497 : vector<8x128xf32>
    %cst_686 = arith.constant 1.000000e+00 : f32
    %1500 = vector.broadcast %cst_686 : f32 to vector<8x128xf32>
    %1501 = arith.subf %1499, %1500 : vector<8x128xf32>
    %1502 = arith.select %457, %1501, %1497 : vector<8x128xi1>, vector<8x128xf32>
    %1503 = vector.extract_strided_slice %1502 {offsets = [0, 0], sizes = [8, 32], strides = [1, 1]} : vector<8x128xf32> to vector<8x32xf32>
    %1504 = vector.extract_strided_slice %1502 {offsets = [0, 32], sizes = [8, 32], strides = [1, 1]} : vector<8x128xf32> to vector<8x32xf32>
    %1505 = vector.extract_strided_slice %1502 {offsets = [0, 64], sizes = [8, 32], strides = [1, 1]} : vector<8x128xf32> to vector<8x32xf32>
    %1506 = vector.extract_strided_slice %1502 {offsets = [0, 96], sizes = [8, 32], strides = [1, 1]} : vector<8x128xf32> to vector<8x32xf32>
    %1507 = arith.mulf %1504, %1381 : vector<8x32xf32>
    %1508 = arith.mulf %1503, %1505 : vector<8x32xf32>
    %1509 = arith.addf %1507, %1508 : vector<8x32xf32>
    %1510 = math.tanh %1509 : vector<8x32xf32>
    %1511 = arith.mulf %1506, %1510 : vector<8x32xf32>
    %1512 = arith.truncf %1511 : vector<8x32xf32> to vector<8x32xbf16>
    %c2_687 = arith.constant 2 : index
    %c0_688 = arith.constant 0 : index
    %c0_689 = arith.constant 0 : index
    %1513 = vector.load %arg4[%c2_687, %c0_688, %c0_689] : memref<4x32x256xbf16, #tpu.memory_space<vmem>>, vector<1x32x256xbf16>
    %1514 = vector.shape_cast %1513 : vector<1x32x256xbf16> to vector<32x256xbf16>
    %cst_690 = arith.constant dense<0.000000e+00> : vector<8x256xf32>
    %1515 = tpu.matmul %1512, %1514, %cst_690 {dimension_numbers = #tpu.dot_dimension_numbers<[1], [0], [0], [1], [0, 0, 1, 1], [], []>} : vector<8x32xbf16>, vector<32x256xbf16>, vector<8x256xf32> -> vector<8x256xf32>
    %1516 = vector.extract_strided_slice %1515 {offsets = [0, 0], sizes = [8, 128], strides = [1, 1]} : vector<8x256xf32> to vector<8x128xf32>
    %1517 = vector.extract_strided_slice %1515 {offsets = [0, 128], sizes = [8, 128], strides = [1, 1]} : vector<8x256xf32> to vector<8x128xf32>
    %1518 = arith.addf %1389, %1421 : vector<8x128xf32>
    %c3_691 = arith.constant 3 : index
    %c0_692 = arith.constant 0 : index
    %c0_693 = arith.constant 0 : index
    %1519 = vector.load %arg6[%c3_691, %c0_692, %c0_693] : memref<5x1x128xf32, #tpu.memory_space<vmem>>, vector<1x1x128xf32>
    %1520 = vector.shape_cast %1519 : vector<1x1x128xf32> to vector<1x128xf32>
    %1521 = vector.broadcast %1520 : vector<1x128xf32> to vector<8x128xf32>
    %1522 = arith.addf %1518, %1521 : vector<8x128xf32>
    %cst_694 = arith.constant 2.000000e+00 : f32
    %1523 = vector.broadcast %cst_694 : f32 to vector<8x128xf32>
    %1524 = arith.mulf %1523, %1522 : vector<8x128xf32>
    %1525 = arith.select %457, %1524, %1522 : vector<8x128xi1>, vector<8x128xf32>
    %1526 = arith.negf %1525 : vector<8x128xf32>
    %1527 = math.exp %1526 : vector<8x128xf32>
    %cst_695 = arith.constant 1.000000e+00 : f32
    %1528 = vector.broadcast %cst_695 : f32 to vector<8x128xf32>
    %1529 = arith.addf %1528, %1527 : vector<8x128xf32>
    %1530 = arith.divf %1528, %1529 : vector<8x128xf32>
    %cst_696 = arith.constant 2.000000e+00 : f32
    %1531 = vector.broadcast %cst_696 : f32 to vector<8x128xf32>
    %1532 = arith.mulf %1531, %1530 : vector<8x128xf32>
    %cst_697 = arith.constant 1.000000e+00 : f32
    %1533 = vector.broadcast %cst_697 : f32 to vector<8x128xf32>
    %1534 = arith.subf %1532, %1533 : vector<8x128xf32>
    %1535 = arith.select %457, %1534, %1530 : vector<8x128xi1>, vector<8x128xf32>
    %1536 = vector.extract_strided_slice %1535 {offsets = [0, 0], sizes = [8, 32], strides = [1, 1]} : vector<8x128xf32> to vector<8x32xf32>
    %1537 = vector.extract_strided_slice %1535 {offsets = [0, 32], sizes = [8, 32], strides = [1, 1]} : vector<8x128xf32> to vector<8x32xf32>
    %1538 = vector.extract_strided_slice %1535 {offsets = [0, 64], sizes = [8, 32], strides = [1, 1]} : vector<8x128xf32> to vector<8x32xf32>
    %1539 = vector.extract_strided_slice %1535 {offsets = [0, 96], sizes = [8, 32], strides = [1, 1]} : vector<8x128xf32> to vector<8x32xf32>
    %1540 = arith.mulf %1537, %1414 : vector<8x32xf32>
    %1541 = arith.mulf %1536, %1538 : vector<8x32xf32>
    %1542 = arith.addf %1540, %1541 : vector<8x32xf32>
    %1543 = math.tanh %1542 : vector<8x32xf32>
    %1544 = arith.mulf %1539, %1543 : vector<8x32xf32>
    %1545 = arith.truncf %1544 : vector<8x32xf32> to vector<8x32xbf16>
    %c3_698 = arith.constant 3 : index
    %c0_699 = arith.constant 0 : index
    %c0_700 = arith.constant 0 : index
    %1546 = vector.load %arg4[%c3_698, %c0_699, %c0_700] : memref<4x32x256xbf16, #tpu.memory_space<vmem>>, vector<1x32x256xbf16>
    %1547 = vector.shape_cast %1546 : vector<1x32x256xbf16> to vector<32x256xbf16>
    %cst_701 = arith.constant dense<0.000000e+00> : vector<8x256xf32>
    %1548 = tpu.matmul %1545, %1547, %cst_701 {dimension_numbers = #tpu.dot_dimension_numbers<[1], [0], [0], [1], [0, 0, 1, 1], [], []>} : vector<8x32xbf16>, vector<32x256xbf16>, vector<8x256xf32> -> vector<8x256xf32>
    %1549 = vector.extract_strided_slice %1548 {offsets = [0, 0], sizes = [8, 128], strides = [1, 1]} : vector<8x256xf32> to vector<8x128xf32>
    %1550 = vector.extract_strided_slice %1548 {offsets = [0, 128], sizes = [8, 128], strides = [1, 1]} : vector<8x256xf32> to vector<8x128xf32>
    %1551 = arith.addf %1422, %1452 : vector<8x128xf32>
    %c4_702 = arith.constant 4 : index
    %c0_703 = arith.constant 0 : index
    %c0_704 = arith.constant 0 : index
    %1552 = vector.load %arg6[%c4_702, %c0_703, %c0_704] : memref<5x1x128xf32, #tpu.memory_space<vmem>>, vector<1x1x128xf32>
    %1553 = vector.shape_cast %1552 : vector<1x1x128xf32> to vector<1x128xf32>
    %1554 = vector.broadcast %1553 : vector<1x128xf32> to vector<8x128xf32>
    %1555 = arith.addf %1551, %1554 : vector<8x128xf32>
    %cst_705 = arith.constant 2.000000e+00 : f32
    %1556 = vector.broadcast %cst_705 : f32 to vector<8x128xf32>
    %1557 = arith.mulf %1556, %1555 : vector<8x128xf32>
    %1558 = arith.select %457, %1557, %1555 : vector<8x128xi1>, vector<8x128xf32>
    %1559 = arith.negf %1558 : vector<8x128xf32>
    %1560 = math.exp %1559 : vector<8x128xf32>
    %cst_706 = arith.constant 1.000000e+00 : f32
    %1561 = vector.broadcast %cst_706 : f32 to vector<8x128xf32>
    %1562 = arith.addf %1561, %1560 : vector<8x128xf32>
    %1563 = arith.divf %1561, %1562 : vector<8x128xf32>
    %cst_707 = arith.constant 2.000000e+00 : f32
    %1564 = vector.broadcast %cst_707 : f32 to vector<8x128xf32>
    %1565 = arith.mulf %1564, %1563 : vector<8x128xf32>
    %cst_708 = arith.constant 1.000000e+00 : f32
    %1566 = vector.broadcast %cst_708 : f32 to vector<8x128xf32>
    %1567 = arith.subf %1565, %1566 : vector<8x128xf32>
    %1568 = arith.select %457, %1567, %1563 : vector<8x128xi1>, vector<8x128xf32>
    %1569 = vector.extract_strided_slice %1568 {offsets = [0, 0], sizes = [8, 32], strides = [1, 1]} : vector<8x128xf32> to vector<8x32xf32>
    %1570 = vector.extract_strided_slice %1568 {offsets = [0, 32], sizes = [8, 32], strides = [1, 1]} : vector<8x128xf32> to vector<8x32xf32>
    %1571 = vector.extract_strided_slice %1568 {offsets = [0, 64], sizes = [8, 32], strides = [1, 1]} : vector<8x128xf32> to vector<8x32xf32>
    %1572 = vector.extract_strided_slice %1568 {offsets = [0, 96], sizes = [8, 32], strides = [1, 1]} : vector<8x128xf32> to vector<8x32xf32>
    %1573 = arith.mulf %1570, %1447 : vector<8x32xf32>
    %1574 = arith.mulf %1569, %1571 : vector<8x32xf32>
    %1575 = arith.addf %1573, %1574 : vector<8x32xf32>
    %1576 = math.tanh %1575 : vector<8x32xf32>
    %1577 = arith.mulf %1572, %1576 : vector<8x32xf32>
    %1578 = arith.truncf %1577 : vector<8x32xf32> to vector<8x32xbf16>
    %c0_709 = arith.constant 0 : index
    %c0_710 = arith.constant 0 : index
    %1579 = vector.load %arg5[%c0_709, %c0_710] : memref<32x128xbf16, #tpu.memory_space<vmem>>, vector<32x128xbf16>
    %cst_711 = arith.constant dense<0.000000e+00> : vector<8x128xf32>
    %1580 = tpu.matmul %1578, %1579, %cst_711 {dimension_numbers = #tpu.dot_dimension_numbers<[1], [0], [0], [1], [0, 0, 1, 1], [], []>} : vector<8x32xbf16>, vector<32x128xbf16>, vector<8x128xf32> -> vector<8x128xf32>
    %1581 = arith.addf %1484, %1516 : vector<8x128xf32>
    %c2_712 = arith.constant 2 : index
    %c0_713 = arith.constant 0 : index
    %c0_714 = arith.constant 0 : index
    %1582 = vector.load %arg6[%c2_712, %c0_713, %c0_714] : memref<5x1x128xf32, #tpu.memory_space<vmem>>, vector<1x1x128xf32>
    %1583 = vector.shape_cast %1582 : vector<1x1x128xf32> to vector<1x128xf32>
    %1584 = vector.broadcast %1583 : vector<1x128xf32> to vector<8x128xf32>
    %1585 = arith.addf %1581, %1584 : vector<8x128xf32>
    %cst_715 = arith.constant 2.000000e+00 : f32
    %1586 = vector.broadcast %cst_715 : f32 to vector<8x128xf32>
    %1587 = arith.mulf %1586, %1585 : vector<8x128xf32>
    %1588 = arith.select %457, %1587, %1585 : vector<8x128xi1>, vector<8x128xf32>
    %1589 = arith.negf %1588 : vector<8x128xf32>
    %1590 = math.exp %1589 : vector<8x128xf32>
    %cst_716 = arith.constant 1.000000e+00 : f32
    %1591 = vector.broadcast %cst_716 : f32 to vector<8x128xf32>
    %1592 = arith.addf %1591, %1590 : vector<8x128xf32>
    %1593 = arith.divf %1591, %1592 : vector<8x128xf32>
    %cst_717 = arith.constant 2.000000e+00 : f32
    %1594 = vector.broadcast %cst_717 : f32 to vector<8x128xf32>
    %1595 = arith.mulf %1594, %1593 : vector<8x128xf32>
    %cst_718 = arith.constant 1.000000e+00 : f32
    %1596 = vector.broadcast %cst_718 : f32 to vector<8x128xf32>
    %1597 = arith.subf %1595, %1596 : vector<8x128xf32>
    %1598 = arith.select %457, %1597, %1593 : vector<8x128xi1>, vector<8x128xf32>
    %1599 = vector.extract_strided_slice %1598 {offsets = [0, 0], sizes = [8, 32], strides = [1, 1]} : vector<8x128xf32> to vector<8x32xf32>
    %1600 = vector.extract_strided_slice %1598 {offsets = [0, 32], sizes = [8, 32], strides = [1, 1]} : vector<8x128xf32> to vector<8x32xf32>
    %1601 = vector.extract_strided_slice %1598 {offsets = [0, 64], sizes = [8, 32], strides = [1, 1]} : vector<8x128xf32> to vector<8x32xf32>
    %1602 = vector.extract_strided_slice %1598 {offsets = [0, 96], sizes = [8, 32], strides = [1, 1]} : vector<8x128xf32> to vector<8x32xf32>
    %1603 = arith.mulf %1600, %1509 : vector<8x32xf32>
    %1604 = arith.mulf %1599, %1601 : vector<8x32xf32>
    %1605 = arith.addf %1603, %1604 : vector<8x32xf32>
    %1606 = math.tanh %1605 : vector<8x32xf32>
    %1607 = arith.mulf %1602, %1606 : vector<8x32xf32>
    %1608 = arith.truncf %1607 : vector<8x32xf32> to vector<8x32xbf16>
    %c2_719 = arith.constant 2 : index
    %c0_720 = arith.constant 0 : index
    %c0_721 = arith.constant 0 : index
    %1609 = vector.load %arg4[%c2_719, %c0_720, %c0_721] : memref<4x32x256xbf16, #tpu.memory_space<vmem>>, vector<1x32x256xbf16>
    %1610 = vector.shape_cast %1609 : vector<1x32x256xbf16> to vector<32x256xbf16>
    %cst_722 = arith.constant dense<0.000000e+00> : vector<8x256xf32>
    %1611 = tpu.matmul %1608, %1610, %cst_722 {dimension_numbers = #tpu.dot_dimension_numbers<[1], [0], [0], [1], [0, 0, 1, 1], [], []>} : vector<8x32xbf16>, vector<32x256xbf16>, vector<8x256xf32> -> vector<8x256xf32>
    %1612 = vector.extract_strided_slice %1611 {offsets = [0, 128], sizes = [8, 128], strides = [1, 1]} : vector<8x256xf32> to vector<8x128xf32>
    %1613 = arith.addf %1517, %1549 : vector<8x128xf32>
    %c3_723 = arith.constant 3 : index
    %c0_724 = arith.constant 0 : index
    %c0_725 = arith.constant 0 : index
    %1614 = vector.load %arg6[%c3_723, %c0_724, %c0_725] : memref<5x1x128xf32, #tpu.memory_space<vmem>>, vector<1x1x128xf32>
    %1615 = vector.shape_cast %1614 : vector<1x1x128xf32> to vector<1x128xf32>
    %1616 = vector.broadcast %1615 : vector<1x128xf32> to vector<8x128xf32>
    %1617 = arith.addf %1613, %1616 : vector<8x128xf32>
    %cst_726 = arith.constant 2.000000e+00 : f32
    %1618 = vector.broadcast %cst_726 : f32 to vector<8x128xf32>
    %1619 = arith.mulf %1618, %1617 : vector<8x128xf32>
    %1620 = arith.select %457, %1619, %1617 : vector<8x128xi1>, vector<8x128xf32>
    %1621 = arith.negf %1620 : vector<8x128xf32>
    %1622 = math.exp %1621 : vector<8x128xf32>
    %cst_727 = arith.constant 1.000000e+00 : f32
    %1623 = vector.broadcast %cst_727 : f32 to vector<8x128xf32>
    %1624 = arith.addf %1623, %1622 : vector<8x128xf32>
    %1625 = arith.divf %1623, %1624 : vector<8x128xf32>
    %cst_728 = arith.constant 2.000000e+00 : f32
    %1626 = vector.broadcast %cst_728 : f32 to vector<8x128xf32>
    %1627 = arith.mulf %1626, %1625 : vector<8x128xf32>
    %cst_729 = arith.constant 1.000000e+00 : f32
    %1628 = vector.broadcast %cst_729 : f32 to vector<8x128xf32>
    %1629 = arith.subf %1627, %1628 : vector<8x128xf32>
    %1630 = arith.select %457, %1629, %1625 : vector<8x128xi1>, vector<8x128xf32>
    %1631 = vector.extract_strided_slice %1630 {offsets = [0, 0], sizes = [8, 32], strides = [1, 1]} : vector<8x128xf32> to vector<8x32xf32>
    %1632 = vector.extract_strided_slice %1630 {offsets = [0, 32], sizes = [8, 32], strides = [1, 1]} : vector<8x128xf32> to vector<8x32xf32>
    %1633 = vector.extract_strided_slice %1630 {offsets = [0, 64], sizes = [8, 32], strides = [1, 1]} : vector<8x128xf32> to vector<8x32xf32>
    %1634 = vector.extract_strided_slice %1630 {offsets = [0, 96], sizes = [8, 32], strides = [1, 1]} : vector<8x128xf32> to vector<8x32xf32>
    %1635 = arith.mulf %1632, %1542 : vector<8x32xf32>
    %1636 = arith.mulf %1631, %1633 : vector<8x32xf32>
    %1637 = arith.addf %1635, %1636 : vector<8x32xf32>
    %1638 = math.tanh %1637 : vector<8x32xf32>
    %1639 = arith.mulf %1634, %1638 : vector<8x32xf32>
    %1640 = arith.truncf %1639 : vector<8x32xf32> to vector<8x32xbf16>
    %c3_730 = arith.constant 3 : index
    %c0_731 = arith.constant 0 : index
    %c0_732 = arith.constant 0 : index
    %1641 = vector.load %arg4[%c3_730, %c0_731, %c0_732] : memref<4x32x256xbf16, #tpu.memory_space<vmem>>, vector<1x32x256xbf16>
    %1642 = vector.shape_cast %1641 : vector<1x32x256xbf16> to vector<32x256xbf16>
    %cst_733 = arith.constant dense<0.000000e+00> : vector<8x256xf32>
    %1643 = tpu.matmul %1640, %1642, %cst_733 {dimension_numbers = #tpu.dot_dimension_numbers<[1], [0], [0], [1], [0, 0, 1, 1], [], []>} : vector<8x32xbf16>, vector<32x256xbf16>, vector<8x256xf32> -> vector<8x256xf32>
    %1644 = vector.extract_strided_slice %1643 {offsets = [0, 0], sizes = [8, 128], strides = [1, 1]} : vector<8x256xf32> to vector<8x128xf32>
    %1645 = vector.extract_strided_slice %1643 {offsets = [0, 128], sizes = [8, 128], strides = [1, 1]} : vector<8x256xf32> to vector<8x128xf32>
    %1646 = arith.addf %1550, %1580 : vector<8x128xf32>
    %c4_734 = arith.constant 4 : index
    %c0_735 = arith.constant 0 : index
    %c0_736 = arith.constant 0 : index
    %1647 = vector.load %arg6[%c4_734, %c0_735, %c0_736] : memref<5x1x128xf32, #tpu.memory_space<vmem>>, vector<1x1x128xf32>
    %1648 = vector.shape_cast %1647 : vector<1x1x128xf32> to vector<1x128xf32>
    %1649 = vector.broadcast %1648 : vector<1x128xf32> to vector<8x128xf32>
    %1650 = arith.addf %1646, %1649 : vector<8x128xf32>
    %cst_737 = arith.constant 2.000000e+00 : f32
    %1651 = vector.broadcast %cst_737 : f32 to vector<8x128xf32>
    %1652 = arith.mulf %1651, %1650 : vector<8x128xf32>
    %1653 = arith.select %457, %1652, %1650 : vector<8x128xi1>, vector<8x128xf32>
    %1654 = arith.negf %1653 : vector<8x128xf32>
    %1655 = math.exp %1654 : vector<8x128xf32>
    %cst_738 = arith.constant 1.000000e+00 : f32
    %1656 = vector.broadcast %cst_738 : f32 to vector<8x128xf32>
    %1657 = arith.addf %1656, %1655 : vector<8x128xf32>
    %1658 = arith.divf %1656, %1657 : vector<8x128xf32>
    %cst_739 = arith.constant 2.000000e+00 : f32
    %1659 = vector.broadcast %cst_739 : f32 to vector<8x128xf32>
    %1660 = arith.mulf %1659, %1658 : vector<8x128xf32>
    %cst_740 = arith.constant 1.000000e+00 : f32
    %1661 = vector.broadcast %cst_740 : f32 to vector<8x128xf32>
    %1662 = arith.subf %1660, %1661 : vector<8x128xf32>
    %1663 = arith.select %457, %1662, %1658 : vector<8x128xi1>, vector<8x128xf32>
    %1664 = vector.extract_strided_slice %1663 {offsets = [0, 0], sizes = [8, 32], strides = [1, 1]} : vector<8x128xf32> to vector<8x32xf32>
    %1665 = vector.extract_strided_slice %1663 {offsets = [0, 32], sizes = [8, 32], strides = [1, 1]} : vector<8x128xf32> to vector<8x32xf32>
    %1666 = vector.extract_strided_slice %1663 {offsets = [0, 64], sizes = [8, 32], strides = [1, 1]} : vector<8x128xf32> to vector<8x32xf32>
    %1667 = vector.extract_strided_slice %1663 {offsets = [0, 96], sizes = [8, 32], strides = [1, 1]} : vector<8x128xf32> to vector<8x32xf32>
    %1668 = arith.mulf %1665, %1575 : vector<8x32xf32>
    %1669 = arith.mulf %1664, %1666 : vector<8x32xf32>
    %1670 = arith.addf %1668, %1669 : vector<8x32xf32>
    %1671 = math.tanh %1670 : vector<8x32xf32>
    %1672 = arith.mulf %1667, %1671 : vector<8x32xf32>
    %1673 = arith.truncf %1672 : vector<8x32xf32> to vector<8x32xbf16>
    %c0_741 = arith.constant 0 : index
    %c0_742 = arith.constant 0 : index
    %1674 = vector.load %arg5[%c0_741, %c0_742] : memref<32x128xbf16, #tpu.memory_space<vmem>>, vector<32x128xbf16>
    %cst_743 = arith.constant dense<0.000000e+00> : vector<8x128xf32>
    %1675 = tpu.matmul %1673, %1674, %cst_743 {dimension_numbers = #tpu.dot_dimension_numbers<[1], [0], [0], [1], [0, 0, 1, 1], [], []>} : vector<8x32xbf16>, vector<32x128xbf16>, vector<8x128xf32> -> vector<8x128xf32>
    %1676 = arith.addf %1612, %1644 : vector<8x128xf32>
    %c3_744 = arith.constant 3 : index
    %c0_745 = arith.constant 0 : index
    %c0_746 = arith.constant 0 : index
    %1677 = vector.load %arg6[%c3_744, %c0_745, %c0_746] : memref<5x1x128xf32, #tpu.memory_space<vmem>>, vector<1x1x128xf32>
    %1678 = vector.shape_cast %1677 : vector<1x1x128xf32> to vector<1x128xf32>
    %1679 = vector.broadcast %1678 : vector<1x128xf32> to vector<8x128xf32>
    %1680 = arith.addf %1676, %1679 : vector<8x128xf32>
    %cst_747 = arith.constant 2.000000e+00 : f32
    %1681 = vector.broadcast %cst_747 : f32 to vector<8x128xf32>
    %1682 = arith.mulf %1681, %1680 : vector<8x128xf32>
    %1683 = arith.select %457, %1682, %1680 : vector<8x128xi1>, vector<8x128xf32>
    %1684 = arith.negf %1683 : vector<8x128xf32>
    %1685 = math.exp %1684 : vector<8x128xf32>
    %cst_748 = arith.constant 1.000000e+00 : f32
    %1686 = vector.broadcast %cst_748 : f32 to vector<8x128xf32>
    %1687 = arith.addf %1686, %1685 : vector<8x128xf32>
    %1688 = arith.divf %1686, %1687 : vector<8x128xf32>
    %cst_749 = arith.constant 2.000000e+00 : f32
    %1689 = vector.broadcast %cst_749 : f32 to vector<8x128xf32>
    %1690 = arith.mulf %1689, %1688 : vector<8x128xf32>
    %cst_750 = arith.constant 1.000000e+00 : f32
    %1691 = vector.broadcast %cst_750 : f32 to vector<8x128xf32>
    %1692 = arith.subf %1690, %1691 : vector<8x128xf32>
    %1693 = arith.select %457, %1692, %1688 : vector<8x128xi1>, vector<8x128xf32>
    %1694 = vector.extract_strided_slice %1693 {offsets = [0, 0], sizes = [8, 32], strides = [1, 1]} : vector<8x128xf32> to vector<8x32xf32>
    %1695 = vector.extract_strided_slice %1693 {offsets = [0, 32], sizes = [8, 32], strides = [1, 1]} : vector<8x128xf32> to vector<8x32xf32>
    %1696 = vector.extract_strided_slice %1693 {offsets = [0, 64], sizes = [8, 32], strides = [1, 1]} : vector<8x128xf32> to vector<8x32xf32>
    %1697 = vector.extract_strided_slice %1693 {offsets = [0, 96], sizes = [8, 32], strides = [1, 1]} : vector<8x128xf32> to vector<8x32xf32>
    %1698 = arith.mulf %1695, %1637 : vector<8x32xf32>
    %1699 = arith.mulf %1694, %1696 : vector<8x32xf32>
    %1700 = arith.addf %1698, %1699 : vector<8x32xf32>
    %1701 = math.tanh %1700 : vector<8x32xf32>
    %1702 = arith.mulf %1697, %1701 : vector<8x32xf32>
    %1703 = arith.truncf %1702 : vector<8x32xf32> to vector<8x32xbf16>
    %c3_751 = arith.constant 3 : index
    %c0_752 = arith.constant 0 : index
    %c0_753 = arith.constant 0 : index
    %1704 = vector.load %arg4[%c3_751, %c0_752, %c0_753] : memref<4x32x256xbf16, #tpu.memory_space<vmem>>, vector<1x32x256xbf16>
    %1705 = vector.shape_cast %1704 : vector<1x32x256xbf16> to vector<32x256xbf16>
    %cst_754 = arith.constant dense<0.000000e+00> : vector<8x256xf32>
    %1706 = tpu.matmul %1703, %1705, %cst_754 {dimension_numbers = #tpu.dot_dimension_numbers<[1], [0], [0], [1], [0, 0, 1, 1], [], []>} : vector<8x32xbf16>, vector<32x256xbf16>, vector<8x256xf32> -> vector<8x256xf32>
    %1707 = vector.extract_strided_slice %1706 {offsets = [0, 128], sizes = [8, 128], strides = [1, 1]} : vector<8x256xf32> to vector<8x128xf32>
    %1708 = arith.addf %1645, %1675 : vector<8x128xf32>
    %c4_755 = arith.constant 4 : index
    %c0_756 = arith.constant 0 : index
    %c0_757 = arith.constant 0 : index
    %1709 = vector.load %arg6[%c4_755, %c0_756, %c0_757] : memref<5x1x128xf32, #tpu.memory_space<vmem>>, vector<1x1x128xf32>
    %1710 = vector.shape_cast %1709 : vector<1x1x128xf32> to vector<1x128xf32>
    %1711 = vector.broadcast %1710 : vector<1x128xf32> to vector<8x128xf32>
    %1712 = arith.addf %1708, %1711 : vector<8x128xf32>
    %cst_758 = arith.constant 2.000000e+00 : f32
    %1713 = vector.broadcast %cst_758 : f32 to vector<8x128xf32>
    %1714 = arith.mulf %1713, %1712 : vector<8x128xf32>
    %1715 = arith.select %457, %1714, %1712 : vector<8x128xi1>, vector<8x128xf32>
    %1716 = arith.negf %1715 : vector<8x128xf32>
    %1717 = math.exp %1716 : vector<8x128xf32>
    %cst_759 = arith.constant 1.000000e+00 : f32
    %1718 = vector.broadcast %cst_759 : f32 to vector<8x128xf32>
    %1719 = arith.addf %1718, %1717 : vector<8x128xf32>
    %1720 = arith.divf %1718, %1719 : vector<8x128xf32>
    %cst_760 = arith.constant 2.000000e+00 : f32
    %1721 = vector.broadcast %cst_760 : f32 to vector<8x128xf32>
    %1722 = arith.mulf %1721, %1720 : vector<8x128xf32>
    %cst_761 = arith.constant 1.000000e+00 : f32
    %1723 = vector.broadcast %cst_761 : f32 to vector<8x128xf32>
    %1724 = arith.subf %1722, %1723 : vector<8x128xf32>
    %1725 = arith.select %457, %1724, %1720 : vector<8x128xi1>, vector<8x128xf32>
    %1726 = vector.extract_strided_slice %1725 {offsets = [0, 0], sizes = [8, 32], strides = [1, 1]} : vector<8x128xf32> to vector<8x32xf32>
    %1727 = vector.extract_strided_slice %1725 {offsets = [0, 32], sizes = [8, 32], strides = [1, 1]} : vector<8x128xf32> to vector<8x32xf32>
    %1728 = vector.extract_strided_slice %1725 {offsets = [0, 64], sizes = [8, 32], strides = [1, 1]} : vector<8x128xf32> to vector<8x32xf32>
    %1729 = vector.extract_strided_slice %1725 {offsets = [0, 96], sizes = [8, 32], strides = [1, 1]} : vector<8x128xf32> to vector<8x32xf32>
    %1730 = arith.mulf %1727, %1670 : vector<8x32xf32>
    %1731 = arith.mulf %1726, %1728 : vector<8x32xf32>
    %1732 = arith.addf %1730, %1731 : vector<8x32xf32>
    %1733 = math.tanh %1732 : vector<8x32xf32>
    %1734 = arith.mulf %1729, %1733 : vector<8x32xf32>
    %1735 = arith.truncf %1734 : vector<8x32xf32> to vector<8x32xbf16>
    %c0_762 = arith.constant 0 : index
    %c0_763 = arith.constant 0 : index
    %1736 = vector.load %arg5[%c0_762, %c0_763] : memref<32x128xbf16, #tpu.memory_space<vmem>>, vector<32x128xbf16>
    %cst_764 = arith.constant dense<0.000000e+00> : vector<8x128xf32>
    %1737 = tpu.matmul %1735, %1736, %cst_764 {dimension_numbers = #tpu.dot_dimension_numbers<[1], [0], [0], [1], [0, 0, 1, 1], [], []>} : vector<8x32xbf16>, vector<32x128xbf16>, vector<8x128xf32> -> vector<8x128xf32>
    %1738 = arith.addf %1707, %1737 : vector<8x128xf32>
    %c4_765 = arith.constant 4 : index
    %c0_766 = arith.constant 0 : index
    %c0_767 = arith.constant 0 : index
    %1739 = vector.load %arg6[%c4_765, %c0_766, %c0_767] : memref<5x1x128xf32, #tpu.memory_space<vmem>>, vector<1x1x128xf32>
    %1740 = vector.shape_cast %1739 : vector<1x1x128xf32> to vector<1x128xf32>
    %1741 = vector.broadcast %1740 : vector<1x128xf32> to vector<8x128xf32>
    %1742 = arith.addf %1738, %1741 : vector<8x128xf32>
    %cst_768 = arith.constant 2.000000e+00 : f32
    %1743 = vector.broadcast %cst_768 : f32 to vector<8x128xf32>
    %1744 = arith.mulf %1743, %1742 : vector<8x128xf32>
    %1745 = arith.select %457, %1744, %1742 : vector<8x128xi1>, vector<8x128xf32>
    %1746 = arith.negf %1745 : vector<8x128xf32>
    %1747 = math.exp %1746 : vector<8x128xf32>
    %cst_769 = arith.constant 1.000000e+00 : f32
    %1748 = vector.broadcast %cst_769 : f32 to vector<8x128xf32>
    %1749 = arith.addf %1748, %1747 : vector<8x128xf32>
    %1750 = arith.divf %1748, %1749 : vector<8x128xf32>
    %cst_770 = arith.constant 2.000000e+00 : f32
    %1751 = vector.broadcast %cst_770 : f32 to vector<8x128xf32>
    %1752 = arith.mulf %1751, %1750 : vector<8x128xf32>
    %cst_771 = arith.constant 1.000000e+00 : f32
    %1753 = vector.broadcast %cst_771 : f32 to vector<8x128xf32>
    %1754 = arith.subf %1752, %1753 : vector<8x128xf32>
    %1755 = arith.select %457, %1754, %1750 : vector<8x128xi1>, vector<8x128xf32>
    %1756 = vector.extract_strided_slice %1755 {offsets = [0, 0], sizes = [8, 32], strides = [1, 1]} : vector<8x128xf32> to vector<8x32xf32>
    %1757 = vector.extract_strided_slice %1755 {offsets = [0, 32], sizes = [8, 32], strides = [1, 1]} : vector<8x128xf32> to vector<8x32xf32>
    %1758 = vector.extract_strided_slice %1755 {offsets = [0, 64], sizes = [8, 32], strides = [1, 1]} : vector<8x128xf32> to vector<8x32xf32>
    %1759 = vector.extract_strided_slice %1755 {offsets = [0, 96], sizes = [8, 32], strides = [1, 1]} : vector<8x128xf32> to vector<8x32xf32>
    %1760 = arith.mulf %1757, %1732 : vector<8x32xf32>
    %1761 = arith.mulf %1756, %1758 : vector<8x32xf32>
    %1762 = arith.addf %1760, %1761 : vector<8x32xf32>
    %1763 = math.tanh %1762 : vector<8x32xf32>
    %1764 = arith.mulf %1759, %1763 : vector<8x32xf32>
    %1765 = tpu.concatenate %1702, %1764 in 1 : vector<8x32xf32>, vector<8x32xf32> -> vector<8x64xf32>
    %c0_772 = arith.constant 0 : index
    %c0_773 = arith.constant 0 : index
    %1766 = vector.load %arg7[%c0_772, %c0_773] : memref<64x4xf32, #tpu.memory_space<vmem>>, vector<64x4xf32>
    %cst_774 = arith.constant dense<0.000000e+00> : vector<8x4xf32>
    %1767 = tpu.matmul %1765, %1766, %cst_774 {dimension_numbers = #tpu.dot_dimension_numbers<[1], [0], [0], [1], [0, 0, 1, 1], [], []>} : vector<8x64xf32>, vector<64x4xf32>, vector<8x4xf32> -> vector<8x4xf32>
    %c0_775 = arith.constant 0 : index
    %c0_776 = arith.constant 0 : index
    %1768 = vector.load %arg8[%c0_775, %c0_776] : memref<1x4xf32, #tpu.memory_space<vmem>>, vector<1x4xf32>
    %1769 = vector.broadcast %1768 : vector<1x4xf32> to vector<8x4xf32>
    %1770 = arith.addf %1767, %1769 : vector<8x4xf32>
    %c0_777 = arith.constant 0 : index
    %c0_778 = arith.constant 0 : index
    %1771 = vector.load %arg9[%c0_777, %c0_778] : memref<8x4xf32, #tpu.memory_space<vmem>>, vector<8x4xf32>
    tpu.vector_store %arg9[%c0_777, %c0_778], %1770 {strides = array<i32>} : memref<8x4xf32, #tpu.memory_space<vmem>>, vector<8x4xf32>,
    return
  }
  func.func @transform_0(%arg0: i32, %arg1: memref<8x8xi32, #tpu.memory_space<smem>>) -> (i32, i32) {
    %c0_i32 = arith.constant 0 : i32
    %c0_i32_0 = arith.constant 0 : i32
    %c0_i32_1 = arith.constant 0 : i32
    return %c0_i32, %c0_i32_0 : i32, i32
  }
  func.func @transform_1(%arg0: i32, %arg1: memref<8x8xi32, #tpu.memory_space<smem>>) -> (i32, i32) {
    %c0_i32 = arith.constant 0 : i32
    %c0_i32_0 = arith.constant 0 : i32
    %c0_i32_1 = arith.constant 0 : i32
    return %c0_i32, %c0_i32_0 : i32, i32
  }
  func.func @transform_2(%arg0: i32, %arg1: memref<8x8xi32, #tpu.memory_space<smem>>) -> (i32, i32, i32) {
    %c0_i32 = arith.constant 0 : i32
    %c0_i32_0 = arith.constant 0 : i32
    %c0_i32_1 = arith.constant 0 : i32
    %c0_i32_2 = arith.constant 0 : i32
    return %c0_i32, %c0_i32_0, %c0_i32_1 : i32, i32, i32
  }
  func.func @transform_3(%arg0: i32, %arg1: memref<8x8xi32, #tpu.memory_space<smem>>) -> (i32, i32) {
    %c0_i32 = arith.constant 0 : i32
    %c0_i32_0 = arith.constant 0 : i32
    %c0_i32_1 = arith.constant 0 : i32
    return %c0_i32, %c0_i32_0 : i32, i32
  }
  func.func @transform_4(%arg0: i32, %arg1: memref<8x8xi32, #tpu.memory_space<smem>>) -> (i32, i32, i32) {
    %c0_i32 = arith.constant 0 : i32
    %c0_i32_0 = arith.constant 0 : i32
    %c0_i32_1 = arith.constant 0 : i32
    %c0_i32_2 = arith.constant 0 : i32
    return %c0_i32, %c0_i32_0, %c0_i32_1 : i32, i32, i32
  }
  func.func @transform_5(%arg0: i32, %arg1: memref<8x8xi32, #tpu.memory_space<smem>>) -> (i32, i32) {
    %c0_i32 = arith.constant 0 : i32
    %c0_i32_0 = arith.constant 0 : i32
    %c0_i32_1 = arith.constant 0 : i32
    return %c0_i32, %c0_i32_0 : i32, i32
  }
  func.func @transform_6(%arg0: i32, %arg1: memref<8x8xi32, #tpu.memory_space<smem>>) -> (i32, i32) {
    %c0_i32 = arith.constant 0 : i32
    %c0_i32_0 = arith.constant 0 : i32
    %c0_i32_1 = arith.constant 0 : i32
    return %c0_i32, %c0_i32_0 : i32, i32
  }
  func.func @transform_7(%arg0: i32, %arg1: memref<8x8xi32, #tpu.memory_space<smem>>) -> (i32, i32) {
    %c0_i32 = arith.constant 0 : i32
    %c0_i32_0 = arith.constant 0 : i32
    return %arg0, %c0_i32 : i32, i32
  }
}

</mosaic_0001>

<bundles_post_ra>
// kernel: stacked_lstm_forward.1
= control target key start
LH: loop header
LB: loop body
LE: loop exit
PB: predicated region body
PF: predicated region fallthrough
CT: control target
= control target key end

     0   :  { %s7243_s0 = inlined_call_operand.vmem [shape: s32[8,8], index: 0, kind: input, shape index: {}]   ;;  %s7244_s1 = inlined_call_operand.hbm [shape: f32[56,256], index: 1, kind: input, shape index: {}]   ;;  %s7245_s2 = inlined_call_operand.hbm [shape: f32[256,128], index: 2, kind: input, shape index: {}]   ;;  %s7246_s3 = inlined_call_operand.hbm [shape: bf16[4,32,256], index: 3, kind: input, shape index: {}]   ;;  %s7247_s4 = inlined_call_operand.vmem [shape: bf16[32,128], index: 4, kind: input, shape index: {}]   ;;  %s7248_s5 = inlined_call_operand.vmem [shape: f32[5,1,128], index: 5, kind: input, shape index: {}]   ;;  %s7249_s6 = inlined_call_operand.vmem [shape: f32[64,4], index: 6, kind: input, shape index: {}]   ;;  %s7250_s7 = inlined_call_operand.vmem [shape: f32[1,4], index: 7, kind: input, shape index: {}]   ;;  %s7251_s8 = inlined_call_operand.vmem [shape: f32[8,4], index: 8, kind: output, shape index: {}]  }
   0x1   :  { %s13_s29 = sshll.u32 %s7243_s0, 4  ;;  %s14_s29 = int_to_ptr.vmem [resolvable:$true] %s13_s29 }
   0x2   :  { %s5601_s30 = scalar_lea.vmem %s14_s29, 128  ;;  %p5606_p1 = scmp.lt.s32.totalorder %s14_s29, %s14_s29 }
   0x3   :  { %p5602_p0 = scmp.ne.s32.totalorder %s14_s29, %s5601_s30  ;;  %p5607_p2 = scmp.lt.s32.totalorder %s5601_s30, %s5601_s30 }
   0x5   :  { %p5608_p3 = por %p5607_p2, %p5606_p1 }
   0x7   :  { %p5609_p4 = pnand %p5608_p3, %p5602_p0 }
   0x9   :  { %5612 = shalt.err (!%p5609_p4)  }
   0xa   :  { %s5685_s9 = smov [#allocation5]  }
   0xb   :  { %16 = dma.vmem_to_smem %s14_s29, 128, %s5685_s9, [#allocation4] }
   0xc   :  { %5679 = dma.done.wait [#allocation4], 128 }
   0xd   :  { %5680 = vsyncadd [#allocation4], 4294967168 }
   0xe   :  { %18 = sfence }
   0xf   :  { %19 = vsyncpa [#allocation7], 0 }
  0x10   :  { %20 = vsyncpa [#allocation9], 0  ;;  %s5686_s10 = smov [#allocation8]   ;;  %s5613_s13 = scalar_lea.hbm %s7245_s2, 4096 }
  0x11   :  { %s38_s11 = sshll.u32 %s5686_s10, 4  ;;  %p5614_p5 = scmp.ne.s32.totalorder %s7245_s2, %s5613_s13  ;;  %s39_s11 = int_to_ptr.vmem [resolvable:$true] %s38_s11 }
  0x12   :  { %p5617_p6 = scmp.lt.u32.totalorder %s5613_s13, %s7245_s2 }
  0x14   :  { %p5619_p7 = pnand %p5617_p6, %p5614_p5 }
  0x16   :  { %5622 = shalt.err (!%p5619_p7)
}
  0x17   :  { %s5623_s18 = scalar_lea.vmem %s39_s11, 4096  ;;  %p5628_p9 = scmp.lt.s32.totalorder %s39_s11, %s39_s11 }
  0x18   :  { %p5624_p8 = scmp.ne.s32.totalorder %s39_s11, %s5623_s18  ;;  %p5629_p10 = scmp.lt.s32.totalorder %s5623_s18, %s5623_s18 }
  0x1a   :  { %p5630_p11 = por %p5629_p10, %p5628_p9 }
  0x1c   :  { %p5631_p12 = pnand %p5630_p11, %p5624_p8 }
  0x1e   :  { %5634 = shalt.err (!%p5631_p12)
}
  0x1f   :  { %s5687_s19 = smov 128   ;;  %s5688_s20 = smov 8  }
  0x20   :  { %44 = dma.hbm_to_vmem [thread:$0]  %s7245_s2, 4096, %s39_s11, [#allocation9], %s5687_s19, %s5687_s19, %s5688_s20  }
  0x21   :  { %s5689_s23 = smov [#allocation6]   ;;  %s5635_s27 = scalar_lea.hbm %s7244_s1, 1792 }
  0x22   :  { %s26_s24 = sshll.u32 %s5689_s23, 4  ;;  %p5636_p13 = scmp.ne.s32.totalorder %s7244_s1, %s5635_s27  ;;  %s27_s24 = int_to_ptr.vmem [resolvable:$true] %s26_s24 }
  0x23   :  { %p5639_p0 = scmp.lt.u32.totalorder %s5635_s27, %s7244_s1 }
  0x25   :  { %p5641_p1 = pnand %p5639_p0, %p5636_p13 }
  0x27   :  { %5644 = shalt.err (!%p5641_p1)
}
  0x28   :  { %s5645_s10 = scalar_lea.vmem %s27_s24, 1792  ;;  %p5650_p3 = scmp.lt.s32.totalorder %s27_s24, %s27_s24 }
  0x29   :  { %p5646_p2 = scmp.ne.s32.totalorder %s27_s24, %s5645_s10  ;;  %p5651_p4 = scmp.lt.s32.totalorder %s5645_s10, %s5645_s10 }
  0x2b   :  { %p5652_p5 = por %p5651_p4, %p5650_p3 }
  0x2d   :  { %p5653_p6 = pnand %p5652_p5, %p5646_p2 }
  0x2f   :  { %5656 = shalt.err (!%p5653_p6)
}
  0x30   :  { %s5690_s2 = smov 256   ;;  %s5691_s11 = smov 16  }
  0x31   :  { %32 = dma.hbm_to_vmem [thread:$0]  %s7244_s1, 1792, %s27_s24, [#allocation7], %s5690_s2, %s5690_s2, %s5691_s11  }
  0x32   :  { %s5692_s13 = smov [#allocation10]   ;;  %s5657_s17 = scalar_lea.hbm %s7246_s3, 2048 }
  0x33   :  { %s50_s14 = sshll.u32 %s5692_s13, 4  ;;  %p5658_p7 = scmp.ne.s32.totalorder %s7246_s3, %s5657_s17  ;;  %s51_s14 = int_to_ptr.vmem [resolvable:$true] %s50_s14 }
  0x34   :  { %p5661_p8 = scmp.lt.u32.totalorder %s5657_s17, %s7246_s3 }
  0x36   :  { %p5663_p9 = pnand %p5661_p8, %p5658_p7 }
  0x38   :  { %5666 = shalt.err (!%p5663_p9)
}
  0x39   :  { %s5667_s25 = scalar_lea.vmem %s51_s14, 2048  ;;  %p5672_p11 = scmp.lt.s32.totalorder %s51_s14, %s51_s14 }
  0x3a   :  { %p5668_p10 = scmp.ne.s32.totalorder %s51_s14, %s5667_s25  ;;  %p5673_p12 = scmp.lt.s32.totalorder %s5667_s25, %s5667_s25 }
  0x3c   :  { %p5674_p13 = por %p5673_p12, %p5672_p11 }
  0x3e   :  { %p5675_p0 = pnand %p5674_p13, %p5668_p10 }
  0x40   :  { %5678 = shalt.err (!%p5675_p0)
}
  0x41   :  { %56 = dma.hbm_to_vmem [thread:$0]  %s7246_s3, 2048, %s51_s14, [#allocation9], %s5687_s19, %s5687_s19, %s5688_s20  }
  0x42   :  { %5681 = dma.done.wait [#allocation7], 1792  }
  0x43   :  { %5682 = vsyncadd [#allocation7], 4294965504 }
  0x44   :  { %5683 = dma.done.wait [#allocation9], 6144  }
  0x45   :  { %5684 = vsyncadd [#allocation9], 4294961152  ;;  %s77_s26 = sld [smem:[#allocation5]]  ;;  %v1014_v0 = vld [vmem:[#allocation8 + $0x80] sm:$0xff]  ;;  %v1015_v1 = vld [vmem:[#allocation8 + $0x88] sm:$0xff]  ;;  %v87_v14 = vlaneseq  ;;  %vm1214_vm4 = vcmask 261120  }
  0x46   :  { %s5789_s27 = sld [smem:[#allocation5 + $0x80]]  ;;  %v998_v2 = vld [vmem:[#allocation8] sm:$0xff]  ;;  %v5234_v3 = vpack.c.bf16 %v1015_v1, %v1014_v0  ;;  %v999_v4 = vld [vmem:[#allocation8 + $0x8] sm:$0xff]  ;;  %v1016_v5 = vld [vmem:[#allocation8 + $0x90] sm:$0xff]  ;;  %vm5697_vm5 = vmmov 0   ;;  %vm4396_vm6 = vcmask 523264  }
  0x47   :  { %s5791_s28 = sld [smem:[#allocation5 + $0x100]]  ;;  %v1017_v6 = vld [vmem:[#allocation8 + $0x98] sm:$0xff]  ;;  %v5236_v7 = vpack.c.bf16 %v999_v4, %v998_v2  ;;  %v1000_v9 = vld [vmem:[#allocation8 + $0x10] sm:$0xff]  ;;  %v1018_v11 = vld [vmem:[#allocation8 + $0xa0] sm:$0xff]  ;;  %vm5814_vm0 = vcmp.lt.s32.totalorder %v87_v14, 256  ;;  %v1144_v60 = vand.u32 127, %v87_v14 }
  0x48   :  { %s5793_s29 = sld [smem:[#allocation5 + $0x180]]  ;;  %v5238_v8 = vpack.c.bf16 %v1017_v6, %v1016_v5  ;;  %v1001_v10 = vld [vmem:[#allocation8 + $0x18] sm:$0xff]  ;;  %5235 = vmatprep.subr.bf16.mxu0 %v5234_v3  ;;  %v1019_v12 = vld [vmem:[#allocation8 + $0xa8] sm:$0xff]  ;;  %v1002_v16 = vld [vmem:[#allocation8 + $0x20] sm:$0xff]  ;;  %vm4470_vm7 = vcmask 31744  }
  0x49   :  { %s5795_s30 = sld [smem:[#allocation5 + $0x200]]  ;;  %5237 = vmatpush3.bf16.msra.mxu0 %v5236_v7  ;;  %v5240_v13 = vpack.c.bf16 %v1001_v10, %v1000_v9  ;;  %v5242_v15 = vpack.c.bf16 %v1019_v12, %v1018_v11  ;;  %v1003_v17 = vld [vmem:[#allocation8 + $0x28] sm:$0xff]  ;;  %v1020_v18 = vld [vmem:[#allocation8 + $0xb0] sm:$0xff]  ;;  %v1021_v19 = vld [vmem:[#allocation8 + $0xb8] sm:$0xff]  ;;  %vm1145_vm1 = vcmp.ge.s32.totalorder %v1144_v60, 64  ;;  %vm1146_vm2 = vcmp.lt.s32.totalorder %v1144_v60, 96 }
  0x4a   :  { %s5797_s9 = sld [smem:[#allocation5 + $0x280]]  ;;  %5239 = vmatprep.subr.bf16.mxu0 %v5238_v8  ;;  %v5244_v20 = vpack.c.bf16 %v1003_v17, %v1002_v16  ;;  %v5246_v22 = vpack.c.bf16 %v1021_v19, %v1020_v18  ;;  %v1004_v23 = vld [vmem:[#allocation8 + $0x30] sm:$0xff]  ;;  %v1005_v24 = vld [vmem:[#allocation8 + $0x38] sm:$0xff]  ;;  %v1022_v25 = vld [vmem:[#allocation8 + $0xc0] sm:$0xff] }
  0x4b   :  { %s5799_s10 = sld [smem:[#allocation5 + $0x300]]  ;;  %s78_s3 = sshra.s32 %s77_s26, 3  ;;  %v1023_v26 = vld [vmem:[#allocation8 + $0xc8] sm:$0xff]  ;;  %v1006_v28 = vld [vmem:[#allocation8 + $0x40] sm:$0xff]  ;;  %v5248_v32 = vpack.c.bf16 %v1005_v24, %v1004_v23  ;;  %v1024_v33 = vld [vmem:[#allocation8 + $0xd0] sm:$0xff] }
  0x4c   :  { %s5801_s2 = sld [smem:[#allocation5 + $0x380]]  ;;  %s81_s19 = sand.u32 7, %s77_s26  ;;  %v1007_v29 = vld [vmem:[#allocation8 + $0x48] sm:$0xff]  ;;  %v1025_v34 = vld [vmem:[#allocation8 + $0xd8] sm:$0xff]  ;;  %v5250_v36 = vpack.c.bf16 %v1023_v26, %v1022_v25  ;;  %v1008_v37 = vld [vmem:[#allocation8 + $0x50] sm:$0xff] }
  0x4d   :  { %s5009_s20 = sshll.u32 %s78_s3, 4  ;;  %s96_s11 = sshra.s32 %s5789_s27, 3  ;;  %5241 = vmatpush3.bf16.msra.mxu0 %v5240_v13  ;;  %v1009_v38 = vld [vmem:[#allocation8 + $0x58] sm:$0xff]  ;;  %v5252_v40 = vpack.c.bf16 %v1007_v29, %v1006_v28  ;;  %v1026_v41 = vld [vmem:[#allocation8 + $0xe0] sm:$0xff]  ;;  %v1027_v42 = vld [vmem:[#allocation8 + $0xe8] sm:$0xff]  ;;  %v5254_v43 = vpack.c.bf16 %v1025_v34, %v1024_v33 }
  0x4e   :  { %s5804_s12 = sadd.s32 %s5009_s20, %s81_s19  ;;  %s99_s0 = sand.u32 7, %s5789_s27  ;;  %5243 = vmatprep.subr.bf16.mxu0 %v5242_v15  ;;  %v5256_v45 = vpack.c.bf16 %v1009_v38, %v1008_v37  ;;  %v5258_v47 = vpack.c.bf16 %v1027_v42, %v1026_v41  ;;  %v1010_v48 = vld [vmem:[#allocation8 + $0x60] sm:$0xff]  ;;  %v1011_v49 = vld [vmem:[#allocation8 + $0x68] sm:$0xff]  ;;  %v1028_v50 = vld [vmem:[#allocation8 + $0xf0] sm:$0xff] }
  0x4f   :  { %s5010_s13 = sshll.u32 %s96_s11, 4  ;;  %s111_s15 = sshra.s32 %s5791_s28, 3  ;;  %v1029_v51 = vld [vmem:[#allocation8 + $0xf8] sm:$0xff]  ;;  %v5260_v53 = vpack.c.bf16 %v1011_v49, %v1010_v48  ;;  %v1012_v55 = vld [vmem:[#allocation8 + $0x70] sm:$0xff]  ;;  %vm5851_vm3 = vmand %vm1145_vm1, %vm1146_vm2 }
  0x50   :  { %s5807_s14 = sadd.s32 %s5010_s13, %s99_s0  ;;  %s114_s16 = sand.u32 7, %s5791_s28  ;;  %v5262_v54 = vpack.c.bf16 %v1029_v51, %v1028_v50  ;;  %v1013_v56 = vld [vmem:[#allocation8 + $0x78] sm:$0xff]  ;;  %v5848_v63 = vld [vmem:[%s7248_s5] ss:$0 sm:$0xff]  ;;  %v5869_v17 = vld [vmem:[#allocation10 + $0x4] ss:$8 sps:$4 sm:$0xff]  }
  0x51   :  { %s5011_s17 = sshll.u32 %s111_s15, 4  ;;  %s126_s18 = sshra.s32 %s5793_s29, 3  ;;  %5245 = vmatpush3.bf16.msra.mxu0 %v5244_v20  ;;  %v5264_v57 = vpack.c.bf16 %v1013_v56, %v1012_v55  ;;  %v5871_v18 = vld [vmem:[#allocation10] ss:$8 sps:$4 sm:$0xff]   ;;  %v5873_v19 = vld [vmem:[#allocation10 + $0x14] ss:$8 sps:$4 sm:$0xff]   ;;  %1218 = vmatprep.subr.bf16.mxu1 %v5869_v17 }
  0x52   :  { %s117_s21 = sadd.s32 %s5011_s17, %s114_s16  ;;  %s129_s22 = sand.u32 7, %s5793_s29  ;;  %5247 = vmatprep.subr.bf16.mxu0 %v5246_v22  ;;  %1219 = vmatpush1.bf16.msra.mxu1 %v5871_v18  ;;  %v5881_v20 = vld [vmem:[#allocation10 + $0x10] ss:$8 sps:$4 sm:$0xff]   ;;  %v5695_v22 = vmov 0  }
  0x53   :  { %s5012_s23 = sshll.u32 %s126_s18, 4  ;;  %s141_s1 = sshra.s32 %s5795_s30, 3  ;;  %1220 = vmatprep.subr.bf16.mxu1 %v5873_v19  ;;  %1250 = vmatprep.mubr.bf16.mxu1 %v5695_v22  ;;  %v5934_v41 = vld [vmem:[%s7248_s5 + $0x1] ss:$0 sm:$0xff]  ;;  %v4382_v2 = vld [vmem:[%s7249_s6 + $0x8] sm:$0xff] }
  0x54   :  { %s132_s25 = sadd.s32 %s5012_s23, %s129_s22  ;;  %s85_s24 = scalar_lea.vmem [#allocation6], %s5804_s12  ;;  %v6427_v21 = vld [vmem:[#allocation10 + $0x30] ss:$8 sps:$4 sm:$0xff]  }
  0x55   :  { %v86_v27 = vld [vmem:[%s85_s24] ss:$8 sm:$0x3]  ;;  %s103_s26 = scalar_lea.vmem [#allocation6], %s5807_s14  ;;  %s118_s27 = scalar_lea.vmem [#allocation6], %s117_s21  ;;  %5249 = vmatpush3.bf16.msra.mxu0 %v5248_v32 }
  0x56   :  { %91 = vst.msk [vmem:[#allocation2] ss:$8 sm:$0x3] %vm5814_vm0, %v86_v27  ;;  %v104_v30 = vld [vmem:[%s103_s26] ss:$8 sm:$0x3]  ;;  %5251 = vmatprep.subr.bf16.mxu0 %v5250_v36  ;;  %1221 = vmatpush1.bf16.msra.mxu1 %v5881_v20 }
  0x57   :  { %v119_v31 = vld [vmem:[%s118_s27] ss:$8 sm:$0x3]  ;;  %106 = vst.msk [vmem:[#allocation2 + $0x1] ss:$8 sm:$0x3] %vm5814_vm0, %v104_v30  ;;  %1297 = vmatprep.subr.bf16.mxu1 %v5869_v17 }
  0x58   :  { %121 = vst.msk [vmem:[#allocation2 + $0x2] ss:$8 sm:$0x3] %vm5814_vm0, %v119_v31  ;;  %s133_s28 = scalar_lea.vmem [#allocation6], %s132_s25  ;;  %s144_s29 = sand.u32 7, %s5795_s30 }
  0x59   :  { %v134_v35 = vld [vmem:[%s133_s28] ss:$8 sm:$0x3]  ;;  %s5013_s3 = sshll.u32 %s141_s1, 4  ;;  %s156_s20 = sshra.s32 %s5797_s9, 3  ;;  %5253 = vmatpush3.bf16.msra.mxu0 %v5252_v40 }
  0x5a   :  { %136 = vst.msk [vmem:[#allocation2 + $0x3] ss:$8 sm:$0x3] %vm5814_vm0, %v134_v35  ;;  %s147_s19 = sadd.s32 %s5013_s3, %s144_s29  ;;  %s159_s11 = sand.u32 7, %s5797_s9  ;;  %5255 = vmatprep.subr.bf16.mxu0 %v5254_v43 }
  0x5b   :  { %s148_s12 = scalar_lea.vmem [#allocation6], %s147_s19  ;;  %s5014_s0 = sshll.u32 %s156_s20, 4 }
  0x5c   :  { %v149_v39 = vld [vmem:[%s148_s12] ss:$8 sm:$0x3]  ;;  %s171_s13 = sshra.s32 %s5799_s10, 3  ;;  %s162_s30 = sadd.s32 %s5014_s0, %s159_s11 }
  0x5d   :  { %151 = vst.msk [vmem:[#allocation2 + $0x4] ss:$8 sm:$0x3] %vm5814_vm0, %v149_v39  ;;  %s174_s14 = sand.u32 7, %s5799_s10  ;;  %s5015_s9 = sshll.u32 %s171_s13, 4  ;;  %5257 = vmatpush3.bf16.msra.mxu0 %v5256_v45 }
  0x5e   :  { %s163_s15 = scalar_lea.vmem [#allocation6], %s162_s30  ;;  %s177_s16 = sadd.s32 %s5015_s9, %s174_s14  ;;  %5259 = vmatprep.subr.bf16.mxu0 %v5258_v47 }
  0x5f   :  { %v164_v44 = vld [vmem:[%s163_s15] ss:$8 sm:$0x3]  ;;  %s186_s17 = sshra.s32 %s5801_s2, 3  ;;  %s189_s18 = sand.u32 7, %s5801_s2 }
  0x60   :  { %166 = vst.msk [vmem:[#allocation2 + $0x5] ss:$8 sm:$0x3] %vm5814_vm0, %v164_v44  ;;  %s178_s21 = scalar_lea.vmem [#allocation6], %s177_s16  ;;  %s5016_s22 = sshll.u32 %s186_s17, 4 }
  0x61   :  { %v179_v46 = vld [vmem:[%s178_s21] ss:$8 sm:$0x3]  ;;  %s192_s10 = sadd.s32 %s5016_s22, %s189_s18  ;;  %5261 = vmatpush3.bf16.msra.mxu0 %v5260_v53  ;;  %s7252_s1 = smov 64  }
  0x62   :  { %181 = vst.msk [vmem:[#allocation2 + $0x6] ss:$8 sm:$0x3] %vm5814_vm0, %v179_v46  ;;  %s193_s23 = scalar_lea.vmem [#allocation6], %s192_s10  ;;  %5263 = vmatprep.subr.bf16.mxu0 %v5262_v54  ;;  %s5694_s24 = smov 32  }
  0x63   :  { %v194_v52 = vld [vmem:[%s193_s23] ss:$8 sm:$0x3]  ;;  %s4693_s26 = sld [smem:[#allocation5 + $0x1]] }
  0x64   :  { %196 = vst.msk [vmem:[#allocation2 + $0x7] ss:$8 sm:$0x3] %vm5814_vm0, %v194_v52  ;;  %s4696_s27 = sld [smem:[#allocation5 + $0x81]] }
  0x65   :  { %5265 = vmatpush3.bf16.msra.mxu0 %v5264_v57  ;;  %s5876_s28 = sld [smem:[#allocation5 + $0x101]] }
  0x66   :  { %s5879_s29 = sld [smem:[#allocation5 + $0x181]] }
  0x67   :  { %s5883_s3 = sld [smem:[#allocation5 + $0x201]] }
  0x68   :  { %s5885_s19 = sld [smem:[#allocation5 + $0x281]] }
  0x69   :  { %s5889_s20 = sld [smem:[#allocation5 + $0x301]]  ;;  %s200_s12 = sshra.s32 %s4693_s26, 3 }
  0x6a   :  { %s5891_s11 = sld [smem:[#allocation5 + $0x381]]  ;;  %s203_s0 = sand.u32 7, %s4693_s26 }
  0x6b   :  { %v983_v58 = vld [vmem:[#allocation2 + $0x8] sm:$0xff]  ;;  %v982_v59 = vld [vmem:[#allocation2] sm:$0xff]  ;;  %s5017_s13 = sshll.u32 %s200_s12, 4  ;;  %s214_s30 = sshra.s32 %s4696_s27, 3 }
  0x6c   :  { %1094 = vmatprep.mubr.f32.mxu0 %v983_v58  ;;  %s206_s14 = sadd.s32 %s5017_s13, %s203_s0  ;;  %s217_s9 = sand.u32 7, %s4696_s27 }
  0x6d   :  { %1095 = vmatmul.mubr.f32.vlgmr.msra.gmra.mrb[0].mxu0 %v982_v59  ;;  %s5018_s15 = sshll.u32 %s214_s30, 4  ;;  %s207_s16 = scalar_lea.vmem [#allocation6], %s206_s14 }
  0x6e   :  { %v208_v24 = vld [vmem:[%s207_s16] ss:$8 sm:$0x3]  ;;  %s220_s17 = sadd.s32 %s5018_s15, %s217_s9  ;;  %s228_s18 = sshra.s32 %s5876_s28, 3 }
  0x6f   :  { %210 = vst.msk [vmem:[#allocation2 + $0x10] ss:$8 sm:$0x3] %vm5814_vm0, %v208_v24  ;;  %s231_s21 = sand.u32 7, %s5876_s28  ;;  %s221_s22 = scalar_lea.vmem [#allocation6], %s220_s17 }
  0x70   :  { %v222_v25 = vld [vmem:[%s221_s22] ss:$8 sm:$0x3]  ;;  %s5019_s10 = sshll.u32 %s228_s18, 4  ;;  %s242_s23 = sshra.s32 %s5879_s29, 3 }
  0x71   :  { %224 = vst.msk [vmem:[#allocation2 + $0x11] ss:$8 sm:$0x3] %vm5814_vm0, %v222_v25  ;;  %s234_s2 = sadd.s32 %s5019_s10, %s231_s21  ;;  %s245_s25 = sand.u32 7, %s5879_s29 }
  0x72   :  { %s5020_s26 = sshll.u32 %s242_s23, 4  ;;  %s235_s27 = scalar_lea.vmem [#allocation6], %s234_s2 }
  0x73   :  { %v236_v26 = vld [vmem:[%s235_s27] ss:$8 sm:$0x3]  ;;  %s248_s12 = sadd.s32 %s5020_s26, %s245_s25  ;;  %s256_s0 = sshra.s32 %s5883_s3, 3 }
  0x74   :  { %238 = vst.msk [vmem:[#allocation2 + $0x12] ss:$8 sm:$0x3] %vm5814_vm0, %v236_v26  ;;  %s259_s28 = sand.u32 7, %s5883_s3  ;;  %s249_s13 = scalar_lea.vmem [#allocation6], %s248_s12 }
  0x75   :  { %v250_v27 = vld [vmem:[%s249_s13] ss:$8 sm:$0x3]  ;;  %s5021_s30 = sshll.u32 %s256_s0, 4  ;;  %s270_s14 = sshra.s32 %s5885_s19, 3 }
  0x76   :  { %252 = vst.msk [vmem:[#allocation2 + $0x13] ss:$8 sm:$0x3] %vm5814_vm0, %v250_v27  ;;  %s262_s29 = sadd.s32 %s5021_s30, %s259_s28  ;;  %s273_s9 = sand.u32 7, %s5885_s19 }
  0x77   :  { %s5022_s15 = sshll.u32 %s270_s14, 4  ;;  %s263_s16 = scalar_lea.vmem [#allocation6], %s262_s29 }
  0x78   :  { %v264_v28 = vld [vmem:[%s263_s16] ss:$8 sm:$0x3]  ;;  %s276_s17 = sadd.s32 %s5022_s15, %s273_s9  ;;  %s284_s18 = sshra.s32 %s5889_s20, 3 }
  0x79   :  { %266 = vst.msk [vmem:[#allocation2 + $0x14] ss:$8 sm:$0x3] %vm5814_vm0, %v264_v28  ;;  %s287_s3 = sand.u32 7, %s5889_s20  ;;  %s277_s21 = scalar_lea.vmem [#allocation6], %s276_s17 }
  0x7a   :  { %v278_v29 = vld [vmem:[%s277_s21] ss:$8 sm:$0x3]  ;;  %s5023_s22 = sshll.u32 %s284_s18, 4  ;;  %s298_s10 = sshra.s32 %s5891_s11, 3 }
  0x7b   :  { %280 = vst.msk [vmem:[#allocation2 + $0x15] ss:$8 sm:$0x3] %vm5814_vm0, %v278_v29  ;;  %s290_s23 = sadd.s32 %s5023_s22, %s287_s3  ;;  %s301_s2 = sand.u32 7, %s5891_s11 }
  0x7c   :  { %s5024_s25 = sshll.u32 %s298_s10, 4  ;;  %s291_s19 = scalar_lea.vmem [#allocation6], %s290_s23 }
  0x7d   :  { %v292_v30 = vld [vmem:[%s291_s19] ss:$8 sm:$0x3]  ;;  %s304_s26 = sadd.s32 %s5024_s25, %s301_s2  ;;  %s4717_s12 = sld [smem:[#allocation5 + $0x2]] }
  0x7e   :  { %294 = vst.msk [vmem:[#allocation2 + $0x16] ss:$8 sm:$0x3] %vm5814_vm0, %v292_v30  ;;  %s305_s27 = scalar_lea.vmem [#allocation6], %s304_s26  ;;  %s4720_s0 = sld [smem:[#allocation5 + $0x82]] }
  0x7f   :  { %v306_v31 = vld [vmem:[%s305_s27] ss:$8 sm:$0x3]  ;;  %s5967_s28 = sld [smem:[#allocation5 + $0x102]] }
  0x80   :  { %308 = vst.msk [vmem:[#allocation2 + $0x17] ss:$8 sm:$0x3] %vm5814_vm0, %v306_v31  ;;  %s5969_s13 = sld [smem:[#allocation5 + $0x182]] }
  0x81   :  { %s5971_s30 = sld [smem:[#allocation5 + $0x202]] }
  0x82   :  { %s5973_s14 = sld [smem:[#allocation5 + $0x282]] }
  0x83   :  { %s5975_s29 = sld [smem:[#allocation5 + $0x302]]  ;;  %s312_s15 = sshra.s32 %s4717_s12, 3 }
  0x84   :  { %s5977_s9 = sld [smem:[#allocation5 + $0x382]]  ;;  %s315_s16 = sand.u32 7, %s4717_s12 }
  0x85   :  { %s5025_s17 = sshll.u32 %s312_s15, 4  ;;  %s326_s18 = sshra.s32 %s4720_s0, 3 }
  0x86   :  { %s318_s3 = sadd.s32 %s5025_s17, %s315_s16  ;;  %s329_s21 = sand.u32 7, %s4720_s0 }
  0x87   :  { %v985_v32 = vld [vmem:[#allocation2 + $0x18] sm:$0xff]  ;;  %v984_v33 = vld [vmem:[#allocation2 + $0x10] sm:$0xff]  ;;  %s5026_s22 = sshll.u32 %s326_s18, 4  ;;  %s319_s10 = scalar_lea.vmem [#allocation6], %s318_s3 }
  0x88   :  { %1099 = vmatprep.mubr.f32.mxu0 %v985_v32  ;;  %s332_s23 = sadd.s32 %s5026_s22, %s329_s21  ;;  %s340_s2 = sshra.s32 %s5967_s28, 3 }
  0x89   :  { %1100 = vmatmul.mubr.f32.gmra.mrb[2].mxu0 %v984_v33  ;;  %s343_s25 = sand.u32 7, %s5967_s28  ;;  %s333_s19 = scalar_lea.vmem [#allocation6], %s332_s23  ;;  %v6009_v33 = vld [vmem:[#allocation10 + $0x24] ss:$8 sps:$4 sm:$0xff]  }
  0x8a   :  { %v334_v24 = vld [vmem:[%s333_s19] ss:$8 sm:$0x3]  ;;  %s5027_s26 = sshll.u32 %s340_s2, 4  ;;  %s354_s27 = sshra.s32 %s5969_s13, 3 }
  0x8b   :  { %336 = vst.msk [vmem:[#allocation2 + $0x21] ss:$8 sm:$0x3] %vm5814_vm0, %v334_v24  ;;  %s346_s20 = sadd.s32 %s5027_s26, %s343_s25  ;;  %s357_s11 = sand.u32 7, %s5969_s13 }
  0x8c   :  { %s5028_s12 = sshll.u32 %s354_s27, 4  ;;  %s347_s0 = scalar_lea.vmem [#allocation6], %s346_s20 }
  0x8d   :  { %v348_v25 = vld [vmem:[%s347_s0] ss:$8 sm:$0x3]  ;;  %s360_s15 = sadd.s32 %s5028_s12, %s357_s11  ;;  %s368_s16 = sshra.s32 %s5971_s30, 3 }
  0x8e   :  { %350 = vst.msk [vmem:[#allocation2 + $0x22] ss:$8 sm:$0x3] %vm5814_vm0, %v348_v25  ;;  %s371_s28 = sand.u32 7, %s5971_s30  ;;  %s361_s17 = scalar_lea.vmem [#allocation6], %s360_s15 }
  0x8f   :  { %v362_v26 = vld [vmem:[%s361_s17] ss:$8 sm:$0x3]  ;;  %s5029_s18 = sshll.u32 %s368_s16, 4  ;;  %s382_s3 = sshra.s32 %s5973_s14, 3 }
  0x90   :  { %364 = vst.msk [vmem:[#allocation2 + $0x23] ss:$8 sm:$0x3] %vm5814_vm0, %v362_v26  ;;  %s374_s13 = sadd.s32 %s5029_s18, %s371_s28  ;;  %s385_s21 = sand.u32 7, %s5973_s14 }
  0x91   :  { %s5030_s22 = sshll.u32 %s382_s3, 4  ;;  %s396_s2 = sshra.s32 %s5975_s29, 3 }
  0x92   :  { %s388_s23 = sadd.s32 %s5030_s22, %s385_s21  ;;  %s399_s30 = sand.u32 7, %s5975_s29 }
  0x93   :  { %s389_s25 = scalar_lea.vmem [#allocation6], %s388_s23  ;;  %s5031_s19 = sshll.u32 %s396_s2, 4 }
  0x94   :  { %v390_v28 = vld [vmem:[%s389_s25] ss:$8 sm:$0x3]  ;;  %s410_s26 = sshra.s32 %s5977_s9, 3  ;;  %s402_s27 = sadd.s32 %s5031_s19, %s399_s30 }
  0x95   :  { %392 = vst.msk [vmem:[#allocation2 + $0x25] ss:$8 sm:$0x3] %vm5814_vm0, %v390_v28  ;;  %s413_s20 = sand.u32 7, %s5977_s9  ;;  %s5032_s11 = sshll.u32 %s410_s26, 4 }
  0x96   :  { %s403_s14 = scalar_lea.vmem [#allocation6], %s402_s27  ;;  %s416_s12 = sadd.s32 %s5032_s11, %s413_s20 }
  0x97   :  { %v404_v29 = vld [vmem:[%s403_s14] ss:$8 sm:$0x3]  ;;  %s417_s0 = scalar_lea.vmem [#allocation6], %s416_s12  ;;  %s4741_s15 = sld [smem:[#allocation5 + $0x3]] }
  0x98   :  { %406 = vst.msk [vmem:[#allocation2 + $0x26] ss:$8 sm:$0x3] %vm5814_vm0, %v404_v29  ;;  %v418_v30 = vld [vmem:[%s417_s0] ss:$8 sm:$0x3] }
  0x99   :  { %420 = vst.msk [vmem:[#allocation2 + $0x27] ss:$8 sm:$0x3] %vm5814_vm0, %v418_v30  ;;  %s4744_s16 = sld [smem:[#allocation5 + $0x83]] }
  0x9a   :  { %s6087_s28 = sld [smem:[#allocation5 + $0x103]] }
  0x9b   :  { %s6089_s17 = sld [smem:[#allocation5 + $0x183]] }
  0x9c   :  { %s6091_s18 = sld [smem:[#allocation5 + $0x203]] }
  0x9d   :  { %s6093_s3 = sld [smem:[#allocation5 + $0x283]]  ;;  %s424_s22 = sshra.s32 %s4741_s15, 3 }
  0x9e   :  { %s6097_s21 = sld [smem:[#allocation5 + $0x383]]  ;;  %s5033_s23 = sshll.u32 %s424_s22, 4 }
  0x9f   :  { %s438_s2 = sshra.s32 %s4744_s16, 3  ;;  %s441_s25 = sand.u32 7, %s4744_s16 }
  0xa0   :  { %s5034_s19 = sshll.u32 %s438_s2, 4  ;;  %s452_s20 = sshra.s32 %s6087_s28, 3 }
  0xa1   :  { %s444_s27 = sadd.s32 %s5034_s19, %s441_s25  ;;  %s455_s11 = sand.u32 7, %s6087_s28 }
  0xa2   :  { %s445_s14 = scalar_lea.vmem [#allocation6], %s444_s27  ;;  %s5035_s12 = sshll.u32 %s452_s20, 4 }
  0xa3   :  { %s466_s0 = sshra.s32 %s6089_s17, 3  ;;  %s458_s29 = sadd.s32 %s5035_s12, %s455_s11 }
  0xa4   :  { %s469_s9 = sand.u32 7, %s6089_s17  ;;  %s459_s16 = scalar_lea.vmem [#allocation6], %s458_s29 }
  0xa5   :  { %s483_s28 = sand.u32 7, %s6091_s18  ;;  %s497_s25 = sand.u32 7, %s6093_s3 }
  0xa6   :  { %s522_s12 = sshra.s32 %s6097_s21, 3  ;;  %s525_s29 = sand.u32 7, %s6097_s21 }
 0x140   :  { %v5105_v61 = vpop.f32.mrb[0].mxu0 }
 0x141   :  { %v5106_v62 = vpop.f32.mrb[1].mxu0 }
 0x142   :  { %v5107_v0 = vadd.f32 %v5106_v62, %v5105_v61 }
 0x144   :  { %v1157_v1 = vadd.f32 %v5107_v0, %v5848_v63 }
 0x146   :  { %v1158_v3 = vmul.f32 2.0, %v1157_v1 }
 0x148   :  { %v1159_v4 = vsel %vm5851_vm3, %v1158_v3, %v1157_v1 }
 0x149   :  { %v4862_v5 = vmul.f32 -1.442695, %v1159_v4 }
 0x14b   :  { %5318 = vpow2.f32 %v4862_v5 }
 0x155   :  { %v5319_v6 = vpop.eup %5318 }
 0x156   :  { %v1163_v7 = vadd.f32 1.0, %v5319_v6 }
 0x158   :  { %5320 = vrcp.f32 %v1163_v7 }
 0x15c   :  { %v5108_v38 = vpop.f32.mrb[2].mxu0 }
 0x15d   :  { %v5109_v39 = vpop.f32.mrb[3].mxu0 }
 0x15e   :  { %v5110_v40 = vadd.f32 %v5109_v39, %v5108_v38 }
 0x162   :  { %v5321_v8 = vpop.eup %5320 }
 0x163   :  { %v1166_v9 = vmul.f32 2.0, %v5321_v8 }
 0x165   :  { %v4863_v10 = vadd.f32 -1.0, %v1166_v9 }
 0x167   :  { %v5859_v11 = vsel %vm5851_vm3, %v4863_v10, %v5321_v8 }
 0x168   :  { %1171 = vrot.lane.b32.xlu0 %v5859_v11, %s7252_s1  ;;  %v1169_v14 = vmul.f32 0.0, %v5859_v11 }
 0x1da   :  { %v1172_v12 = vpop.permute.xlu0 %1171 }
 0x1db   :  { %v1174_v13 = vmul.f32 %v1172_v12, %v5859_v11 }
 0x1dd   :  { %1176 = vrot.lane.b32.xlu0 %v1174_v13, %s5694_s24 }
 0x24f   :  { %v1177_v15 = vpop.permute.xlu0 %1176 }
 0x250   :  { %v5866_v16 = vadd.f32 %v1177_v15, %v1169_v14 }
 0x252   :  { %5322 = vtanh.f32 %v5866_v16 }
 0x25c   :  { %v5323_v23 = vpop.eup %5322 }
 0x25d   :  { %1182 = vrot.lane.b32.xlu1 %v5323_v23, %s7252_s1  ;;  %v320_v23 = vld [vmem:[%s319_s10] ss:$8 sm:$0x3]  ;;  %s375_s10 = scalar_lea.vmem [#allocation6], %s374_s13  ;;  %s6095_s13 = sld [smem:[#allocation5 + $0x303]] }
 0x25e   :  { %322 = vst.msk [vmem:[#allocation2 + $0x20] ss:$8 sm:$0x3] %vm5814_vm0, %v320_v23  ;;  %v376_v27 = vld [vmem:[%s375_s10] ss:$8 sm:$0x3] }
 0x25f   :  { %378 = vst.msk [vmem:[#allocation2 + $0x24] ss:$8 sm:$0x3] %vm5814_vm0, %v376_v27  ;;  %s427_s10 = sand.u32 7, %s4741_s15  ;;  %s5036_s15 = sshll.u32 %s466_s0, 4 }
 0x260   :  { %s430_s30 = sadd.s32 %s5033_s23, %s427_s10  ;;  %s472_s22 = sadd.s32 %s5036_s15, %s469_s9 }
 0x261   :  { %s431_s26 = scalar_lea.vmem [#allocation6], %s430_s30  ;;  %s480_s10 = sshra.s32 %s6091_s18, 3 }
 0x262   :  { %s473_s23 = scalar_lea.vmem [#allocation6], %s472_s22  ;;  %s5037_s2 = sshll.u32 %s480_s10, 4 }
 0x263   :  { %s494_s30 = sshra.s32 %s6093_s3, 3  ;;  %s486_s17 = sadd.s32 %s5037_s2, %s483_s28 }
 0x264   :  { %s5038_s19 = sshll.u32 %s494_s30, 4  ;;  %s508_s20 = sshra.s32 %s6095_s13, 3 }
 0x265   :  { %s500_s27 = sadd.s32 %s5038_s19, %s497_s25  ;;  %s511_s18 = sand.u32 7, %s6095_s13 }
 0x266   :  { %v987_v31 = vld [vmem:[#allocation2 + $0x28] sm:$0xff]  ;;  %v986_v32 = vld [vmem:[#allocation2 + $0x20] sm:$0xff]  ;;  %s501_s11 = scalar_lea.vmem [#allocation6], %s500_s27  ;;  %s5040_s9 = sshll.u32 %s522_s12, 4 }
 0x267   :  { %1104 = vmatprep.mubr.f32.mxu0 %v987_v31  ;;  %s528_s15 = sadd.s32 %s5040_s9, %s525_s29  ;;  %s4765_s22 = sld [smem:[#allocation5 + $0x4]] }
 0x268   :  { %1105 = vmatmul.mubr.f32.gmra.mrb[4].mxu0 %v986_v32  ;;  %s4768_s10 = sld [smem:[#allocation5 + $0x84]] }
 0x269   :  { %s6236_s28 = sld [smem:[#allocation5 + $0x104]] }
 0x26a   :  { %s6241_s2 = sld [smem:[#allocation5 + $0x204]] }
 0x26b   :  { %s6243_s30 = sld [smem:[#allocation5 + $0x284]] }
 0x26c   :  { %s6247_s25 = sld [smem:[#allocation5 + $0x384]] }
 0x26d   :  { %s536_s19 = sshra.s32 %s4765_s22, 3 }
 0x26e   :  { %s5041_s27 = sshll.u32 %s536_s19, 4 }
 0x26f   :  { %s564_s29 = sshra.s32 %s6236_s28, 3  ;;  %s567_s9 = sand.u32 7, %s6236_s28 }
 0x270   :  { %s595_s28 = sand.u32 7, %s6241_s2 }
 0x2cf   :  { %v1183_v34 = vpop.permute.xlu1 %1182 }
 0x2d0   :  { %v1185_v35 = vmul.f32 %v1183_v34, %v5859_v11 }
 0x2d2   :  { %v1186_v36 = vpack.c.bf16 %v1185_v35, %v1185_v35 }
 0x2d4   :  { %1192 = vrot.lane.b32.xlu1 %v1186_v36, %s5694_s24 }
 0x346   :  { %v1193_v37 = vpop.permute.xlu1 %1192 }
 0x347   :  { %4868 = vmatmul.mubr.msk.bf16.vlgmr.msra.gmra.mrb[0].mxu1 %vm1214_vm4, %v1193_v37 }
 0x348   :  { %1298 = vmatpush1.bf16.msra.mxu1 %v5871_v18  ;;  %1329 = vmatprep.mubr.bf16.mxu1 %v5695_v22 }
 0x349   :  { %1299 = vmatprep.subr.bf16.mxu1 %v5873_v19 }
 0x34c   :  { %1300 = vmatpush1.bf16.msra.mxu1 %v5881_v20 }
 0x34d   :  { %1408 = vmatprep.subr.bf16.mxu1 %v6009_v33 }
 0x41a   :  { %v1252_v42 = vpop.f32.mrb[0].mxu1 }
 0x41b   :  { %v1260_v43 = vadd.f32 %v5110_v40, %v1252_v42  ;;  %v1254_v44 = vpop.f32.mrb[1].mxu1  ;;  %v6016_v40 = vld [vmem:[#allocation10 + $0x20] ss:$8 sps:$4 sm:$0xff]   ;;  %v6018_v42 = vld [vmem:[#allocation10 + $0x34] ss:$8 sps:$4 sm:$0xff]  }
 0x41c   :  { %v1347_v45 = vadd.f32 %v5934_v41, %v1254_v44  ;;  %v1256_v46 = vpop.f32.mrb[2].mxu1  ;;  %v6022_v44 = vld [vmem:[#allocation10 + $0x30] ss:$8 sps:$4 sm:$0xff]  }
 0x41d   :  { %v1261_v47 = vadd.f32 %v5848_v63, %v1260_v43  ;;  %v1257_v48 = vpop.f32.mrb[3].mxu1 }
 0x41e   :  { %v1348_v49 = vmul.f32 2.0, %v1347_v45 }
 0x41f   :  { %v1262_v50 = vmul.f32 2.0, %v1261_v47 }
 0x420   :  { %v1349_v51 = vsel %vm5851_vm3, %v1348_v49, %v1347_v45  ;;  %v5111_v45 = vpop.f32.mrb[4].mxu0 }
 0x421   :  { %v1263_v52 = vsel %vm5851_vm3, %v1262_v50, %v1261_v47  ;;  %v4874_v53 = vmul.f32 -1.442695, %v1349_v51  ;;  %v5112_v46 = vpop.f32.mrb[5].mxu0 }
 0x422   :  { %v4869_v54 = vmul.f32 -1.442695, %v1263_v52  ;;  %v5113_v48 = vadd.f32 %v5112_v46, %v5111_v45 }
 0x423   :  { %5324 = vpow2.f32 %v4874_v53 }
 0x424   :  { %5326 = vpow2.f32 %v4869_v54 }
 0x42d   :  { %v5325_v55 = vpop.eup %5324 }
 0x42e   :  { %v5327_v56 = vpop.eup %5326  ;;  %v1353_v57 = vadd.f32 1.0, %v5325_v55 }
 0x42f   :  { %v1267_v58 = vadd.f32 1.0, %v5327_v56 }
 0x430   :  { %5328 = vrcp.f32 %v1353_v57  ;;  %v6040_v57 = vld [vmem:[%s7248_s5 + $0x2] ss:$0 sm:$0xff] }
 0x431   :  { %5330 = vrcp.f32 %v1267_v58 }
 0x43a   :  { %v5329_v59 = vpop.eup %5328 }
 0x43b   :  { %v5331_v60 = vpop.eup %5330  ;;  %v1356_v61 = vmul.f32 2.0, %v5329_v59 }
 0x43c   :  { %v1270_v62 = vmul.f32 2.0, %v5331_v60 }
 0x43d   :  { %v4875_v0 = vadd.f32 -1.0, %v1356_v61 }
 0x43e   :  { %v4870_v1 = vadd.f32 -1.0, %v1270_v62 }
 0x43f   :  { %v5944_v3 = vsel %vm5851_vm3, %v4875_v0, %v5329_v59 }
 0x440   :  { %1361 = vrot.lane.b32.xlu1 %v5944_v3, %s7252_s1  ;;  %v5950_v4 = vsel %vm5851_vm3, %v4870_v1, %v5331_v60  ;;  %v1359_v9 = vmul.f32 0.0, %v5944_v3 }
 0x441   :  { %1275 = vrot.lane.b32.xlu0 %v5950_v4, %s7252_s1  ;;  %v1273_v11 = vmul.f32 %v5950_v4, %v5866_v16 }
 0x4b2   :  { %v1362_v5 = vpop.permute.xlu1 %1361 }
 0x4b3   :  { %v1364_v6 = vmul.f32 %v1362_v5, %v5944_v3  ;;  %v1276_v7 = vpop.permute.xlu0 %1275 }
 0x4b4   :  { %v1278_v8 = vmul.f32 %v1276_v7, %v5950_v4 }
 0x4b5   :  { %1366 = vrot.lane.b32.xlu1 %v1364_v6, %s5694_s24 }
 0x4b6   :  { %1280 = vrot.lane.b32.xlu0 %v1278_v8, %s5694_s24 }
 0x527   :  { %v1367_v10 = vpop.permute.xlu1 %1366 }
 0x528   :  { %v5961_v12 = vadd.f32 %v1367_v10, %v1359_v9  ;;  %v1281_v13 = vpop.permute.xlu0 %1280 }
 0x529   :  { %v5963_v14 = vadd.f32 %v1281_v13, %v1273_v11 }
 0x52a   :  { %5332 = vtanh.f32 %v5961_v12 }
 0x52b   :  { %5334 = vtanh.f32 %v5963_v14 }
 0x534   :  { %v5333_v15 = vpop.eup %5332 }
 0x535   :  { %v5335_v16 = vpop.eup %5334  ;;  %1372 = vrot.lane.b32.xlu1 %v5333_v15, %s7252_s1 }
 0x536   :  { %1286 = vrot.lane.b32.xlu0 %v5335_v16, %s7252_s1 }
 0x5a7   :  { %v1373_v34 = vpop.permute.xlu1 %1372 }
 0x5a8   :  { %v1375_v35 = vmul.f32 %v1373_v34, %v5944_v3  ;;  %v1287_v36 = vpop.permute.xlu0 %1286 }
 0x5a9   :  { %v1289_v37 = vmul.f32 %v1287_v36, %v5950_v4 }
 0x5aa   :  { %v1376_v38 = vpack.c.bf16 %v1375_v35, %v1375_v35 }
 0x5ab   :  { %v1290_v39 = vpack.c.bf16 %v1289_v37, %v1289_v37 }
 0x5ac   :  { %1383 = vrot.lane.b32.xlu1 %v1376_v38, %s5694_s24 }
 0x5ad   :  { %1292 = vrot.lane.b32.xlu0 %v1290_v39, %s5694_s24 }
 0x61e   :  { %v1384_v47 = vpop.permute.xlu1 %1383 }
 0x61f   :  { %v1293_v43 = vpop.permute.xlu0 %1292 }
 0x620   :  { %4871 = vmatmul.mubr.msk.bf16.vlgmr.msra.gmra.mrb[4].mxu1 %vm1214_vm4, %v1293_v43 }
 0x621   :  { %1409 = vmatpush1.bf16.msra.mxu1 %v6016_v40  ;;  %1440 = vmatprep.mubr.bf16.mxu1 %v5695_v22 }
 0x622   :  { %1410 = vmatprep.subr.bf16.mxu1 %v6018_v42 }
 0x625   :  { %1411 = vmatpush1.bf16.msra.mxu1 %v6022_v44 }
 0x626   :  { %1487 = vmatprep.subr.bf16.mxu1 %v5869_v17 }
 0x628   :  { %4880 = vmatmul.mubr.msk.bf16.vlgmr.msra.gmra.mrb[8].mxu1 %vm1214_vm4, %v1384_v47 }
 0x629   :  { %1488 = vmatpush1.bf16.msra.mxu1 %v5871_v18  ;;  %1519 = vmatprep.mubr.bf16.mxu1 %v5695_v22 }
 0x62a   :  { %1489 = vmatprep.subr.bf16.mxu1 %v5873_v19 }
 0x62d   :  { %1490 = vmatpush1.bf16.msra.mxu1 %v5881_v20 }
 0x62e   :  { %1565 = vmatprep.subr.bf16.mxu1 %v6009_v33 }
 0x6f3   :  { %v1331_v49 = vpop.f32.mrb[4].mxu1 }
 0x6f4   :  { %v1450_v50 = vadd.f32 %v5113_v48, %v1331_v49  ;;  %v1333_v51 = vpop.f32.mrb[5].mxu1 }
 0x6f5   :  { %v1335_v52 = vpop.f32.mrb[6].mxu1 }
 0x6f6   :  { %v1451_v53 = vadd.f32 %v5848_v63, %v1450_v50  ;;  %v1336_v54 = vpop.f32.mrb[7].mxu1 }
 0x6f8   :  { %v1452_v55 = vmul.f32 2.0, %v1451_v53 }
 0x6fa   :  { %v1453_v56 = vsel %vm5851_vm3, %v1452_v55, %v1451_v53 }
 0x6fb   :  { %v4881_v58 = vmul.f32 -1.442695, %v1453_v56  ;;  %v1442_v59 = vpop.f32.mrb[8].mxu1 }
 0x6fc   :  { %v1528_v60 = vadd.f32 %v1442_v59, %v1333_v51  ;;  %v1444_v61 = vpop.f32.mrb[9].mxu1  ;;  %v446_v59 = vld [vmem:[%s445_s14] ss:$8 sm:$0x3]  ;;  %s5039_s14 = sshll.u32 %s508_s20, 4  ;;  %s550_s20 = sshra.s32 %s4768_s10, 3 }
 0x6fd   :  { %5336 = vpow2.f32 %v4881_v58  ;;  %v1615_v62 = vadd.f32 %v6040_v57, %v1444_v61  ;;  %v1446_v0 = vpop.f32.mrb[10].mxu1  ;;  %v432_v58 = vld [vmem:[%s431_s26] ss:$8 sm:$0x3]  ;;  %s487_s26 = scalar_lea.vmem [#allocation6], %s486_s17  ;;  %s514_s0 = sadd.s32 %s5039_s14, %s511_s18 }
 0x6fe   :  { %v1529_v1 = vadd.f32 %v5934_v41, %v1528_v60  ;;  %v1447_v3 = vpop.f32.mrb[11].mxu1  ;;  %434 = vst.msk [vmem:[#allocation2 + $0x30] ss:$8 sm:$0x3] %vm5814_vm0, %v432_v58  ;;  %s515_s3 = scalar_lea.vmem [#allocation6], %s514_s0  ;;  %s6245_s17 = sld [smem:[#allocation5 + $0x304]] }
 0x6ff   :  { %v1616_v4 = vmul.f32 2.0, %v1615_v62  ;;  %448 = vst.msk [vmem:[#allocation2 + $0x31] ss:$8 sm:$0x3] %vm5814_vm0, %v446_v59  ;;  %s5042_s14 = sshll.u32 %s550_s20, 4 }
 0x700   :  { %v1530_v5 = vmul.f32 2.0, %v1529_v1  ;;  %v460_v60 = vld [vmem:[%s459_s16] ss:$8 sm:$0x3]  ;;  %s529_s16 = scalar_lea.vmem [#allocation6], %s528_s15  ;;  %s5043_s15 = sshll.u32 %s564_s29, 4 }
 0x701   :  { %v1617_v6 = vsel %vm5851_vm3, %v1616_v4, %v1615_v62  ;;  %462 = vst.msk [vmem:[#allocation2 + $0x32] ss:$8 sm:$0x3] %vm5814_vm0, %v460_v60  ;;  %v474_v61 = vld [vmem:[%s473_s23] ss:$8 sm:$0x3]  ;;  %s570_s13 = sadd.s32 %s5043_s15, %s567_s9 }
 0x702   :  { %v1531_v7 = vsel %vm5851_vm3, %v1530_v5, %v1529_v1  ;;  %v4889_v8 = vmul.f32 -1.442695, %v1617_v6  ;;  %476 = vst.msk [vmem:[#allocation2 + $0x33] ss:$8 sm:$0x3] %vm5814_vm0, %v474_v61  ;;  %s6239_s23 = sld [smem:[#allocation5 + $0x184]] }
 0x703   :  { %v4884_v9 = vmul.f32 -1.442695, %v1531_v7  ;;  %v488_v62 = vld [vmem:[%s487_s26] ss:$8 sm:$0x3]  ;;  %s539_s26 = sand.u32 7, %s4765_s22 }
 0x704   :  { %5338 = vpow2.f32 %v4889_v8  ;;  %490 = vst.msk [vmem:[#allocation2 + $0x34] ss:$8 sm:$0x3] %vm5814_vm0, %v488_v62  ;;  %v502_v0 = vld [vmem:[%s501_s11] ss:$8 sm:$0x3]  ;;  %s542_s18 = sadd.s32 %s5041_s27, %s539_s26 }
 0x705   :  { %5340 = vpow2.f32 %v4884_v9  ;;  %504 = vst.msk [vmem:[#allocation2 + $0x35] ss:$8 sm:$0x3] %vm5814_vm0, %v502_v0  ;;  %v516_v1 = vld [vmem:[%s515_s3] ss:$8 sm:$0x3] }
 0x706   :  { %518 = vst.msk [vmem:[#allocation2 + $0x36] ss:$8 sm:$0x3] %vm5814_vm0, %v516_v1  ;;  %v530_v3 = vld [vmem:[%s529_s16] ss:$8 sm:$0x3] }
 0x707   :  { %v5337_v10 = vpop.eup %5336  ;;  %532 = vst.msk [vmem:[#allocation2 + $0x37] ss:$8 sm:$0x3] %vm5814_vm0, %v530_v3  ;;  %s553_s11 = sand.u32 7, %s4768_s10  ;;  %s543_s12 = scalar_lea.vmem [#allocation6], %s542_s18 }
 0x708   :  { %v1457_v11 = vadd.f32 1.0, %v5337_v10  ;;  %s556_s0 = sadd.s32 %s5042_s14, %s553_s11  ;;  %s578_s16 = sshra.s32 %s6239_s23, 3 }
 0x709   :  { %s557_s3 = scalar_lea.vmem [#allocation6], %s556_s0  ;;  %s581_s21 = sand.u32 7, %s6239_s23 }
 0x70a   :  { %5342 = vrcp.f32 %v1457_v11  ;;  %s5044_s22 = sshll.u32 %s578_s16, 4  ;;  %s571_s10 = scalar_lea.vmem [#allocation6], %s570_s13 }
 0x70b   :  { %s584_s19 = sadd.s32 %s5044_s22, %s581_s21  ;;  %s592_s26 = sshra.s32 %s6241_s2, 3 }
 0x70c   :  { %s585_s27 = scalar_lea.vmem [#allocation6], %s584_s19  ;;  %s5045_s20 = sshll.u32 %s592_s26, 4 }
 0x70d   :  { %s606_s18 = sshra.s32 %s6243_s30, 3  ;;  %s598_s23 = sadd.s32 %s5045_s20, %s595_s28 }
 0x70e   :  { %v5339_v13 = vpop.eup %5338  ;;  %v989_v4 = vld [vmem:[#allocation2 + $0x38] sm:$0xff]  ;;  %v988_v5 = vld [vmem:[#allocation2 + $0x30] sm:$0xff]  ;;  %s609_s11 = sand.u32 7, %s6243_s30  ;;  %s5046_s14 = sshll.u32 %s606_s18, 4 }
 0x70f   :  { %v5341_v15 = vpop.eup %5340  ;;  %v1621_v16 = vadd.f32 1.0, %v5339_v13  ;;  %1109 = vmatprep.mubr.f32.mxu0 %v989_v4  ;;  %s612_s0 = sadd.s32 %s5046_s14, %s609_s11  ;;  %s620_s29 = sshra.s32 %s6245_s17, 3 }
 0x710   :  { %v1535_v23 = vadd.f32 1.0, %v5341_v15  ;;  %1110 = vmatmul.mubr.f32.gmra.mrb[6].mxu0 %v988_v5  ;;  %s623_s2 = sand.u32 7, %s6245_s17  ;;  %s613_s9 = scalar_lea.vmem [#allocation6], %s612_s0 }
 0x711   :  { %5344 = vrcp.f32 %v1621_v16  ;;  %s634_s15 = sshra.s32 %s6247_s25, 3  ;;  %s637_s13 = sand.u32 7, %s6247_s25 }
 0x712   :  { %5346 = vrcp.f32 %v1535_v23  ;;  %s5048_s21 = sshll.u32 %s634_s15, 4  ;;  %s4789_s17 = sld [smem:[#allocation5 + $0x5]] }
 0x713   :  { %s640_s22 = sadd.s32 %s5048_s21, %s637_s13  ;;  %s4792_s19 = sld [smem:[#allocation5 + $0x85]] }
 0x714   :  { %v5343_v24 = vpop.eup %5342  ;;  %s6279_s26 = sld [smem:[#allocation5 + $0x105]]  ;;  %s6293_s11 = sld [smem:[#allocation5 + $0x86]] }
 0x715   :  { %v1460_v25 = vmul.f32 2.0, %v5343_v24  ;;  %s6281_s25 = sld [smem:[#allocation5 + $0x185]]  ;;  %s6295_s14 = sld [smem:[#allocation5 + $0x106]] }
 0x716   :  { %s6283_s28 = sld [smem:[#allocation5 + $0x205]] }
 0x717   :  { %v4882_v26 = vadd.f32 -1.0, %v1460_v25  ;;  %v6142_v25 = vld [vmem:[#allocation10 + $0x40] ss:$8 sps:$4 sm:$0xff]   ;;  %s6287_s20 = sld [smem:[#allocation5 + $0x305]] }
 0x718   :  { %s6289_s18 = sld [smem:[#allocation5 + $0x385]]  ;;  %s648_s0 = sshra.s32 %s4789_s17, 3 }
 0x719   :  { %v6050_v27 = vsel %vm5851_vm3, %v4882_v26, %v5343_v24  ;;  %v6139_v24 = vld [vmem:[#allocation10 + $0x44] ss:$8 sps:$4 sm:$0xff]   ;;  %v6145_v26 = vld [vmem:[#allocation10 + $0x54] ss:$8 sps:$4 sm:$0xff]   ;;  %s665_s15 = sand.u32 7, %s4792_s19 }
 0x71a   :  { %1465 = vrot.lane.b32.xlu0 %v6050_v27, %s7252_s1  ;;  %v1463_v47 = vmul.f32 %v6050_v27, %v5963_v14 }
 0x71b   :  { %v5345_v28 = vpop.eup %5344 }
 0x71c   :  { %v5347_v29 = vpop.eup %5346  ;;  %v1624_v30 = vmul.f32 2.0, %v5345_v28 }
 0x71d   :  { %v1538_v31 = vmul.f32 2.0, %v5347_v29 }
 0x71e   :  { %v4890_v32 = vadd.f32 -1.0, %v1624_v30 }
 0x71f   :  { %v4885_v34 = vadd.f32 -1.0, %v1538_v31 }
 0x720   :  { %v6056_v35 = vsel %vm5851_vm3, %v4890_v32, %v5345_v28 }
 0x721   :  { %1629 = vrot.lane.b32.xlu0 %v6056_v35, %s7252_s1  ;;  %v6062_v36 = vsel %vm5851_vm3, %v4885_v34, %v5347_v29  ;;  %v1627_v50 = vmul.f32 0.0, %v6056_v35 }
 0x722   :  { %1543 = vrot.lane.b32.xlu1 %v6062_v36, %s7252_s1  ;;  %v1541_v52 = vmul.f32 %v6062_v36, %v5961_v12 }
 0x78c   :  { %v1466_v37 = vpop.permute.xlu0 %1465 }
 0x78d   :  { %v1468_v38 = vmul.f32 %v1466_v37, %v6050_v27 }
 0x78f   :  { %1470 = vrot.lane.b32.xlu1 %v1468_v38, %s5694_s24 }
 0x793   :  { %v1630_v39 = vpop.permute.xlu0 %1629 }
 0x794   :  { %v1632_v43 = vmul.f32 %v1630_v39, %v6056_v35  ;;  %v1544_v45 = vpop.permute.xlu1 %1543 }
 0x795   :  { %v1546_v46 = vmul.f32 %v1544_v45, %v6062_v36 }
 0x796   :  { %1634 = vrot.lane.b32.xlu1 %v1632_v43, %s5694_s24 }
 0x797   :  { %1548 = vrot.lane.b32.xlu0 %v1546_v46, %s5694_s24 }
 0x801   :  { %v1471_v48 = vpop.permute.xlu1 %1470 }
 0x802   :  { %v6074_v49 = vadd.f32 %v1471_v48, %v1463_v47 }
 0x804   :  { %5348 = vtanh.f32 %v6074_v49 }
 0x808   :  { %v1635_v51 = vpop.permute.xlu1 %1634 }
 0x809   :  { %v6080_v53 = vadd.f32 %v1635_v51, %v1627_v50  ;;  %v1549_v54 = vpop.permute.xlu0 %1548 }
 0x80a   :  { %v6082_v55 = vadd.f32 %v1549_v54, %v1541_v52 }
 0x80b   :  { %5350 = vtanh.f32 %v6080_v53 }
 0x80c   :  { %5352 = vtanh.f32 %v6082_v55 }
 0x80e   :  { %v5349_v14 = vpop.eup %5348 }
 0x80f   :  { %1476 = vrot.lane.b32.xlu0 %v5349_v14, %s7252_s1 }
 0x815   :  { %v5351_v12 = vpop.eup %5350 }
 0x816   :  { %v5353_v56 = vpop.eup %5352  ;;  %1640 = vrot.lane.b32.xlu0 %v5351_v12, %s7252_s1 }
 0x817   :  { %1554 = vrot.lane.b32.xlu1 %v5353_v56, %s7252_s1 }
 0x881   :  { %v1477_v6 = vpop.permute.xlu0 %1476 }
 0x882   :  { %v1479_v7 = vmul.f32 %v1477_v6, %v6050_v27 }
 0x884   :  { %v1480_v8 = vpack.c.bf16 %v1479_v7, %v1479_v7 }
 0x886   :  { %1482 = vrot.lane.b32.xlu1 %v1480_v8, %s5694_s24 }
 0x888   :  { %v1641_v9 = vpop.permute.xlu0 %1640 }
 0x889   :  { %v1643_v10 = vmul.f32 %v1641_v9, %v6056_v35  ;;  %v1555_v11 = vpop.permute.xlu1 %1554 }
 0x88a   :  { %v1557_v13 = vmul.f32 %v1555_v11, %v6062_v36 }
 0x88b   :  { %v1644_v15 = vpack.c.bf16 %v1643_v10, %v1643_v10 }
 0x88c   :  { %v1558_v16 = vpack.c.bf16 %v1557_v13, %v1557_v13 }
 0x88d   :  { %1651 = vrot.lane.b32.xlu1 %v1644_v15, %s5694_s24 }
 0x88e   :  { %1560 = vrot.lane.b32.xlu0 %v1558_v16, %s5694_s24 }
 0x8f8   :  { %v1483_v23 = vpop.permute.xlu1 %1482 }
 0x8f9   :  { %4883 = vmatmul.mubr.msk.bf16.vlgmr.msra.gmra.mrb[12].mxu1 %vm1214_vm4, %v1483_v23 }
 0x8fa   :  { %1566 = vmatpush1.bf16.msra.mxu1 %v6016_v40  ;;  %1597 = vmatprep.mubr.bf16.mxu1 %v5695_v22  ;;  %v6149_v40 = vld [vmem:[#allocation10 + $0x50] ss:$8 sps:$4 sm:$0xff]  }
 0x8fb   :  { %1567 = vmatprep.subr.bf16.mxu1 %v6018_v42  ;;  %v5114_v42 = vpop.f32.mrb[6].mxu0 }
 0x8fe   :  { %1568 = vmatpush1.bf16.msra.mxu1 %v6022_v44  ;;  %v5115_v44 = vpop.f32.mrb[7].mxu0 }
 0x8ff   :  { %1676 = vmatprep.subr.bf16.mxu1 %v6139_v24  ;;  %v1652_v28 = vpop.permute.xlu1 %1651  ;;  %v5116_v29 = vadd.f32 %v5115_v44, %v5114_v42 }
 0x900   :  { %v1561_v27 = vpop.permute.xlu0 %1560 }
 0x901   :  { %4886 = vmatmul.mubr.msk.bf16.vlgmr.msra.gmra.mrb[16].mxu1 %vm1214_vm4, %v1561_v27 }
 0x902   :  { %1677 = vmatpush1.bf16.msra.mxu1 %v6142_v25  ;;  %1708 = vmatprep.mubr.bf16.mxu1 %v5695_v22 }
 0x903   :  { %1678 = vmatprep.subr.bf16.mxu1 %v6145_v26 }
 0x906   :  { %1679 = vmatpush1.bf16.msra.mxu1 %v6149_v40 }
 0x907   :  { %1755 = vmatprep.subr.bf16.mxu1 %v5869_v17 }
 0x909   :  { %4895 = vmatmul.mubr.msk.bf16.vlgmr.msra.gmra.mrb[20].mxu1 %vm1214_vm4, %v1652_v28 }
 0x90a   :  { %1756 = vmatpush1.bf16.msra.mxu1 %v5871_v18  ;;  %1787 = vmatprep.mubr.bf16.mxu1 %v5695_v22 }
 0x90b   :  { %1757 = vmatprep.subr.bf16.mxu1 %v5873_v19 }
 0x90e   :  { %1758 = vmatpush1.bf16.msra.mxu1 %v5881_v20 }
 0x90f   :  { %1833 = vmatprep.subr.bf16.mxu1 %v6009_v33 }
 0x9cc   :  { %v1521_v30 = vpop.f32.mrb[12].mxu1 }
 0x9cd   :  { %v1718_v31 = vadd.f32 %v5116_v29, %v1521_v30  ;;  %v1523_v32 = vpop.f32.mrb[13].mxu1 }
 0x9ce   :  { %v1525_v34 = vpop.f32.mrb[14].mxu1 }
 0x9cf   :  { %v1719_v17 = vadd.f32 %v5848_v63, %v1718_v31  ;;  %v1526_v35 = vpop.f32.mrb[15].mxu1  ;;  %v6170_v63 = vld [vmem:[%s7248_s5 + $0x3] ss:$0 sm:$0xff] }
 0x9d1   :  { %v1720_v36 = vmul.f32 2.0, %v1719_v17 }
 0x9d3   :  { %v1721_v37 = vsel %vm5851_vm3, %v1720_v36, %v1719_v17 }
 0x9d4   :  { %v4896_v18 = vmul.f32 -1.442695, %v1721_v37  ;;  %v1599_v38 = vpop.f32.mrb[16].mxu1 }
 0x9d5   :  { %v1796_v39 = vadd.f32 %v1599_v38, %v1523_v32  ;;  %v1601_v43 = vpop.f32.mrb[17].mxu1 }
 0x9d6   :  { %5354 = vpow2.f32 %v4896_v18  ;;  %v1603_v19 = vpop.f32.mrb[18].mxu1 }
 0x9d7   :  { %v1797_v20 = vadd.f32 %v5934_v41, %v1796_v39  ;;  %v1604_v45 = vpop.f32.mrb[19].mxu1 }
 0x9d9   :  { %v1798_v46 = vmul.f32 2.0, %v1797_v20 }
 0x9db   :  { %v1799_v47 = vsel %vm5851_vm3, %v1798_v46, %v1797_v20 }
 0x9dc   :  { %v4899_v48 = vmul.f32 -1.442695, %v1799_v47  ;;  %v1710_v50 = vpop.f32.mrb[20].mxu1 }
 0x9dd   :  { %v1874_v51 = vadd.f32 %v1710_v50, %v1601_v43  ;;  %v1712_v52 = vpop.f32.mrb[21].mxu1 }
 0x9de   :  { %5356 = vpow2.f32 %v4899_v48  ;;  %v1961_v54 = vadd.f32 %v6170_v63, %v1712_v52  ;;  %v1714_v14 = vpop.f32.mrb[22].mxu1 }
 0x9df   :  { %v1875_v41 = vadd.f32 %v6040_v57, %v1874_v51  ;;  %v1715_v12 = vpop.f32.mrb[23].mxu1 }
 0x9e0   :  { %v5355_v56 = vpop.eup %5354  ;;  %v1962_v58 = vmul.f32 2.0, %v1961_v54  ;;  %v6232_v12 = vld [vmem:[#allocation10 + $0x60] ss:$8 sps:$4 sm:$0xff]  }
 0x9e1   :  { %v1725_v59 = vadd.f32 1.0, %v5355_v56  ;;  %v1876_v60 = vmul.f32 2.0, %v1875_v41 }
 0x9e2   :  { %v1963_v61 = vsel %vm5851_vm3, %v1962_v58, %v1961_v54  ;;  %v544_v58 = vld [vmem:[%s543_s12] ss:$8 sm:$0x3]  ;;  %s599_s12 = scalar_lea.vmem [#allocation6], %s598_s23  ;;  %s6291_s23 = sld [smem:[#allocation5 + $0x6]] }
 0x9e3   :  { %5358 = vrcp.f32 %v1725_v59  ;;  %v1877_v62 = vsel %vm5851_vm3, %v1876_v60, %v1875_v41  ;;  %v4907_v0 = vmul.f32 -1.442695, %v1963_v61  ;;  %v6230_v41 = vld [vmem:[#allocation10 + $0x64] ss:$8 sps:$4 sm:$0xff]  }
 0x9e4   :  { %v4902_v1 = vmul.f32 -1.442695, %v1877_v62  ;;  %2022 = vmatprep.subr.bf16.mxu0 %v6230_v41  ;;  %546 = vst.msk [vmem:[#allocation2 + $0x40] ss:$8 sm:$0x3] %vm5814_vm0, %v544_v58 }
 0x9e5   :  { %5360 = vpow2.f32 %v4907_v0  ;;  %2023 = vmatpush1.bf16.msra.mxu0 %v6232_v12  ;;  %v558_v59 = vld [vmem:[%s557_s3] ss:$8 sm:$0x3]  ;;  %s5047_s3 = sshll.u32 %s620_s29, 4  ;;  %s662_s29 = sshra.s32 %s4792_s19, 3 }
 0x9e6   :  { %5362 = vpow2.f32 %v4902_v1  ;;  %560 = vst.msk [vmem:[#allocation2 + $0x41] ss:$8 sm:$0x3] %vm5814_vm0, %v558_v59  ;;  %v572_v60 = vld [vmem:[%s571_s10] ss:$8 sm:$0x3]  ;;  %s626_s16 = sadd.s32 %s5047_s3, %s623_s2 }
 0x9e7   :  { %574 = vst.msk [vmem:[#allocation2 + $0x42] ss:$8 sm:$0x3] %vm5814_vm0, %v572_v60  ;;  %v586_v61 = vld [vmem:[%s585_s27] ss:$8 sm:$0x3] }
 0x9e8   :  { %v5357_v3 = vpop.eup %5356  ;;  %588 = vst.msk [vmem:[#allocation2 + $0x43] ss:$8 sm:$0x3] %vm5814_vm0, %v586_v61  ;;  %v600_v62 = vld [vmem:[%s599_s12] ss:$8 sm:$0x3] }
 0x9e9   :  { %v1803_v4 = vadd.f32 1.0, %v5357_v3  ;;  %602 = vst.msk [vmem:[#allocation2 + $0x44] ss:$8 sm:$0x3] %vm5814_vm0, %v600_v62  ;;  %s627_s30 = scalar_lea.vmem [#allocation6], %s626_s16  ;;  %s641_s10 = scalar_lea.vmem [#allocation6], %s640_s22 }
 0x9ea   :  { %v614_v0 = vld [vmem:[%s613_s9] ss:$8 sm:$0x3]  ;;  %s6285_s27 = sld [smem:[#allocation5 + $0x285]]  ;;  %s6297_s12 = sld [smem:[#allocation5 + $0x186]] }
 0x9eb   :  { %5364 = vrcp.f32 %v1803_v4  ;;  %616 = vst.msk [vmem:[#allocation2 + $0x45] ss:$8 sm:$0x3] %vm5814_vm0, %v614_v0  ;;  %v628_v1 = vld [vmem:[%s627_s30] ss:$8 sm:$0x3] }
 0x9ec   :  { %630 = vst.msk [vmem:[#allocation2 + $0x46] ss:$8 sm:$0x3] %vm5814_vm0, %v628_v1  ;;  %v642_v3 = vld [vmem:[%s641_s10] ss:$8 sm:$0x3] }
 0x9ed   :  { %v5359_v57 = vpop.eup %5358  ;;  %644 = vst.msk [vmem:[#allocation2 + $0x47] ss:$8 sm:$0x3] %vm5814_vm0, %v642_v3  ;;  %s651_s2 = sand.u32 7, %s4789_s17  ;;  %s5049_s9 = sshll.u32 %s648_s0, 4 }
 0x9ee   :  { %v1728_v5 = vmul.f32 2.0, %v5359_v57  ;;  %s654_s3 = sadd.s32 %s5049_s9, %s651_s2  ;;  %s5050_s16 = sshll.u32 %s662_s29, 4  ;;  %v6420_v0 = vld [vmem:[#allocation10 + $0x20] ss:$8 sps:$4 sm:$0xff]   ;;  %v6424_v1 = vld [vmem:[#allocation10 + $0x34] ss:$8 sps:$4 sm:$0xff]  }
 0x9ef   :  { %v5361_v6 = vpop.eup %5360  ;;  %s655_s13 = scalar_lea.vmem [#allocation6], %s654_s3  ;;  %s668_s21 = sadd.s32 %s5050_s16, %s665_s15 }
 0x9f0   :  { %v5363_v7 = vpop.eup %5362  ;;  %v1967_v8 = vadd.f32 1.0, %v5361_v6  ;;  %v4897_v9 = vadd.f32 -1.0, %v1728_v5  ;;  %v656_v5 = vld [vmem:[%s655_s13] ss:$8 sm:$0x3]  ;;  %s676_s30 = sshra.s32 %s6279_s26, 3 }
 0x9f1   :  { %v1881_v10 = vadd.f32 1.0, %v5363_v7  ;;  %658 = vst.msk [vmem:[#allocation2 + $0x50] ss:$8 sm:$0x3] %vm5814_vm0, %v656_v5  ;;  %s679_s22 = sand.u32 7, %s6279_s26  ;;  %s669_s10 = scalar_lea.vmem [#allocation6], %s668_s21 }
 0x9f2   :  { %5366 = vrcp.f32 %v1967_v8  ;;  %v6180_v11 = vsel %vm5851_vm3, %v4897_v9, %v5359_v57  ;;  %v670_v6 = vld [vmem:[%s669_s10] ss:$8 sm:$0x3]  ;;  %s690_s17 = sshra.s32 %s6281_s25, 3  ;;  %s693_s0 = sand.u32 7, %s6281_s25 }
 0x9f3   :  { %5368 = vrcp.f32 %v1881_v10  ;;  %1733 = vrot.lane.b32.xlu0 %v6180_v11, %s7252_s1  ;;  %v1731_v43 = vmul.f32 %v6180_v11, %v6074_v49  ;;  %672 = vst.msk [vmem:[#allocation2 + $0x51] ss:$8 sm:$0x3] %vm5814_vm0, %v670_v6  ;;  %s5052_s29 = sshll.u32 %s690_s17, 4  ;;  %s704_s3 = sshra.s32 %s6283_s28, 3 }
 0x9f4   :  { %v991_v4 = vld [vmem:[#allocation2 + $0x48] sm:$0xff]  ;;  %v990_v57 = vld [vmem:[#allocation2 + $0x40] sm:$0xff]  ;;  %s696_s9 = sadd.s32 %s5052_s29, %s693_s0  ;;  %s707_s26 = sand.u32 7, %s6283_s28  ;;  %v6442_v6 = vld [vmem:[#allocation10] ss:$8 sps:$4 sm:$0xff]  }
 0x9f5   :  { %v5365_v13 = vpop.eup %5364  ;;  %1114 = vmatprep.mubr.f32.mxu0 %v991_v4  ;;  %s697_s15 = scalar_lea.vmem [#allocation6], %s696_s9  ;;  %s5053_s16 = sshll.u32 %s704_s3, 4 }
 0x9f6   :  { %v1806_v15 = vmul.f32 2.0, %v5365_v13  ;;  %1115 = vmatmul.mubr.f32.gmra.mrb[8].mxu0 %v990_v57  ;;  %v698_v8 = vld [vmem:[%s697_s15] ss:$8 sm:$0x3]  ;;  %s718_s13 = sshra.s32 %s6285_s27, 3  ;;  %s721_s25 = sand.u32 7, %s6285_s27 }
 0x9f7   :  { %700 = vst.msk [vmem:[#allocation2 + $0x53] ss:$8 sm:$0x3] %vm5814_vm0, %v698_v8  ;;  %s5054_s21 = sshll.u32 %s718_s13, 4  ;;  %s732_s10 = sshra.s32 %s6287_s20, 3 }
 0x9f8   :  { %v4900_v16 = vadd.f32 -1.0, %v1806_v15  ;;  %s735_s28 = sand.u32 7, %s6287_s20  ;;  %s746_s0 = sshra.s32 %s6289_s18, 3  ;;  %v6325_v15 = vld [vmem:[#allocation10 + $0x70] ss:$8 sps:$4 sm:$0xff]  }
 0x9f9   :  { %s749_s27 = sand.u32 7, %s6289_s18  ;;  %s760_s3 = sshra.s32 %s6291_s23, 3  ;;  %v6436_v57 = vld [vmem:[#allocation10 + $0x4] ss:$8 sps:$4 sm:$0xff]  }
 0x9fa   :  { %v6186_v23 = vsel %vm5851_vm3, %v4900_v16, %v5365_v13  ;;  %v6323_v13 = vld [vmem:[#allocation10 + $0x74] ss:$8 sps:$4 sm:$0xff]   ;;  %s763_s18 = sand.u32 7, %s6291_s23  ;;  %s5057_s15 = sshll.u32 %s760_s3, 4 }
 0x9fb   :  { %1811 = vrot.lane.b32.xlu1 %v6186_v23, %s7252_s1  ;;  %v1809_v45 = vmul.f32 %v6186_v23, %v6082_v55  ;;  %2024 = vmatprep.subr.bf16.mxu0 %v6323_v13  ;;  %s766_s13 = sadd.s32 %s5057_s15, %s763_s18  ;;  %s6360_s3 = sld [smem:[#allocation5 + $0x7]] }
 0x9fc   :  { %v5367_v27 = vpop.eup %5366  ;;  %2025 = vmatpush1.bf16.msra.mxu0 %v6325_v15  ;;  %s767_s23 = scalar_lea.vmem [#allocation6], %s766_s13  ;;  %s6362_s18 = sld [smem:[#allocation5 + $0x87]] }
 0x9fd   :  { %v5369_v42 = vpop.eup %5368  ;;  %v1970_v44 = vmul.f32 2.0, %v5367_v27  ;;  %2179 = vmatprep.subr.bf16.mxu0 %v6009_v33  ;;  %s6366_s15 = sld [smem:[#allocation5 + $0x187]] }
 0x9fe   :  { %v1884_v28 = vmul.f32 2.0, %v5369_v42  ;;  %s6371_s13 = sld [smem:[#allocation5 + $0x287]] }
 0x9ff   :  { %v4908_v29 = vadd.f32 -1.0, %v1970_v44 }
 0xa00   :  { %v4903_v30 = vadd.f32 -1.0, %v1884_v28 }
 0xa01   :  { %v6192_v31 = vsel %vm5851_vm3, %v4908_v29, %v5367_v27 }
 0xa02   :  { %1975 = vrot.lane.b32.xlu1 %v6192_v31, %s7252_s1  ;;  %v6198_v32 = vsel %vm5851_vm3, %v4903_v30, %v5369_v42  ;;  %v1973_v50 = vmul.f32 0.0, %v6192_v31 }
 0xa03   :  { %1889 = vrot.lane.b32.xlu0 %v6198_v32, %s7252_s1  ;;  %v1887_v49 = vmul.f32 %v6198_v32, %v6080_v53 }
 0xa65   :  { %v1734_v34 = vpop.permute.xlu0 %1733 }
 0xa66   :  { %v1736_v17 = vmul.f32 %v1734_v34, %v6180_v11 }
 0xa68   :  { %1738 = vrot.lane.b32.xlu0 %v1736_v17, %s5694_s24 }
 0xa6d   :  { %v1812_v35 = vpop.permute.xlu1 %1811 }
 0xa6e   :  { %v1814_v36 = vmul.f32 %v1812_v35, %v6186_v23 }
 0xa70   :  { %1816 = vrot.lane.b32.xlu1 %v1814_v36, %s5694_s24 }
 0xa74   :  { %v1976_v37 = vpop.permute.xlu1 %1975 }
 0xa75   :  { %v1978_v18 = vmul.f32 %v1976_v37, %v6192_v31  ;;  %v1890_v38 = vpop.permute.xlu0 %1889 }
 0xa76   :  { %v1892_v39 = vmul.f32 %v1890_v38, %v6198_v32 }
 0xa77   :  { %1980 = vrot.lane.b32.xlu1 %v1978_v18, %s5694_s24 }
 0xa78   :  { %1894 = vrot.lane.b32.xlu0 %v1892_v39, %s5694_s24 }
 0xada   :  { %v1739_v19 = vpop.permute.xlu0 %1738 }
 0xadb   :  { %v6212_v20 = vadd.f32 %v1739_v19, %v1731_v43 }
 0xadd   :  { %5370 = vtanh.f32 %v6212_v20 }
 0xae2   :  { %v1817_v46 = vpop.permute.xlu1 %1816 }
 0xae3   :  { %v6217_v47 = vadd.f32 %v1817_v46, %v1809_v45 }
 0xae5   :  { %5372 = vtanh.f32 %v6217_v47 }
 0xae7   :  { %v5371_v48 = vpop.eup %5370 }
 0xae8   :  { %1744 = vrot.lane.b32.xlu0 %v5371_v48, %s7252_s1 }
 0xae9   :  { %v1981_v51 = vpop.permute.xlu1 %1980 }
 0xaea   :  { %v6224_v52 = vadd.f32 %v1981_v51, %v1973_v50  ;;  %v1895_v54 = vpop.permute.xlu0 %1894 }
 0xaeb   :  { %v6226_v14 = vadd.f32 %v1895_v54, %v1887_v49 }
 0xaec   :  { %5374 = vtanh.f32 %v6224_v52 }
 0xaed   :  { %5376 = vtanh.f32 %v6226_v14 }
 0xaef   :  { %v5373_v55 = vpop.eup %5372 }
 0xaf0   :  { %1822 = vrot.lane.b32.xlu1 %v5373_v55, %s7252_s1 }
 0xaf6   :  { %v5375_v53 = vpop.eup %5374 }
 0xaf7   :  { %v5377_v56 = vpop.eup %5376  ;;  %1986 = vrot.lane.b32.xlu1 %v5375_v53, %s7252_s1 }
 0xaf8   :  { %1900 = vrot.lane.b32.xlu0 %v5377_v56, %s7252_s1  ;;  %s5051_s1 = sshll.u32 %s676_s30, 4 }
 0xaf9   :  { %s682_s19 = sadd.s32 %s5051_s1, %s679_s22  ;;  %s710_s1 = sadd.s32 %s5053_s16, %s707_s26 }
 0xafa   :  { %s683_s2 = scalar_lea.vmem [#allocation6], %s682_s19  ;;  %s711_s30 = scalar_lea.vmem [#allocation6], %s710_s1 }
 0xafb   :  { %v684_v7 = vld [vmem:[%s683_s2] ss:$8 sm:$0x3]  ;;  %s724_s22 = sadd.s32 %s5054_s21, %s721_s25  ;;  %s5055_s19 = sshll.u32 %s732_s10, 4 }
 0xafc   :  { %686 = vst.msk [vmem:[#allocation2 + $0x52] ss:$8 sm:$0x3] %vm5814_vm0, %v684_v7  ;;  %v712_v9 = vld [vmem:[%s711_s30] ss:$8 sm:$0x3]  ;;  %s738_s29 = sadd.s32 %s5055_s19, %s735_s28 }
 0xafd   :  { %714 = vst.msk [vmem:[#allocation2 + $0x54] ss:$8 sm:$0x3] %vm5814_vm0, %v712_v9  ;;  %s725_s17 = scalar_lea.vmem [#allocation6], %s724_s22  ;;  %s5056_s2 = sshll.u32 %s746_s0, 4 }
 0xafe   :  { %v726_v10 = vld [vmem:[%s725_s17] ss:$8 sm:$0x3]  ;;  %s739_s9 = scalar_lea.vmem [#allocation6], %s738_s29  ;;  %s752_s20 = sadd.s32 %s5056_s2, %s749_s27 }
 0xaff   :  { %728 = vst.msk [vmem:[#allocation2 + $0x55] ss:$8 sm:$0x3] %vm5814_vm0, %v726_v10  ;;  %v740_v27 = vld [vmem:[%s739_s9] ss:$8 sm:$0x3] }
 0xb00   :  { %742 = vst.msk [vmem:[#allocation2 + $0x56] ss:$8 sm:$0x3] %vm5814_vm0, %v740_v27  ;;  %s753_s26 = scalar_lea.vmem [#allocation6], %s752_s20  ;;  %s774_s16 = sshra.s32 %s6293_s11, 3 }
 0xb01   :  { %v754_v44 = vld [vmem:[%s753_s26] ss:$8 sm:$0x3]  ;;  %s777_s1 = sand.u32 7, %s6293_s11  ;;  %s5058_s25 = sshll.u32 %s774_s16, 4 }
 0xb02   :  { %756 = vst.msk [vmem:[#allocation2 + $0x57] ss:$8 sm:$0x3] %vm5814_vm0, %v754_v44  ;;  %s780_s21 = sadd.s32 %s5058_s25, %s777_s1  ;;  %s788_s30 = sshra.s32 %s6295_s14, 3 }
 0xb03   :  { %s791_s22 = sand.u32 7, %s6295_s14  ;;  %s781_s10 = scalar_lea.vmem [#allocation6], %s780_s21 }
 0xb04   :  { %v782_v33 = vld [vmem:[%s781_s10] ss:$8 sm:$0x3]  ;;  %s5059_s28 = sshll.u32 %s788_s30, 4  ;;  %s802_s17 = sshra.s32 %s6297_s12, 3 }
 0xb05   :  { %784 = vst.msk [vmem:[#allocation2 + $0x61] ss:$8 sm:$0x3] %vm5814_vm0, %v782_v33  ;;  %s794_s11 = sadd.s32 %s5059_s28, %s791_s22  ;;  %s805_s19 = sand.u32 7, %s6297_s12 }
 0xb06   :  { %s5060_s0 = sshll.u32 %s802_s17, 4  ;;  %s795_s29 = scalar_lea.vmem [#allocation6], %s794_s11 }
 0xb07   :  { %v796_v35 = vld [vmem:[%s795_s29] ss:$8 sm:$0x3]  ;;  %s808_s27 = sadd.s32 %s5060_s0, %s805_s19  ;;  %s4825_s14 = sld [smem:[#allocation5 + $0x206]] }
 0xb08   :  { %798 = vst.msk [vmem:[#allocation2 + $0x62] ss:$8 sm:$0x3] %vm5814_vm0, %v796_v35  ;;  %s809_s2 = scalar_lea.vmem [#allocation6], %s808_s27  ;;  %s6351_s9 = sld [smem:[#allocation5 + $0x286]] }
 0xb09   :  { %v993_v34 = vld [vmem:[#allocation2 + $0x58] sm:$0xff]  ;;  %v992_v17 = vld [vmem:[#allocation2 + $0x50] sm:$0xff]  ;;  %v810_v37 = vld [vmem:[%s809_s2] ss:$8 sm:$0x3]  ;;  %s6356_s12 = sld [smem:[#allocation5 + $0x306]] }
 0xb0a   :  { %1119 = vmatprep.mubr.f32.mxu0 %v993_v34  ;;  %812 = vst.msk [vmem:[#allocation2 + $0x63] ss:$8 sm:$0x3] %vm5814_vm0, %v810_v37  ;;  %s6358_s20 = sld [smem:[#allocation5 + $0x386]]  ;;  %s6364_s26 = sld [smem:[#allocation5 + $0x107]] }
 0xb0b   :  { %1120 = vmatmul.mubr.f32.gmra.mrb[10].mxu0 %v992_v17  ;;  %s6369_s16 = sld [smem:[#allocation5 + $0x207]] }
 0xb0d   :  { %s816_s1 = sshra.s32 %s4825_s14, 3  ;;  %s819_s25 = sand.u32 7, %s4825_s14 }
 0xb0e   :  { %s830_s21 = sshra.s32 %s6351_s9, 3  ;;  %s833_s22 = sand.u32 7, %s6351_s9 }
 0xb0f   :  { %s5062_s10 = sshll.u32 %s830_s21, 4  ;;  %s844_s11 = sshra.s32 %s6356_s12, 3 }
 0xb10   :  { %s836_s17 = sadd.s32 %s5062_s10, %s833_s22  ;;  %s847_s19 = sand.u32 7, %s6356_s12 }
 0xb11   :  { %s837_s0 = scalar_lea.vmem [#allocation6], %s836_s17  ;;  %s5063_s29 = sshll.u32 %s844_s11, 4 }
 0xb12   :  { %s858_s27 = sshra.s32 %s6358_s20, 3  ;;  %s850_s14 = sadd.s32 %s5063_s29, %s847_s19 }
 0xb13   :  { %s861_s2 = sand.u32 7, %s6358_s20  ;;  %s5064_s9 = sshll.u32 %s858_s27, 4 }
 0xb14   :  { %s875_s12 = sand.u32 7, %s6360_s3  ;;  %s886_s22 = sshra.s32 %s6362_s18, 3 }
 0xb15   :  { %s889_s10 = sand.u32 7, %s6362_s18  ;;  %s900_s19 = sshra.s32 %s6364_s26, 3 }
 0xb16   :  { %s5067_s29 = sshll.u32 %s900_s19, 4  ;;  %s914_s27 = sshra.s32 %s6366_s15, 3 }
 0xb17   :  { %s917_s18 = sand.u32 7, %s6366_s15 }
 0xb5a   :  { %v1745_v16 = vpop.permute.xlu0 %1744 }
 0xb5b   :  { %v1747_v42 = vmul.f32 %v1745_v16, %v6180_v11  ;;  %v768_v11 = vld [vmem:[%s767_s23] ss:$8 sm:$0x3]  ;;  %s5061_s23 = sshll.u32 %s816_s1, 4  ;;  %s851_s1 = scalar_lea.vmem [#allocation6], %s850_s14 }
 0xb5c   :  { %770 = vst.msk [vmem:[#allocation2 + $0x60] ss:$8 sm:$0x3] %vm5814_vm0, %v768_v11  ;;  %s822_s30 = sadd.s32 %s5061_s23, %s819_s25  ;;  %v852_v45 = vld [vmem:[%s851_s1] ss:$8 sm:$0x3]  ;;  %s864_s25 = sadd.s32 %s5064_s9, %s861_s2 }
 0xb5d   :  { %v1748_v28 = vpack.c.bf16 %v1747_v42, %v1747_v42  ;;  %s823_s28 = scalar_lea.vmem [#allocation6], %s822_s30  ;;  %s872_s23 = sshra.s32 %s6360_s3, 3  ;;  %854 = vst.msk [vmem:[#allocation2 + $0x66] ss:$8 sm:$0x3] %vm5814_vm0, %v852_v45 }
 0xb5e   :  { %s865_s21 = scalar_lea.vmem [#allocation6], %s864_s25  ;;  %s5065_s30 = sshll.u32 %s872_s23, 4 }
 0xb5f   :  { %1750 = vrot.lane.b32.xlu0 %v1748_v28, %s5694_s24  ;;  %v866_v46 = vld [vmem:[%s865_s21] ss:$8 sm:$0x3]  ;;  %s878_s20 = sadd.s32 %s5065_s30, %s875_s12  ;;  %s903_s3 = sand.u32 7, %s6364_s26 }
 0xb60   :  { %868 = vst.msk [vmem:[#allocation2 + $0x67] ss:$8 sm:$0x3] %vm5814_vm0, %v866_v46  ;;  %s879_s17 = scalar_lea.vmem [#allocation6], %s878_s20  ;;  %s906_s14 = sadd.s32 %s5067_s29, %s903_s3  ;;  %v6480_v46 = vld [vmem:[%s7248_s5 + $0x4] ss:$0 sm:$0xff] }
 0xb61   :  { %v880_v48 = vld [vmem:[%s879_s17] ss:$8 sm:$0x3]  ;;  %s5068_s2 = sshll.u32 %s914_s27, 4  ;;  %s907_s9 = scalar_lea.vmem [#allocation6], %s906_s14 }
 0xb62   :  { %v1823_v29 = vpop.permute.xlu1 %1822  ;;  %882 = vst.msk [vmem:[#allocation2 + $0x70] ss:$8 sm:$0x3] %vm5814_vm0, %v880_v48  ;;  %v908_v54 = vld [vmem:[%s907_s9] ss:$8 sm:$0x3]  ;;  %s920_s1 = sadd.s32 %s5068_s2, %s917_s18 }
 0xb63   :  { %v1825_v30 = vmul.f32 %v1823_v29, %v6186_v23  ;;  %s928_s25 = sshra.s32 %s6369_s16, 3  ;;  %910 = vst.msk [vmem:[#allocation2 + $0x72] ss:$8 sm:$0x3] %vm5814_vm0, %v908_v54  ;;  %s931_s26 = sand.u32 7, %s6369_s16 }
 0xb64   :  { %s921_s23 = scalar_lea.vmem [#allocation6], %s920_s1  ;;  %s5069_s12 = sshll.u32 %s928_s25, 4 }
 0xb65   :  { %v1826_v36 = vpack.c.bf16 %v1825_v30, %v1825_v30  ;;  %v922_v55 = vld [vmem:[%s921_s23] ss:$8 sm:$0x3]  ;;  %s942_s21 = sshra.s32 %s6371_s13, 3  ;;  %s934_s15 = sadd.s32 %s5069_s12, %s931_s26 }
 0xb66   :  { %924 = vst.msk [vmem:[#allocation2 + $0x73] ss:$8 sm:$0x3] %vm5814_vm0, %v922_v55  ;;  %s945_s30 = sand.u32 7, %s6371_s13  ;;  %s935_s20 = scalar_lea.vmem [#allocation6], %s934_s15 }
 0xb67   :  { %1828 = vrot.lane.b32.xlu1 %v1826_v36, %s5694_s24  ;;  %v936_v53 = vld [vmem:[%s935_s20] ss:$8 sm:$0x3]  ;;  %s4858_s17 = sld [smem:[#allocation5 + $0x387]] }
 0xb68   :  { %938 = vst.msk [vmem:[#allocation2 + $0x74] ss:$8 sm:$0x3] %vm5814_vm0, %v936_v53 }
 0xb69   :  { %v1987_v23 = vpop.permute.xlu1 %1986 }
 0xb6a   :  { %v1989_v18 = vmul.f32 %v1987_v23, %v6192_v31  ;;  %v1901_v38 = vpop.permute.xlu0 %1900  ;;  %v824_v31 = vld [vmem:[%s823_s28] ss:$8 sm:$0x3]  ;;  %s5066_s28 = sshll.u32 %s886_s22, 4  ;;  %s5070_s22 = sshll.u32 %s942_s21, 4 }
 0xb6b   :  { %v1903_v39 = vmul.f32 %v1901_v38, %v6198_v32  ;;  %826 = vst.msk [vmem:[#allocation2 + $0x64] ss:$8 sm:$0x3] %vm5814_vm0, %v824_v31  ;;  %v838_v32 = vld [vmem:[%s837_s0] ss:$8 sm:$0x3]  ;;  %s892_s11 = sadd.s32 %s5066_s28, %s889_s10  ;;  %s948_s10 = sadd.s32 %s5070_s22, %s945_s30 }
 0xb6c   :  { %v1990_v43 = vpack.c.bf16 %v1989_v18, %v1989_v18  ;;  %840 = vst.msk [vmem:[#allocation2 + $0x65] ss:$8 sm:$0x3] %vm5814_vm0, %v838_v32  ;;  %s893_s0 = scalar_lea.vmem [#allocation6], %s892_s11  ;;  %s4855_s28 = sld [smem:[#allocation5 + $0x307]] }
 0xb6d   :  { %v1904_v19 = vpack.c.bf16 %v1903_v39, %v1903_v39  ;;  %v894_v50 = vld [vmem:[%s893_s0] ss:$8 sm:$0x3]  ;;  %s949_s16 = scalar_lea.vmem [#allocation6], %s948_s10  ;;  %s970_s0 = sshra.s32 %s4858_s17, 3 }
 0xb6e   :  { %1997 = vrot.lane.b32.xlu1 %v1990_v43, %s5694_s24  ;;  %896 = vst.msk [vmem:[#allocation2 + $0x71] ss:$8 sm:$0x3] %vm5814_vm0, %v894_v50  ;;  %v950_v56 = vld [vmem:[%s949_s16] ss:$8 sm:$0x3] }
 0xb6f   :  { %1906 = vrot.lane.b32.xlu0 %v1904_v19, %s5694_s24  ;;  %952 = vst.msk [vmem:[#allocation2 + $0x75] ss:$8 sm:$0x3] %vm5814_vm0, %v950_v56  ;;  %s973_s13 = sand.u32 7, %s4858_s17  ;;  %s5072_s27 = sshll.u32 %s970_s0, 4 }
 0xb70   :  { %s976_s18 = sadd.s32 %s5072_s27, %s973_s13  ;;  %v6474_v19 = vld [vmem:[%s7248_s5 + $0x1] ss:$0 sm:$0xff]  ;;  %s7258_s30 = smov 64  }
 0xb71   :  { %s977_s2 = scalar_lea.vmem [#allocation6], %s976_s18 }
 0xb72   :  { %s956_s11 = sshra.s32 %s4855_s28, 3  ;;  %s959_s19 = sand.u32 7, %s4855_s28  ;;  %v978_v59 = vld [vmem:[%s977_s2] ss:$8 sm:$0x3] }
 0xb73   :  { %v995_v51 = vld [vmem:[#allocation2 + $0x68] sm:$0xff]  ;;  %v994_v49 = vld [vmem:[#allocation2 + $0x60] sm:$0xff]  ;;  %s5071_s3 = sshll.u32 %s956_s11, 4  ;;  %980 = vst.msk [vmem:[#allocation2 + $0x77] ss:$8 sm:$0x3] %vm5814_vm0, %v978_v59 }
 0xb74   :  { %1124 = vmatprep.mubr.f32.mxu0 %v995_v51  ;;  %s962_s29 = sadd.s32 %s5071_s3, %s959_s19 }
 0xb75   :  { %1125 = vmatmul.mubr.f32.gmra.mrb[12].mxu0 %v994_v49  ;;  %s963_s14 = scalar_lea.vmem [#allocation6], %s962_s29 }
 0xb76   :  { %v964_v58 = vld [vmem:[%s963_s14] ss:$8 sm:$0x3] }
 0xb77   :  { %966 = vst.msk [vmem:[#allocation2 + $0x76] ss:$8 sm:$0x3] %vm5814_vm0, %v964_v58 }
 0xb7e   :  { %v997_v60 = vld [vmem:[#allocation2 + $0x78] sm:$0xff]  ;;  %v996_v61 = vld [vmem:[#allocation2 + $0x70] sm:$0xff] }
 0xb7f   :  { %1129 = vmatprep.mubr.f32.mxu0 %v997_v60 }
 0xb80   :  { %1130 = vmatmul.mubr.f32.gmra.mrb[14].mxu0 %v996_v61 }
 0xb81   :  { %2054 = vmatprep.mubr.bf16.mxu0 %v5695_v22 }
 0xbd1   :  { %v1751_v62 = vpop.permute.xlu0 %1750 }
 0xbd2   :  { %4898 = vmatmul.mubr.msk.bf16.vlgmr.msra.gmra.mrb[24].mxu1 %vm1214_vm4, %v1751_v62  ;;  %v6488_v62 = vld [vmem:[%s7248_s5 + $0x2] ss:$0 sm:$0xff] }
 0xbd3   :  { %1834 = vmatpush1.bf16.msra.mxu1 %v6420_v0  ;;  %1865 = vmatprep.mubr.bf16.mxu1 %v5695_v22 }
 0xbd4   :  { %1835 = vmatprep.subr.bf16.mxu1 %v6424_v1 }
 0xbd7   :  { %1836 = vmatpush1.bf16.msra.mxu1 %v6427_v21 }
 0xbd8   :  { %1911 = vmatprep.subr.bf16.mxu1 %v6139_v24 }
 0xbd9   :  { %v1829_v3 = vpop.permute.xlu1 %1828 }
 0xbda   :  { %4901 = vmatmul.mubr.msk.bf16.vlgmr.msra.gmra.mrb[28].mxu1 %vm1214_vm4, %v1829_v3 }
 0xbdb   :  { %1912 = vmatpush1.bf16.msra.mxu1 %v6142_v25  ;;  %1943 = vmatprep.mubr.bf16.mxu1 %v5695_v22  ;;  %v6446_v25 = vld [vmem:[#allocation10 + $0x14] ss:$8 sps:$4 sm:$0xff]  }
 0xbdc   :  { %1913 = vmatprep.subr.bf16.mxu1 %v6145_v26  ;;  %v5117_v26 = vpop.f32.mrb[8].mxu0 }
 0xbdd   :  { %v5118_v7 = vpop.f32.mrb[9].mxu0 }
 0xbde   :  { %v5119_v8 = vadd.f32 %v5118_v7, %v5117_v26  ;;  %v5120_v9 = vpop.f32.mrb[10].mxu0 }
 0xbdf   :  { %1914 = vmatpush1.bf16.msra.mxu1 %v6149_v40  ;;  %v6452_v40 = vld [vmem:[#allocation10 + $0x10] ss:$8 sps:$4 sm:$0xff]   ;;  %v5121_v10 = vpop.f32.mrb[11].mxu0 }
 0xbe0   :  { %v1998_v4 = vpop.permute.xlu1 %1997  ;;  %2101 = vmatprep.subr.bf16.mxu1 %v6436_v57  ;;  %v6457_v16 = vadd.f32 %v5121_v10, %v5120_v9 }
 0xbe1   :  { %v1907_v5 = vpop.permute.xlu0 %1906  ;;  %4913 = vmatmul.mubr.msk.bf16.vlgmr.msra.gmra.mrb[16].mxu0 %vm1214_vm4, %v1998_v4 }
 0xbe2   :  { %4904 = vmatmul.mubr.msk.bf16.vlgmr.msra.gmra.mrb[32].mxu1 %vm1214_vm4, %v1907_v5  ;;  %2180 = vmatpush1.bf16.msra.mxu0 %v6420_v0 }
 0xbe3   :  { %2102 = vmatpush1.bf16.msra.mxu1 %v6442_v6  ;;  %2133 = vmatprep.mubr.bf16.mxu1 %v5695_v22 }
 0xbe4   :  { %2103 = vmatprep.subr.bf16.mxu1 %v6446_v25  ;;  %2181 = vmatprep.subr.bf16.mxu0 %v6424_v1 }
 0xbe5   :  { %2211 = vmatprep.mubr.bf16.mxu0 %v5695_v22 }
 0xbe6   :  { %2182 = vmatpush1.bf16.msra.mxu0 %v6427_v21 }
 0xbe7   :  { %2104 = vmatpush1.bf16.msra.mxu1 %v6452_v40  ;;  %2335 = vmatprep.subr.bf16.mxu0 %v6230_v41 }
 0xbe8   :  { %2257 = vmatprep.subr.bf16.mxu1 %v6139_v24  ;;  %v6466_v24 = vld [vmem:[%s7248_s5] ss:$0 sm:$0xff] }
 0xc48   :  { %v5123_v27 = vpop.f32.mrb[12].mxu0 }
 0xc49   :  { %v5124_v42 = vpop.f32.mrb[13].mxu0 }
 0xc4a   :  { %v6459_v44 = vadd.f32 %v5124_v42, %v5123_v27 }
 0xc53   :  { %v5126_v28 = vpop.f32.mrb[14].mxu0 }
 0xc54   :  { %v5127_v11 = vpop.f32.mrb[15].mxu0 }
 0xc55   :  { %v6461_v33 = vadd.f32 %v5127_v11, %v5126_v28 }
 0xca5   :  { %v1789_v29 = vpop.f32.mrb[24].mxu1 }
 0xca6   :  { %v2064_v30 = vadd.f32 %v5119_v8, %v1789_v29  ;;  %v1791_v34 = vpop.f32.mrb[25].mxu1 }
 0xca7   :  { %v1793_v41 = vpop.f32.mrb[26].mxu1 }
 0xca8   :  { %v2065_v17 = vadd.f32 %v6466_v24, %v2064_v30  ;;  %v1794_v35 = vpop.f32.mrb[27].mxu1 }
 0xcaa   :  { %v2066_v36 = vmul.f32 2.0, %v2065_v17 }
 0xcac   :  { %v2067_v37 = vsel %vm5851_vm3, %v2066_v36, %v2065_v17 }
 0xcad   :  { %v4914_v23 = vmul.f32 -1.442695, %v2067_v37  ;;  %v1867_v18 = vpop.f32.mrb[28].mxu1 }
 0xcae   :  { %v2142_v38 = vadd.f32 %v1867_v18, %v1791_v34  ;;  %v1869_v39 = vpop.f32.mrb[29].mxu1 }
 0xcaf   :  { %5378 = vpow2.f32 %v4914_v23  ;;  %v1871_v43 = vpop.f32.mrb[30].mxu1 }
 0xcb0   :  { %v2143_v31 = vadd.f32 %v6474_v19, %v2142_v38  ;;  %v1872_v32 = vpop.f32.mrb[31].mxu1 }
 0xcb2   :  { %v2144_v45 = vmul.f32 2.0, %v2143_v31 }
 0xcb4   :  { %v2145_v48 = vsel %vm5851_vm3, %v2144_v45, %v2143_v31  ;;  %v2056_v50 = vpop.f32.mrb[16].mxu0 }
 0xcb5   :  { %v4917_v51 = vmul.f32 -1.442695, %v2145_v48  ;;  %v1945_v49 = vpop.f32.mrb[32].mxu1  ;;  %v2058_v54 = vpop.f32.mrb[17].mxu0 }
 0xcb6   :  { %v2220_v55 = vadd.f32 %v1945_v49, %v1869_v39  ;;  %v2385_v53 = vadd.f32 %v6480_v46, %v2058_v54  ;;  %v1947_v56 = vpop.f32.mrb[33].mxu1  ;;  %v2060_v58 = vpop.f32.mrb[18].mxu0 }
 0xcb7   :  { %5380 = vpow2.f32 %v4917_v51  ;;  %v2298_v59 = vadd.f32 %v2056_v50, %v1947_v56  ;;  %v1949_v60 = vpop.f32.mrb[34].mxu1  ;;  %v2061_v61 = vpop.f32.mrb[19].mxu0 }
 0xcb8   :  { %v2221_v3 = vadd.f32 %v6488_v62, %v2220_v55  ;;  %v2386_v4 = vmul.f32 2.0, %v2385_v53  ;;  %v1950_v5 = vpop.f32.mrb[35].mxu1 }
 0xcb9   :  { %v5379_v26 = vpop.eup %5378  ;;  %v2299_v7 = vadd.f32 %v6170_v63, %v2298_v59 }
 0xcba   :  { %v2071_v8 = vadd.f32 1.0, %v5379_v26  ;;  %v2222_v9 = vmul.f32 2.0, %v2221_v3  ;;  %v2387_v10 = vsel %vm5851_vm3, %v2386_v4, %v2385_v53 }
 0xcbb   :  { %v4928_v27 = vmul.f32 -1.442695, %v2387_v10  ;;  %v2300_v42 = vmul.f32 2.0, %v2299_v7 }
 0xcbc   :  { %5382 = vrcp.f32 %v2071_v8  ;;  %v2223_v28 = vsel %vm5851_vm3, %v2222_v9, %v2221_v3 }
 0xcbd   :  { %v4920_v11 = vmul.f32 -1.442695, %v2223_v28  ;;  %5384 = vpow2.f32 %v4928_v27  ;;  %v2301_v29 = vsel %vm5851_vm3, %v2300_v42, %v2299_v7 }
 0xcbe   :  { %v4923_v30 = vmul.f32 -1.442695, %v2301_v29 }
 0xcbf   :  { %5386 = vpow2.f32 %v4920_v11 }
 0xcc0   :  { %5388 = vpow2.f32 %v4923_v30 }
 0xcc1   :  { %v5381_v63 = vpop.eup %5380 }
 0xcc2   :  { %v2149_v34 = vadd.f32 1.0, %v5381_v63 }
 0xcc4   :  { %5390 = vrcp.f32 %v2149_v34 }
 0xcc6   :  { %v5383_v41 = vpop.eup %5382 }
 0xcc7   :  { %v5385_v17 = vpop.eup %5384  ;;  %v2074_v35 = vmul.f32 2.0, %v5383_v41 }
 0xcc8   :  { %v2391_v36 = vadd.f32 1.0, %v5385_v17 }
 0xcc9   :  { %v5387_v37 = vpop.eup %5386  ;;  %v4915_v23 = vadd.f32 -1.0, %v2074_v35 }
 0xcca   :  { %v5389_v18 = vpop.eup %5388  ;;  %v2227_v38 = vadd.f32 1.0, %v5387_v37  ;;  %5392 = vrcp.f32 %v2391_v36 }
 0xccb   :  { %v2305_v39 = vadd.f32 1.0, %v5389_v18  ;;  %v6500_v43 = vsel %vm5851_vm3, %v4915_v23, %v5383_v41 }
 0xccc   :  { %5394 = vrcp.f32 %v2227_v38  ;;  %2079 = vrot.lane.b32.xlu0 %v6500_v43, %s7258_s30  ;;  %v2077_v11 = vmul.f32 %v6500_v43, %v6212_v20 }
 0xccd   :  { %5396 = vrcp.f32 %v2305_v39 }
 0xcce   :  { %v5391_v31 = vpop.eup %5390 }
 0xccf   :  { %v2152_v32 = vmul.f32 2.0, %v5391_v31 }
 0xcd1   :  { %v4918_v45 = vadd.f32 -1.0, %v2152_v32 }
 0xcd3   :  { %v6506_v48 = vsel %vm5851_vm3, %v4918_v45, %v5391_v31 }
 0xcd4   :  { %v5393_v50 = vpop.eup %5392  ;;  %2157 = vrot.lane.b32.xlu1 %v6506_v48, %s7258_s30  ;;  %v2155_v63 = vmul.f32 %v6506_v48, %v6217_v47 }
 0xcd5   :  { %v2394_v55 = vmul.f32 2.0, %v5393_v50 }
 0xcd6   :  { %v5395_v51 = vpop.eup %5394 }
 0xcd7   :  { %v5397_v49 = vpop.eup %5396  ;;  %v2230_v54 = vmul.f32 2.0, %v5395_v51  ;;  %v4929_v60 = vadd.f32 -1.0, %v2394_v55 }
 0xcd8   :  { %v2308_v53 = vmul.f32 2.0, %v5397_v49 }
 0xcd9   :  { %v4921_v56 = vadd.f32 -1.0, %v2230_v54  ;;  %v2396_v3 = vsel %vm5851_vm3, %v4929_v60, %v5393_v50 }
 0xcda   :  { %v4924_v58 = vadd.f32 -1.0, %v2308_v53  ;;  %v2397_v47 = vmul.f32 0.0, %v2396_v3 }
 0xcdb   :  { %v2232_v59 = vsel %vm5851_vm3, %v4921_v56, %v5395_v51 }
 0xcdc   :  { %2235 = vrot.lane.b32.xlu0 %v2232_v59, %s7258_s30  ;;  %v2310_v61 = vsel %vm5851_vm3, %v4924_v58, %v5397_v49  ;;  %v2233_v35 = vmul.f32 %v2232_v59, %v6226_v14 }
 0xcdd   :  { %2313 = vrot.lane.b32.xlu1 %v2310_v61, %s7258_s30  ;;  %v2311_v20 = vmul.f32 %v2310_v61, %v6224_v52 }
 0xce0   :  { %2399 = vrot.lane.b32.xlu0 %v2396_v3, %s7258_s30 }
 0xd3e   :  { %v2080_v4 = vpop.permute.xlu0 %2079 }
 0xd3f   :  { %v2082_v5 = vmul.f32 %v2080_v4, %v6500_v43 }
 0xd41   :  { %2084 = vrot.lane.b32.xlu1 %v2082_v5, %s5694_s24 }
 0xd46   :  { %v2158_v26 = vpop.permute.xlu1 %2157 }
 0xd47   :  { %v2160_v7 = vmul.f32 %v2158_v26, %v6506_v48 }
 0xd49   :  { %2162 = vrot.lane.b32.xlu0 %v2160_v7, %s5694_s24 }
 0xd4e   :  { %v2236_v8 = vpop.permute.xlu0 %2235 }
 0xd4f   :  { %v2238_v9 = vmul.f32 %v2236_v8, %v2232_v59  ;;  %v2314_v10 = vpop.permute.xlu1 %2313 }
 0xd50   :  { %v2316_v27 = vmul.f32 %v2314_v10, %v2310_v61  ;;  %v6579_v10 = vld [vmem:[%s7247_s4] sm:$0xff]  }
 0xd51   :  { %2240 = vrot.lane.b32.xlu1 %v2238_v9, %s5694_s24 }
 0xd52   :  { %v2400_v42 = vpop.permute.xlu0 %2399  ;;  %2318 = vrot.lane.b32.xlu0 %v2316_v27, %s5694_s24 }
 0xd53   :  { %v2402_v28 = vmul.f32 %v2400_v42, %v2396_v3 }
 0xd55   :  { %2404 = vrot.lane.b32.xlu1 %v2402_v28, %s5694_s24  ;;  %v6602_v28 = vld [vmem:[#allocation10 + $0x44] ss:$8 sps:$4 sm:$0xff]  }
 0xdb3   :  { %v2085_v29 = vpop.permute.xlu1 %2084 }
 0xdb4   :  { %v6528_v30 = vadd.f32 %v2085_v29, %v2077_v11  ;;  %v6609_v11 = vld [vmem:[#allocation10 + $0x64] ss:$8 sps:$4 sm:$0xff]  }
 0xdb6   :  { %5398 = vtanh.f32 %v6528_v30 }
 0xdbb   :  { %v2163_v34 = vpop.permute.xlu0 %2162 }
 0xdbc   :  { %v6533_v41 = vadd.f32 %v2163_v34, %v2155_v63 }
 0xdbe   :  { %5400 = vtanh.f32 %v6533_v41 }
 0xdc0   :  { %v5399_v17 = vpop.eup %5398 }
 0xdc1   :  { %2090 = vrot.lane.b32.xlu0 %v5399_v17, %s7258_s30 }
 0xdc3   :  { %v2241_v36 = vpop.permute.xlu1 %2240 }
 0xdc4   :  { %v6539_v37 = vadd.f32 %v2241_v36, %v2233_v35  ;;  %v2319_v23 = vpop.permute.xlu0 %2318 }
 0xdc5   :  { %v6541_v18 = vadd.f32 %v2319_v23, %v2311_v20 }
 0xdc6   :  { %5402 = vtanh.f32 %v6539_v37 }
 0xdc7   :  { %5404 = vtanh.f32 %v6541_v18  ;;  %v2405_v38 = vpop.permute.xlu1 %2404 }
 0xdc8   :  { %v5401_v39 = vpop.eup %5400  ;;  %v6545_v31 = vadd.f32 %v2405_v38, %v2397_v47 }
 0xdc9   :  { %2168 = vrot.lane.b32.xlu1 %v5401_v39, %s7258_s30 }
 0xdca   :  { %5406 = vtanh.f32 %v6545_v31 }
 0xdd0   :  { %v5403_v14 = vpop.eup %5402 }
 0xdd1   :  { %v5405_v52 = vpop.eup %5404  ;;  %2246 = vrot.lane.b32.xlu0 %v5403_v14, %s7258_s30 }
 0xdd2   :  { %2324 = vrot.lane.b32.xlu1 %v5405_v52, %s7258_s30 }
 0xdd4   :  { %v5407_v32 = vpop.eup %5406 }
 0xdd5   :  { %2410 = vrot.lane.b32.xlu0 %v5407_v32, %s7258_s30 }
 0xe33   :  { %v2091_v45 = vpop.permute.xlu0 %2090 }
 0xe34   :  { %v2093_v50 = vmul.f32 %v2091_v45, %v6500_v43 }
 0xe36   :  { %v2094_v51 = vpack.c.bf16 %v2093_v50, %v2093_v50 }
 0xe38   :  { %2096 = vrot.lane.b32.xlu1 %v2094_v51, %s5694_s24 }
 0xe3b   :  { %v2169_v49 = vpop.permute.xlu1 %2168 }
 0xe3c   :  { %v2171_v54 = vmul.f32 %v2169_v49, %v6506_v48  ;;  %v6560_v48 = vld [vmem:[#allocation10 + $0x40] ss:$8 sps:$4 sm:$0xff]  }
 0xe3e   :  { %v2172_v55 = vpack.c.bf16 %v2171_v54, %v2171_v54 }
 0xe40   :  { %2174 = vrot.lane.b32.xlu0 %v2172_v55, %s5694_s24 }
 0xe43   :  { %v2247_v53 = vpop.permute.xlu0 %2246 }
 0xe44   :  { %v2249_v56 = vmul.f32 %v2247_v53, %v2232_v59  ;;  %v2325_v58 = vpop.permute.xlu1 %2324  ;;  %v6564_v59 = vld [vmem:[#allocation10 + $0x54] ss:$8 sps:$4 sm:$0xff]  }
 0xe45   :  { %v2327_v60 = vmul.f32 %v2325_v58, %v2310_v61  ;;  %v6567_v61 = vld [vmem:[#allocation10 + $0x50] ss:$8 sps:$4 sm:$0xff]  }
 0xe46   :  { %v2250_v4 = vpack.c.bf16 %v2249_v56, %v2249_v56 }
 0xe47   :  { %v2328_v5 = vpack.c.bf16 %v2327_v60, %v2327_v60  ;;  %v2411_v26 = vpop.permute.xlu0 %2410 }
 0xe48   :  { %v2413_v7 = vmul.f32 %v2411_v26, %v2396_v3  ;;  %2252 = vrot.lane.b32.xlu1 %v2250_v4, %s5694_s24  ;;  %v5696_v3 = vmov 0.0  }
 0xe49   :  { %2330 = vrot.lane.b32.xlu0 %v2328_v5, %s5694_s24 }
 0xe4a   :  { %v2414_v43 = vpack.c.bf16 %v2413_v7, %v2413_v7 }
 0xe4c   :  { %2420 = vrot.lane.b32.xlu1 %v2414_v43, %s5694_s24  ;;  %v6623_v43 = vld [vmem:[%s7248_s5 + $0x3] ss:$0 sm:$0xff] }
 0xeaa   :  { %v2097_v8 = vpop.permute.xlu1 %2096 }
 0xeab   :  { %4916 = vmatmul.mubr.msk.bf16.vlgmr.msra.gmra.mrb[36].mxu1 %vm1214_vm4, %v2097_v8 }
 0xeac   :  { %2258 = vmatpush1.bf16.msra.mxu1 %v6560_v48  ;;  %2289 = vmatprep.mubr.bf16.mxu1 %v5695_v22 }
 0xead   :  { %2259 = vmatprep.subr.bf16.mxu1 %v6564_v59 }
 0xeb0   :  { %2260 = vmatpush1.bf16.msra.mxu1 %v6567_v61 }
 0xeb1   :  { %5159 = vmatprep.subr.bf16.mxu1 %v5696_v3 }
 0xeb2   :  { %v2175_v9 = vpop.permute.xlu0 %2174 }
 0xeb3   :  { %4919 = vmatmul.mubr.msk.bf16.vlgmr.msra.gmra.mrb[20].mxu0 %vm1214_vm4, %v2175_v9 }
 0xeb4   :  { %2336 = vmatpush1.bf16.msra.mxu0 %v6232_v12  ;;  %2367 = vmatprep.mubr.bf16.mxu0 %v5695_v22  ;;  %v6588_v12 = vld [vmem:[%s7247_s4 + $0x8] sm:$0xff]  }
 0xeb5   :  { %2337 = vmatprep.subr.bf16.mxu0 %v6323_v13  ;;  %v6597_v13 = vld [vmem:[#allocation10 + $0x24] ss:$8 sps:$4 sm:$0xff]  }
 0xeb8   :  { %2338 = vmatpush1.bf16.msra.mxu0 %v6325_v15 }
 0xeb9   :  { %2515 = vmatprep.subr.bf16.mxu0 %v6436_v57 }
 0xeba   :  { %v2253_v27 = vpop.permute.xlu1 %2252 }
 0xebb   :  { %v2331_v42 = vpop.permute.xlu0 %2330  ;;  %4922 = vmatmul.mubr.msk.bf16.vlgmr.msra.gmra.mrb[40].mxu1 %vm1214_vm4, %v2253_v27 }
 0xebc   :  { %5160 = vmatpush3.bf16.msra.mxu1 %v6579_v10  ;;  %4925 = vmatmul.mubr.msk.bf16.vlgmr.msra.gmra.mrb[24].mxu0 %vm1214_vm4, %v2331_v42 }
 0xebd   :  { %5161 = vmatprep.subr.bf16.mxu1 %v5696_v3  ;;  %5163 = vmatprep.mubr.msk.bf16.mxu1 %vm5697_vm5, %v5696_v3 }
 0xebe   :  { %2516 = vmatpush1.bf16.msra.mxu0 %v6442_v6  ;;  %2547 = vmatprep.mubr.bf16.mxu0 %v5695_v22  ;;  %v2421_v15 = vpop.permute.xlu1 %2420 }
 0xebf   :  { %2517 = vmatprep.subr.bf16.mxu0 %v6446_v25 }
 0xec0   :  { %5162 = vmatpush3.bf16.msra.mxu1 %v6588_v12 }
 0xec1   :  { %2593 = vmatprep.subr.bf16.mxu1 %v6597_v13 }
 0xec2   :  { %2518 = vmatpush1.bf16.msra.mxu0 %v6452_v40 }
 0xec3   :  { %5164 = vmatmul.mubr.msk.bf16.vlgmr.msra.gmra.mrb[44].mxu1 %vm1214_vm4, %v2421_v15  ;;  %2671 = vmatprep.subr.bf16.mxu0 %v6602_v28 }
 0xec4   :  { %2594 = vmatpush1.bf16.msra.mxu1 %v6420_v0  ;;  %2625 = vmatprep.mubr.bf16.mxu1 %v5695_v22 }
 0xec5   :  { %2595 = vmatprep.subr.bf16.mxu1 %v6424_v1 }
 0xec8   :  { %2596 = vmatpush1.bf16.msra.mxu1 %v6427_v21 }
 0xec9   :  { %2749 = vmatprep.subr.bf16.mxu1 %v6609_v11 }
 0xf7e   :  { %v2135_v29 = vpop.f32.mrb[36].mxu1 }
 0xf7f   :  { %v2478_v63 = vadd.f32 %v6457_v16, %v2135_v29  ;;  %v2137_v34 = vpop.f32.mrb[37].mxu1 }
 0xf80   :  { %v2139_v17 = vpop.f32.mrb[38].mxu1 }
 0xf81   :  { %v2479_v35 = vadd.f32 %v6466_v24, %v2478_v63  ;;  %v2140_v36 = vpop.f32.mrb[39].mxu1 }
 0xf83   :  { %v2480_v20 = vmul.f32 2.0, %v2479_v35 }
 0xf85   :  { %v2481_v23 = vsel %vm5851_vm3, %v2480_v20, %v2479_v35 }
 0xf86   :  { %v4933_v47 = vmul.f32 -1.442695, %v2481_v23  ;;  %v2213_v38 = vpop.f32.mrb[20].mxu0 }
 0xf87   :  { %v2556_v39 = vadd.f32 %v2213_v38, %v2137_v34  ;;  %v2215_v14 = vpop.f32.mrb[21].mxu0 }
 0xf88   :  { %5408 = vpow2.f32 %v4933_v47  ;;  %v2217_v52 = vpop.f32.mrb[22].mxu0 }
 0xf89   :  { %v2557_v32 = vadd.f32 %v6474_v19, %v2556_v39  ;;  %v2218_v45 = vpop.f32.mrb[23].mxu0 }
 0xf8b   :  { %v2558_v50 = vmul.f32 2.0, %v2557_v32 }
 0xf8d   :  { %v2559_v16 = vsel %vm5851_vm3, %v2558_v50, %v2557_v32 }
 0xf8e   :  { %v4936_v51 = vmul.f32 -1.442695, %v2559_v16  ;;  %v2291_v49 = vpop.f32.mrb[40].mxu1 }
 0xf8f   :  { %v2634_v54 = vadd.f32 %v2291_v49, %v2215_v14  ;;  %v2293_v55 = vpop.f32.mrb[41].mxu1  ;;  %v2369_v53 = vpop.f32.mrb[24].mxu0 }
 0xf90   :  { %5410 = vpow2.f32 %v4936_v51  ;;  %v2712_v56 = vadd.f32 %v2369_v53, %v2293_v55  ;;  %v2295_v58 = vpop.f32.mrb[42].mxu1  ;;  %v2371_v60 = vpop.f32.mrb[25].mxu0 }
 0xf91   :  { %v2635_v4 = vadd.f32 %v6488_v62, %v2634_v54  ;;  %v2296_v5 = vpop.f32.mrb[43].mxu1  ;;  %v2373_v26 = vpop.f32.mrb[26].mxu0 }
 0xf92   :  { %v5409_v7 = vpop.eup %5408  ;;  %v2713_v8 = vadd.f32 %v6623_v43, %v2712_v56  ;;  %v2374_v9 = vpop.f32.mrb[27].mxu0 }
 0xf93   :  { %v2485_v27 = vadd.f32 1.0, %v5409_v7  ;;  %v2636_v42 = vmul.f32 2.0, %v2635_v4 }
 0xf94   :  { %v2714_v15 = vmul.f32 2.0, %v2713_v8 }
 0xf95   :  { %5412 = vrcp.f32 %v2485_v27  ;;  %v2637_v29 = vsel %vm5851_vm3, %v2636_v42, %v2635_v4 }
 0xf96   :  { %v4939_v63 = vmul.f32 -1.442695, %v2637_v29  ;;  %v2715_v34 = vsel %vm5851_vm3, %v2714_v15, %v2713_v8  ;;  %v2471_v17 = vpop.f32.mrb[44].mxu1 }
 0xf97   :  { %v4942_v35 = vmul.f32 -1.442695, %v2715_v34  ;;  %v2790_v36 = vadd.f32 %v2471_v17, %v2371_v60  ;;  %v5165_v20 = vpop.f32.mrb[45].mxu1 }
 0xf98   :  { %5414 = vpow2.f32 %v4939_v63  ;;  %v2474_v23 = vpop.f32.mrb[46].mxu1 }
 0xf99   :  { %5416 = vpow2.f32 %v4942_v35  ;;  %v2791_v47 = vadd.f32 %v6480_v46, %v2790_v36  ;;  %v5166_v38 = vpop.f32.mrb[47].mxu1 }
 0xf9a   :  { %v5411_v39 = vpop.eup %5410 }
 0xf9b   :  { %v2563_v14 = vadd.f32 1.0, %v5411_v39  ;;  %v2792_v52 = vmul.f32 2.0, %v2791_v47 }
 0xf9d   :  { %5418 = vrcp.f32 %v2563_v14  ;;  %v2793_v32 = vsel %vm5851_vm3, %v2792_v52, %v2791_v47 }
 0xf9e   :  { %v4945_v45 = vmul.f32 -1.442695, %v2793_v32 }
 0xf9f   :  { %v5413_v50 = vpop.eup %5412 }
 0xfa0   :  { %5420 = vpow2.f32 %v4945_v45  ;;  %v2488_v16 = vmul.f32 2.0, %v5413_v50 }
 0xfa2   :  { %v5415_v51 = vpop.eup %5414  ;;  %v4934_v49 = vadd.f32 -1.0, %v2488_v16 }
 0xfa3   :  { %v5417_v54 = vpop.eup %5416  ;;  %v2641_v55 = vadd.f32 1.0, %v5415_v51 }
 0xfa4   :  { %v2719_v53 = vadd.f32 1.0, %v5417_v54  ;;  %v6635_v56 = vsel %vm5851_vm3, %v4934_v49, %v5413_v50 }
 0xfa5   :  { %5422 = vrcp.f32 %v2641_v55  ;;  %2493 = vrot.lane.b32.xlu0 %v6635_v56, %s7258_s30  ;;  %v2491_v51 = vmul.f32 %v6635_v56, %v6528_v30 }
 0xfa6   :  { %5424 = vrcp.f32 %v2719_v53 }
 0xfa7   :  { %v5419_v58 = vpop.eup %5418 }
 0xfa8   :  { %v2566_v60 = vmul.f32 2.0, %v5419_v58 }
 0xfaa   :  { %v5421_v4 = vpop.eup %5420  ;;  %v4937_v5 = vadd.f32 -1.0, %v2566_v60 }
 0xfab   :  { %v2797_v26 = vadd.f32 1.0, %v5421_v4 }
 0xfac   :  { %v6641_v7 = vsel %vm5851_vm3, %v4937_v5, %v5419_v58 }
 0xfad   :  { %5426 = vrcp.f32 %v2797_v26  ;;  %2571 = vrot.lane.b32.xlu1 %v6641_v7, %s7258_s30  ;;  %v2569_v55 = vmul.f32 %v6641_v7, %v6533_v41 }
 0xfaf   :  { %v5423_v8 = vpop.eup %5422 }
 0xfb0   :  { %v5425_v9 = vpop.eup %5424  ;;  %v2644_v27 = vmul.f32 2.0, %v5423_v8 }
 0xfb1   :  { %v2722_v42 = vmul.f32 2.0, %v5425_v9 }
 0xfb2   :  { %v4940_v15 = vadd.f32 -1.0, %v2644_v27 }
 0xfb3   :  { %v4943_v29 = vadd.f32 -1.0, %v2722_v42 }
 0xfb4   :  { %v6647_v63 = vsel %vm5851_vm3, %v4940_v15, %v5423_v8 }
 0xfb5   :  { %2649 = vrot.lane.b32.xlu0 %v6647_v63, %s7258_s30  ;;  %v6653_v34 = vsel %vm5851_vm3, %v4943_v29, %v5425_v9  ;;  %v2647_v4 = vmul.f32 %v6647_v63, %v6539_v37 }
 0xfb6   :  { %2727 = vrot.lane.b32.xlu1 %v6653_v34, %s7258_s30  ;;  %v2725_v5 = vmul.f32 %v6653_v34, %v6541_v18 }
 0xfb7   :  { %v5427_v17 = vpop.eup %5426 }
 0xfb8   :  { %v2800_v35 = vmul.f32 2.0, %v5427_v17 }
 0xfba   :  { %v4946_v36 = vadd.f32 -1.0, %v2800_v35 }
 0xfbc   :  { %v6659_v20 = vsel %vm5851_vm3, %v4946_v36, %v5427_v17 }
 0xfbd   :  { %2805 = vrot.lane.b32.xlu0 %v6659_v20, %s7258_s30  ;;  %v2803_v27 = vmul.f32 %v6659_v20, %v6545_v31 }
0x1017   :  { %v2494_v23 = vpop.permute.xlu0 %2493 }
0x1018   :  { %v2496_v47 = vmul.f32 %v2494_v23, %v6635_v56 }
0x101a   :  { %2498 = vrot.lane.b32.xlu1 %v2496_v47, %s5694_s24 }
0x101f   :  { %v2572_v38 = vpop.permute.xlu1 %2571 }
0x1020   :  { %v2574_v39 = vmul.f32 %v2572_v38, %v6641_v7 }
0x1022   :  { %2576 = vrot.lane.b32.xlu0 %v2574_v39, %s5694_s24 }
0x1027   :  { %v2650_v14 = vpop.permute.xlu0 %2649 }
0x1028   :  { %v2652_v52 = vmul.f32 %v2650_v14, %v6647_v63  ;;  %v2728_v32 = vpop.permute.xlu1 %2727 }
0x1029   :  { %v2730_v45 = vmul.f32 %v2728_v32, %v6653_v34 }
0x102a   :  { %2654 = vrot.lane.b32.xlu1 %v2652_v52, %s5694_s24 }
0x102b   :  { %2732 = vrot.lane.b32.xlu0 %v2730_v45, %s5694_s24 }
0x102f   :  { %v2806_v50 = vpop.permute.xlu0 %2805 }
0x1030   :  { %v2808_v16 = vmul.f32 %v2806_v50, %v6659_v20 }
0x1032   :  { %2810 = vrot.lane.b32.xlu1 %v2808_v16, %s5694_s24 }
0x108c   :  { %v2499_v49 = vpop.permute.xlu1 %2498 }
0x108d   :  { %v6675_v54 = vadd.f32 %v2499_v49, %v2491_v51  ;;  %v6727_v51 = vld [vmem:[#allocation10 + $0x70] ss:$8 sps:$4 sm:$0xff]  }
0x108f   :  { %5428 = vtanh.f32 %v6675_v54 }
0x1094   :  { %v2577_v53 = vpop.permute.xlu0 %2576 }
0x1095   :  { %v6680_v58 = vadd.f32 %v2577_v53, %v2569_v55 }
0x1097   :  { %5430 = vtanh.f32 %v6680_v58 }
0x1099   :  { %v5429_v60 = vpop.eup %5428 }
0x109a   :  { %2504 = vrot.lane.b32.xlu0 %v5429_v60, %s7258_s30 }
0x109c   :  { %v2655_v30 = vpop.permute.xlu1 %2654 }
0x109d   :  { %v6688_v26 = vadd.f32 %v2655_v30, %v2647_v4  ;;  %v2733_v8 = vpop.permute.xlu0 %2732 }
0x109e   :  { %v6690_v9 = vadd.f32 %v2733_v8, %v2725_v5 }
0x109f   :  { %5432 = vtanh.f32 %v6688_v26 }
0x10a0   :  { %5434 = vtanh.f32 %v6690_v9 }
0x10a1   :  { %v5431_v41 = vpop.eup %5430 }
0x10a2   :  { %2582 = vrot.lane.b32.xlu1 %v5431_v41, %s7258_s30 }
0x10a4   :  { %v2811_v37 = vpop.permute.xlu1 %2810 }
0x10a5   :  { %v6697_v42 = vadd.f32 %v2811_v37, %v2803_v27 }
0x10a7   :  { %5436 = vtanh.f32 %v6697_v42 }
0x10a9   :  { %v5433_v18 = vpop.eup %5432 }
0x10aa   :  { %v5435_v15 = vpop.eup %5434  ;;  %2660 = vrot.lane.b32.xlu0 %v5433_v18, %s7258_s30 }
0x10ab   :  { %2738 = vrot.lane.b32.xlu1 %v5435_v15, %s7258_s30 }
0x10b1   :  { %v5437_v29 = vpop.eup %5436 }
0x10b2   :  { %2816 = vrot.lane.b32.xlu0 %v5437_v29, %s7258_s30 }
0x110c   :  { %v2505_v17 = vpop.permute.xlu0 %2504 }
0x110d   :  { %v2507_v35 = vmul.f32 %v2505_v17, %v6635_v56 }
0x110f   :  { %v2508_v36 = vpack.c.bf16 %v2507_v35, %v2507_v35 }
0x1111   :  { %2510 = vrot.lane.b32.xlu1 %v2508_v36, %s5694_s24 }
0x1114   :  { %v2583_v31 = vpop.permute.xlu1 %2582 }
0x1115   :  { %v2585_v23 = vmul.f32 %v2583_v31, %v6641_v7 }
0x1117   :  { %v2586_v47 = vpack.c.bf16 %v2585_v23, %v2585_v23 }
0x1119   :  { %2588 = vrot.lane.b32.xlu0 %v2586_v47, %s5694_s24 }
0x111c   :  { %v2661_v38 = vpop.permute.xlu0 %2660 }
0x111d   :  { %v2663_v39 = vmul.f32 %v2661_v38, %v6647_v63  ;;  %v2739_v14 = vpop.permute.xlu1 %2738 }
0x111e   :  { %v2741_v52 = vmul.f32 %v2739_v14, %v6653_v34  ;;  %v6720_v34 = vld [vmem:[#allocation10 + $0x60] ss:$8 sps:$4 sm:$0xff]  }
0x111f   :  { %v2664_v32 = vpack.c.bf16 %v2663_v39, %v2663_v39 }
0x1120   :  { %v2742_v45 = vpack.c.bf16 %v2741_v52, %v2741_v52 }
0x1121   :  { %2666 = vrot.lane.b32.xlu1 %v2664_v32, %s5694_s24 }
0x1122   :  { %2744 = vrot.lane.b32.xlu0 %v2742_v45, %s5694_s24 }
0x1124   :  { %v2817_v56 = vpop.permute.xlu0 %2816 }
0x1125   :  { %v2819_v50 = vmul.f32 %v2817_v56, %v6659_v20  ;;  %v6724_v20 = vld [vmem:[#allocation10 + $0x74] ss:$8 sps:$4 sm:$0xff]  }
0x1127   :  { %v2820_v16 = vpack.c.bf16 %v2819_v50, %v2819_v50 }
0x1129   :  { %2822 = vrot.lane.b32.xlu1 %v2820_v16, %s5694_s24 }
0x1183   :  { %v2511_v7 = vpop.permute.xlu1 %2510 }
0x1184   :  { %4935 = vmatmul.mubr.msk.bf16.vlgmr.msra.gmra.mrb[28].mxu0 %vm1214_vm4, %v2511_v7 }
0x1185   :  { %2672 = vmatpush1.bf16.msra.mxu0 %v6560_v48  ;;  %2703 = vmatprep.mubr.bf16.mxu0 %v5695_v22 }
0x1186   :  { %2673 = vmatprep.subr.bf16.mxu0 %v6564_v59 }
0x1189   :  { %2674 = vmatpush1.bf16.msra.mxu0 %v6567_v61 }
0x118a   :  { %5167 = vmatprep.subr.bf16.mxu0 %v5696_v3 }
0x118b   :  { %v2589_v63 = vpop.permute.xlu0 %2588 }
0x118c   :  { %4938 = vmatmul.mubr.msk.bf16.vlgmr.msra.gmra.mrb[48].mxu1 %vm1214_vm4, %v2589_v63 }
0x118d   :  { %2750 = vmatpush1.bf16.msra.mxu1 %v6720_v34  ;;  %2781 = vmatprep.mubr.bf16.mxu1 %v5695_v22 }
0x118e   :  { %2751 = vmatprep.subr.bf16.mxu1 %v6724_v20 }
0x1191   :  { %2752 = vmatpush1.bf16.msra.mxu1 %v6727_v51 }
0x1192   :  { %2905 = vmatprep.subr.bf16.mxu1 %v6436_v57 }
0x1193   :  { %v2667_v49 = vpop.permute.xlu1 %2666 }
0x1194   :  { %4941 = vmatmul.mubr.msk.bf16.vlgmr.msra.gmra.mrb[32].mxu0 %vm1214_vm4, %v2667_v49  ;;  %v2745_v55 = vpop.permute.xlu0 %2744 }
0x1195   :  { %5168 = vmatpush3.bf16.msra.mxu0 %v6579_v10  ;;  %4944 = vmatmul.mubr.msk.bf16.vlgmr.msra.gmra.mrb[52].mxu1 %vm1214_vm4, %v2745_v55 }
0x1196   :  { %5169 = vmatprep.subr.bf16.mxu0 %v5696_v3  ;;  %5171 = vmatprep.mubr.msk.bf16.mxu0 %vm5697_vm5, %v5696_v3 }
0x1197   :  { %2906 = vmatpush1.bf16.msra.mxu1 %v6442_v6  ;;  %2937 = vmatprep.mubr.bf16.mxu1 %v5695_v22 }
0x1198   :  { %2907 = vmatprep.subr.bf16.mxu1 %v6446_v25 }
0x1199   :  { %5170 = vmatpush3.bf16.msra.mxu0 %v6588_v12 }
0x119a   :  { %2983 = vmatprep.subr.bf16.mxu0 %v6597_v13 }
0x119b   :  { %v2823_v57 = vpop.permute.xlu1 %2822  ;;  %2908 = vmatpush1.bf16.msra.mxu1 %v6452_v40 }
0x119c   :  { %5172 = vmatmul.mubr.msk.bf16.vlgmr.msra.gmra.mrb[36].mxu0 %vm1214_vm4, %v2823_v57  ;;  %3061 = vmatprep.subr.bf16.mxu1 %v6602_v28 }
0x119d   :  { %2984 = vmatpush1.bf16.msra.mxu0 %v6420_v0  ;;  %3015 = vmatprep.mubr.bf16.mxu0 %v5695_v22 }
0x119e   :  { %2985 = vmatprep.subr.bf16.mxu0 %v6424_v1 }
0x11a1   :  { %2986 = vmatpush1.bf16.msra.mxu0 %v6427_v21 }
0x11a2   :  { %3139 = vmatprep.subr.bf16.mxu0 %v6609_v11 }
0x1257   :  { %v2549_v6 = vpop.f32.mrb[28].mxu0 }
0x1258   :  { %v2868_v25 = vadd.f32 %v6459_v44, %v2549_v6  ;;  %v2551_v53 = vpop.f32.mrb[29].mxu0 }
0x1259   :  { %v2553_v60 = vpop.f32.mrb[30].mxu0 }
0x125a   :  { %v2869_v40 = vadd.f32 %v6466_v24, %v2868_v25  ;;  %v2554_v4 = vpop.f32.mrb[31].mxu0 }
0x125c   :  { %v2870_v30 = vmul.f32 2.0, %v2869_v40 }
0x125e   :  { %v2871_v0 = vsel %vm5851_vm3, %v2870_v30, %v2869_v40 }
0x125f   :  { %v4948_v5 = vmul.f32 -1.442695, %v2871_v0  ;;  %v2627_v8 = vpop.f32.mrb[48].mxu1 }
0x1260   :  { %v2946_v41 = vadd.f32 %v2627_v8, %v2551_v53  ;;  %v2629_v1 = vpop.f32.mrb[49].mxu1 }
0x1261   :  { %5438 = vpow2.f32 %v4948_v5  ;;  %v2631_v21 = vpop.f32.mrb[50].mxu1 }
0x1262   :  { %v2947_v27 = vadd.f32 %v6474_v19, %v2946_v41  ;;  %v2632_v37 = vpop.f32.mrb[51].mxu1 }
0x1264   :  { %v2948_v18 = vmul.f32 2.0, %v2947_v27 }
0x1266   :  { %v2949_v44 = vsel %vm5851_vm3, %v2948_v18, %v2947_v27 }
0x1267   :  { %v4951_v15 = vmul.f32 -1.442695, %v2949_v44  ;;  %v2705_v24 = vpop.f32.mrb[32].mxu0 }
0x1268   :  { %v3024_v29 = vadd.f32 %v2705_v24, %v2629_v1  ;;  %v2707_v17 = vpop.f32.mrb[33].mxu0  ;;  %v2783_v35 = vpop.f32.mrb[52].mxu1 }
0x1269   :  { %5440 = vpow2.f32 %v4951_v15  ;;  %v3102_v36 = vadd.f32 %v2783_v35, %v2707_v17  ;;  %v2709_v31 = vpop.f32.mrb[34].mxu0  ;;  %v2785_v23 = vpop.f32.mrb[53].mxu1 }
0x126a   :  { %v3025_v47 = vadd.f32 %v6488_v62, %v3024_v29  ;;  %v2710_v38 = vpop.f32.mrb[35].mxu0  ;;  %v2787_v39 = vpop.f32.mrb[54].mxu1 }
0x126b   :  { %v5439_v14 = vpop.eup %5438  ;;  %v3103_v19 = vadd.f32 %v6623_v43, %v3102_v36  ;;  %v2788_v52 = vpop.f32.mrb[55].mxu1 }
0x126c   :  { %v2875_v32 = vadd.f32 1.0, %v5439_v14  ;;  %v3026_v45 = vmul.f32 2.0, %v3025_v47 }
0x126d   :  { %v3104_v56 = vmul.f32 2.0, %v3103_v19 }
0x126e   :  { %5442 = vrcp.f32 %v2875_v32  ;;  %v3027_v50 = vsel %vm5851_vm3, %v3026_v45, %v3025_v47 }
0x126f   :  { %v4954_v16 = vmul.f32 -1.442695, %v3027_v50  ;;  %v3105_v7 = vsel %vm5851_vm3, %v3104_v56, %v3103_v19  ;;  %v2861_v63 = vpop.f32.mrb[36].mxu0 }
0x1270   :  { %v4957_v49 = vmul.f32 -1.442695, %v3105_v7  ;;  %v3180_v62 = vadd.f32 %v2861_v63, %v2785_v23  ;;  %v5173_v55 = vpop.f32.mrb[37].mxu0 }
0x1271   :  { %5444 = vpow2.f32 %v4954_v16  ;;  %v2864_v57 = vpop.f32.mrb[38].mxu0 }
0x1272   :  { %5446 = vpow2.f32 %v4957_v49  ;;  %v3181_v6 = vadd.f32 %v6480_v46, %v3180_v62  ;;  %v5174_v25 = vpop.f32.mrb[39].mxu0 }
0x1273   :  { %v5441_v53 = vpop.eup %5440 }
0x1274   :  { %v2953_v60 = vadd.f32 1.0, %v5441_v53  ;;  %v3182_v40 = vmul.f32 2.0, %v3181_v6 }
0x1276   :  { %5448 = vrcp.f32 %v2953_v60  ;;  %v3183_v4 = vsel %vm5851_vm3, %v3182_v40, %v3181_v6 }
0x1277   :  { %v4960_v30 = vmul.f32 -1.442695, %v3183_v4 }
0x1278   :  { %v5443_v0 = vpop.eup %5442 }
0x1279   :  { %5450 = vpow2.f32 %v4960_v30  ;;  %v2878_v5 = vmul.f32 2.0, %v5443_v0 }
0x127b   :  { %v5445_v8 = vpop.eup %5444  ;;  %v4949_v41 = vadd.f32 -1.0, %v2878_v5 }
0x127c   :  { %v5447_v1 = vpop.eup %5446  ;;  %v3031_v21 = vadd.f32 1.0, %v5445_v8 }
0x127d   :  { %v3109_v27 = vadd.f32 1.0, %v5447_v1  ;;  %v6768_v46 = vsel %vm5851_vm3, %v4949_v41, %v5443_v0 }
0x127e   :  { %5452 = vrcp.f32 %v3031_v21  ;;  %2883 = vrot.lane.b32.xlu0 %v6768_v46, %s7258_s30  ;;  %v2881_v6 = vmul.f32 %v6768_v46, %v6675_v54 }
0x127f   :  { %5454 = vrcp.f32 %v3109_v27 }
0x1280   :  { %v5449_v37 = vpop.eup %5448 }
0x1281   :  { %v2956_v18 = vmul.f32 2.0, %v5449_v37 }
0x1283   :  { %v5451_v44 = vpop.eup %5450  ;;  %v4952_v15 = vadd.f32 -1.0, %v2956_v18 }
0x1284   :  { %v3187_v24 = vadd.f32 1.0, %v5451_v44 }
0x1285   :  { %v6774_v29 = vsel %vm5851_vm3, %v4952_v15, %v5449_v37 }
0x1286   :  { %5456 = vrcp.f32 %v3187_v24  ;;  %2961 = vrot.lane.b32.xlu1 %v6774_v29, %s7258_s30  ;;  %v2959_v60 = vmul.f32 %v6774_v29, %v6680_v58 }
0x1288   :  { %v5453_v17 = vpop.eup %5452 }
0x1289   :  { %v5455_v35 = vpop.eup %5454  ;;  %v3034_v36 = vmul.f32 2.0, %v5453_v17 }
0x128a   :  { %v3112_v31 = vmul.f32 2.0, %v5455_v35 }
0x128b   :  { %v4955_v23 = vadd.f32 -1.0, %v3034_v36 }
0x128c   :  { %v4958_v47 = vadd.f32 -1.0, %v3112_v31 }
0x128d   :  { %v6780_v38 = vsel %vm5851_vm3, %v4955_v23, %v5453_v17 }
0x128e   :  { %3039 = vrot.lane.b32.xlu0 %v6780_v38, %s7258_s30  ;;  %v6786_v39 = vsel %vm5851_vm3, %v4958_v47, %v5455_v35  ;;  %v3037_v0 = vmul.f32 %v6780_v38, %v6688_v26 }
0x128f   :  { %3117 = vrot.lane.b32.xlu1 %v6786_v39, %s7258_s30  ;;  %v3115_v5 = vmul.f32 %v6786_v39, %v6690_v9 }
0x1290   :  { %v5457_v14 = vpop.eup %5456 }
0x1291   :  { %v3190_v19 = vmul.f32 2.0, %v5457_v14 }
0x1293   :  { %v4961_v52 = vadd.f32 -1.0, %v3190_v19 }
0x1295   :  { %v6792_v32 = vsel %vm5851_vm3, %v4961_v52, %v5457_v14 }
0x1296   :  { %3195 = vrot.lane.b32.xlu0 %v6792_v32, %s7258_s30  ;;  %v3193_v21 = vmul.f32 %v6792_v32, %v6697_v42 }
0x12f0   :  { %v2884_v45 = vpop.permute.xlu0 %2883 }
0x12f1   :  { %v2886_v56 = vmul.f32 %v2884_v45, %v6768_v46 }
0x12f3   :  { %2888 = vrot.lane.b32.xlu1 %v2886_v56, %s5694_s24 }
0x12f8   :  { %v2962_v50 = vpop.permute.xlu1 %2961 }
0x12f9   :  { %v2964_v16 = vmul.f32 %v2962_v50, %v6774_v29  ;;  %v5581_v50 = vld [vmem:[#allocation10 + $0x10] ss:$8 sps:$4 sm:$0xff]  }
0x12fb   :  { %2966 = vrot.lane.b32.xlu0 %v2964_v16, %s5694_s24  ;;  %v6872_v16 = vld [vmem:[#allocation10 + $0x34] ss:$8 sps:$4 sm:$0xff]  }
0x1300   :  { %v3040_v7 = vpop.permute.xlu0 %3039 }
0x1301   :  { %v3042_v63 = vmul.f32 %v3040_v7, %v6780_v38  ;;  %v3118_v49 = vpop.permute.xlu1 %3117 }
0x1302   :  { %v3120_v62 = vmul.f32 %v3118_v49, %v6786_v39  ;;  %v5585_v49 = vld [vmem:[%s7248_s5] ss:$0 sm:$0xff] }
0x1303   :  { %3044 = vrot.lane.b32.xlu1 %v3042_v63, %s5694_s24 }
0x1304   :  { %3122 = vrot.lane.b32.xlu0 %v3120_v62, %s5694_s24 }
0x1308   :  { %v3196_v55 = vpop.permute.xlu0 %3195 }
0x1309   :  { %v3198_v57 = vmul.f32 %v3196_v55, %v6792_v32 }
0x130b   :  { %3200 = vrot.lane.b32.xlu1 %v3198_v57, %s5694_s24 }
0x1365   :  { %v2889_v25 = vpop.permute.xlu1 %2888 }
0x1366   :  { %v6808_v53 = vadd.f32 %v2889_v25, %v2881_v6 }
0x1368   :  { %5458 = vtanh.f32 %v6808_v53 }
0x136d   :  { %v2967_v40 = vpop.permute.xlu0 %2966 }
0x136e   :  { %v6813_v4 = vadd.f32 %v2967_v40, %v2959_v60 }
0x1370   :  { %5460 = vtanh.f32 %v6813_v4 }
0x1372   :  { %v5459_v30 = vpop.eup %5458 }
0x1373   :  { %2894 = vrot.lane.b32.xlu0 %v5459_v30, %s7258_s30 }
0x1375   :  { %v3045_v54 = vpop.permute.xlu1 %3044 }
0x1376   :  { %v6821_v8 = vadd.f32 %v3045_v54, %v3037_v0  ;;  %v3123_v41 = vpop.permute.xlu0 %3122 }
0x1377   :  { %v6823_v1 = vadd.f32 %v3123_v41, %v3115_v5 }
0x1378   :  { %5462 = vtanh.f32 %v6821_v8 }
0x1379   :  { %5464 = vtanh.f32 %v6823_v1 }
0x137a   :  { %v5461_v58 = vpop.eup %5460 }
0x137b   :  { %2972 = vrot.lane.b32.xlu1 %v5461_v58, %s7258_s30 }
0x137d   :  { %v3201_v26 = vpop.permute.xlu1 %3200 }
0x137e   :  { %v6830_v27 = vadd.f32 %v3201_v26, %v3193_v21 }
0x1380   :  { %5466 = vtanh.f32 %v6830_v27 }
0x1382   :  { %v5463_v9 = vpop.eup %5462 }
0x1383   :  { %v5465_v37 = vpop.eup %5464  ;;  %3050 = vrot.lane.b32.xlu0 %v5463_v9, %s7258_s30 }
0x1384   :  { %3128 = vrot.lane.b32.xlu1 %v5465_v37, %s7258_s30 }
0x138a   :  { %v5467_v18 = vpop.eup %5466 }
0x138b   :  { %3206 = vrot.lane.b32.xlu0 %v5467_v18, %s7258_s30 }
0x13e5   :  { %v2895_v44 = vpop.permute.xlu0 %2894 }
0x13e6   :  { %v2897_v15 = vmul.f32 %v2895_v44, %v6768_v46 }
0x13e8   :  { %v2898_v24 = vpack.c.bf16 %v2897_v15, %v2897_v15 }
0x13ea   :  { %2900 = vrot.lane.b32.xlu1 %v2898_v24, %s5694_s24  ;;  %v6896_v24 = vld [vmem:[%s7248_s5 + $0x2] ss:$0 sm:$0xff] }
0x13ed   :  { %v2973_v42 = vpop.permute.xlu1 %2972 }
0x13ee   :  { %v2975_v17 = vmul.f32 %v2973_v42, %v6774_v29 }
0x13f0   :  { %v2976_v35 = vpack.c.bf16 %v2975_v17, %v2975_v17 }
0x13f2   :  { %2978 = vrot.lane.b32.xlu0 %v2976_v35, %s5694_s24 }
0x13f5   :  { %v3051_v36 = vpop.permute.xlu0 %3050 }
0x13f6   :  { %v3053_v31 = vmul.f32 %v3051_v36, %v6780_v38  ;;  %v3129_v23 = vpop.permute.xlu1 %3128 }
0x13f7   :  { %v3131_v47 = vmul.f32 %v3129_v23, %v6786_v39 }
0x13f8   :  { %v3054_v14 = vpack.c.bf16 %v3053_v31, %v3053_v31 }
0x13f9   :  { %v3132_v19 = vpack.c.bf16 %v3131_v47, %v3131_v47 }
0x13fa   :  { %3056 = vrot.lane.b32.xlu1 %v3054_v14, %s5694_s24 }
0x13fb   :  { %3134 = vrot.lane.b32.xlu0 %v3132_v19, %s5694_s24 }
0x13fd   :  { %v3207_v46 = vpop.permute.xlu0 %3206 }
0x13fe   :  { %v3209_v52 = vmul.f32 %v3207_v46, %v6792_v32  ;;  %v5580_v32 = vld [vmem:[#allocation10 + $0x14] ss:$8 sps:$4 sm:$0xff]  }
0x1400   :  { %v3210_v45 = vpack.c.bf16 %v3209_v52, %v3209_v52 }
0x1402   :  { %3212 = vrot.lane.b32.xlu1 %v3210_v45, %s5694_s24 }
0x145c   :  { %v2901_v29 = vpop.permute.xlu1 %2900 }
0x145d   :  { %4950 = vmatmul.mubr.msk.bf16.vlgmr.msra.gmra.mrb[56].mxu1 %vm1214_vm4, %v2901_v29 }
0x145e   :  { %3062 = vmatpush1.bf16.msra.mxu1 %v6560_v48  ;;  %3093 = vmatprep.mubr.bf16.mxu1 %v5695_v22  ;;  %v5578_v48 = vld [vmem:[#allocation10 + $0x4] ss:$8 sps:$4 sm:$0xff]  }
0x145f   :  { %3063 = vmatprep.subr.bf16.mxu1 %v6564_v59 }
0x1462   :  { %3064 = vmatpush1.bf16.msra.mxu1 %v6567_v61  ;;  %v5579_v61 = vld [vmem:[#allocation10] ss:$8 sps:$4 sm:$0xff]  }
0x1463   :  { %5175 = vmatprep.subr.bf16.mxu1 %v5696_v3 }
0x1464   :  { %v2979_v38 = vpop.permute.xlu0 %2978 }
0x1465   :  { %4953 = vmatmul.mubr.msk.bf16.vlgmr.msra.gmra.mrb[40].mxu0 %vm1214_vm4, %v2979_v38 }
0x1466   :  { %3140 = vmatpush1.bf16.msra.mxu0 %v6720_v34  ;;  %3171 = vmatprep.mubr.bf16.mxu0 %v5695_v22 }
0x1467   :  { %3141 = vmatprep.subr.bf16.mxu0 %v6724_v20 }
0x146a   :  { %3142 = vmatpush1.bf16.msra.mxu0 %v6727_v51 }
0x146b   :  { %3295 = vmatprep.subr.bf16.mxu0 %v5578_v48 }
0x146c   :  { %v3057_v39 = vpop.permute.xlu1 %3056 }
0x146d   :  { %4956 = vmatmul.mubr.msk.bf16.vlgmr.msra.gmra.mrb[60].mxu1 %vm1214_vm4, %v3057_v39  ;;  %v3135_v59 = vpop.permute.xlu0 %3134 }
0x146e   :  { %5176 = vmatpush3.bf16.msra.mxu1 %v6579_v10  ;;  %4959 = vmatmul.mubr.msk.bf16.vlgmr.msra.gmra.mrb[44].mxu0 %vm1214_vm4, %v3135_v59  ;;  %v6868_v10 = vld [vmem:[#allocation10 + $0x20] ss:$8 sps:$4 sm:$0xff]  }
0x146f   :  { %5177 = vmatprep.subr.bf16.mxu1 %v5696_v3  ;;  %5179 = vmatprep.mubr.msk.bf16.mxu1 %vm5697_vm5, %v5696_v3 }
0x1470   :  { %3296 = vmatpush1.bf16.msra.mxu0 %v5579_v61  ;;  %3327 = vmatprep.mubr.bf16.mxu0 %v5695_v22 }
0x1471   :  { %3297 = vmatprep.subr.bf16.mxu0 %v5580_v32 }
0x1472   :  { %5178 = vmatpush3.bf16.msra.mxu1 %v6588_v12  ;;  %v6875_v12 = vld [vmem:[#allocation10 + $0x30] ss:$8 sps:$4 sm:$0xff]  }
0x1473   :  { %3372 = vmatprep.subr.bf16.mxu1 %v6597_v13 }
0x1474   :  { %v3213_v56 = vpop.permute.xlu1 %3212  ;;  %3298 = vmatpush1.bf16.msra.mxu0 %v5581_v50 }
0x1475   :  { %5180 = vmatmul.mubr.msk.bf16.vlgmr.msra.gmra.mrb[64].mxu1 %vm1214_vm4, %v3213_v56  ;;  %3450 = vmatprep.subr.bf16.mxu0 %v6602_v28 }
0x1476   :  { %3373 = vmatpush1.bf16.msra.mxu1 %v6868_v10  ;;  %3404 = vmatprep.mubr.bf16.mxu1 %v5695_v22 }
0x1477   :  { %3374 = vmatprep.subr.bf16.mxu1 %v6872_v16 }
0x147a   :  { %3375 = vmatpush1.bf16.msra.mxu1 %v6875_v12 }
0x147b   :  { %3528 = vmatprep.subr.bf16.mxu1 %v6609_v11 }
0x1530   :  { %v2939_v13 = vpop.f32.mrb[56].mxu1 }
0x1531   :  { %v3258_v7 = vadd.f32 %v6461_v33, %v2939_v13  ;;  %v2941_v28 = vpop.f32.mrb[57].mxu1  ;;  %v6888_v33 = vld [vmem:[%s7248_s5 + $0x1] ss:$0 sm:$0xff] }
0x1532   :  { %v2943_v63 = vpop.f32.mrb[58].mxu1 }
0x1533   :  { %v3259_v62 = vadd.f32 %v5585_v49, %v3258_v7  ;;  %v2944_v55 = vpop.f32.mrb[59].mxu1 }
0x1535   :  { %v3260_v57 = vmul.f32 2.0, %v3259_v62 }
0x1537   :  { %v3261_v6 = vsel %vm5851_vm3, %v3260_v57, %v3259_v62 }
0x1538   :  { %v4963_v25 = vmul.f32 -1.442695, %v3261_v6  ;;  %v3017_v60 = vpop.f32.mrb[40].mxu0 }
0x1539   :  { %v3335_v40 = vadd.f32 %v3017_v60, %v2941_v28  ;;  %v3019_v30 = vpop.f32.mrb[41].mxu0 }
0x153a   :  { %5468 = vpow2.f32 %v4963_v25  ;;  %v3021_v11 = vpop.f32.mrb[42].mxu0 }
0x153b   :  { %v3336_v0 = vadd.f32 %v6888_v33, %v3335_v40  ;;  %v3022_v54 = vpop.f32.mrb[43].mxu0 }
0x153d   :  { %v3337_v5 = vmul.f32 2.0, %v3336_v0 }
0x153f   :  { %v3338_v41 = vsel %vm5851_vm3, %v3337_v5, %v3336_v0 }
0x1540   :  { %v4966_v58 = vmul.f32 -1.442695, %v3338_v41  ;;  %v3095_v21 = vpop.f32.mrb[60].mxu1 }
0x1541   :  { %v3413_v26 = vadd.f32 %v3095_v21, %v3019_v30  ;;  %v3097_v9 = vpop.f32.mrb[61].mxu1  ;;  %v3173_v37 = vpop.f32.mrb[44].mxu0 }
0x1542   :  { %5470 = vpow2.f32 %v4966_v58  ;;  %v3491_v18 = vadd.f32 %v3173_v37, %v3097_v9  ;;  %v3099_v44 = vpop.f32.mrb[62].mxu1  ;;  %v3175_v15 = vpop.f32.mrb[45].mxu0 }
0x1543   :  { %v3414_v42 = vadd.f32 %v6896_v24, %v3413_v26  ;;  %v3100_v17 = vpop.f32.mrb[63].mxu1  ;;  %v3177_v35 = vpop.f32.mrb[46].mxu0 }
0x1544   :  { %v5469_v36 = vpop.eup %5468  ;;  %v3492_v31 = vadd.f32 %v6623_v43, %v3491_v18  ;;  %v3178_v23 = vpop.f32.mrb[47].mxu0  ;;  %v6907_v43 = vld [vmem:[%s7248_s5 + $0x4] ss:$0 sm:$0xff] }
0x1545   :  { %v3265_v47 = vadd.f32 1.0, %v5469_v36  ;;  %v3415_v14 = vmul.f32 2.0, %v3414_v42 }
0x1546   :  { %v3493_v19 = vmul.f32 2.0, %v3492_v31 }
0x1547   :  { %5472 = vrcp.f32 %v3265_v47  ;;  %v3416_v46 = vsel %vm5851_vm3, %v3415_v14, %v3414_v42 }
0x1548   :  { %v4969_v52 = vmul.f32 -1.442695, %v3416_v46  ;;  %v3494_v45 = vsel %vm5851_vm3, %v3493_v19, %v3492_v31  ;;  %v3251_v29 = vpop.f32.mrb[64].mxu1 }
0x1549   :  { %v4972_v38 = vmul.f32 -1.442695, %v3494_v45  ;;  %v3569_v48 = vadd.f32 %v3251_v29, %v3175_v15  ;;  %v5181_v39 = vpop.f32.mrb[65].mxu1 }
0x154a   :  { %5474 = vpow2.f32 %v4969_v52  ;;  %v3254_v59 = vpop.f32.mrb[66].mxu1 }
0x154b   :  { %5476 = vpow2.f32 %v4972_v38  ;;  %v3570_v61 = vadd.f32 %v6907_v43, %v3569_v48  ;;  %v5182_v32 = vpop.f32.mrb[67].mxu1 }
0x154c   :  { %v5471_v56 = vpop.eup %5470 }
0x154d   :  { %v3342_v50 = vadd.f32 1.0, %v5471_v56  ;;  %v3571_v13 = vmul.f32 2.0, %v3570_v61 }
0x154f   :  { %5478 = vrcp.f32 %v3342_v50  ;;  %v3572_v7 = vsel %vm5851_vm3, %v3571_v13, %v3570_v61 }
0x1550   :  { %v4975_v28 = vmul.f32 -1.442695, %v3572_v7 }
0x1551   :  { %v5473_v63 = vpop.eup %5472 }
0x1552   :  { %5480 = vpow2.f32 %v4975_v28  ;;  %v3268_v49 = vmul.f32 2.0, %v5473_v63 }
0x1554   :  { %v5475_v62 = vpop.eup %5474  ;;  %v4964_v55 = vadd.f32 -1.0, %v3268_v49 }
0x1555   :  { %v5477_v57 = vpop.eup %5476  ;;  %v3420_v6 = vadd.f32 1.0, %v5475_v62 }
0x1556   :  { %v3498_v25 = vadd.f32 1.0, %v5477_v57  ;;  %v6914_v60 = vsel %vm5851_vm3, %v4964_v55, %v5473_v63 }
0x1557   :  { %5482 = vrcp.f32 %v3420_v6  ;;  %3273 = vrot.lane.b32.xlu0 %v6914_v60, %s7258_s30  ;;  %v3271_v38 = vmul.f32 %v6914_v60, %v6808_v53 }
0x1558   :  { %5484 = vrcp.f32 %v3498_v25 }
0x1559   :  { %v5479_v40 = vpop.eup %5478 }
0x155a   :  { %v3345_v30 = vmul.f32 2.0, %v5479_v40 }
0x155c   :  { %v5481_v11 = vpop.eup %5480  ;;  %v4967_v0 = vadd.f32 -1.0, %v3345_v30 }
0x155d   :  { %v3576_v54 = vadd.f32 1.0, %v5481_v11 }
0x155e   :  { %v6920_v5 = vsel %vm5851_vm3, %v4967_v0, %v5479_v40 }
0x155f   :  { %5486 = vrcp.f32 %v3576_v54  ;;  %3350 = vrot.lane.b32.xlu1 %v6920_v5, %s7258_s30  ;;  %v3348_v59 = vmul.f32 %v6920_v5, %v6813_v4 }
0x1561   :  { %v5483_v41 = vpop.eup %5482 }
0x1562   :  { %v5485_v58 = vpop.eup %5484  ;;  %v3423_v21 = vmul.f32 2.0, %v5483_v41 }
0x1563   :  { %v3501_v26 = vmul.f32 2.0, %v5485_v58 }
0x1564   :  { %v4970_v9 = vadd.f32 -1.0, %v3423_v21 }
0x1565   :  { %v4973_v37 = vadd.f32 -1.0, %v3501_v26 }
0x1566   :  { %v6926_v18 = vsel %vm5851_vm3, %v4970_v9, %v5483_v41 }
0x1567   :  { %3428 = vrot.lane.b32.xlu0 %v6926_v18, %s7258_s30  ;;  %v6932_v44 = vsel %vm5851_vm3, %v4973_v37, %v5485_v58  ;;  %v3426_v50 = vmul.f32 %v6926_v18, %v6821_v8 }
0x1568   :  { %3506 = vrot.lane.b32.xlu1 %v6932_v44, %s7258_s30  ;;  %v3504_v53 = vmul.f32 %v6932_v44, %v6823_v1 }
0x1569   :  { %v5487_v15 = vpop.eup %5486 }
0x156a   :  { %v3579_v42 = vmul.f32 2.0, %v5487_v15 }
0x156c   :  { %v4976_v17 = vadd.f32 -1.0, %v3579_v42 }
0x156e   :  { %v6938_v35 = vsel %vm5851_vm3, %v4976_v17, %v5487_v15  ;;  %v6990_v15 = vld [vmem:[#allocation10 + $0x40] ss:$8 sps:$4 sm:$0xff]   ;;  %v5592_v17 = vld [vmem:[#allocation10 + $0x24] ss:$8 sps:$4 sm:$0xff]  }
0x156f   :  { %3584 = vrot.lane.b32.xlu0 %v6938_v35, %s7258_s30  ;;  %v3582_v49 = vmul.f32 %v6938_v35, %v6830_v27 }
0x15c9   :  { %v3274_v36 = vpop.permute.xlu0 %3273 }
0x15ca   :  { %v3276_v31 = vmul.f32 %v3274_v36, %v6914_v60 }
0x15cc   :  { %3278 = vrot.lane.b32.xlu1 %v3276_v31, %s5694_s24  ;;  %v7010_v31 = vld [vmem:[%s7247_s4] sm:$0xff]  }
0x15d1   :  { %v3351_v23 = vpop.permute.xlu1 %3350 }
0x15d2   :  { %v3353_v47 = vmul.f32 %v3351_v23, %v6920_v5 }
0x15d4   :  { %3355 = vrot.lane.b32.xlu0 %v3353_v47, %s5694_s24 }
0x15d9   :  { %v3429_v14 = vpop.permute.xlu0 %3428 }
0x15da   :  { %v3431_v19 = vmul.f32 %v3429_v14, %v6926_v18  ;;  %v3507_v46 = vpop.permute.xlu1 %3506 }
0x15db   :  { %v3509_v52 = vmul.f32 %v3507_v46, %v6932_v44 }
0x15dc   :  { %3433 = vrot.lane.b32.xlu1 %v3431_v19, %s5694_s24 }
0x15dd   :  { %3511 = vrot.lane.b32.xlu0 %v3509_v52, %s5694_s24 }
0x15e1   :  { %v3585_v45 = vpop.permute.xlu0 %3584 }
0x15e2   :  { %v3587_v29 = vmul.f32 %v3585_v45, %v6938_v35 }
0x15e4   :  { %3589 = vrot.lane.b32.xlu1 %v3587_v29, %s5694_s24 }
0x163e   :  { %v3279_v48 = vpop.permute.xlu1 %3278 }
0x163f   :  { %v3281_v39 = vadd.f32 %v3279_v48, %v3271_v38 }
0x1641   :  { %5488 = vtanh.f32 %v3281_v39 }
0x1646   :  { %v3356_v61 = vpop.permute.xlu0 %3355 }
0x1647   :  { %v6956_v32 = vadd.f32 %v3356_v61, %v3348_v59 }
0x1649   :  { %5490 = vtanh.f32 %v6956_v32 }
0x164b   :  { %v5489_v56 = vpop.eup %5488 }
0x164c   :  { %3284 = vrot.lane.b32.xlu0 %v5489_v56, %s7258_s30 }
0x164e   :  { %v3434_v13 = vpop.permute.xlu1 %3433 }
0x164f   :  { %v6964_v7 = vadd.f32 %v3434_v13, %v3426_v50  ;;  %v3512_v28 = vpop.permute.xlu0 %3511 }
0x1650   :  { %v6966_v63 = vadd.f32 %v3512_v28, %v3504_v53 }
0x1651   :  { %5492 = vtanh.f32 %v6964_v7 }
0x1652   :  { %5494 = vtanh.f32 %v6966_v63 }
0x1653   :  { %v5491_v4 = vpop.eup %5490 }
0x1654   :  { %3361 = vrot.lane.b32.xlu1 %v5491_v4, %s7258_s30 }
0x1656   :  { %v3590_v8 = vpop.permute.xlu1 %3589 }
0x1657   :  { %v6973_v62 = vadd.f32 %v3590_v8, %v3582_v49 }
0x1659   :  { %5496 = vtanh.f32 %v6973_v62 }
0x165b   :  { %v5493_v1 = vpop.eup %5492 }
0x165c   :  { %v5495_v55 = vpop.eup %5494  ;;  %3439 = vrot.lane.b32.xlu0 %v5493_v1, %s7258_s30 }
0x165d   :  { %3517 = vrot.lane.b32.xlu1 %v5495_v55, %s7258_s30 }
0x1663   :  { %v5497_v57 = vpop.eup %5496 }
0x1664   :  { %3595 = vrot.lane.b32.xlu0 %v5497_v57, %s7258_s30 }
0x16be   :  { %v3285_v6 = vpop.permute.xlu0 %3284 }
0x16bf   :  { %v3287_v25 = vmul.f32 %v3285_v6, %v6914_v60 }
0x16c1   :  { %v3288_v40 = vpack.c.bf16 %v3287_v25, %v3287_v25 }
0x16c3   :  { %3290 = vrot.lane.b32.xlu1 %v3288_v40, %s5694_s24 }
0x16c6   :  { %v3362_v27 = vpop.permute.xlu1 %3361 }
0x16c7   :  { %v3364_v30 = vmul.f32 %v3362_v27, %v6920_v5 }
0x16c9   :  { %v3365_v11 = vpack.c.bf16 %v3364_v30, %v3364_v30 }
0x16cb   :  { %3367 = vrot.lane.b32.xlu0 %v3365_v11, %s5694_s24 }
0x16ce   :  { %v3440_v0 = vpop.permute.xlu0 %3439 }
0x16cf   :  { %v3442_v54 = vmul.f32 %v3440_v0, %v6926_v18  ;;  %v3518_v41 = vpop.permute.xlu1 %3517  ;;  %v6994_v18 = vld [vmem:[#allocation10 + $0x54] ss:$8 sps:$4 sm:$0xff]  }
0x16d0   :  { %v3520_v58 = vmul.f32 %v3518_v41, %v6932_v44  ;;  %v6997_v44 = vld [vmem:[#allocation10 + $0x50] ss:$8 sps:$4 sm:$0xff]  }
0x16d1   :  { %v3443_v21 = vpack.c.bf16 %v3442_v54, %v3442_v54 }
0x16d2   :  { %v3521_v26 = vpack.c.bf16 %v3520_v58, %v3520_v58 }
0x16d3   :  { %3445 = vrot.lane.b32.xlu1 %v3443_v21, %s5694_s24 }
0x16d4   :  { %3523 = vrot.lane.b32.xlu0 %v3521_v26, %s5694_s24 }
0x16d6   :  { %v3596_v60 = vpop.permute.xlu0 %3595 }
0x16d7   :  { %v3598_v9 = vmul.f32 %v3596_v60, %v6938_v35 }
0x16d9   :  { %v3599_v37 = vpack.c.bf16 %v3598_v9, %v3598_v9 }
0x16db   :  { %3601 = vrot.lane.b32.xlu1 %v3599_v37, %s5694_s24 }
0x1735   :  { %v3291_v5 = vpop.permute.xlu1 %3290 }
0x1736   :  { %4965 = vmatmul.mubr.msk.bf16.vlgmr.msra.gmra.mrb[48].mxu0 %vm1214_vm4, %v3291_v5 }
0x1737   :  { %3451 = vmatpush1.bf16.msra.mxu0 %v6990_v15  ;;  %3482 = vmatprep.mubr.bf16.mxu0 %v5695_v22 }
0x1738   :  { %3452 = vmatprep.subr.bf16.mxu0 %v6994_v18 }
0x173b   :  { %3453 = vmatpush1.bf16.msra.mxu0 %v6997_v44 }
0x173c   :  { %5183 = vmatprep.subr.bf16.mxu0 %v5696_v3 }
0x173d   :  { %v3368_v42 = vpop.permute.xlu0 %3367 }
0x173e   :  { %4968 = vmatmul.mubr.msk.bf16.vlgmr.msra.gmra.mrb[68].mxu1 %vm1214_vm4, %v3368_v42 }
0x173f   :  { %3529 = vmatpush1.bf16.msra.mxu1 %v6720_v34  ;;  %3560 = vmatprep.mubr.bf16.mxu1 %v5695_v22  ;;  %v7023_v34 = vld [vmem:[%s7247_s4 + $0x8] sm:$0xff]  }
0x1740   :  { %3530 = vmatprep.subr.bf16.mxu1 %v6724_v20  ;;  %v7026_v20 = vld [vmem:[#allocation10 + $0x44] ss:$8 sps:$4 sm:$0xff]  }
0x1743   :  { %3531 = vmatpush1.bf16.msra.mxu1 %v6727_v51 }
0x1744   :  { %3683 = vmatprep.subr.bf16.mxu1 %v5592_v17 }
0x1745   :  { %v3446_v35 = vpop.permute.xlu1 %3445 }
0x1746   :  { %4971 = vmatmul.mubr.msk.bf16.vlgmr.msra.gmra.mrb[52].mxu0 %vm1214_vm4, %v3446_v35  ;;  %v3524_v36 = vpop.permute.xlu0 %3523 }
0x1747   :  { %5184 = vmatpush3.bf16.msra.mxu0 %v7010_v31  ;;  %4974 = vmatmul.mubr.msk.bf16.vlgmr.msra.gmra.mrb[72].mxu1 %vm1214_vm4, %v3524_v36 }
0x1748   :  { %5185 = vmatprep.subr.bf16.mxu0 %v5696_v3  ;;  %5187 = vmatprep.mubr.msk.bf16.mxu0 %vm5697_vm5, %v5696_v3 }
0x1749   :  { %3684 = vmatpush1.bf16.msra.mxu1 %v6868_v10  ;;  %3715 = vmatprep.mubr.bf16.mxu1 %v5695_v22  ;;  %v7031_v10 = vld [vmem:[#allocation10 + $0x64] ss:$8 sps:$4 sm:$0xff]  }
0x174a   :  { %3685 = vmatprep.subr.bf16.mxu1 %v6872_v16 }
0x174b   :  { %5186 = vmatpush3.bf16.msra.mxu0 %v7023_v34 }
0x174c   :  { %3760 = vmatprep.subr.bf16.mxu0 %v7026_v20 }
0x174d   :  { %v3602_v51 = vpop.permute.xlu1 %3601  ;;  %3686 = vmatpush1.bf16.msra.mxu1 %v6875_v12 }
0x174e   :  { %5188 = vmatmul.mubr.msk.bf16.vlgmr.msra.gmra.mrb[56].mxu0 %vm1214_vm4, %v3602_v51  ;;  %3838 = vmatprep.subr.bf16.mxu1 %v7031_v10 }
0x174f   :  { %3761 = vmatpush1.bf16.msra.mxu0 %v6990_v15  ;;  %3792 = vmatprep.mubr.bf16.mxu0 %v5695_v22 }
0x1750   :  { %3762 = vmatprep.subr.bf16.mxu0 %v6994_v18 }
0x1753   :  { %3763 = vmatpush1.bf16.msra.mxu0 %v6997_v44 }
0x1754   :  { %5191 = vmatprep.subr.bf16.mxu0 %v5696_v3 }
0x1809   :  { %v3329_v16 = vpop.f32.mrb[48].mxu0 }
0x180a   :  { %v3330_v23 = vpop.f32.mrb[49].mxu0 }
0x180b   :  { %v3332_v47 = vpop.f32.mrb[50].mxu0 }
0x180c   :  { %v3333_v12 = vpop.f32.mrb[51].mxu0 }
0x1811   :  { %v3406_v14 = vpop.f32.mrb[68].mxu1 }
0x1812   :  { %v3646_v19 = vadd.f32 %v3406_v14, %v3330_v23  ;;  %v3408_v46 = vpop.f32.mrb[69].mxu1 }
0x1813   :  { %v3410_v52 = vpop.f32.mrb[70].mxu1 }
0x1814   :  { %v3647_v45 = vadd.f32 %v6888_v33, %v3646_v19  ;;  %v3411_v29 = vpop.f32.mrb[71].mxu1  ;;  %v7046_v33 = vld [vmem:[%s7248_s5 + $0x3] ss:$0 sm:$0xff] }
0x1816   :  { %v3648_v38 = vmul.f32 2.0, %v3647_v45 }
0x1818   :  { %v3649_v48 = vsel %vm5851_vm3, %v3648_v38, %v3647_v45 }
0x1819   :  { %v4978_v39 = vmul.f32 -1.442695, %v3649_v48  ;;  %v3484_v59 = vpop.f32.mrb[52].mxu0 }
0x181a   :  { %v3723_v61 = vadd.f32 %v3484_v59, %v3408_v46  ;;  %v3486_v56 = vpop.f32.mrb[53].mxu0  ;;  %v3562_v50 = vpop.f32.mrb[72].mxu1 }
0x181b   :  { %5498 = vpow2.f32 %v4978_v39  ;;  %v3801_v13 = vadd.f32 %v3562_v50, %v3486_v56  ;;  %v3488_v53 = vpop.f32.mrb[54].mxu0  ;;  %v3564_v28 = vpop.f32.mrb[73].mxu1 }
0x181c   :  { %v3724_v4 = vadd.f32 %v6896_v24, %v3723_v61  ;;  %v3489_v49 = vpop.f32.mrb[55].mxu0  ;;  %v3566_v8 = vpop.f32.mrb[74].mxu1 }
0x181d   :  { %v3802_v1 = vadd.f32 %v7046_v33, %v3801_v13  ;;  %v3567_v55 = vpop.f32.mrb[75].mxu1 }
0x181e   :  { %v3725_v57 = vmul.f32 2.0, %v3724_v4 }
0x181f   :  { %v3803_v6 = vmul.f32 2.0, %v3802_v1 }
0x1820   :  { %v3726_v25 = vsel %vm5851_vm3, %v3725_v57, %v3724_v4 }
0x1821   :  { %v4981_v40 = vmul.f32 -1.442695, %v3726_v25  ;;  %v3804_v27 = vsel %vm5851_vm3, %v3803_v6, %v3802_v1  ;;  %v3640_v30 = vpop.f32.mrb[56].mxu0 }
0x1822   :  { %v4984_v11 = vmul.f32 -1.442695, %v3804_v27  ;;  %v3879_v0 = vadd.f32 %v3640_v30, %v3564_v28  ;;  %v5189_v54 = vpop.f32.mrb[57].mxu0 }
0x1823   :  { %5500 = vpow2.f32 %v4981_v40  ;;  %v3643_v41 = vpop.f32.mrb[58].mxu0 }
0x1824   :  { %5502 = vpow2.f32 %v4984_v11  ;;  %v3880_v58 = vadd.f32 %v6907_v43, %v3879_v0  ;;  %v5190_v21 = vpop.f32.mrb[59].mxu0 }
0x1825   :  { %v5499_v26 = vpop.eup %5498 }
0x1826   :  { %v3653_v60 = vadd.f32 1.0, %v5499_v26  ;;  %v3881_v9 = vmul.f32 2.0, %v3880_v58 }
0x1828   :  { %5504 = vrcp.f32 %v3653_v60  ;;  %v3882_v37 = vsel %vm5851_vm3, %v3881_v9, %v3880_v58 }
0x1829   :  { %v4987_v5 = vmul.f32 -1.442695, %v3882_v37 }
0x182b   :  { %5506 = vpow2.f32 %v4987_v5 }
0x182d   :  { %v5501_v42 = vpop.eup %5500 }
0x182e   :  { %v5503_v17 = vpop.eup %5502  ;;  %v3730_v35 = vadd.f32 1.0, %v5501_v42 }
0x182f   :  { %v3808_v36 = vadd.f32 1.0, %v5503_v17 }
0x1830   :  { %5508 = vrcp.f32 %v3730_v35 }
0x1831   :  { %5510 = vrcp.f32 %v3808_v36 }
0x1832   :  { %v5505_v51 = vpop.eup %5504 }
0x1833   :  { %v3656_v16 = vmul.f32 2.0, %v5505_v51 }
0x1835   :  { %v5507_v23 = vpop.eup %5506  ;;  %v4979_v47 = vadd.f32 -1.0, %v3656_v16 }
0x1836   :  { %v3886_v12 = vadd.f32 1.0, %v5507_v23 }
0x1837   :  { %v3658_v14 = vsel %vm5851_vm3, %v4979_v47, %v5505_v51 }
0x1838   :  { %5512 = vrcp.f32 %v3886_v12  ;;  %3661 = vrot.lane.b32.xlu0 %v3658_v14, %s7258_s30  ;;  %v3659_v57 = vmul.f32 %v3658_v14, %v6956_v32  ;;  %v7094_v12 = vld [vmem:[#allocation10 + $0x60] ss:$8 sps:$4 sm:$0xff]  }
0x183a   :  { %v5509_v19 = vpop.eup %5508 }
0x183b   :  { %v5511_v46 = vpop.eup %5510  ;;  %v3733_v52 = vmul.f32 2.0, %v5509_v19 }
0x183c   :  { %v3811_v45 = vmul.f32 2.0, %v5511_v46 }
0x183d   :  { %v4982_v29 = vadd.f32 -1.0, %v3733_v52 }
0x183e   :  { %v4985_v38 = vadd.f32 -1.0, %v3811_v45 }
0x183f   :  { %v3735_v48 = vsel %vm5851_vm3, %v4982_v29, %v5509_v19  ;;  %v7101_v19 = vld [vmem:[#allocation10 + $0x70] ss:$8 sps:$4 sm:$0xff]  }
0x1840   :  { %3738 = vrot.lane.b32.xlu1 %v3735_v48, %s7258_s30  ;;  %v3813_v39 = vsel %vm5851_vm3, %v4985_v38, %v5511_v46  ;;  %v3736_v40 = vmul.f32 %v3735_v48, %v6964_v7 }
0x1841   :  { %3816 = vrot.lane.b32.xlu0 %v3813_v39, %s7258_s30  ;;  %v3814_v30 = vmul.f32 %v3813_v39, %v6966_v63 }
0x1842   :  { %v5513_v59 = vpop.eup %5512 }
0x1843   :  { %v3889_v61 = vmul.f32 2.0, %v5513_v59 }
0x1845   :  { %v4988_v56 = vadd.f32 -1.0, %v3889_v61 }
0x1847   :  { %v3891_v50 = vsel %vm5851_vm3, %v4988_v56, %v5513_v59 }
0x1848   :  { %3894 = vrot.lane.b32.xlu1 %v3891_v50, %s7258_s30  ;;  %v3892_v32 = vmul.f32 %v3891_v50, %v6973_v62 }
0x18aa   :  { %v3662_v13 = vpop.permute.xlu0 %3661 }
0x18ab   :  { %v3664_v53 = vmul.f32 %v3662_v13, %v3658_v14 }
0x18ad   :  { %3666 = vrot.lane.b32.xlu0 %v3664_v53, %s5694_s24 }
0x18b2   :  { %v3739_v28 = vpop.permute.xlu1 %3738 }
0x18b3   :  { %v3741_v4 = vmul.f32 %v3739_v28, %v3735_v48  ;;  %v3817_v49 = vpop.permute.xlu0 %3816 }
0x18b4   :  { %v3819_v8 = vmul.f32 %v3817_v49, %v3813_v39 }
0x18b5   :  { %3743 = vrot.lane.b32.xlu1 %v3741_v4, %s5694_s24 }
0x18b6   :  { %3821 = vrot.lane.b32.xlu0 %v3819_v8, %s5694_s24 }
0x18ba   :  { %v3895_v1 = vpop.permute.xlu1 %3894 }
0x18bb   :  { %v3897_v55 = vmul.f32 %v3895_v1, %v3891_v50 }
0x18bd   :  { %3899 = vrot.lane.b32.xlu1 %v3897_v55, %s5694_s24 }
0x191f   :  { %v3667_v6 = vpop.permute.xlu0 %3666 }
0x1920   :  { %v3669_v25 = vadd.f32 %v3667_v6, %v3659_v57 }
0x1922   :  { %5514 = vtanh.f32 %v3669_v25 }
0x1927   :  { %v3744_v27 = vpop.permute.xlu1 %3743 }
0x1928   :  { %v7075_v11 = vadd.f32 %v3744_v27, %v3736_v40  ;;  %v3822_v0 = vpop.permute.xlu0 %3821 }
0x1929   :  { %v7077_v54 = vadd.f32 %v3822_v0, %v3814_v30 }
0x192a   :  { %5516 = vtanh.f32 %v7075_v11 }
0x192b   :  { %5518 = vtanh.f32 %v7077_v54 }
0x192c   :  { %v5515_v41 = vpop.eup %5514 }
0x192d   :  { %3672 = vrot.lane.b32.xlu0 %v5515_v41, %s7258_s30 }
0x192f   :  { %v3900_v58 = vpop.permute.xlu1 %3899 }
0x1930   :  { %v7083_v21 = vadd.f32 %v3900_v58, %v3892_v32 }
0x1932   :  { %5520 = vtanh.f32 %v7083_v21 }
0x1934   :  { %v5517_v7 = vpop.eup %5516 }
0x1935   :  { %v5519_v63 = vpop.eup %5518  ;;  %3749 = vrot.lane.b32.xlu1 %v5517_v7, %s7258_s30 }
0x1936   :  { %3827 = vrot.lane.b32.xlu0 %v5519_v63, %s7258_s30 }
0x193c   :  { %v5521_v26 = vpop.eup %5520 }
0x193d   :  { %3905 = vrot.lane.b32.xlu1 %v5521_v26, %s7258_s30 }
0x199f   :  { %v3673_v60 = vpop.permute.xlu0 %3672 }
0x19a0   :  { %v3675_v9 = vmul.f32 %v3673_v60, %v3658_v14  ;;  %v7098_v14 = vld [vmem:[#allocation10 + $0x74] ss:$8 sps:$4 sm:$0xff]  }
0x19a2   :  { %v3676_v37 = vpack.c.bf16 %v3675_v9, %v3675_v9 }
0x19a4   :  { %3678 = vrot.lane.b32.xlu0 %v3676_v37, %s5694_s24 }
0x19a7   :  { %v3750_v62 = vpop.permute.xlu1 %3749 }
0x19a8   :  { %v3752_v5 = vmul.f32 %v3750_v62, %v3735_v48  ;;  %v3828_v42 = vpop.permute.xlu0 %3827 }
0x19a9   :  { %v3830_v17 = vmul.f32 %v3828_v42, %v3813_v39 }
0x19aa   :  { %v3753_v35 = vpack.c.bf16 %v3752_v5, %v3752_v5 }
0x19ab   :  { %v3831_v36 = vpack.c.bf16 %v3830_v17, %v3830_v17 }
0x19ac   :  { %3755 = vrot.lane.b32.xlu1 %v3753_v35, %s5694_s24 }
0x19ad   :  { %3833 = vrot.lane.b32.xlu0 %v3831_v36, %s5694_s24 }
0x19af   :  { %v3906_v51 = vpop.permute.xlu1 %3905 }
0x19b0   :  { %v3908_v16 = vmul.f32 %v3906_v51, %v3891_v50 }
0x19b2   :  { %v3909_v23 = vpack.c.bf16 %v3908_v16, %v3908_v16 }
0x19b4   :  { %3911 = vrot.lane.b32.xlu1 %v3909_v23, %s5694_s24 }
0x1a16   :  { %v3679_v47 = vpop.permute.xlu0 %3678 }
0x1a17   :  { %4980 = vmatmul.mubr.msk.bf16.vlgmr.msra.gmra.mrb[76].mxu1 %vm1214_vm4, %v3679_v47 }
0x1a18   :  { %3839 = vmatpush1.bf16.msra.mxu1 %v7094_v12  ;;  %3870 = vmatprep.mubr.bf16.mxu1 %v5695_v22 }
0x1a19   :  { %3840 = vmatprep.subr.bf16.mxu1 %v7098_v14 }
0x1a1c   :  { %3841 = vmatpush1.bf16.msra.mxu1 %v7101_v19 }
0x1a1d   :  { %3993 = vmatprep.subr.bf16.mxu1 %v7026_v20 }
0x1a1e   :  { %v3756_v46 = vpop.permute.xlu1 %3755 }
0x1a1f   :  { %v3834_v52 = vpop.permute.xlu0 %3833  ;;  %4983 = vmatmul.mubr.msk.bf16.vlgmr.msra.gmra.mrb[60].mxu0 %vm1214_vm4, %v3756_v46 }
0x1a20   :  { %5192 = vmatpush3.bf16.msra.mxu0 %v7010_v31  ;;  %4986 = vmatmul.mubr.msk.bf16.vlgmr.msra.gmra.mrb[80].mxu1 %vm1214_vm4, %v3834_v52 }
0x1a21   :  { %5193 = vmatprep.subr.bf16.mxu0 %v5696_v3  ;;  %5195 = vmatprep.mubr.msk.bf16.mxu0 %vm5697_vm5, %v5696_v3 }
0x1a22   :  { %3994 = vmatpush1.bf16.msra.mxu1 %v6990_v15  ;;  %4025 = vmatprep.mubr.bf16.mxu1 %v5695_v22 }
0x1a23   :  { %3995 = vmatprep.subr.bf16.mxu1 %v6994_v18 }
0x1a24   :  { %5194 = vmatpush3.bf16.msra.mxu0 %v7023_v34 }
0x1a25   :  { %4070 = vmatprep.subr.bf16.mxu0 %v7031_v10 }
0x1a26   :  { %v3912_v20 = vpop.permute.xlu1 %3911  ;;  %3996 = vmatpush1.bf16.msra.mxu1 %v6997_v44 }
0x1a27   :  { %5196 = vmatmul.mubr.msk.bf16.vlgmr.msra.gmra.mrb[64].mxu0 %vm1214_vm4, %v3912_v20  ;;  %5199 = vmatprep.subr.bf16.mxu1 %v5696_v3 }
0x1a28   :  { %4071 = vmatpush1.bf16.msra.mxu0 %v7094_v12  ;;  %4102 = vmatprep.mubr.bf16.mxu0 %v5695_v22 }
0x1a29   :  { %4072 = vmatprep.subr.bf16.mxu0 %v7098_v14 }
0x1a2c   :  { %4073 = vmatpush1.bf16.msra.mxu0 %v7101_v19 }
0x1a2d   :  { %4225 = vmatprep.subr.bf16.mxu0 %v7031_v10 }
0x1aea   :  { %v3717_v15 = vpop.f32.mrb[76].mxu1 }
0x1aeb   :  { %v3718_v18 = vpop.f32.mrb[77].mxu1 }
0x1aec   :  { %v3720_v45 = vpop.f32.mrb[78].mxu1 }
0x1aed   :  { %v3721_v29 = vpop.f32.mrb[79].mxu1 }
0x1af2   :  { %v3794_v38 = vpop.f32.mrb[60].mxu0 }
0x1af3   :  { %v3956_v44 = vadd.f32 %v3794_v38, %v3718_v18  ;;  %v3796_v48 = vpop.f32.mrb[61].mxu0  ;;  %v3872_v39 = vpop.f32.mrb[80].mxu1 }
0x1af4   :  { %v4033_v59 = vadd.f32 %v3872_v39, %v3796_v48  ;;  %v3798_v61 = vpop.f32.mrb[62].mxu0  ;;  %v3874_v56 = vpop.f32.mrb[81].mxu1 }
0x1af5   :  { %v3957_v50 = vadd.f32 %v6896_v24, %v3956_v44  ;;  %v3799_v13 = vpop.f32.mrb[63].mxu0  ;;  %v3876_v53 = vpop.f32.mrb[82].mxu1 }
0x1af6   :  { %v4034_v28 = vadd.f32 %v7046_v33, %v4033_v59  ;;  %v3877_v4 = vpop.f32.mrb[83].mxu1 }
0x1af7   :  { %v3958_v49 = vmul.f32 2.0, %v3957_v50 }
0x1af8   :  { %v4035_v10 = vmul.f32 2.0, %v4034_v28 }
0x1af9   :  { %v3959_v8 = vsel %vm5851_vm3, %v3958_v49, %v3957_v50 }
0x1afa   :  { %v4990_v1 = vmul.f32 -1.442695, %v3959_v8  ;;  %v4036_v55 = vsel %vm5851_vm3, %v4035_v10, %v4034_v28  ;;  %v3950_v57 = vpop.f32.mrb[64].mxu0 }
0x1afb   :  { %v4993_v6 = vmul.f32 -1.442695, %v4036_v55  ;;  %v4111_v25 = vadd.f32 %v3950_v57, %v3874_v56  ;;  %v5197_v40 = vpop.f32.mrb[65].mxu0 }
0x1afc   :  { %5522 = vpow2.f32 %v4990_v1  ;;  %v3953_v24 = vpop.f32.mrb[66].mxu0 }
0x1afd   :  { %5524 = vpow2.f32 %v4993_v6  ;;  %v4112_v27 = vadd.f32 %v6907_v43, %v4111_v25  ;;  %v5198_v30 = vpop.f32.mrb[67].mxu0 }
0x1aff   :  { %v4113_v0 = vmul.f32 2.0, %v4112_v27 }
0x1b01   :  { %v4114_v41 = vsel %vm5851_vm3, %v4113_v0, %v4112_v27 }
0x1b02   :  { %v4996_v32 = vmul.f32 -1.442695, %v4114_v41 }
0x1b04   :  { %5526 = vpow2.f32 %v4996_v32 }
0x1b06   :  { %v5523_v58 = vpop.eup %5522 }
0x1b07   :  { %v5525_v7 = vpop.eup %5524  ;;  %v3963_v63 = vadd.f32 1.0, %v5523_v58 }
0x1b08   :  { %v4040_v26 = vadd.f32 1.0, %v5525_v7 }
0x1b09   :  { %5528 = vrcp.f32 %v3963_v63 }
0x1b0a   :  { %5530 = vrcp.f32 %v4040_v26 }
0x1b0e   :  { %v5527_v60 = vpop.eup %5526 }
0x1b0f   :  { %v4118_v9 = vadd.f32 1.0, %v5527_v60 }
0x1b11   :  { %5532 = vrcp.f32 %v4118_v9 }
0x1b13   :  { %v5529_v37 = vpop.eup %5528 }
0x1b14   :  { %v5531_v62 = vpop.eup %5530  ;;  %v3966_v5 = vmul.f32 2.0, %v5529_v37 }
0x1b15   :  { %v4043_v42 = vmul.f32 2.0, %v5531_v62 }
0x1b16   :  { %v4991_v17 = vadd.f32 -1.0, %v3966_v5 }
0x1b17   :  { %v4994_v35 = vadd.f32 -1.0, %v4043_v42 }
0x1b18   :  { %v3968_v36 = vsel %vm5851_vm3, %v4991_v17, %v5529_v37 }
0x1b19   :  { %3971 = vrot.lane.b32.xlu0 %v3968_v36, %s7258_s30  ;;  %v4045_v51 = vsel %vm5851_vm3, %v4994_v35, %v5531_v62  ;;  %v3969_v38 = vmul.f32 %v3968_v36, %v7075_v11 }
0x1b1a   :  { %4048 = vrot.lane.b32.xlu1 %v4045_v51, %s7258_s30  ;;  %v4046_v48 = vmul.f32 %v4045_v51, %v7077_v54 }
0x1b1b   :  { %v5533_v16 = vpop.eup %5532 }
0x1b1c   :  { %v4121_v23 = vmul.f32 2.0, %v5533_v16 }
0x1b1e   :  { %v4997_v47 = vadd.f32 -1.0, %v4121_v23 }
0x1b20   :  { %v4123_v46 = vsel %vm5851_vm3, %v4997_v47, %v5533_v16 }
0x1b21   :  { %4126 = vrot.lane.b32.xlu0 %v4123_v46, %s7258_s30  ;;  %v4124_v56 = vmul.f32 %v4123_v46, %v7083_v21 }
0x1b8b   :  { %v3972_v52 = vpop.permute.xlu0 %3971 }
0x1b8c   :  { %v3974_v20 = vmul.f32 %v3972_v52, %v3968_v36  ;;  %v4049_v15 = vpop.permute.xlu1 %4048 }
0x1b8d   :  { %v4051_v18 = vmul.f32 %v4049_v15, %v4045_v51 }
0x1b8e   :  { %3976 = vrot.lane.b32.xlu1 %v3974_v20, %s5694_s24 }
0x1b8f   :  { %4053 = vrot.lane.b32.xlu0 %v4051_v18, %s5694_s24 }
0x1b93   :  { %v4127_v45 = vpop.permute.xlu0 %4126 }
0x1b94   :  { %v4129_v29 = vmul.f32 %v4127_v45, %v4123_v46 }
0x1b96   :  { %4131 = vrot.lane.b32.xlu1 %v4129_v29, %s5694_s24 }
0x1c00   :  { %v3977_v44 = vpop.permute.xlu1 %3976 }
0x1c01   :  { %v3979_v39 = vadd.f32 %v3977_v44, %v3969_v38  ;;  %v4054_v59 = vpop.permute.xlu0 %4053 }
0x1c02   :  { %v7147_v61 = vadd.f32 %v4054_v59, %v4046_v48 }
0x1c03   :  { %5534 = vtanh.f32 %v3979_v39 }
0x1c04   :  { %5536 = vtanh.f32 %v7147_v61 }
0x1c08   :  { %v4132_v50 = vpop.permute.xlu1 %4131 }
0x1c09   :  { %v7151_v13 = vadd.f32 %v4132_v50, %v4124_v56 }
0x1c0b   :  { %5538 = vtanh.f32 %v7151_v13 }
0x1c0d   :  { %v5535_v53 = vpop.eup %5534 }
0x1c0e   :  { %v5537_v28 = vpop.eup %5536  ;;  %3982 = vrot.lane.b32.xlu0 %v5535_v53, %s7258_s30 }
0x1c0f   :  { %4059 = vrot.lane.b32.xlu1 %v5537_v28, %s7258_s30 }
0x1c15   :  { %v5539_v11 = vpop.eup %5538 }
0x1c16   :  { %4137 = vrot.lane.b32.xlu0 %v5539_v11, %s7258_s30 }
0x1c80   :  { %v3983_v54 = vpop.permute.xlu0 %3982 }
0x1c81   :  { %v3985_v4 = vmul.f32 %v3983_v54, %v3968_v36  ;;  %v4060_v49 = vpop.permute.xlu1 %4059 }
0x1c82   :  { %v4062_v10 = vmul.f32 %v4060_v49, %v4045_v51 }
0x1c83   :  { %v3986_v8 = vpack.c.bf16 %v3985_v4, %v3985_v4 }
0x1c84   :  { %v4063_v21 = vpack.c.bf16 %v4062_v10, %v4062_v10 }
0x1c85   :  { %3988 = vrot.lane.b32.xlu1 %v3986_v8, %s5694_s24 }
0x1c86   :  { %4065 = vrot.lane.b32.xlu0 %v4063_v21, %s5694_s24 }
0x1c88   :  { %v4138_v1 = vpop.permute.xlu0 %4137 }
0x1c89   :  { %v4140_v55 = vmul.f32 %v4138_v1, %v4123_v46 }
0x1c8b   :  { %v4141_v57 = vpack.c.bf16 %v4140_v55, %v4140_v55 }
0x1c8d   :  { %4143 = vrot.lane.b32.xlu1 %v4141_v57, %s5694_s24 }
0x1cf7   :  { %v3989_v6 = vpop.permute.xlu1 %3988 }
0x1cf8   :  { %4992 = vmatmul.mubr.msk.bf16.vlgmr.msra.gmra.mrb[84].mxu1 %vm1214_vm4, %v3989_v6  ;;  %v4066_v25 = vpop.permute.xlu0 %4065 }
0x1cf9   :  { %5200 = vmatpush3.bf16.msra.mxu1 %v7010_v31  ;;  %4995 = vmatmul.mubr.msk.bf16.vlgmr.msra.gmra.mrb[68].mxu0 %vm1214_vm4, %v4066_v25 }
0x1cfa   :  { %5201 = vmatprep.subr.bf16.mxu1 %v5696_v3  ;;  %5203 = vmatprep.mubr.msk.bf16.mxu1 %vm5697_vm5, %v5696_v3 }
0x1cfb   :  { %4226 = vmatpush1.bf16.msra.mxu0 %v7094_v12  ;;  %4257 = vmatprep.mubr.bf16.mxu0 %v5695_v22 }
0x1cfc   :  { %4227 = vmatprep.subr.bf16.mxu0 %v7098_v14 }
0x1cfd   :  { %5202 = vmatpush3.bf16.msra.mxu1 %v7023_v34 }
0x1cfe   :  { %5207 = vmatprep.subr.bf16.mxu1 %v5696_v3 }
0x1cff   :  { %v4144_v40 = vpop.permute.xlu1 %4143  ;;  %4228 = vmatpush1.bf16.msra.mxu0 %v7101_v19 }
0x1d00   :  { %5204 = vmatmul.mubr.msk.bf16.vlgmr.msra.gmra.mrb[88].mxu1 %vm1214_vm4, %v4144_v40 }
0x1d01   :  { %5208 = vmatpush3.bf16.msra.mxu1 %v7010_v31  ;;  %5211 = vmatprep.mubr.msk.bf16.mxu1 %vm5697_vm5, %v5696_v3 }
0x1d02   :  { %5209 = vmatprep.subr.bf16.mxu1 %v5696_v3 }
0x1d05   :  { %5210 = vmatpush3.bf16.msra.mxu1 %v7023_v34 }
0x1dcb   :  { %v4027_v22 = vpop.f32.mrb[84].mxu1 }
0x1dcc   :  { %v4028_v12 = vpop.f32.mrb[85].mxu1  ;;  %v4104_v14 = vpop.f32.mrb[68].mxu0 }
0x1dcd   :  { %v4188_v24 = vadd.f32 %v4104_v14, %v4028_v12  ;;  %v4030_v27 = vpop.f32.mrb[86].mxu1  ;;  %v4106_v30 = vpop.f32.mrb[69].mxu0 }
0x1dce   :  { %v4031_v0 = vpop.f32.mrb[87].mxu1  ;;  %v4108_v41 = vpop.f32.mrb[70].mxu0 }
0x1dcf   :  { %v4189_v19 = vadd.f32 %v7046_v33, %v4188_v24  ;;  %v4109_v32 = vpop.f32.mrb[71].mxu0 }
0x1dd1   :  { %v4190_v58 = vmul.f32 2.0, %v4189_v19 }
0x1dd3   :  { %v4191_v31 = vsel %vm5851_vm3, %v4190_v58, %v4189_v19  ;;  %v4182_v7 = vpop.f32.mrb[88].mxu1 }
0x1dd4   :  { %v4999_v63 = vmul.f32 -1.442695, %v4191_v31  ;;  %v4265_v26 = vadd.f32 %v4182_v7, %v4106_v30  ;;  %v5205_v60 = vpop.f32.mrb[89].mxu1 }
0x1dd5   :  { %v4185_v34 = vpop.f32.mrb[90].mxu1  ;;  %v4381_v60 = vld [vmem:[%s7249_s6] sm:$0xff] }
0x1dd6   :  { %5540 = vpow2.f32 %v4999_v63  ;;  %v4266_v9 = vadd.f32 %v6907_v43, %v4265_v26  ;;  %v5206_v37 = vpop.f32.mrb[91].mxu1  ;;  %v4383_v34 = vld [vmem:[%s7249_s6 + $0x10] sm:$0xff] }
0x1dd7   :  { %v5267_v37 = vpack.c.bf16 %v4382_v2, %v4381_v60 }
0x1dd8   :  { %v4267_v62 = vmul.f32 2.0, %v4266_v9 }
0x1dda   :  { %v4268_v5 = vsel %vm5851_vm3, %v4267_v62, %v4266_v9  ;;  %v5698_v9 = vmov 0.0|0.0   ;;  %v4384_v62 = vld [vmem:[%s7249_s6 + $0x18] sm:$0xff] }
0x1ddb   :  { %v5002_v42 = vmul.f32 -1.442695, %v4268_v5  ;;  %5266 = vmatprep.subr.bf16.mxu0 %v5698_v9  ;;  %v5270_v5 = vpack.c.bf16 %v4384_v62, %v4383_v34 }
0x1ddd   :  { %5542 = vpow2.f32 %v5002_v42  ;;  %v4385_v42 = vld [vmem:[%s7249_s6 + $0x20] sm:$0xff] }
0x1de0   :  { %v5541_v33 = vpop.eup %5540 }
0x1de1   :  { %v4195_v17 = vadd.f32 1.0, %v5541_v33  ;;  %v4386_v33 = vld [vmem:[%s7249_s6 + $0x28] sm:$0xff] }
0x1de3   :  { %5544 = vrcp.f32 %v4195_v17  ;;  %v5273_v17 = vpack.c.bf16 %v4386_v33, %v4385_v42 }
0x1de7   :  { %v5543_v35 = vpop.eup %5542 }
0x1de8   :  { %v4272_v36 = vadd.f32 1.0, %v5543_v35  ;;  %v4387_v35 = vld [vmem:[%s7249_s6 + $0x30] sm:$0xff] }
0x1dea   :  { %5546 = vrcp.f32 %v4272_v36  ;;  %v4388_v36 = vld [vmem:[%s7249_s6 + $0x38] sm:$0xff] }
0x1ded   :  { %v5545_v51 = vpop.eup %5544 }
0x1dee   :  { %v4198_v16 = vmul.f32 2.0, %v5545_v51 }
0x1df0   :  { %v5000_v23 = vadd.f32 -1.0, %v4198_v16  ;;  %v5276_v16 = vpack.c.bf16 %v4388_v36, %v4387_v35 }
0x1df2   :  { %v4200_v47 = vsel %vm5851_vm3, %v5000_v23, %v5545_v51 }
0x1df3   :  { %4203 = vrot.lane.b32.xlu0 %v4200_v47, %s7258_s30  ;;  %v4201_v44 = vmul.f32 %v4200_v47, %v7147_v61 }
0x1df4   :  { %v5547_v46 = vpop.eup %5546 }
0x1df5   :  { %v4275_v52 = vmul.f32 2.0, %v5547_v46 }
0x1df7   :  { %v5003_v20 = vadd.f32 -1.0, %v4275_v52 }
0x1df9   :  { %v4277_v15 = vsel %vm5851_vm3, %v5003_v20, %v5547_v46 }
0x1dfa   :  { %4280 = vrot.lane.b32.xlu1 %v4277_v15, %s7258_s30  ;;  %v4278_v59 = vmul.f32 %v4277_v15, %v7151_v13 }
0x1e65   :  { %v4204_v18 = vpop.permute.xlu0 %4203 }
0x1e66   :  { %v4206_v45 = vmul.f32 %v4204_v18, %v4200_v47 }
0x1e68   :  { %4208 = vrot.lane.b32.xlu0 %v4206_v45, %s5694_s24 }
0x1e6c   :  { %v4281_v29 = vpop.permute.xlu1 %4280 }
0x1e6d   :  { %v4283_v38 = vmul.f32 %v4281_v29, %v4277_v15 }
0x1e6f   :  { %4285 = vrot.lane.b32.xlu1 %v4283_v38, %s5694_s24 }
0x1eda   :  { %v4209_v48 = vpop.permute.xlu0 %4208 }
0x1edb   :  { %v4211_v39 = vadd.f32 %v4209_v48, %v4201_v44 }
0x1edd   :  { %5548 = vtanh.f32 %v4211_v39 }
0x1ee1   :  { %v4286_v56 = vpop.permute.xlu1 %4285 }
0x1ee2   :  { %v4288_v50 = vadd.f32 %v4286_v56, %v4278_v59 }
0x1ee4   :  { %5550 = vtanh.f32 %v4288_v50 }
0x1ee7   :  { %v5549_v53 = vpop.eup %5548 }
0x1ee8   :  { %4214 = vrot.lane.b32.xlu0 %v5549_v53, %s7258_s30 }
0x1eee   :  { %v5551_v28 = vpop.eup %5550 }
0x1eef   :  { %4291 = vrot.lane.b32.xlu1 %v5551_v28, %s7258_s30 }
0x1f5a   :  { %v4215_v11 = vpop.permute.xlu0 %4214 }
0x1f5b   :  { %v4217_v54 = vmul.f32 %v4215_v11, %v4200_v47 }
0x1f5d   :  { %v4218_v4 = vpack.c.bf16 %v4217_v54, %v4217_v54 }
0x1f5f   :  { %4220 = vrot.lane.b32.xlu0 %v4218_v4, %s5694_s24 }
0x1f61   :  { %v4292_v61 = vpop.permute.xlu1 %4291 }
0x1f62   :  { %v4294_v49 = vmul.f32 %v4292_v61, %v4277_v15  ;;  %v5007_v15 = vld [vmem:[%s7250_s7] ss:$0 sm:$0xff] }
0x1f64   :  { %v4295_v10 = vpack.c.bf16 %v4294_v49, %v4294_v49 }
0x1f66   :  { %4297 = vrot.lane.b32.xlu1 %v4295_v10, %s5694_s24 }
0x1fd1   :  { %v4221_v13 = vpop.permute.xlu0 %4220 }
0x1fd2   :  { %5001 = vmatmul.mubr.msk.bf16.vlgmr.msra.gmra.mrb[72].mxu0 %vm1214_vm4, %v4221_v13 }
0x1fd3   :  { %5231 = vmatprep.mubr.msk.f32.mxu0 %vm5697_vm5, %v5696_v3  ;;  %5268 = vmatpush3.bf16.msra.mxu0 %v5267_v37 }
0x1fd4   :  { %5269 = vmatprep.subr.bf16.mxu0 %v5698_v9 }
0x1fd7   :  { %5271 = vmatpush3.bf16.msra.mxu0 %v5270_v5 }
0x1fd8   :  { %v4298_v8 = vpop.permute.xlu1 %4297  ;;  %5272 = vmatprep.subr.bf16.mxu0 %v5698_v9 }
0x1fd9   :  { %5212 = vmatmul.mubr.msk.bf16.vlgmr.msra.gmra.mrb[92].mxu1 %vm1214_vm4, %v4298_v8 }
0x1fdb   :  { %5274 = vmatpush3.bf16.msra.mxu0 %v5273_v17 }
0x1fdc   :  { %5275 = vmatprep.subr.bf16.mxu0 %v5698_v9 }
0x1fdf   :  { %5277 = vmatpush3.bf16.msra.mxu0 %v5276_v16 }
0x20a5   :  { %v4259_v21 = vpop.f32.mrb[72].mxu0 }
0x20a6   :  { %v4260_v1 = vpop.f32.mrb[73].mxu0 }
0x20a7   :  { %v4262_v55 = vpop.f32.mrb[74].mxu0 }
0x20a8   :  { %v4263_v57 = vpop.f32.mrb[75].mxu0 }
0x20ac   :  { %v4336_v6 = vpop.f32.mrb[92].mxu1 }
0x20ad   :  { %v4342_v25 = vadd.f32 %v4336_v6, %v4260_v1  ;;  %v5213_v40 = vpop.f32.mrb[93].mxu1 }
0x20ae   :  { %v4339_v22 = vpop.f32.mrb[94].mxu1 }
0x20af   :  { %v4343_v12 = vadd.f32 %v6907_v43, %v4342_v25  ;;  %v5214_v14 = vpop.f32.mrb[95].mxu1 }
0x20b1   :  { %v4344_v24 = vmul.f32 2.0, %v4343_v12 }
0x20b3   :  { %v4345_v27 = vsel %vm5851_vm3, %v4344_v24, %v4343_v12 }
0x20b4   :  { %v5005_v30 = vmul.f32 -1.442695, %v4345_v27 }
0x20b6   :  { %5552 = vpow2.f32 %v5005_v30 }
0x20c0   :  { %v5553_v3 = vpop.eup %5552 }
0x20c1   :  { %v4349_v0 = vadd.f32 1.0, %v5553_v3 }
0x20c3   :  { %5554 = vrcp.f32 %v4349_v0 }
0x20cd   :  { %v5555_v41 = vpop.eup %5554 }
0x20ce   :  { %v4352_v19 = vmul.f32 2.0, %v5555_v41 }
0x20d0   :  { %v5006_v32 = vadd.f32 -1.0, %v4352_v19 }
0x20d2   :  { %v4354_v58 = vsel %vm5851_vm3, %v5006_v32, %v5555_v41 }
0x20d3   :  { %4357 = vrot.lane.b32.xlu0 %v4354_v58, %s7258_s30  ;;  %v4355_v7 = vmul.f32 %v4354_v58, %v4288_v50 }
0x2145   :  { %v4358_v31 = vpop.permute.xlu0 %4357 }
0x2146   :  { %v4360_v43 = vmul.f32 %v4358_v31, %v4354_v58 }
0x2148   :  { %4362 = vrot.lane.b32.xlu1 %v4360_v43, %s5694_s24 }
0x214c   :  { %4373 = vrot.lane.b32.xlu1 %v4217_v54, %s5694_s24 }
0x21ba   :  { %v4363_v63 = vpop.permute.xlu1 %4362 }
0x21bb   :  { %v4365_v26 = vadd.f32 %v4363_v63, %v4355_v7 }
0x21bd   :  { %5556 = vtanh.f32 %v4365_v26 }
0x21be   :  { %v4374_v46 = vpop.permute.xlu1 %4373 }
0x21c7   :  { %v5557_v51 = vpop.eup %5556 }
0x21c8   :  { %4368 = vrot.lane.b32.xlu0 %v5557_v51, %s7258_s30 }
0x223a   :  { %v4369_v23 = vpop.permute.xlu0 %4368 }
0x223b   :  { %v4371_v47 = vmul.f32 %v4369_v23, %v4354_v58 }
0x223d   :  { %4377 = vrot.lane.b32.xlu0 %v4371_v47, %s7258_s30 }
0x22af   :  { %v4378_v52 = vpop.permute.xlu0 %4377 }
0x22b0   :  { %v4380_v20 = vsel %vm1214_vm4, %v4374_v46, %v4378_v52 }
0x22b1   :  { %5232 = vmatmul.mubr.msk.f32.vlgmr.msra.gmra.mrb[76].mxu0 %vm4396_vm6, %v4380_v20 }
0x2384   :  { %v4466_v18 = vpop.f32.mrb[76].mxu0 }
0x2385   :  { %v4467_v45 = vadd.f32 %v5007_v15, %v4466_v18  ;;  %v5233_v29 = vpop.f32.mrb[77].mxu0 }
0x2387   :  { %4471 = vst.msk [vmem:[%s7251_s8] sm:$0xff] %vm4470_vm7, %v4467_v45 }
0x2388   :  { %4476 = vsyncpa [#allocation7], 1 }
0x2389   :  { %4477 = vsyncpa [#allocation9], 1 }

</bundles_post_ra>
